<compile_context>
chip_gen: v5e
topology: v5e:2x2
jax: 0.10.0
libtpu: 0.0.40
codegen_flags: <defaults>
</compile_context>

<pallas_src>
import functools

import jax
import jax.numpy as jnp
from jax import lax
from jax.experimental import pallas as pl
from jax.experimental.pallas import tpu as pltpu

_W_OFF = 8  # sublane-aligned horizontal offset of the interior inside the padded scratch


# ----------------------------------------------------------------------------
# Fused network kernel
# ----------------------------------------------------------------------------
def _net_kernel(x_ref,
                w1_ref, s1_ref, b1_ref,
                w2_ref, s2_ref, b2_ref,
                w3_ref, s3_ref, b3_ref,
                fc1w_ref, fc1b_ref, fc2w_ref, fc2b_ref,
                o_ref,
                pad1_ref, act1_ref, pad2_ref, act2_ref, pad3_ref, act3_ref,
                *, Nb, H, W, C):
    f32, bf16 = jnp.float32, jnp.bfloat16

    def conv_bn_relu_pool(pad_ref, act_ref, w_ref, s_ref, b_ref, src4, h, w, cin, cout):
        # ---- 'same' padding in VMEM: zero the scratch, write interior at aligned offset
        pad_ref[...] = jnp.zeros(pad_ref.shape, f32)
        pad_ref[:, 1:h + 1, _W_OFF:_W_OFF + w, :] = src4
        # ---- im2col: 9 shifted taps concatenated along lanes -> one MXU matmul
        m = Nb * h * w
        taps = [pad_ref[:, kh:kh + h, _W_OFF - 1 + kw:_W_OFF - 1 + kw + w, :]
                .reshape(m, cin)
                for kh in range(3) for kw in range(3)]
        patches = jnp.concatenate(taps, axis=-1).astype(bf16)            # (m, 9*cin)
        acc = jnp.dot(patches, w_ref[...], preferred_element_type=f32)   # (m, cout) f32
        # ---- folded BatchNorm (eval) + ReLU in f32
        y = jnp.maximum(acc * s_ref[...] + b_ref[...], 0.0)
        act_ref[...] = y.reshape(Nb * h, w, cout)                        # rows = (n, hh)
        # ---- MaxPool 2x2 stride 2:
        #  W (sublane dim): two strided reads + elementwise max (documented pl.ds stride)
        #  H (leading dim): leading-dim-only reshape + max (no relayout)
        yw = jnp.maximum(act_ref[:, pl.ds(0, w // 2, stride=2), :],
                         act_ref[:, pl.ds(1, w // 2, stride=2), :])      # (Nb*h, w/2, cout)
        yw = yw.reshape(Nb * (h // 2), 2, w // 2, cout)
        return jnp.maximum(yw[:, 0], yw[:, 1]).reshape(Nb, h // 2, w // 2, cout)

    p1 = conv_bn_relu_pool(pad1_ref, act1_ref, w1_ref, s1_ref, b1_ref,
                           x_ref[...], H, W, C, 32)
    p2 = conv_bn_relu_pool(pad2_ref, act2_ref, w2_ref, s2_ref, b2_ref,
                           p1, H // 2, W // 2, 32, 64)
    p3 = conv_bn_relu_pool(pad3_ref, act3_ref, w3_ref, s3_ref, b3_ref,
                           p2, H // 4, W // 4, 64, 128)

    # Flatten in (h, w, c) order; fc1 weight rows were permuted to match at prep time.
    # Each piece is 128 lanes -> lane-aligned concat.
    H8, W8 = H // 8, W // 8
    feats = jnp.concatenate([p3[:, i, j, :] for i in range(H8) for j in range(W8)],
                            axis=-1)                                      # (Nb, H8*W8*128)
    h1 = jnp.dot(feats.astype(bf16), fc1w_ref[...], preferred_element_type=f32)
    h1 = jnp.maximum(h1 + fc1b_ref[...], 0.0)                             # fc1 + ReLU
    # TODO(synk): Dropout(p=0.3) is the identity in eval mode; training-mode RNG masking
    # is intentionally not implemented.
    out = (jnp.dot(h1.astype(bf16), fc2w_ref[...], preferred_element_type=f32)
           + fc2b_ref[...])
    o_ref[...] = out.astype(o_ref.dtype)    # (Nb, 128) lane-dense; wrapper slices [:, :nc]


def _pick_batch_tile(n):
    """Batch tile: whole batch if small/odd; sublane-aligned 8 otherwise."""
    if n <= 8 or n % 8 != 0:
        return n
    return 8


@functools.partial(jax.jit, static_argnames=("num_class",))
def net_forward(x_nchw, params, num_class):
    N, C, H, W = x_nchw.shape
    Nb = _pick_batch_tile(N)
    G = N // Nb
    kpad = params["fc2_w"].shape[1]        # lane-dense padded class dim (128)

    # NCHW (PyTorch) -> NHWC (channels on the 128-lane dim inside the kernel).
    x = jnp.transpose(x_nchw, (0, 2, 3, 1)).astype(jnp.float32)

    kern = functools.partial(_net_kernel, Nb=Nb, H=H, W=W, C=C)
    whole = lambda g: (0, 0)               # full-array (resident) blocks for parameters

    out = pl.pallas_call(
        kern,
        out_shape=jax.ShapeDtypeStruct((N, kpad), jnp.float32),
        grid=(G,),
        in_specs=[
            pl.BlockSpec((Nb, H, W, C), lambda g: (g, 0, 0, 0)),
            pl.BlockSpec(params["conv1_w"].shape, whole),
            pl.BlockSpec(params["conv1_scale"].shape, whole),
            pl.BlockSpec(params["conv1_bias"].shape, whole),
            pl.BlockSpec(params["conv2_w"].shape, whole),
            pl.BlockSpec(params["conv2_scale"].shape, whole),
            pl.BlockSpec(params["conv2_bias"].shape, whole),
            pl.BlockSpec(params["conv3_w"].shape, whole),
            pl.BlockSpec(params["conv3_scale"].shape, whole),
            pl.BlockSpec(params["conv3_bias"].shape, whole),
            pl.BlockSpec(params["fc1_w"].shape, whole),
            pl.BlockSpec(params["fc1_b"].shape, whole),
            pl.BlockSpec(params["fc2_w"].shape, whole),
            pl.BlockSpec(params["fc2_b"].shape, whole),
        ],
        out_specs=pl.BlockSpec((Nb, kpad), lambda g: (g, 0)),
        scratch_shapes=[
            pltpu.VMEM((Nb, H + 2, W + 2 * _W_OFF, C), jnp.float32),              # pad1
            pltpu.VMEM((Nb * H, W, 32), jnp.float32),                             # act1
            pltpu.VMEM((Nb, H // 2 + 2, W // 2 + 2 * _W_OFF, 32), jnp.float32),   # pad2
            pltpu.VMEM((Nb * (H // 2), W // 2, 64), jnp.float32),                 # act2
            pltpu.VMEM((Nb, H // 4 + 2, W // 4 + 2 * _W_OFF, 64), jnp.float32),   # pad3
            pltpu.VMEM((Nb * (H // 4), W // 4, 128), jnp.float32),                # act3
        ],
        compiler_params=pltpu.CompilerParams(dimension_semantics=("parallel",)),
    )(x,
      params["conv1_w"], params["conv1_scale"], params["conv1_bias"],
      params["conv2_w"], params["conv2_scale"], params["conv2_bias"],
      params["conv3_w"], params["conv3_scale"], params["conv3_bias"],
      params["fc1_w"], params["fc1_b"], params["fc2_w"], params["fc2_b"])

    return out[:, :num_class]


# ----------------------------------------------------------------------------
# Parameters: synthetic weights in native PyTorch layouts + one-time conversion
# ----------------------------------------------------------------------------
class _KeyGen:
    """Endless deterministic key stream (fold_in-based, cannot run out of keys)."""

    def __init__(self, key):
        self._key = key
        self._i = 0

    def __call__(self):
        self._i += 1
        return jax.random.fold_in(self._key, self._i)


def init_raw_params(key, num_class, C, H, W):
    """Synthetic parameters in native PyTorch layouts (Conv2d OIHW, Linear (out,in))."""
    kg = _KeyGen(key)
    chans = [C, 32, 64, 128]
    p = {}
    for i in range(3):
        cin, cout = chans[i], chans[i + 1]
        p[f"conv{i+1}_w"] = 0.05 * jax.random.normal(kg(), (cout, cin, 3, 3), jnp.float32)
        p[f"conv{i+1}_b"] = 0.05 * jax.random.normal(kg(), (cout,), jnp.float32)
        p[f"bn{i+1}_gamma"] = 1.0 + 0.1 * jax.random.normal(kg(), (cout,), jnp.float32)
        p[f"bn{i+1}_beta"] = 0.05 * jax.random.normal(kg(), (cout,), jnp.float32)
        p[f"bn{i+1}_mean"] = 0.05 * jax.random.normal(kg(), (cout,), jnp.float32)
        p[f"bn{i+1}_var"] = 0.5 + jax.random.uniform(kg(), (cout,), jnp.float32)
    feat = 128 * (H // 8) * (W // 8)
    p["fc1_w"] = 0.05 * jax.random.normal(kg(), (256, feat), jnp.float32)
    p["fc1_b"] = 0.05 * jax.random.normal(kg(), (256,), jnp.float32)
    p["fc2_w"] = 0.05 * jax.random.normal(kg(), (num_class, 256), jnp.float32)
    p["fc2_b"] = 0.05 * jax.random.normal(kg(), (num_class,), jnp.float32)
    return p


def _fold_bn(conv_b, gamma, beta, mean, var, eps=1e-5):
    scale = gamma / jnp.sqrt(var + eps)
    bias = (conv_b - mean) * scale + beta
    return scale, bias


def prepare_params(raw, num_class, C, H, W):
    """One-time conversion of PyTorch-layout params into kernel-ready layouts."""
    p = {}
    chans = [C, 32, 64, 128]
    for i in range(3):
        cin, cout = chans[i], chans[i + 1]
        # OIHW -> HWIO -> (9*cin, cout); row order (kh, kw, cin) matches the in-kernel
        # im2col tap-concatenation order.
        w2d = jnp.transpose(raw[f"conv{i+1}_w"], (2, 3, 1, 0)).reshape(9 * cin, cout)
        scale, bias = _fold_bn(raw[f"conv{i+1}_b"], raw[f"bn{i+1}_gamma"],
                               raw[f"bn{i+1}_beta"], raw[f"bn{i+1}_mean"],
                               raw[f"bn{i+1}_var"])
        p[f"conv{i+1}_w"] = w2d.astype(jnp.bfloat16)
        p[f"conv{i+1}_scale"] = scale.reshape(1, cout).astype(jnp.float32)
        p[f"conv{i+1}_bias"] = bias.reshape(1, cout).astype(jnp.float32)
    H8, W8 = H // 8, W // 8
    # fc1: PyTorch weight is (256, 128*H8*W8) over NCHW-flattened features (c, h, w).
    # Permute its columns once to the kernel's NHWC flatten order (h, w, c).
    w1 = raw["fc1_w"].reshape(256, 128, H8, W8)
    w1 = jnp.transpose(w1, (0, 2, 3, 1)).reshape(256, H8 * W8 * 128)
    p["fc1_w"] = jnp.transpose(w1, (1, 0)).astype(jnp.bfloat16)          # (feat, 256)
    p["fc1_b"] = raw["fc1_b"].reshape(1, 256).astype(jnp.float32)
    # fc2: pad num_class up to a lane-dense 128 columns (zeros); wrapper slices [:, :nc].
    kpad = max(128, ((num_class + 127) // 128) * 128)
    w2 = jnp.zeros((256, kpad), jnp.float32).at[:, :num_class].set(
        jnp.transpose(raw["fc2_w"], (1, 0)))
    b2 = jnp.zeros((1, kpad), jnp.float32).at[0, :num_class].set(raw["fc2_b"])
    p["fc2_w"] = w2.astype(jnp.bfloat16)
    p["fc2_b"] = b2
    return p


# ----------------------------------------------------------------------------
# Pure-JAX (XLA, f32, NCHW) reference mirroring the PyTorch module, for checking
# ----------------------------------------------------------------------------
def net_forward_reference(x_nchw, raw, num_class, eps=1e-5):
    x = x_nchw.astype(jnp.float32)
    for i in (1, 2, 3):
        x = lax.conv_general_dilated(x, raw[f"conv{i}_w"], window_strides=(1, 1),
                                     padding="SAME",
                                     dimension_numbers=("NCHW", "OIHW", "NCHW"))
        x = x + raw[f"conv{i}_b"][None, :, None, None]
        g, bt = raw[f"bn{i}_gamma"], raw[f"bn{i}_beta"]
        mu, var = raw[f"bn{i}_mean"], raw[f"bn{i}_var"]
        x = (g[None, :, None, None] * (x - mu[None, :, None, None])
             / jnp.sqrt(var[None, :, None, None] + eps) + bt[None, :, None, None])
        x = jnp.maximum(x, 0.0)
        x = lax.reduce_window(x, -jnp.inf, lax.max, (1, 1, 2, 2), (1, 1, 2, 2), "VALID")
    x = x.reshape(x.shape[0], -1)                       # NCHW flatten, like torch
    x = jnp.maximum(x @ raw["fc1_w"].T + raw["fc1_b"], 0.0)
    return x @ raw["fc2_w"].T + raw["fc2_b"]            # dropout = identity (eval)


if __name__ == "__main__":
    num_class, C, H, W = 10, 4, 16, 16
    batch = 2
    key = jax.random.PRNGKey(0)
    kx, kp = jax.random.split(key)
    x = jax.random.normal(kx, (batch, C, H, W), jnp.float32)   # NCHW, like PyTorch
    raw = init_raw_params(kp, num_class, C, H, W)              # PyTorch-layout params
    params = prepare_params(raw, num_class, C, H, W)           # kernel-ready layouts

    out = net_forward(x, params, num_class=num_class)
    out = jax.block_until_ready(out)

    assert out.shape == (batch, num_class), out.shape
    assert bool(jnp.all(jnp.isfinite(out)))
    ref = net_forward_reference(x, raw, num_class)
    diff = float(jnp.max(jnp.abs(out - ref)))
    assert diff < 0.1, f"mismatch vs pure-JAX reference (bf16 tolerance): max|diff|={diff:.4f}"
    print("KERNEL_OK")
</pallas_src>

<mosaic_0001>
module attributes {stable_mosaic.version = 11 : i64} {
  func.func @_net_kernel(%arg0: i32, %arg1: memref<2x16x16x4xf32, #tpu.memory_space<vmem>>, %arg2: memref<36x32xbf16, #tpu.memory_space<vmem>>, %arg3: memref<1x32xf32, #tpu.memory_space<vmem>>, %arg4: memref<1x32xf32, #tpu.memory_space<vmem>>, %arg5: memref<288x64xbf16, #tpu.memory_space<vmem>>, %arg6: memref<1x64xf32, #tpu.memory_space<vmem>>, %arg7: memref<1x64xf32, #tpu.memory_space<vmem>>, %arg8: memref<576x128xbf16, #tpu.memory_space<vmem>>, %arg9: memref<1x128xf32, #tpu.memory_space<vmem>>, %arg10: memref<1x128xf32, #tpu.memory_space<vmem>>, %arg11: memref<512x256xbf16, #tpu.memory_space<vmem>>, %arg12: memref<1x256xf32, #tpu.memory_space<vmem>>, %arg13: memref<256x128xbf16, #tpu.memory_space<vmem>>, %arg14: memref<1x128xf32, #tpu.memory_space<vmem>>, %arg15: memref<2x128xf32, #tpu.memory_space<vmem>>, %arg16: memref<2x18x32x4xf32, #tpu.memory_space<vmem>>, %arg17: memref<32x16x32xf32, #tpu.memory_space<vmem>>, %arg18: memref<2x10x24x32xf32, #tpu.memory_space<vmem>>, %arg19: memref<16x8x64xf32, #tpu.memory_space<vmem>>, %arg20: memref<2x6x20x64xf32, #tpu.memory_space<vmem>>, %arg21: memref<8x4x128xf32, #tpu.memory_space<vmem>>) attributes {dimension_semantics = [#tpu.dimension_semantics<parallel>], iteration_bounds = array<i64: 1>, scalar_prefetch = 0 : i64, scratch_operands = 6 : i64, tpu.core_type = #tpu.core_type<tc>, window_params = [{transform_indices = @transform_0, window_bounds = array<i64: 2, 16, 16, 4>}, {pipeline_mode = #tpu.pipeline_mode<synchronous>, transform_indices = @transform_1, window_bounds = array<i64: 36, 32>}, {pipeline_mode = #tpu.pipeline_mode<synchronous>, transform_indices = @transform_2, window_bounds = array<i64: 1, 32>}, {pipeline_mode = #tpu.pipeline_mode<synchronous>, transform_indices = @transform_3, window_bounds = array<i64: 1, 32>}, {pipeline_mode = #tpu.pipeline_mode<synchronous>, transform_indices = @transform_4, window_bounds = array<i64: 288, 64>}, {pipeline_mode = #tpu.pipeline_mode<synchronous>, transform_indices = @transform_5, window_bounds = array<i64: 1, 64>}, {pipeline_mode = #tpu.pipeline_mode<synchronous>, transform_indices = @transform_6, window_bounds = array<i64: 1, 64>}, {pipeline_mode = #tpu.pipeline_mode<synchronous>, transform_indices = @transform_7, window_bounds = array<i64: 576, 128>}, {pipeline_mode = #tpu.pipeline_mode<synchronous>, transform_indices = @transform_8, window_bounds = array<i64: 1, 128>}, {pipeline_mode = #tpu.pipeline_mode<synchronous>, transform_indices = @transform_9, window_bounds = array<i64: 1, 128>}, {pipeline_mode = #tpu.pipeline_mode<synchronous>, transform_indices = @transform_10, window_bounds = array<i64: 512, 256>}, {pipeline_mode = #tpu.pipeline_mode<synchronous>, transform_indices = @transform_11, window_bounds = array<i64: 1, 256>}, {pipeline_mode = #tpu.pipeline_mode<synchronous>, transform_indices = @transform_12, window_bounds = array<i64: 256, 128>}, {pipeline_mode = #tpu.pipeline_mode<synchronous>, transform_indices = @transform_13, window_bounds = array<i64: 1, 128>}, {transform_indices = @transform_14, window_bounds = array<i64: 2, 128>}]} {
    %c0 = arith.constant 0 : index
    %c0_0 = arith.constant 0 : index
    %c0_1 = arith.constant 0 : index
    %c0_2 = arith.constant 0 : index
    %0 = vector.load %arg1[%c0, %c0_0, %c0_1, %c0_2] : memref<2x16x16x4xf32, #tpu.memory_space<vmem>>, vector<2x16x16x4xf32>
    %cst = arith.constant 0.000000e+00 : f32
    %1 = vector.broadcast %cst : f32 to vector<2x18x32x4xf32>
    %c0_3 = arith.constant 0 : index
    %c0_4 = arith.constant 0 : index
    %c0_5 = arith.constant 0 : index
    %c0_6 = arith.constant 0 : index
    %2 = vector.load %arg16[%c0_3, %c0_4, %c0_5, %c0_6] : memref<2x18x32x4xf32, #tpu.memory_space<vmem>>, vector<2x18x32x4xf32>
    tpu.vector_store %arg16[%c0_3, %c0_4, %c0_5, %c0_6], %1 {strides = array<i32>} : memref<2x18x32x4xf32, #tpu.memory_space<vmem>>, vector<2x18x32x4xf32>,
    %c0_7 = arith.constant 0 : index
    %c1 = arith.constant 1 : index
    %c8 = arith.constant 8 : index
    %c0_8 = arith.constant 0 : index
    %3 = vector.load %arg16[%c0_7, %c1, %c8, %c0_8] : memref<2x18x32x4xf32, #tpu.memory_space<vmem>>, vector<2x16x16x4xf32>
    tpu.vector_store %arg16[%c0_7, %c1, %c8, %c0_8], %0 {strides = array<i32>} : memref<2x18x32x4xf32, #tpu.memory_space<vmem>>, vector<2x16x16x4xf32>,
    %c0_9 = arith.constant 0 : index
    %c0_10 = arith.constant 0 : index
    %c7 = arith.constant 7 : index
    %c0_11 = arith.constant 0 : index
    %4 = vector.load %arg16[%c0_9, %c0_10, %c7, %c0_11] : memref<2x18x32x4xf32, #tpu.memory_space<vmem>>, vector<2x16x16x4xf32>
    %5 = vector.shape_cast %4 : vector<2x16x16x4xf32> to vector<512x4xf32>
    %c0_12 = arith.constant 0 : index
    %c0_13 = arith.constant 0 : index
    %c8_14 = arith.constant 8 : index
    %c0_15 = arith.constant 0 : index
    %6 = vector.load %arg16[%c0_12, %c0_13, %c8_14, %c0_15] : memref<2x18x32x4xf32, #tpu.memory_space<vmem>>, vector<2x16x16x4xf32>
    %7 = vector.shape_cast %6 : vector<2x16x16x4xf32> to vector<512x4xf32>
    %c0_16 = arith.constant 0 : index
    %c0_17 = arith.constant 0 : index
    %c9 = arith.constant 9 : index
    %c0_18 = arith.constant 0 : index
    %8 = vector.load %arg16[%c0_16, %c0_17, %c9, %c0_18] : memref<2x18x32x4xf32, #tpu.memory_space<vmem>>, vector<2x16x16x4xf32>
    %9 = vector.shape_cast %8 : vector<2x16x16x4xf32> to vector<512x4xf32>
    %c0_19 = arith.constant 0 : index
    %c1_20 = arith.constant 1 : index
    %c7_21 = arith.constant 7 : index
    %c0_22 = arith.constant 0 : index
    %10 = vector.load %arg16[%c0_19, %c1_20, %c7_21, %c0_22] : memref<2x18x32x4xf32, #tpu.memory_space<vmem>>, vector<2x16x16x4xf32>
    %11 = vector.shape_cast %10 : vector<2x16x16x4xf32> to vector<512x4xf32>
    %c0_23 = arith.constant 0 : index
    %c1_24 = arith.constant 1 : index
    %c8_25 = arith.constant 8 : index
    %c0_26 = arith.constant 0 : index
    %12 = vector.load %arg16[%c0_23, %c1_24, %c8_25, %c0_26] : memref<2x18x32x4xf32, #tpu.memory_space<vmem>>, vector<2x16x16x4xf32>
    %13 = vector.shape_cast %12 : vector<2x16x16x4xf32> to vector<512x4xf32>
    %c0_27 = arith.constant 0 : index
    %c1_28 = arith.constant 1 : index
    %c9_29 = arith.constant 9 : index
    %c0_30 = arith.constant 0 : index
    %14 = vector.load %arg16[%c0_27, %c1_28, %c9_29, %c0_30] : memref<2x18x32x4xf32, #tpu.memory_space<vmem>>, vector<2x16x16x4xf32>
    %15 = vector.shape_cast %14 : vector<2x16x16x4xf32> to vector<512x4xf32>
    %c0_31 = arith.constant 0 : index
    %c2 = arith.constant 2 : index
    %c7_32 = arith.constant 7 : index
    %c0_33 = arith.constant 0 : index
    %16 = vector.load %arg16[%c0_31, %c2, %c7_32, %c0_33] : memref<2x18x32x4xf32, #tpu.memory_space<vmem>>, vector<2x16x16x4xf32>
    %17 = vector.shape_cast %16 : vector<2x16x16x4xf32> to vector<512x4xf32>
    %c0_34 = arith.constant 0 : index
    %c2_35 = arith.constant 2 : index
    %c8_36 = arith.constant 8 : index
    %c0_37 = arith.constant 0 : index
    %18 = vector.load %arg16[%c0_34, %c2_35, %c8_36, %c0_37] : memref<2x18x32x4xf32, #tpu.memory_space<vmem>>, vector<2x16x16x4xf32>
    %19 = vector.shape_cast %18 : vector<2x16x16x4xf32> to vector<512x4xf32>
    %c0_38 = arith.constant 0 : index
    %c2_39 = arith.constant 2 : index
    %c9_40 = arith.constant 9 : index
    %c0_41 = arith.constant 0 : index
    %20 = vector.load %arg16[%c0_38, %c2_39, %c9_40, %c0_41] : memref<2x18x32x4xf32, #tpu.memory_space<vmem>>, vector<2x16x16x4xf32>
    %21 = vector.shape_cast %20 : vector<2x16x16x4xf32> to vector<512x4xf32>
    %22 = tpu.concatenate %5, %7, %9, %11, %13, %15, %17, %19, %21 in 1 : vector<512x4xf32>, vector<512x4xf32>, vector<512x4xf32>, vector<512x4xf32>, vector<512x4xf32>, vector<512x4xf32>, vector<512x4xf32>, vector<512x4xf32>, vector<512x4xf32> -> vector<512x36xf32>
    %23 = arith.truncf %22 : vector<512x36xf32> to vector<512x36xbf16>
    %c0_42 = arith.constant 0 : index
    %c0_43 = arith.constant 0 : index
    %24 = vector.load %arg2[%c0_42, %c0_43] : memref<36x32xbf16, #tpu.memory_space<vmem>>, vector<36x32xbf16>
    %cst_44 = arith.constant dense<0.000000e+00> : vector<512x32xf32>
    %25 = tpu.matmul %23, %24, %cst_44 {dimension_numbers = #tpu.dot_dimension_numbers<[1], [0], [0], [1], [0, 0, 1, 1], [], []>} : vector<512x36xbf16>, vector<36x32xbf16>, vector<512x32xf32> -> vector<512x32xf32>
    %c0_45 = arith.constant 0 : index
    %c0_46 = arith.constant 0 : index
    %26 = vector.load %arg3[%c0_45, %c0_46] : memref<1x32xf32, #tpu.memory_space<vmem>>, vector<1x32xf32>
    %27 = vector.broadcast %26 : vector<1x32xf32> to vector<512x32xf32>
    %28 = arith.mulf %25, %27 : vector<512x32xf32>
    %c0_47 = arith.constant 0 : index
    %c0_48 = arith.constant 0 : index
    %29 = vector.load %arg4[%c0_47, %c0_48] : memref<1x32xf32, #tpu.memory_space<vmem>>, vector<1x32xf32>
    %30 = vector.broadcast %29 : vector<1x32xf32> to vector<512x32xf32>
    %31 = arith.addf %28, %30 : vector<512x32xf32>
    %cst_49 = arith.constant 0.000000e+00 : f32
    %32 = vector.broadcast %cst_49 : f32 to vector<512x32xf32>
    %33 = arith.maximumf %31, %32 : vector<512x32xf32>
    %34 = vector.shape_cast %33 : vector<512x32xf32> to vector<32x16x32xf32>
    %c0_50 = arith.constant 0 : index
    %c0_51 = arith.constant 0 : index
    %c0_52 = arith.constant 0 : index
    %35 = vector.load %arg17[%c0_50, %c0_51, %c0_52] : memref<32x16x32xf32, #tpu.memory_space<vmem>>, vector<32x16x32xf32>
    tpu.vector_store %arg17[%c0_50, %c0_51, %c0_52], %34 {strides = array<i32>} : memref<32x16x32xf32, #tpu.memory_space<vmem>>, vector<32x16x32xf32>,
    %c0_53 = arith.constant 0 : index
    %c0_54 = arith.constant 0 : index
    %c0_55 = arith.constant 0 : index
    %36 = tpu.strided_load %arg17[%c0_53, %c0_54, %c0_55] {strides = array<i32: 1, 2, 1>} : memref<32x16x32xf32, #tpu.memory_space<vmem>>, vector<32x8x32xf32>
    %c0_56 = arith.constant 0 : index
    %c1_57 = arith.constant 1 : index
    %c0_58 = arith.constant 0 : index
    %37 = tpu.strided_load %arg17[%c0_56, %c1_57, %c0_58] {strides = array<i32: 1, 2, 1>} : memref<32x16x32xf32, #tpu.memory_space<vmem>>, vector<32x8x32xf32>
    %38 = arith.maximumf %36, %37 : vector<32x8x32xf32>
    %39 = vector.shape_cast %38 : vector<32x8x32xf32> to vector<16x2x8x32xf32>
    %40 = vector.extract_strided_slice %39 {offsets = [0, 0, 0, 0], sizes = [16, 1, 8, 32], strides = [1, 1, 1, 1]} : vector<16x2x8x32xf32> to vector<16x1x8x32xf32>
    %41 = vector.shape_cast %40 : vector<16x1x8x32xf32> to vector<16x8x32xf32>
    %42 = vector.extract_strided_slice %39 {offsets = [0, 1, 0, 0], sizes = [16, 1, 8, 32], strides = [1, 1, 1, 1]} : vector<16x2x8x32xf32> to vector<16x1x8x32xf32>
    %43 = vector.shape_cast %42 : vector<16x1x8x32xf32> to vector<16x8x32xf32>
    %44 = arith.maximumf %41, %43 : vector<16x8x32xf32>
    %45 = vector.shape_cast %44 : vector<16x8x32xf32> to vector<2x8x8x32xf32>
    %cst_59 = arith.constant 0.000000e+00 : f32
    %46 = vector.broadcast %cst_59 : f32 to vector<2x10x24x32xf32>
    %c0_60 = arith.constant 0 : index
    %c0_61 = arith.constant 0 : index
    %c0_62 = arith.constant 0 : index
    %c0_63 = arith.constant 0 : index
    %47 = vector.load %arg18[%c0_60, %c0_61, %c0_62, %c0_63] : memref<2x10x24x32xf32, #tpu.memory_space<vmem>>, vector<2x10x24x32xf32>
    tpu.vector_store %arg18[%c0_60, %c0_61, %c0_62, %c0_63], %46 {strides = array<i32>} : memref<2x10x24x32xf32, #tpu.memory_space<vmem>>, vector<2x10x24x32xf32>,
    %c0_64 = arith.constant 0 : index
    %c1_65 = arith.constant 1 : index
    %c8_66 = arith.constant 8 : index
    %c0_67 = arith.constant 0 : index
    %48 = vector.load %arg18[%c0_64, %c1_65, %c8_66, %c0_67] : memref<2x10x24x32xf32, #tpu.memory_space<vmem>>, vector<2x8x8x32xf32>
    tpu.vector_store %arg18[%c0_64, %c1_65, %c8_66, %c0_67], %45 {strides = array<i32>} : memref<2x10x24x32xf32, #tpu.memory_space<vmem>>, vector<2x8x8x32xf32>,
    %c0_68 = arith.constant 0 : index
    %c0_69 = arith.constant 0 : index
    %c7_70 = arith.constant 7 : index
    %c0_71 = arith.constant 0 : index
    %49 = vector.load %arg18[%c0_68, %c0_69, %c7_70, %c0_71] : memref<2x10x24x32xf32, #tpu.memory_space<vmem>>, vector<2x8x8x32xf32>
    %50 = vector.shape_cast %49 : vector<2x8x8x32xf32> to vector<128x32xf32>
    %c0_72 = arith.constant 0 : index
    %c0_73 = arith.constant 0 : index
    %c8_74 = arith.constant 8 : index
    %c0_75 = arith.constant 0 : index
    %51 = vector.load %arg18[%c0_72, %c0_73, %c8_74, %c0_75] : memref<2x10x24x32xf32, #tpu.memory_space<vmem>>, vector<2x8x8x32xf32>
    %52 = vector.shape_cast %51 : vector<2x8x8x32xf32> to vector<128x32xf32>
    %c0_76 = arith.constant 0 : index
    %c0_77 = arith.constant 0 : index
    %c9_78 = arith.constant 9 : index
    %c0_79 = arith.constant 0 : index
    %53 = vector.load %arg18[%c0_76, %c0_77, %c9_78, %c0_79] : memref<2x10x24x32xf32, #tpu.memory_space<vmem>>, vector<2x8x8x32xf32>
    %54 = vector.shape_cast %53 : vector<2x8x8x32xf32> to vector<128x32xf32>
    %c0_80 = arith.constant 0 : index
    %c1_81 = arith.constant 1 : index
    %c7_82 = arith.constant 7 : index
    %c0_83 = arith.constant 0 : index
    %55 = vector.load %arg18[%c0_80, %c1_81, %c7_82, %c0_83] : memref<2x10x24x32xf32, #tpu.memory_space<vmem>>, vector<2x8x8x32xf32>
    %56 = vector.shape_cast %55 : vector<2x8x8x32xf32> to vector<128x32xf32>
    %c0_84 = arith.constant 0 : index
    %c1_85 = arith.constant 1 : index
    %c8_86 = arith.constant 8 : index
    %c0_87 = arith.constant 0 : index
    %57 = vector.load %arg18[%c0_84, %c1_85, %c8_86, %c0_87] : memref<2x10x24x32xf32, #tpu.memory_space<vmem>>, vector<2x8x8x32xf32>
    %58 = vector.shape_cast %57 : vector<2x8x8x32xf32> to vector<128x32xf32>
    %c0_88 = arith.constant 0 : index
    %c1_89 = arith.constant 1 : index
    %c9_90 = arith.constant 9 : index
    %c0_91 = arith.constant 0 : index
    %59 = vector.load %arg18[%c0_88, %c1_89, %c9_90, %c0_91] : memref<2x10x24x32xf32, #tpu.memory_space<vmem>>, vector<2x8x8x32xf32>
    %60 = vector.shape_cast %59 : vector<2x8x8x32xf32> to vector<128x32xf32>
    %c0_92 = arith.constant 0 : index
    %c2_93 = arith.constant 2 : index
    %c7_94 = arith.constant 7 : index
    %c0_95 = arith.constant 0 : index
    %61 = vector.load %arg18[%c0_92, %c2_93, %c7_94, %c0_95] : memref<2x10x24x32xf32, #tpu.memory_space<vmem>>, vector<2x8x8x32xf32>
    %62 = vector.shape_cast %61 : vector<2x8x8x32xf32> to vector<128x32xf32>
    %c0_96 = arith.constant 0 : index
    %c2_97 = arith.constant 2 : index
    %c8_98 = arith.constant 8 : index
    %c0_99 = arith.constant 0 : index
    %63 = vector.load %arg18[%c0_96, %c2_97, %c8_98, %c0_99] : memref<2x10x24x32xf32, #tpu.memory_space<vmem>>, vector<2x8x8x32xf32>
    %64 = vector.shape_cast %63 : vector<2x8x8x32xf32> to vector<128x32xf32>
    %c0_100 = arith.constant 0 : index
    %c2_101 = arith.constant 2 : index
    %c9_102 = arith.constant 9 : index
    %c0_103 = arith.constant 0 : index
    %65 = vector.load %arg18[%c0_100, %c2_101, %c9_102, %c0_103] : memref<2x10x24x32xf32, #tpu.memory_space<vmem>>, vector<2x8x8x32xf32>
    %66 = vector.shape_cast %65 : vector<2x8x8x32xf32> to vector<128x32xf32>
    %67 = tpu.concatenate %50, %52, %54, %56, %58, %60, %62, %64, %66 in 1 : vector<128x32xf32>, vector<128x32xf32>, vector<128x32xf32>, vector<128x32xf32>, vector<128x32xf32>, vector<128x32xf32>, vector<128x32xf32>, vector<128x32xf32>, vector<128x32xf32> -> vector<128x288xf32>
    %68 = arith.truncf %67 : vector<128x288xf32> to vector<128x288xbf16>
    %c0_104 = arith.constant 0 : index
    %c0_105 = arith.constant 0 : index
    %69 = vector.load %arg5[%c0_104, %c0_105] : memref<288x64xbf16, #tpu.memory_space<vmem>>, vector<288x64xbf16>
    %cst_106 = arith.constant dense<0.000000e+00> : vector<128x64xf32>
    %70 = tpu.matmul %68, %69, %cst_106 {dimension_numbers = #tpu.dot_dimension_numbers<[1], [0], [0], [1], [0, 0, 1, 1], [], []>} : vector<128x288xbf16>, vector<288x64xbf16>, vector<128x64xf32> -> vector<128x64xf32>
    %c0_107 = arith.constant 0 : index
    %c0_108 = arith.constant 0 : index
    %71 = vector.load %arg6[%c0_107, %c0_108] : memref<1x64xf32, #tpu.memory_space<vmem>>, vector<1x64xf32>
    %72 = vector.broadcast %71 : vector<1x64xf32> to vector<128x64xf32>
    %73 = arith.mulf %70, %72 : vector<128x64xf32>
    %c0_109 = arith.constant 0 : index
    %c0_110 = arith.constant 0 : index
    %74 = vector.load %arg7[%c0_109, %c0_110] : memref<1x64xf32, #tpu.memory_space<vmem>>, vector<1x64xf32>
    %75 = vector.broadcast %74 : vector<1x64xf32> to vector<128x64xf32>
    %76 = arith.addf %73, %75 : vector<128x64xf32>
    %cst_111 = arith.constant 0.000000e+00 : f32
    %77 = vector.broadcast %cst_111 : f32 to vector<128x64xf32>
    %78 = arith.maximumf %76, %77 : vector<128x64xf32>
    %79 = vector.shape_cast %78 : vector<128x64xf32> to vector<16x8x64xf32>
    %c0_112 = arith.constant 0 : index
    %c0_113 = arith.constant 0 : index
    %c0_114 = arith.constant 0 : index
    %80 = vector.load %arg19[%c0_112, %c0_113, %c0_114] : memref<16x8x64xf32, #tpu.memory_space<vmem>>, vector<16x8x64xf32>
    tpu.vector_store %arg19[%c0_112, %c0_113, %c0_114], %79 {strides = array<i32>} : memref<16x8x64xf32, #tpu.memory_space<vmem>>, vector<16x8x64xf32>,
    %c0_115 = arith.constant 0 : index
    %c0_116 = arith.constant 0 : index
    %c0_117 = arith.constant 0 : index
    %81 = tpu.strided_load %arg19[%c0_115, %c0_116, %c0_117] {strides = array<i32: 1, 2, 1>} : memref<16x8x64xf32, #tpu.memory_space<vmem>>, vector<16x4x64xf32>
    %c0_118 = arith.constant 0 : index
    %c1_119 = arith.constant 1 : index
    %c0_120 = arith.constant 0 : index
    %82 = tpu.strided_load %arg19[%c0_118, %c1_119, %c0_120] {strides = array<i32: 1, 2, 1>} : memref<16x8x64xf32, #tpu.memory_space<vmem>>, vector<16x4x64xf32>
    %83 = arith.maximumf %81, %82 : vector<16x4x64xf32>
    %84 = vector.shape_cast %83 : vector<16x4x64xf32> to vector<8x2x4x64xf32>
    %85 = vector.extract_strided_slice %84 {offsets = [0, 0, 0, 0], sizes = [8, 1, 4, 64], strides = [1, 1, 1, 1]} : vector<8x2x4x64xf32> to vector<8x1x4x64xf32>
    %86 = vector.shape_cast %85 : vector<8x1x4x64xf32> to vector<8x4x64xf32>
    %87 = vector.extract_strided_slice %84 {offsets = [0, 1, 0, 0], sizes = [8, 1, 4, 64], strides = [1, 1, 1, 1]} : vector<8x2x4x64xf32> to vector<8x1x4x64xf32>
    %88 = vector.shape_cast %87 : vector<8x1x4x64xf32> to vector<8x4x64xf32>
    %89 = arith.maximumf %86, %88 : vector<8x4x64xf32>
    %90 = vector.shape_cast %89 : vector<8x4x64xf32> to vector<2x4x4x64xf32>
    %cst_121 = arith.constant 0.000000e+00 : f32
    %91 = vector.broadcast %cst_121 : f32 to vector<2x6x20x64xf32>
    %c0_122 = arith.constant 0 : index
    %c0_123 = arith.constant 0 : index
    %c0_124 = arith.constant 0 : index
    %c0_125 = arith.constant 0 : index
    %92 = vector.load %arg20[%c0_122, %c0_123, %c0_124, %c0_125] : memref<2x6x20x64xf32, #tpu.memory_space<vmem>>, vector<2x6x20x64xf32>
    tpu.vector_store %arg20[%c0_122, %c0_123, %c0_124, %c0_125], %91 {strides = array<i32>} : memref<2x6x20x64xf32, #tpu.memory_space<vmem>>, vector<2x6x20x64xf32>,
    %c0_126 = arith.constant 0 : index
    %c1_127 = arith.constant 1 : index
    %c8_128 = arith.constant 8 : index
    %c0_129 = arith.constant 0 : index
    %93 = vector.load %arg20[%c0_126, %c1_127, %c8_128, %c0_129] : memref<2x6x20x64xf32, #tpu.memory_space<vmem>>, vector<2x4x4x64xf32>
    tpu.vector_store %arg20[%c0_126, %c1_127, %c8_128, %c0_129], %90 {strides = array<i32>} : memref<2x6x20x64xf32, #tpu.memory_space<vmem>>, vector<2x4x4x64xf32>,
    %c0_130 = arith.constant 0 : index
    %c0_131 = arith.constant 0 : index
    %c7_132 = arith.constant 7 : index
    %c0_133 = arith.constant 0 : index
    %94 = vector.load %arg20[%c0_130, %c0_131, %c7_132, %c0_133] : memref<2x6x20x64xf32, #tpu.memory_space<vmem>>, vector<2x4x4x64xf32>
    %95 = vector.shape_cast %94 : vector<2x4x4x64xf32> to vector<32x64xf32>
    %c0_134 = arith.constant 0 : index
    %c0_135 = arith.constant 0 : index
    %c8_136 = arith.constant 8 : index
    %c0_137 = arith.constant 0 : index
    %96 = vector.load %arg20[%c0_134, %c0_135, %c8_136, %c0_137] : memref<2x6x20x64xf32, #tpu.memory_space<vmem>>, vector<2x4x4x64xf32>
    %97 = vector.shape_cast %96 : vector<2x4x4x64xf32> to vector<32x64xf32>
    %c0_138 = arith.constant 0 : index
    %c0_139 = arith.constant 0 : index
    %c9_140 = arith.constant 9 : index
    %c0_141 = arith.constant 0 : index
    %98 = vector.load %arg20[%c0_138, %c0_139, %c9_140, %c0_141] : memref<2x6x20x64xf32, #tpu.memory_space<vmem>>, vector<2x4x4x64xf32>
    %99 = vector.shape_cast %98 : vector<2x4x4x64xf32> to vector<32x64xf32>
    %c0_142 = arith.constant 0 : index
    %c1_143 = arith.constant 1 : index
    %c7_144 = arith.constant 7 : index
    %c0_145 = arith.constant 0 : index
    %100 = vector.load %arg20[%c0_142, %c1_143, %c7_144, %c0_145] : memref<2x6x20x64xf32, #tpu.memory_space<vmem>>, vector<2x4x4x64xf32>
    %101 = vector.shape_cast %100 : vector<2x4x4x64xf32> to vector<32x64xf32>
    %c0_146 = arith.constant 0 : index
    %c1_147 = arith.constant 1 : index
    %c8_148 = arith.constant 8 : index
    %c0_149 = arith.constant 0 : index
    %102 = vector.load %arg20[%c0_146, %c1_147, %c8_148, %c0_149] : memref<2x6x20x64xf32, #tpu.memory_space<vmem>>, vector<2x4x4x64xf32>
    %103 = vector.shape_cast %102 : vector<2x4x4x64xf32> to vector<32x64xf32>
    %c0_150 = arith.constant 0 : index
    %c1_151 = arith.constant 1 : index
    %c9_152 = arith.constant 9 : index
    %c0_153 = arith.constant 0 : index
    %104 = vector.load %arg20[%c0_150, %c1_151, %c9_152, %c0_153] : memref<2x6x20x64xf32, #tpu.memory_space<vmem>>, vector<2x4x4x64xf32>
    %105 = vector.shape_cast %104 : vector<2x4x4x64xf32> to vector<32x64xf32>
    %c0_154 = arith.constant 0 : index
    %c2_155 = arith.constant 2 : index
    %c7_156 = arith.constant 7 : index
    %c0_157 = arith.constant 0 : index
    %106 = vector.load %arg20[%c0_154, %c2_155, %c7_156, %c0_157] : memref<2x6x20x64xf32, #tpu.memory_space<vmem>>, vector<2x4x4x64xf32>
    %107 = vector.shape_cast %106 : vector<2x4x4x64xf32> to vector<32x64xf32>
    %c0_158 = arith.constant 0 : index
    %c2_159 = arith.constant 2 : index
    %c8_160 = arith.constant 8 : index
    %c0_161 = arith.constant 0 : index
    %108 = vector.load %arg20[%c0_158, %c2_159, %c8_160, %c0_161] : memref<2x6x20x64xf32, #tpu.memory_space<vmem>>, vector<2x4x4x64xf32>
    %109 = vector.shape_cast %108 : vector<2x4x4x64xf32> to vector<32x64xf32>
    %c0_162 = arith.constant 0 : index
    %c2_163 = arith.constant 2 : index
    %c9_164 = arith.constant 9 : index
    %c0_165 = arith.constant 0 : index
    %110 = vector.load %arg20[%c0_162, %c2_163, %c9_164, %c0_165] : memref<2x6x20x64xf32, #tpu.memory_space<vmem>>, vector<2x4x4x64xf32>
    %111 = vector.shape_cast %110 : vector<2x4x4x64xf32> to vector<32x64xf32>
    %112 = tpu.concatenate %95, %97, %99, %101, %103, %105, %107, %109, %111 in 1 : vector<32x64xf32>, vector<32x64xf32>, vector<32x64xf32>, vector<32x64xf32>, vector<32x64xf32>, vector<32x64xf32>, vector<32x64xf32>, vector<32x64xf32>, vector<32x64xf32> -> vector<32x576xf32>
    %113 = arith.truncf %112 : vector<32x576xf32> to vector<32x576xbf16>
    %c0_166 = arith.constant 0 : index
    %c0_167 = arith.constant 0 : index
    %114 = vector.load %arg8[%c0_166, %c0_167] : memref<576x128xbf16, #tpu.memory_space<vmem>>, vector<576x128xbf16>
    %cst_168 = arith.constant dense<0.000000e+00> : vector<32x128xf32>
    %115 = tpu.matmul %113, %114, %cst_168 {dimension_numbers = #tpu.dot_dimension_numbers<[1], [0], [0], [1], [0, 0, 1, 1], [], []>} : vector<32x576xbf16>, vector<576x128xbf16>, vector<32x128xf32> -> vector<32x128xf32>
    %c0_169 = arith.constant 0 : index
    %c0_170 = arith.constant 0 : index
    %116 = vector.load %arg9[%c0_169, %c0_170] : memref<1x128xf32, #tpu.memory_space<vmem>>, vector<1x128xf32>
    %117 = vector.broadcast %116 : vector<1x128xf32> to vector<32x128xf32>
    %118 = arith.mulf %115, %117 : vector<32x128xf32>
    %c0_171 = arith.constant 0 : index
    %c0_172 = arith.constant 0 : index
    %119 = vector.load %arg10[%c0_171, %c0_172] : memref<1x128xf32, #tpu.memory_space<vmem>>, vector<1x128xf32>
    %120 = vector.broadcast %119 : vector<1x128xf32> to vector<32x128xf32>
    %121 = arith.addf %118, %120 : vector<32x128xf32>
    %cst_173 = arith.constant 0.000000e+00 : f32
    %122 = vector.broadcast %cst_173 : f32 to vector<32x128xf32>
    %123 = arith.maximumf %121, %122 : vector<32x128xf32>
    %124 = vector.shape_cast %123 : vector<32x128xf32> to vector<8x4x128xf32>
    %c0_174 = arith.constant 0 : index
    %c0_175 = arith.constant 0 : index
    %c0_176 = arith.constant 0 : index
    %125 = vector.load %arg21[%c0_174, %c0_175, %c0_176] : memref<8x4x128xf32, #tpu.memory_space<vmem>>, vector<8x4x128xf32>
    tpu.vector_store %arg21[%c0_174, %c0_175, %c0_176], %124 {strides = array<i32>} : memref<8x4x128xf32, #tpu.memory_space<vmem>>, vector<8x4x128xf32>,
    %c0_177 = arith.constant 0 : index
    %c0_178 = arith.constant 0 : index
    %c0_179 = arith.constant 0 : index
    %126 = tpu.strided_load %arg21[%c0_177, %c0_178, %c0_179] {strides = array<i32: 1, 2, 1>} : memref<8x4x128xf32, #tpu.memory_space<vmem>>, vector<8x2x128xf32>
    %c0_180 = arith.constant 0 : index
    %c1_181 = arith.constant 1 : index
    %c0_182 = arith.constant 0 : index
    %127 = tpu.strided_load %arg21[%c0_180, %c1_181, %c0_182] {strides = array<i32: 1, 2, 1>} : memref<8x4x128xf32, #tpu.memory_space<vmem>>, vector<8x2x128xf32>
    %128 = arith.maximumf %126, %127 : vector<8x2x128xf32>
    %129 = vector.shape_cast %128 : vector<8x2x128xf32> to vector<4x2x2x128xf32>
    %130 = vector.extract_strided_slice %129 {offsets = [0, 0, 0, 0], sizes = [4, 1, 2, 128], strides = [1, 1, 1, 1]} : vector<4x2x2x128xf32> to vector<4x1x2x128xf32>
    %131 = vector.shape_cast %130 : vector<4x1x2x128xf32> to vector<4x2x128xf32>
    %132 = vector.extract_strided_slice %129 {offsets = [0, 1, 0, 0], sizes = [4, 1, 2, 128], strides = [1, 1, 1, 1]} : vector<4x2x2x128xf32> to vector<4x1x2x128xf32>
    %133 = vector.shape_cast %132 : vector<4x1x2x128xf32> to vector<4x2x128xf32>
    %134 = arith.maximumf %131, %133 : vector<4x2x128xf32>
    %135 = vector.shape_cast %134 : vector<4x2x128xf32> to vector<2x2x2x128xf32>
    %136 = vector.extract_strided_slice %135 {offsets = [0, 0, 0, 0], sizes = [2, 1, 1, 128], strides = [1, 1, 1, 1]} : vector<2x2x2x128xf32> to vector<2x1x1x128xf32>
    %137 = vector.shape_cast %136 : vector<2x1x1x128xf32> to vector<2x128xf32>
    %138 = vector.extract_strided_slice %135 {offsets = [0, 0, 1, 0], sizes = [2, 1, 1, 128], strides = [1, 1, 1, 1]} : vector<2x2x2x128xf32> to vector<2x1x1x128xf32>
    %139 = vector.shape_cast %138 : vector<2x1x1x128xf32> to vector<2x128xf32>
    %140 = vector.extract_strided_slice %135 {offsets = [0, 1, 0, 0], sizes = [2, 1, 1, 128], strides = [1, 1, 1, 1]} : vector<2x2x2x128xf32> to vector<2x1x1x128xf32>
    %141 = vector.shape_cast %140 : vector<2x1x1x128xf32> to vector<2x128xf32>
    %142 = vector.extract_strided_slice %135 {offsets = [0, 1, 1, 0], sizes = [2, 1, 1, 128], strides = [1, 1, 1, 1]} : vector<2x2x2x128xf32> to vector<2x1x1x128xf32>
    %143 = vector.shape_cast %142 : vector<2x1x1x128xf32> to vector<2x128xf32>
    %144 = tpu.concatenate %137, %139, %141, %143 in 1 : vector<2x128xf32>, vector<2x128xf32>, vector<2x128xf32>, vector<2x128xf32> -> vector<2x512xf32>
    %145 = arith.truncf %144 : vector<2x512xf32> to vector<2x512xbf16>
    %c0_183 = arith.constant 0 : index
    %c0_184 = arith.constant 0 : index
    %146 = vector.load %arg11[%c0_183, %c0_184] : memref<512x256xbf16, #tpu.memory_space<vmem>>, vector<512x256xbf16>
    %cst_185 = arith.constant dense<0.000000e+00> : vector<2x256xf32>
    %147 = tpu.matmul %145, %146, %cst_185 {dimension_numbers = #tpu.dot_dimension_numbers<[1], [0], [0], [1], [0, 0, 1, 1], [], []>} : vector<2x512xbf16>, vector<512x256xbf16>, vector<2x256xf32> -> vector<2x256xf32>
    %c0_186 = arith.constant 0 : index
    %c0_187 = arith.constant 0 : index
    %148 = vector.load %arg12[%c0_186, %c0_187] : memref<1x256xf32, #tpu.memory_space<vmem>>, vector<1x256xf32>
    %149 = vector.broadcast %148 : vector<1x256xf32> to vector<2x256xf32>
    %150 = arith.addf %147, %149 : vector<2x256xf32>
    %cst_188 = arith.constant 0.000000e+00 : f32
    %151 = vector.broadcast %cst_188 : f32 to vector<2x256xf32>
    %152 = arith.maximumf %150, %151 : vector<2x256xf32>
    %153 = arith.truncf %152 : vector<2x256xf32> to vector<2x256xbf16>
    %c0_189 = arith.constant 0 : index
    %c0_190 = arith.constant 0 : index
    %154 = vector.load %arg13[%c0_189, %c0_190] : memref<256x128xbf16, #tpu.memory_space<vmem>>, vector<256x128xbf16>
    %cst_191 = arith.constant dense<0.000000e+00> : vector<2x128xf32>
    %155 = tpu.matmul %153, %154, %cst_191 {dimension_numbers = #tpu.dot_dimension_numbers<[1], [0], [0], [1], [0, 0, 1, 1], [], []>} : vector<2x256xbf16>, vector<256x128xbf16>, vector<2x128xf32> -> vector<2x128xf32>
    %c0_192 = arith.constant 0 : index
    %c0_193 = arith.constant 0 : index
    %156 = vector.load %arg14[%c0_192, %c0_193] : memref<1x128xf32, #tpu.memory_space<vmem>>, vector<1x128xf32>
    %157 = vector.broadcast %156 : vector<1x128xf32> to vector<2x128xf32>
    %158 = arith.addf %155, %157 : vector<2x128xf32>
    %c0_194 = arith.constant 0 : index
    %c0_195 = arith.constant 0 : index
    %159 = vector.load %arg15[%c0_194, %c0_195] : memref<2x128xf32, #tpu.memory_space<vmem>>, vector<2x128xf32>
    tpu.vector_store %arg15[%c0_194, %c0_195], %158 {strides = array<i32>} : memref<2x128xf32, #tpu.memory_space<vmem>>, vector<2x128xf32>,
    return
  }
  func.func @transform_0(%arg0: i32) -> (i32, i32, i32, i32) {
    %c0_i32 = arith.constant 0 : i32
    %c0_i32_0 = arith.constant 0 : i32
    %c0_i32_1 = arith.constant 0 : i32
    %c0_i32_2 = arith.constant 0 : i32
    return %arg0, %c0_i32, %c0_i32_0, %c0_i32_1 : i32, i32, i32, i32
  }
  func.func @transform_1(%arg0: i32) -> (i32, i32) {
    %c0_i32 = arith.constant 0 : i32
    %c0_i32_0 = arith.constant 0 : i32
    %c0_i32_1 = arith.constant 0 : i32
    return %c0_i32, %c0_i32_0 : i32, i32
  }
  func.func @transform_2(%arg0: i32) -> (i32, i32) {
    %c0_i32 = arith.constant 0 : i32
    %c0_i32_0 = arith.constant 0 : i32
    %c0_i32_1 = arith.constant 0 : i32
    return %c0_i32, %c0_i32_0 : i32, i32
  }
  func.func @transform_3(%arg0: i32) -> (i32, i32) {
    %c0_i32 = arith.constant 0 : i32
    %c0_i32_0 = arith.constant 0 : i32
    %c0_i32_1 = arith.constant 0 : i32
    return %c0_i32, %c0_i32_0 : i32, i32
  }
  func.func @transform_4(%arg0: i32) -> (i32, i32) {
    %c0_i32 = arith.constant 0 : i32
    %c0_i32_0 = arith.constant 0 : i32
    %c0_i32_1 = arith.constant 0 : i32
    return %c0_i32, %c0_i32_0 : i32, i32
  }
  func.func @transform_5(%arg0: i32) -> (i32, i32) {
    %c0_i32 = arith.constant 0 : i32
    %c0_i32_0 = arith.constant 0 : i32
    %c0_i32_1 = arith.constant 0 : i32
    return %c0_i32, %c0_i32_0 : i32, i32
  }
  func.func @transform_6(%arg0: i32) -> (i32, i32) {
    %c0_i32 = arith.constant 0 : i32
    %c0_i32_0 = arith.constant 0 : i32
    %c0_i32_1 = arith.constant 0 : i32
    return %c0_i32, %c0_i32_0 : i32, i32
  }
  func.func @transform_7(%arg0: i32) -> (i32, i32) {
    %c0_i32 = arith.constant 0 : i32
    %c0_i32_0 = arith.constant 0 : i32
    %c0_i32_1 = arith.constant 0 : i32
    return %c0_i32, %c0_i32_0 : i32, i32
  }
  func.func @transform_8(%arg0: i32) -> (i32, i32) {
    %c0_i32 = arith.constant 0 : i32
    %c0_i32_0 = arith.constant 0 : i32
    %c0_i32_1 = arith.constant 0 : i32
    return %c0_i32, %c0_i32_0 : i32, i32
  }
  func.func @transform_9(%arg0: i32) -> (i32, i32) {
    %c0_i32 = arith.constant 0 : i32
    %c0_i32_0 = arith.constant 0 : i32
    %c0_i32_1 = arith.constant 0 : i32
    return %c0_i32, %c0_i32_0 : i32, i32
  }
  func.func @transform_10(%arg0: i32) -> (i32, i32) {
    %c0_i32 = arith.constant 0 : i32
    %c0_i32_0 = arith.constant 0 : i32
    %c0_i32_1 = arith.constant 0 : i32
    return %c0_i32, %c0_i32_0 : i32, i32
  }
  func.func @transform_11(%arg0: i32) -> (i32, i32) {
    %c0_i32 = arith.constant 0 : i32
    %c0_i32_0 = arith.constant 0 : i32
    %c0_i32_1 = arith.constant 0 : i32
    return %c0_i32, %c0_i32_0 : i32, i32
  }
  func.func @transform_12(%arg0: i32) -> (i32, i32) {
    %c0_i32 = arith.constant 0 : i32
    %c0_i32_0 = arith.constant 0 : i32
    %c0_i32_1 = arith.constant 0 : i32
    return %c0_i32, %c0_i32_0 : i32, i32
  }
  func.func @transform_13(%arg0: i32) -> (i32, i32) {
    %c0_i32 = arith.constant 0 : i32
    %c0_i32_0 = arith.constant 0 : i32
    %c0_i32_1 = arith.constant 0 : i32
    return %c0_i32, %c0_i32_0 : i32, i32
  }
  func.func @transform_14(%arg0: i32) -> (i32, i32) {
    %c0_i32 = arith.constant 0 : i32
    %c0_i32_0 = arith.constant 0 : i32
    return %arg0, %c0_i32 : i32, i32
  }
}

</mosaic_0001>

<bundles_post_ra>
// kernel: net_forward.1
= control target key start
LH: loop header
LB: loop body
LE: loop exit
PB: predicated region body
PF: predicated region fallthrough
CT: control target
= control target key end

     0   :  { %19 = vsyncpa [#allocation9], 0  ;;  %s13353_s0 = inlined_call_operand.vmem [shape: f32[2,16,16,4], index: 0, kind: input, shape index: {}]   ;;  %s13354_s1 = inlined_call_operand.vmem [shape: bf16[36,32], index: 1, kind: input, shape index: {}]   ;;  %s13355_s2 = inlined_call_operand.vmem [shape: f32[1,32], index: 2, kind: input, shape index: {}]   ;;  %s13356_s3 = inlined_call_operand.vmem [shape: f32[1,32], index: 3, kind: input, shape index: {}]   ;;  %s13357_s4 = inlined_call_operand.vmem [shape: bf16[288,64], index: 4, kind: input, shape index: {}]   ;;  %s13358_s5 = inlined_call_operand.vmem [shape: f32[1,64], index: 5, kind: input, shape index: {}]   ;;  %s13359_s6 = inlined_call_operand.vmem [shape: f32[1,64], index: 6, kind: input, shape index: {}]   ;;  %s13360_s7 = inlined_call_operand.hbm [shape: bf16[576,128], index: 7, kind: input, shape index: {}]   ;;  %s13361_s8 = inlined_call_operand.vmem [shape: f32[1,128], index: 8, kind: input, shape index: {}]   ;;  %s13362_s9 = inlined_call_operand.vmem [shape: f32[1,128], index: 9, kind: input, shape index: {}]   ;;  %s13363_s10 = inlined_call_operand.vmem [shape: bf16[512,256], index: 10, kind: input, shape index: {}]   ;;  %s13364_s11 = inlined_call_operand.vmem [shape: f32[1,256], index: 11, kind: input, shape index: {}]   ;;  %s13365_s12 = inlined_call_operand.vmem [shape: bf16[256,128], index: 12, kind: input, shape index: {}]   ;;  %s13366_s13 = inlined_call_operand.vmem [shape: f32[1,128], index: 13, kind: input, shape index: {}]   ;;  %s13367_s14 = inlined_call_operand.hbm [shape: f32[2,128], index: 14, kind: output, shape index: {}]  }
   0x1   :  { %20 = vsyncpa [#allocation10], 0  ;;  %s39_s15 = sshll.u32 %s13360_s7, 4  ;;  %s9477_s16 = smov [#allocation8]   ;;  %s40_s15 = int_to_ptr.hbm [resolvable:$true] %s39_s15 }
   0x2   :  { %s41_s17 = sshll.u32 %s9477_s16, 4  ;;  %s9478_s18 = smov 64   ;;  %s42_s17 = int_to_ptr.vmem [resolvable:$true] %s41_s17 }
   0x3   :  { %s9479_s19 = smov 4  }
   0x4   :  { %47 = dma.hbm_to_vmem [thread:$0]  %s40_s15, 4608, %s42_s17, [#allocation9], %s9478_s18, %s9478_s18, %s9479_s19  }
   0x5   :  { %9473 = dma.done.wait [#allocation9], 4608  }
   0x6   :  { %9474 = vsyncadd [#allocation9], 4294962688  ;;  %vm129_vm0 = vcmask 31744   ;;  %v13368_v0 = vmov 0.0   ;;  %v71_v4 = vld [vmem:[%s13353_s0 + $0x30] sm:$0xff]  ;;  %v72_v5 = vld [vmem:[%s13353_s0 + $0x38] sm:$0xff] }
   0x7   :  { %131 = vst.msk [vmem:[#allocation2 + $0x8] sm:$0xff] %vm129_vm0, %v13368_v0  ;;  %v67_v6 = vld [vmem:[%s13353_s0 + $0x10] sm:$0xff]  ;;  %v68_v7 = vld [vmem:[%s13353_s0 + $0x18] sm:$0xff]  ;;  %v65_v8 = vld [vmem:[%s13353_s0] sm:$0xff]  ;;  %s9481_s7 = smov 8   ;;  %s9483_s24 = smov 20  }
   0x8   :  { %132 = vst.msk [vmem:[#allocation2 + $0x10] sm:$0xff] %vm129_vm0, %v13368_v0  ;;  %v66_v9 = vld [vmem:[%s13353_s0 + $0x8] sm:$0xff]  ;;  %v73_v10 = vld [vmem:[%s13353_s0 + $0x40] sm:$0xff]  ;;  %v75_v15 = vld [vmem:[%s13353_s0 + $0x50] sm:$0xff]  ;;  %s9484_s25 = smov 16   ;;  %s9485_s26 = smov 24  }
   0x9   :  { %130 = vst.msk [vmem:[#allocation2] sm:$0xff] %vm129_vm0, %v13368_v0  ;;  %v74_v11 = vld [vmem:[%s13353_s0 + $0x48] sm:$0xff]  ;;  %v69_v12 = vld [vmem:[%s13353_s0 + $0x20] sm:$0xff]  ;;  %v76_v17 = vld [vmem:[%s13353_s0 + $0x58] sm:$0xff]  ;;  %s9486_s27 = smov 32   ;;  %s9487_s28 = smov 28  }
   0xa   :  { %133 = vst.msk [vmem:[#allocation2 + $0x18] sm:$0xff] %vm129_vm0, %v13368_v0  ;;  %v70_v13 = vld [vmem:[%s13353_s0 + $0x28] sm:$0xff]  ;;  %v79_v20 = vld [vmem:[%s13353_s0 + $0x70] sm:$0xff]  ;;  %v80_v22 = vld [vmem:[%s13353_s0 + $0x78] sm:$0xff]  ;;  %vm3632_vm1 = vcmask 1041408   ;;  %vm3418_vm2 = vcmask 261120  }
   0xb   :  { %134 = vst.msk [vmem:[#allocation2 + $0x20] sm:$0xff] %vm129_vm0, %v13368_v0  ;;  %v77_v25 = vld [vmem:[%s13353_s0 + $0x60] sm:$0xff]  ;;  %v78_v27 = vld [vmem:[%s13353_s0 + $0x68] sm:$0xff]  ;;  %v83_v40 = vld [vmem:[%s13353_s0 + $0x90] sm:$0xff]  ;;  %vm3028_vm3 = vcmask 64512   ;;  %vm3158_vm4 = vcmask 130048  }
   0xc   :  { %135 = vst.msk [vmem:[#allocation2 + $0x28] sm:$0xff] %vm129_vm0, %v13368_v0  ;;  %v81_v30 = vld [vmem:[%s13353_s0 + $0x80] sm:$0xff]  ;;  %v82_v32 = vld [vmem:[%s13353_s0 + $0x88] sm:$0xff]  ;;  %v84_v42 = vld [vmem:[%s13353_s0 + $0x98] sm:$0xff]  ;;  %vm3093_vm5 = vcmask 97280   ;;  %vm3223_vm6 = vcmask 162816  }
   0xd   :  { %136 = vst.msk [vmem:[#allocation2 + $0x30] sm:$0xff] %vm129_vm0, %v13368_v0  ;;  %v85_v35 = vld [vmem:[%s13353_s0 + $0xa0] sm:$0xff]  ;;  %v86_v37 = vld [vmem:[%s13353_s0 + $0xa8] sm:$0xff]  ;;  %v87_v44 = vld [vmem:[%s13353_s0 + $0xb0] sm:$0xff]  ;;  %vm3288_vm7 = vcmask 195584   ;;  %vm3353_vm8 = vcmask 228352  }
   0xe   :  { %v403_v1 = vld [vmem:[#allocation2 + $0x8] sm:$0xff]  ;;  %137 = vst.msk [vmem:[#allocation2 + $0x38] sm:$0xff] %vm129_vm0, %v13368_v0  ;;  %v88_v47 = vld [vmem:[%s13353_s0 + $0xb8] sm:$0xff]  ;;  %v89_v53 = vld [vmem:[%s13353_s0 + $0xc0] sm:$0xff]  ;;  %vm3535_vm9 = vcmask 293888   ;;  %vm4866_vm10 = vcmask 523264  }
   0xf   :  { %v404_v2 = vld [vmem:[#allocation2 + $0x10] sm:$0xff]  ;;  %138 = vst.msk [vmem:[#allocation2 + $0x40] sm:$0xff] %vm129_vm0, %v13368_v0  ;;  %v91_v48 = vld [vmem:[%s13353_s0 + $0xd0] sm:$0xff]  ;;  %v90_v56 = vld [vmem:[%s13353_s0 + $0xc8] sm:$0xff]  ;;  %vm4883_vm11 = vcmask 785408   ;;  %vm5448_vm12 = vcmask 519168  }
  0x10   :  { %v7810_v3 = vpack.i.bf16 %v404_v2, %v403_v1  ;;  %139 = vst.msk [vmem:[#allocation2 + $0x48] sm:$0xff] %vm129_vm0, %v13368_v0  ;;  %v92_v51 = vld [vmem:[%s13353_s0 + $0xd8] sm:$0xff]  ;;  %v93_v58 = vld [vmem:[%s13353_s0 + $0xe0] sm:$0xff]  ;;  %v94_v59 = vld [vmem:[%s13353_s0 + $0xe8] sm:$0xff]  ;;  %vm6377_vm13 = vcmask 1041409   ;;  %s9489_s30 = smov [#allocation11]  }
  0x11   :  { %140 = vst.msk [vmem:[#allocation2 + $0x50] sm:$0xff] %vm129_vm0, %v13368_v0  ;;  %v97_v61 = vld [vmem:[%s13353_s0 + $0x100] sm:$0xff]  ;;  %v98_v1 = vld [vmem:[%s13353_s0 + $0x108] sm:$0xff]  ;;  %v99_v2 = vld [vmem:[%s13353_s0 + $0x110] sm:$0xff]  ;;  %s7059_s15 = sshll.u32 %s13367_s14, 4  ;;  %s7060_s15 = int_to_ptr.hbm [resolvable:$true] %s7059_s15 }
  0x12   :  { %7811 = vrot.lane.b32.xlu0 %v7810_v3, %s9479_s19  ;;  %141 = vst.msk [vmem:[#allocation2 + $0x58] sm:$0xff] %vm129_vm0, %v13368_v0 }
  0x13   :  { %142 = vst.msk [vmem:[#allocation2 + $0x60] sm:$0xff] %vm129_vm0, %v13368_v0 }
  0x14   :  { %143 = vst.msk [vmem:[#allocation2 + $0x68] sm:$0xff] %vm129_vm0, %v13368_v0 }
  0x15   :  { %144 = vst.msk [vmem:[#allocation2 + $0x70] sm:$0xff] %vm129_vm0, %v13368_v0 }
  0x16   :  { %145 = vst.msk [vmem:[#allocation2 + $0x78] sm:$0xff] %vm129_vm0, %v13368_v0 }
  0x17   :  { %146 = vst.msk [vmem:[#allocation2 + $0x80] sm:$0xff] %vm129_vm0, %v13368_v0 }
  0x18   :  { %147 = vst.msk [vmem:[#allocation2 + $0x88] sm:$0xff] %vm129_vm0, %v13368_v0 }
  0x19   :  { %148 = vst.msk [vmem:[#allocation2 + $0x90] sm:$0xff] %vm129_vm0, %v13368_v0 }
  0x1a   :  { %149 = vst.msk [vmem:[#allocation2 + $0x98] sm:$0xff] %vm129_vm0, %v13368_v0 }
  0x1b   :  { %150 = vst.msk [vmem:[#allocation2 + $0xa0] sm:$0xff] %vm129_vm0, %v13368_v0 }
  0x1c   :  { %151 = vst.msk [vmem:[#allocation2 + $0xa8] sm:$0xff] %vm129_vm0, %v13368_v0 }
  0x1d   :  { %152 = vst.msk [vmem:[#allocation2 + $0xb0] sm:$0xff] %vm129_vm0, %v13368_v0 }
  0x1e   :  { %153 = vst.msk [vmem:[#allocation2 + $0xb8] sm:$0xff] %vm129_vm0, %v13368_v0 }
  0x1f   :  { %154 = vst.msk [vmem:[#allocation2 + $0xc0] sm:$0xff] %vm129_vm0, %v13368_v0 }
  0x20   :  { %155 = vst.msk [vmem:[#allocation2 + $0xc8] sm:$0xff] %vm129_vm0, %v13368_v0 }
  0x21   :  { %156 = vst.msk [vmem:[#allocation2 + $0xd0] sm:$0xff] %vm129_vm0, %v13368_v0 }
  0x22   :  { %157 = vst.msk [vmem:[#allocation2 + $0xd8] sm:$0xff] %vm129_vm0, %v13368_v0 }
  0x23   :  { %158 = vst.msk [vmem:[#allocation2 + $0xe0] sm:$0xff] %vm129_vm0, %v13368_v0 }
  0x24   :  { %159 = vst.msk [vmem:[#allocation2 + $0xe8] sm:$0xff] %vm129_vm0, %v13368_v0 }
  0x25   :  { %160 = vst.msk [vmem:[#allocation2 + $0xf0] sm:$0xff] %vm129_vm0, %v13368_v0 }
  0x26   :  { %161 = vst.msk [vmem:[#allocation2 + $0xf8] sm:$0xff] %vm129_vm0, %v13368_v0 }
  0x27   :  { %162 = vst.msk [vmem:[#allocation2 + $0x100] sm:$0xff] %vm129_vm0, %v13368_v0 }
  0x28   :  { %163 = vst.msk [vmem:[#allocation2 + $0x108] sm:$0xff] %vm129_vm0, %v13368_v0 }
  0x29   :  { %164 = vst.msk [vmem:[#allocation2 + $0x110] sm:$0xff] %vm129_vm0, %v13368_v0 }
  0x2a   :  { %165 = vst.msk [vmem:[#allocation2 + $0x118] sm:$0xff] %vm129_vm0, %v13368_v0 }
  0x2b   :  { %166 = vst.msk [vmem:[#allocation2 + $0x120] sm:$0xff] %vm129_vm0, %v13368_v0 }
  0x2c   :  { %167 = vst.msk [vmem:[#allocation2 + $0x128] sm:$0xff] %vm129_vm0, %v13368_v0 }
  0x2d   :  { %168 = vst.msk [vmem:[#allocation2 + $0x130] sm:$0xff] %vm129_vm0, %v13368_v0 }
  0x2e   :  { %169 = vst.msk [vmem:[#allocation2 + $0x138] sm:$0xff] %vm129_vm0, %v13368_v0 }
  0x2f   :  { %170 = vst.msk [vmem:[#allocation2 + $0x140] sm:$0xff] %vm129_vm0, %v13368_v0 }
  0x30   :  { %171 = vst.msk [vmem:[#allocation2 + $0x148] sm:$0xff] %vm129_vm0, %v13368_v0 }
  0x31   :  { %172 = vst.msk [vmem:[#allocation2 + $0x150] sm:$0xff] %vm129_vm0, %v13368_v0 }
  0x32   :  { %173 = vst.msk [vmem:[#allocation2 + $0x158] sm:$0xff] %vm129_vm0, %v13368_v0 }
  0x33   :  { %174 = vst.msk [vmem:[#allocation2 + $0x160] sm:$0xff] %vm129_vm0, %v13368_v0 }
  0x34   :  { %175 = vst.msk [vmem:[#allocation2 + $0x168] sm:$0xff] %vm129_vm0, %v13368_v0 }
  0x35   :  { %176 = vst.msk [vmem:[#allocation2 + $0x170] sm:$0xff] %vm129_vm0, %v13368_v0 }
  0x36   :  { %177 = vst.msk [vmem:[#allocation2 + $0x178] sm:$0xff] %vm129_vm0, %v13368_v0 }
  0x37   :  { %178 = vst.msk [vmem:[#allocation2 + $0x180] sm:$0xff] %vm129_vm0, %v13368_v0 }
  0x38   :  { %179 = vst.msk [vmem:[#allocation2 + $0x188] sm:$0xff] %vm129_vm0, %v13368_v0 }
  0x39   :  { %180 = vst.msk [vmem:[#allocation2 + $0x190] sm:$0xff] %vm129_vm0, %v13368_v0 }
  0x3a   :  { %181 = vst.msk [vmem:[#allocation2 + $0x198] sm:$0xff] %vm129_vm0, %v13368_v0 }
  0x3b   :  { %182 = vst.msk [vmem:[#allocation2 + $0x1a0] sm:$0xff] %vm129_vm0, %v13368_v0 }
  0x3c   :  { %183 = vst.msk [vmem:[#allocation2 + $0x1a8] sm:$0xff] %vm129_vm0, %v13368_v0 }
  0x3d   :  { %184 = vst.msk [vmem:[#allocation2 + $0x1b0] sm:$0xff] %vm129_vm0, %v13368_v0 }
  0x3e   :  { %185 = vst.msk [vmem:[#allocation2 + $0x1b8] sm:$0xff] %vm129_vm0, %v13368_v0 }
  0x3f   :  { %186 = vst.msk [vmem:[#allocation2 + $0x1c0] sm:$0xff] %vm129_vm0, %v13368_v0 }
  0x40   :  { %187 = vst.msk [vmem:[#allocation2 + $0x1c8] sm:$0xff] %vm129_vm0, %v13368_v0 }
  0x41   :  { %188 = vst.msk [vmem:[#allocation2 + $0x1d0] sm:$0xff] %vm129_vm0, %v13368_v0 }
  0x42   :  { %189 = vst.msk [vmem:[#allocation2 + $0x1d8] sm:$0xff] %vm129_vm0, %v13368_v0 }
  0x43   :  { %190 = vst.msk [vmem:[#allocation2 + $0x1e0] sm:$0xff] %vm129_vm0, %v13368_v0 }
  0x44   :  { %191 = vst.msk [vmem:[#allocation2 + $0x1e8] sm:$0xff] %vm129_vm0, %v13368_v0 }
  0x45   :  { %192 = vst.msk [vmem:[#allocation2 + $0x1f0] sm:$0xff] %vm129_vm0, %v13368_v0 }
  0x46   :  { %193 = vst.msk [vmem:[#allocation2 + $0x1f8] sm:$0xff] %vm129_vm0, %v13368_v0 }
  0x47   :  { %194 = vst.msk [vmem:[#allocation2 + $0x200] sm:$0xff] %vm129_vm0, %v13368_v0 }
  0x48   :  { %195 = vst.msk [vmem:[#allocation2 + $0x208] sm:$0xff] %vm129_vm0, %v13368_v0 }
  0x49   :  { %196 = vst.msk [vmem:[#allocation2 + $0x210] sm:$0xff] %vm129_vm0, %v13368_v0 }
  0x4a   :  { %197 = vst.msk [vmem:[#allocation2 + $0x218] sm:$0xff] %vm129_vm0, %v13368_v0 }
  0x4b   :  { %198 = vst.msk [vmem:[#allocation2 + $0x220] sm:$0xff] %vm129_vm0, %v13368_v0 }
  0x4c   :  { %199 = vst.msk [vmem:[#allocation2 + $0x228] sm:$0xff] %vm129_vm0, %v13368_v0 }
  0x4d   :  { %200 = vst.msk [vmem:[#allocation2 + $0x230] sm:$0xff] %vm129_vm0, %v13368_v0 }
  0x4e   :  { %201 = vst.msk [vmem:[#allocation2 + $0x238] sm:$0xff] %vm129_vm0, %v13368_v0 }
  0x4f   :  { %202 = vst.msk [vmem:[#allocation2 + $0x240] sm:$0xff] %vm129_vm0, %v13368_v0 }
  0x50   :  { %203 = vst.msk [vmem:[#allocation2 + $0x248] sm:$0xff] %vm129_vm0, %v13368_v0 }
  0x51   :  { %204 = vst.msk [vmem:[#allocation2 + $0x250] sm:$0xff] %vm129_vm0, %v13368_v0 }
  0x52   :  { %205 = vst.msk [vmem:[#allocation2 + $0x258] sm:$0xff] %vm129_vm0, %v13368_v0 }
  0x53   :  { %206 = vst.msk [vmem:[#allocation2 + $0x260] sm:$0xff] %vm129_vm0, %v13368_v0 }
  0x54   :  { %207 = vst.msk [vmem:[#allocation2 + $0x268] sm:$0xff] %vm129_vm0, %v13368_v0 }
  0x55   :  { %208 = vst.msk [vmem:[#allocation2 + $0x270] sm:$0xff] %vm129_vm0, %v13368_v0 }
  0x56   :  { %209 = vst.msk [vmem:[#allocation2 + $0x278] sm:$0xff] %vm129_vm0, %v13368_v0 }
  0x57   :  { %210 = vst.msk [vmem:[#allocation2 + $0x280] sm:$0xff] %vm129_vm0, %v13368_v0 }
  0x58   :  { %211 = vst.msk [vmem:[#allocation2 + $0x288] sm:$0xff] %vm129_vm0, %v13368_v0 }
  0x59   :  { %212 = vst.msk [vmem:[#allocation2 + $0x290] sm:$0xff] %vm129_vm0, %v13368_v0 }
  0x5a   :  { %213 = vst.msk [vmem:[#allocation2 + $0x298] sm:$0xff] %vm129_vm0, %v13368_v0 }
  0x5b   :  { %214 = vst.msk [vmem:[#allocation2 + $0x2a0] sm:$0xff] %vm129_vm0, %v13368_v0 }
  0x5c   :  { %215 = vst.msk [vmem:[#allocation2 + $0x2a8] sm:$0xff] %vm129_vm0, %v13368_v0 }
  0x5d   :  { %216 = vst.msk [vmem:[#allocation2 + $0x2b0] sm:$0xff] %vm129_vm0, %v13368_v0 }
  0x5e   :  { %217 = vst.msk [vmem:[#allocation2 + $0x2b8] sm:$0xff] %vm129_vm0, %v13368_v0 }
  0x5f   :  { %218 = vst.msk [vmem:[#allocation2 + $0x2c0] sm:$0xff] %vm129_vm0, %v13368_v0 }
  0x60   :  { %219 = vst.msk [vmem:[#allocation2 + $0x2c8] sm:$0xff] %vm129_vm0, %v13368_v0 }
  0x61   :  { %220 = vst.msk [vmem:[#allocation2 + $0x2d0] sm:$0xff] %vm129_vm0, %v13368_v0 }
  0x62   :  { %221 = vst.msk [vmem:[#allocation2 + $0x2d8] sm:$0xff] %vm129_vm0, %v13368_v0 }
  0x63   :  { %222 = vst.msk [vmem:[#allocation2 + $0x2e0] sm:$0xff] %vm129_vm0, %v13368_v0 }
  0x64   :  { %223 = vst.msk [vmem:[#allocation2 + $0x2e8] sm:$0xff] %vm129_vm0, %v13368_v0 }
  0x65   :  { %224 = vst.msk [vmem:[#allocation2 + $0x2f0] sm:$0xff] %vm129_vm0, %v13368_v0 }
  0x66   :  { %225 = vst.msk [vmem:[#allocation2 + $0x2f8] sm:$0xff] %vm129_vm0, %v13368_v0 }
  0x67   :  { %226 = vst.msk [vmem:[#allocation2 + $0x300] sm:$0xff] %vm129_vm0, %v13368_v0 }
  0x68   :  { %227 = vst.msk [vmem:[#allocation2 + $0x308] sm:$0xff] %vm129_vm0, %v13368_v0 }
  0x69   :  { %228 = vst.msk [vmem:[#allocation2 + $0x310] sm:$0xff] %vm129_vm0, %v13368_v0 }
  0x6a   :  { %229 = vst.msk [vmem:[#allocation2 + $0x318] sm:$0xff] %vm129_vm0, %v13368_v0 }
  0x6b   :  { %230 = vst.msk [vmem:[#allocation2 + $0x320] sm:$0xff] %vm129_vm0, %v13368_v0 }
  0x6c   :  { %231 = vst.msk [vmem:[#allocation2 + $0x328] sm:$0xff] %vm129_vm0, %v13368_v0 }
  0x6d   :  { %232 = vst.msk [vmem:[#allocation2 + $0x330] sm:$0xff] %vm129_vm0, %v13368_v0 }
  0x6e   :  { %233 = vst.msk [vmem:[#allocation2 + $0x338] sm:$0xff] %vm129_vm0, %v13368_v0 }
  0x6f   :  { %234 = vst.msk [vmem:[#allocation2 + $0x340] sm:$0xff] %vm129_vm0, %v13368_v0 }
  0x70   :  { %235 = vst.msk [vmem:[#allocation2 + $0x348] sm:$0xff] %vm129_vm0, %v13368_v0 }
  0x71   :  { %236 = vst.msk [vmem:[#allocation2 + $0x350] sm:$0xff] %vm129_vm0, %v13368_v0 }
  0x72   :  { %237 = vst.msk [vmem:[#allocation2 + $0x358] sm:$0xff] %vm129_vm0, %v13368_v0 }
  0x73   :  { %238 = vst.msk [vmem:[#allocation2 + $0x360] sm:$0xff] %vm129_vm0, %v13368_v0 }
  0x74   :  { %239 = vst.msk [vmem:[#allocation2 + $0x368] sm:$0xff] %vm129_vm0, %v13368_v0 }
  0x75   :  { %240 = vst.msk [vmem:[#allocation2 + $0x370] sm:$0xff] %vm129_vm0, %v13368_v0 }
  0x76   :  { %241 = vst.msk [vmem:[#allocation2 + $0x378] sm:$0xff] %vm129_vm0, %v13368_v0 }
  0x77   :  { %242 = vst.msk [vmem:[#allocation2 + $0x380] sm:$0xff] %vm129_vm0, %v13368_v0 }
  0x78   :  { %243 = vst.msk [vmem:[#allocation2 + $0x388] sm:$0xff] %vm129_vm0, %v13368_v0 }
  0x79   :  { %244 = vst.msk [vmem:[#allocation2 + $0x390] sm:$0xff] %vm129_vm0, %v13368_v0 }
  0x7a   :  { %245 = vst.msk [vmem:[#allocation2 + $0x398] sm:$0xff] %vm129_vm0, %v13368_v0 }
  0x7b   :  { %246 = vst.msk [vmem:[#allocation2 + $0x3a0] sm:$0xff] %vm129_vm0, %v13368_v0 }
  0x7c   :  { %247 = vst.msk [vmem:[#allocation2 + $0x3a8] sm:$0xff] %vm129_vm0, %v13368_v0 }
  0x7d   :  { %248 = vst.msk [vmem:[#allocation2 + $0x3b0] sm:$0xff] %vm129_vm0, %v13368_v0 }
  0x7e   :  { %249 = vst.msk [vmem:[#allocation2 + $0x3b8] sm:$0xff] %vm129_vm0, %v13368_v0 }
  0x7f   :  { %250 = vst.msk [vmem:[#allocation2 + $0x3c0] sm:$0xff] %vm129_vm0, %v13368_v0 }
  0x80   :  { %251 = vst.msk [vmem:[#allocation2 + $0x3c8] sm:$0xff] %vm129_vm0, %v13368_v0 }
  0x81   :  { %252 = vst.msk [vmem:[#allocation2 + $0x3d0] sm:$0xff] %vm129_vm0, %v13368_v0 }
  0x82   :  { %253 = vst.msk [vmem:[#allocation2 + $0x3d8] sm:$0xff] %vm129_vm0, %v13368_v0 }
  0x83   :  { %254 = vst.msk [vmem:[#allocation2 + $0x3e0] sm:$0xff] %vm129_vm0, %v13368_v0 }
  0x84   :  { %255 = vst.msk [vmem:[#allocation2 + $0x3e8] sm:$0xff] %vm129_vm0, %v13368_v0 }
  0x85   :  { %256 = vst.msk [vmem:[#allocation2 + $0x3f0] sm:$0xff] %vm129_vm0, %v13368_v0 }
  0x86   :  { %257 = vst.msk [vmem:[#allocation2 + $0x3f8] sm:$0xff] %vm129_vm0, %v13368_v0 }
  0x87   :  { %258 = vst.msk [vmem:[#allocation2 + $0x400] sm:$0xff] %vm129_vm0, %v13368_v0 }
  0x88   :  { %259 = vst.msk [vmem:[#allocation2 + $0x408] sm:$0xff] %vm129_vm0, %v13368_v0 }
  0x89   :  { %260 = vst.msk [vmem:[#allocation2 + $0x410] sm:$0xff] %vm129_vm0, %v13368_v0 }
  0x8a   :  { %261 = vst.msk [vmem:[#allocation2 + $0x418] sm:$0xff] %vm129_vm0, %v13368_v0 }
  0x8b   :  { %262 = vst.msk [vmem:[#allocation2 + $0x420] sm:$0xff] %vm129_vm0, %v13368_v0 }
  0x8c   :  { %263 = vst.msk [vmem:[#allocation2 + $0x428] sm:$0xff] %vm129_vm0, %v13368_v0 }
  0x8d   :  { %264 = vst.msk [vmem:[#allocation2 + $0x430] sm:$0xff] %vm129_vm0, %v13368_v0 }
  0x8e   :  { %265 = vst.msk [vmem:[#allocation2 + $0x438] sm:$0xff] %vm129_vm0, %v13368_v0 }
  0x8f   :  { %266 = vst.msk [vmem:[#allocation2 + $0x440] sm:$0xff] %vm129_vm0, %v13368_v0 }
  0x90   :  { %267 = vst.msk [vmem:[#allocation2 + $0x448] sm:$0xff] %vm129_vm0, %v13368_v0 }
  0x91   :  { %268 = vst.msk [vmem:[#allocation2 + $0x450] sm:$0xff] %vm129_vm0, %v13368_v0 }
  0x92   :  { %269 = vst.msk [vmem:[#allocation2 + $0x458] sm:$0xff] %vm129_vm0, %v13368_v0 }
  0x93   :  { %270 = vst.msk [vmem:[#allocation2 + $0x460] sm:$0xff] %vm129_vm0, %v13368_v0 }
  0x94   :  { %271 = vst.msk [vmem:[#allocation2 + $0x468] sm:$0xff] %vm129_vm0, %v13368_v0 }
  0x95   :  { %272 = vst.msk [vmem:[#allocation2 + $0x470] sm:$0xff] %vm129_vm0, %v13368_v0 }
  0x96   :  { %273 = vst.msk [vmem:[#allocation2 + $0x478] sm:$0xff] %vm129_vm0, %v13368_v0 }
  0x97   :  { %281 = vst.msk [vmem:[#allocation2 + $0x88] sm:$0xff] %vm129_vm0, %v71_v4 }
  0x98   :  { %282 = vst.msk [vmem:[#allocation2 + $0x90] sm:$0xff] %vm129_vm0, %v72_v5  ;;  %v100_v5 = vld [vmem:[%s13353_s0 + $0x118] sm:$0xff] }
  0x99   :  { %277 = vst.msk [vmem:[#allocation2 + $0x48] sm:$0xff] %vm129_vm0, %v67_v6 }
  0x9a   :  { %278 = vst.msk [vmem:[#allocation2 + $0x50] sm:$0xff] %vm129_vm0, %v68_v7  ;;  %v103_v7 = vld [vmem:[%s13353_s0 + $0x130] sm:$0xff] }
  0x9b   :  { %275 = vst.msk [vmem:[#allocation2 + $0x28] sm:$0xff] %vm129_vm0, %v65_v8 }
  0x9c   :  { %276 = vst.msk [vmem:[#allocation2 + $0x30] sm:$0xff] %vm129_vm0, %v66_v9 }
  0x9d   :  { %283 = vst.msk [vmem:[#allocation2 + $0xa8] sm:$0xff] %vm129_vm0, %v73_v10  ;;  %v104_v10 = vld [vmem:[%s13353_s0 + $0x138] sm:$0xff] }
  0x9e   :  { %v411_v14 = vld [vmem:[#allocation2 + $0x88] sm:$0xff]  ;;  %284 = vst.msk [vmem:[#allocation2 + $0xb0] sm:$0xff] %vm129_vm0, %v74_v11 }
  0x9f   :  { %v412_v16 = vld [vmem:[#allocation2 + $0x90] sm:$0xff]  ;;  %279 = vst.msk [vmem:[#allocation2 + $0x68] sm:$0xff] %vm129_vm0, %v69_v12  ;;  %v101_v12 = vld [vmem:[%s13353_s0 + $0x120] sm:$0xff] }
  0xa0   :  { %v7830_v18 = vpack.i.bf16 %v412_v16, %v411_v14  ;;  %v407_v19 = vld [vmem:[#allocation2 + $0x48] sm:$0xff]  ;;  %280 = vst.msk [vmem:[#allocation2 + $0x70] sm:$0xff] %vm129_vm0, %v70_v13  ;;  %v102_v13 = vld [vmem:[%s13353_s0 + $0x128] sm:$0xff] }
  0xa1   :  { %v408_v21 = vld [vmem:[#allocation2 + $0x50] sm:$0xff]  ;;  %285 = vst.msk [vmem:[#allocation2 + $0xc8] sm:$0xff] %vm129_vm0, %v75_v15  ;;  %v105_v15 = vld [vmem:[%s13353_s0 + $0x140] sm:$0xff] }
  0xa2   :  { %7831 = vrot.lane.b32.xlu2 %v7830_v18, %s9479_s19  ;;  %v7820_v23 = vpack.i.bf16 %v408_v21, %v407_v19  ;;  %v405_v24 = vld [vmem:[#allocation2 + $0x28] sm:$0xff]  ;;  %286 = vst.msk [vmem:[#allocation2 + $0xd0] sm:$0xff] %vm129_vm0, %v76_v17  ;;  %v106_v18 = vld [vmem:[%s13353_s0 + $0x148] sm:$0xff]  ;;  %v109_v19 = vld [vmem:[%s13353_s0 + $0x160] sm:$0xff] }
  0xa3   :  { %v406_v26 = vld [vmem:[#allocation2 + $0x30] sm:$0xff]  ;;  %289 = vst.msk [vmem:[#allocation2 + $0x108] sm:$0xff] %vm129_vm0, %v79_v20 }
  0xa4   :  { %7821 = vrot.lane.b32.xlu1 %v7820_v23, %s9479_s19  ;;  %v7815_v28 = vpack.i.bf16 %v406_v26, %v405_v24  ;;  %v413_v29 = vld [vmem:[#allocation2 + $0xa8] sm:$0xff]  ;;  %290 = vst.msk [vmem:[#allocation2 + $0x110] sm:$0xff] %vm129_vm0, %v80_v22  ;;  %v110_v22 = vld [vmem:[%s13353_s0 + $0x168] sm:$0xff] }
  0xa5   :  { %v414_v31 = vld [vmem:[#allocation2 + $0xb0] sm:$0xff]  ;;  %287 = vst.msk [vmem:[#allocation2 + $0xe8] sm:$0xff] %vm129_vm0, %v77_v25  ;;  %v107_v24 = vld [vmem:[%s13353_s0 + $0x150] sm:$0xff] }
  0xa6   :  { %7816 = vrot.lane.b32.xlu0 %v7815_v28, %s9479_s19  ;;  %v7835_v33 = vpack.i.bf16 %v414_v31, %v413_v29  ;;  %v409_v34 = vld [vmem:[#allocation2 + $0x68] sm:$0xff]  ;;  %288 = vst.msk [vmem:[#allocation2 + $0xf0] sm:$0xff] %vm129_vm0, %v78_v27  ;;  %v108_v27 = vld [vmem:[%s13353_s0 + $0x158] sm:$0xff] }
  0xa7   :  { %v410_v36 = vld [vmem:[#allocation2 + $0x70] sm:$0xff]  ;;  %291 = vst.msk [vmem:[#allocation2 + $0x128] sm:$0xff] %vm129_vm0, %v81_v30  ;;  %v111_v29 = vld [vmem:[%s13353_s0 + $0x170] sm:$0xff] }
  0xa8   :  { %v7825_v38 = vpack.i.bf16 %v410_v36, %v409_v34  ;;  %v415_v39 = vld [vmem:[#allocation2 + $0xc8] sm:$0xff]  ;;  %292 = vst.msk [vmem:[#allocation2 + $0x130] sm:$0xff] %vm129_vm0, %v82_v32  ;;  %v112_v30 = vld [vmem:[%s13353_s0 + $0x178] sm:$0xff]  ;;  %v113_v36 = vld [vmem:[%s13353_s0 + $0x180] sm:$0xff] }
  0xa9   :  { %v416_v41 = vld [vmem:[#allocation2 + $0xd0] sm:$0xff]  ;;  %295 = vst.msk [vmem:[#allocation2 + $0x168] sm:$0xff] %vm129_vm0, %v85_v35  ;;  %v115_v32 = vld [vmem:[%s13353_s0 + $0x190] sm:$0xff] }
  0xaa   :  { %7836 = vrot.lane.b32.xlu2 %v7835_v33, %s9479_s19  ;;  %v7840_v43 = vpack.i.bf16 %v416_v41, %v415_v39  ;;  %296 = vst.msk [vmem:[#allocation2 + $0x170] sm:$0xff] %vm129_vm0, %v86_v37  ;;  %v419_v45 = vld [vmem:[#allocation2 + $0x108] sm:$0xff]  ;;  %v116_v35 = vld [vmem:[%s13353_s0 + $0x198] sm:$0xff]  ;;  %v114_v39 = vld [vmem:[%s13353_s0 + $0x188] sm:$0xff] }
  0xab   :  { %v420_v46 = vld [vmem:[#allocation2 + $0x110] sm:$0xff]  ;;  %293 = vst.msk [vmem:[#allocation2 + $0x148] sm:$0xff] %vm129_vm0, %v83_v40  ;;  %v435_v37 = vld [vmem:[#allocation2 + $0x248] sm:$0xff]  ;;  %v117_v41 = vld [vmem:[%s13353_s0 + $0x1a0] sm:$0xff] }
  0xac   :  { %7826 = vrot.lane.b32.xlu1 %v7825_v38, %s9479_s19  ;;  %294 = vst.msk [vmem:[#allocation2 + $0x150] sm:$0xff] %vm129_vm0, %v84_v42  ;;  %v417_v49 = vld [vmem:[#allocation2 + $0xe8] sm:$0xff]  ;;  %v7850_v52 = vpack.i.bf16 %v420_v46, %v419_v45  ;;  %v436_v38 = vld [vmem:[#allocation2 + $0x250] sm:$0xff]  ;;  %v121_v46 = vld [vmem:[%s13353_s0 + $0x1c0] sm:$0xff] }
  0xad   :  { %v418_v50 = vld [vmem:[#allocation2 + $0xf0] sm:$0xff]  ;;  %297 = vst.msk [vmem:[#allocation2 + $0x188] sm:$0xff] %vm129_vm0, %v87_v44  ;;  %v118_v44 = vld [vmem:[%s13353_s0 + $0x1a8] sm:$0xff]  ;;  %v7890_v45 = vpack.i.bf16 %v436_v38, %v435_v37  ;;  %v790_v0 = vld [vmem:[#allocation2 + $0x68] sm:$0xff] }
  0xae   :  { %7841 = vrot.lane.b32.xlu0 %v7840_v43, %s9479_s19  ;;  %298 = vst.msk [vmem:[#allocation2 + $0x190] sm:$0xff] %vm129_vm0, %v88_v47  ;;  %v421_v54 = vld [vmem:[#allocation2 + $0x128] sm:$0xff]  ;;  %v7845_v57 = vpack.i.bf16 %v418_v50, %v417_v49  ;;  %v122_v47 = vld [vmem:[%s13353_s0 + $0x1c8] sm:$0xff]  ;;  %v474_v38 = vld [vmem:[#allocation2 + $0x71] sm:$0xff] }
  0xaf   :  { %v422_v55 = vld [vmem:[#allocation2 + $0x130] sm:$0xff]  ;;  %301 = vst.msk [vmem:[#allocation2 + $0x1c8] sm:$0xff] %vm129_vm0, %v91_v48  ;;  %v119_v49 = vld [vmem:[%s13353_s0 + $0x1b0] sm:$0xff] }
  0xb0   :  { %302 = vst.msk [vmem:[#allocation2 + $0x1d0] sm:$0xff] %vm129_vm0, %v92_v51  ;;  %v7855_v60 = vpack.i.bf16 %v422_v55, %v421_v54  ;;  %v425_v62 = vld [vmem:[#allocation2 + $0x168] sm:$0xff] }
  0xb1   :  { %299 = vst.msk [vmem:[#allocation2 + $0x1a8] sm:$0xff] %vm129_vm0, %v89_v53  ;;  %v426_v63 = vld [vmem:[#allocation2 + $0x170] sm:$0xff]  ;;  %v123_v53 = vld [vmem:[%s13353_s0 + $0x1d0] sm:$0xff] }
  0xb2   :  { %7851 = vrot.lane.b32.xlu2 %v7850_v52, %s9479_s19  ;;  %300 = vst.msk [vmem:[#allocation2 + $0x1b0] sm:$0xff] %vm129_vm0, %v90_v56  ;;  %v423_v3 = vld [vmem:[#allocation2 + $0x148] sm:$0xff]  ;;  %v7865_v6 = vpack.i.bf16 %v426_v63, %v425_v62  ;;  %v120_v52 = vld [vmem:[%s13353_s0 + $0x1b8] sm:$0xff] }
  0xb3   :  { %303 = vst.msk [vmem:[#allocation2 + $0x1e8] sm:$0xff] %vm129_vm0, %v93_v58  ;;  %v424_v4 = vld [vmem:[#allocation2 + $0x150] sm:$0xff]  ;;  %v125_v58 = vld [vmem:[%s13353_s0 + $0x1e0] sm:$0xff] }
  0xb4   :  { %7846 = vrot.lane.b32.xlu1 %v7845_v57, %s9479_s19  ;;  %304 = vst.msk [vmem:[#allocation2 + $0x1f0] sm:$0xff] %vm129_vm0, %v94_v59  ;;  %v427_v8 = vld [vmem:[#allocation2 + $0x188] sm:$0xff]  ;;  %v7860_v11 = vpack.i.bf16 %v424_v4, %v423_v3  ;;  %v124_v56 = vld [vmem:[%s13353_s0 + $0x1d8] sm:$0xff] }
  0xb5   :  { %307 = vst.msk [vmem:[#allocation2 + $0x268] sm:$0xff] %vm129_vm0, %v97_v61  ;;  %v428_v9 = vld [vmem:[#allocation2 + $0x190] sm:$0xff]  ;;  %v126_v61 = vld [vmem:[%s13353_s0 + $0x1e8] sm:$0xff] }
  0xb6   :  { %7856 = vrot.lane.b32.xlu0 %v7855_v60, %s9479_s19  ;;  %308 = vst.msk [vmem:[#allocation2 + $0x270] sm:$0xff] %vm129_vm0, %v98_v1  ;;  %v7870_v14 = vpack.i.bf16 %v428_v9, %v427_v8  ;;  %v431_v16 = vld [vmem:[#allocation2 + $0x1c8] sm:$0xff] }
  0xb7   :  { %309 = vst.msk [vmem:[#allocation2 + $0x288] sm:$0xff] %vm129_vm0, %v99_v2  ;;  %v432_v17 = vld [vmem:[#allocation2 + $0x1d0] sm:$0xff] }
  0xb8   :  { %310 = vst.msk [vmem:[#allocation2 + $0x290] sm:$0xff] %vm129_vm0, %v100_v5  ;;  %v429_v20 = vld [vmem:[#allocation2 + $0x1a8] sm:$0xff]  ;;  %v7880_v23 = vpack.i.bf16 %v432_v17, %v431_v16 }
  0xb9   :  { %313 = vst.msk [vmem:[#allocation2 + $0x2c8] sm:$0xff] %vm129_vm0, %v103_v7  ;;  %v430_v21 = vld [vmem:[#allocation2 + $0x1b0] sm:$0xff] }
  0xba   :  { %7866 = vrot.lane.b32.xlu2 %v7865_v6, %s9479_s19  ;;  %314 = vst.msk [vmem:[#allocation2 + $0x2d0] sm:$0xff] %vm129_vm0, %v104_v10  ;;  %v433_v25 = vld [vmem:[#allocation2 + $0x1e8] sm:$0xff]  ;;  %v7875_v28 = vpack.i.bf16 %v430_v21, %v429_v20 }
  0xbb   :  { %311 = vst.msk [vmem:[#allocation2 + $0x2a8] sm:$0xff] %vm129_vm0, %v101_v12  ;;  %v434_v26 = vld [vmem:[#allocation2 + $0x1f0] sm:$0xff] }
  0xbc   :  { %7861 = vrot.lane.b32.xlu1 %v7860_v11, %s9479_s19  ;;  %312 = vst.msk [vmem:[#allocation2 + $0x2b0] sm:$0xff] %vm129_vm0, %v102_v13  ;;  %v7885_v31 = vpack.i.bf16 %v434_v26, %v433_v25  ;;  %v437_v33 = vld [vmem:[#allocation2 + $0x268] sm:$0xff] }
  0xbd   :  { %315 = vst.msk [vmem:[#allocation2 + $0x2e8] sm:$0xff] %vm129_vm0, %v105_v15  ;;  %v438_v34 = vld [vmem:[#allocation2 + $0x270] sm:$0xff] }
  0xbe   :  { %7871 = vrot.lane.b32.xlu0 %v7870_v14, %s9479_s19  ;;  %316 = vst.msk [vmem:[#allocation2 + $0x2f0] sm:$0xff] %vm129_vm0, %v106_v18  ;;  %v7895_v40 = vpack.i.bf16 %v438_v34, %v437_v33  ;;  %v439_v42 = vld [vmem:[#allocation2 + $0x288] sm:$0xff]  ;;  %v470_v34 = vld [vmem:[#allocation2 + $0x31] sm:$0xff] }
  0xbf   :  { %319 = vst.msk [vmem:[#allocation2 + $0x328] sm:$0xff] %vm129_vm0, %v109_v19  ;;  %v440_v43 = vld [vmem:[#allocation2 + $0x290] sm:$0xff] }
  0xc0   :  { %320 = vst.msk [vmem:[#allocation2 + $0x330] sm:$0xff] %vm129_vm0, %v110_v22  ;;  %v7900_v48 = vpack.i.bf16 %v440_v43, %v439_v42  ;;  %v443_v50 = vld [vmem:[#allocation2 + $0x2c8] sm:$0xff]  ;;  %v476_v43 = vld [vmem:[#allocation2 + $0x91] sm:$0xff] }
  0xc1   :  { %317 = vst.msk [vmem:[#allocation2 + $0x308] sm:$0xff] %vm129_vm0, %v107_v24  ;;  %v444_v51 = vld [vmem:[#allocation2 + $0x2d0] sm:$0xff] }
  0xc2   :  { %7881 = vrot.lane.b32.xlu2 %v7880_v23, %s9479_s19  ;;  %318 = vst.msk [vmem:[#allocation2 + $0x310] sm:$0xff] %vm129_vm0, %v108_v27  ;;  %v441_v54 = vld [vmem:[#allocation2 + $0x2a8] sm:$0xff]  ;;  %v7910_v57 = vpack.i.bf16 %v444_v51, %v443_v50  ;;  %v478_v50 = vld [vmem:[#allocation2 + $0xb1] sm:$0xff] }
  0xc3   :  { %321 = vst.msk [vmem:[#allocation2 + $0x348] sm:$0xff] %vm129_vm0, %v111_v29  ;;  %v442_v55 = vld [vmem:[#allocation2 + $0x2b0] sm:$0xff] }
  0xc4   :  { %7876 = vrot.lane.b32.xlu1 %v7875_v28, %s9479_s19  ;;  %322 = vst.msk [vmem:[#allocation2 + $0x350] sm:$0xff] %vm129_vm0, %v112_v30  ;;  %v445_v59 = vld [vmem:[#allocation2 + $0x2e8] sm:$0xff]  ;;  %v7905_v62 = vpack.i.bf16 %v442_v55, %v441_v54  ;;  %v468_v29 = vld [vmem:[#allocation2 + $0x11] sm:$0xff] }
  0xc5   :  { %325 = vst.msk [vmem:[#allocation2 + $0x388] sm:$0xff] %vm129_vm0, %v115_v32  ;;  %v446_v60 = vld [vmem:[#allocation2 + $0x2f0] sm:$0xff] }
  0xc6   :  { %7886 = vrot.lane.b32.xlu0 %v7885_v31, %s9479_s19  ;;  %326 = vst.msk [vmem:[#allocation2 + $0x390] sm:$0xff] %vm129_vm0, %v116_v35  ;;  %v7915_v63 = vpack.i.bf16 %v446_v60, %v445_v59  ;;  %v449_v1 = vld [vmem:[#allocation2 + $0x328] sm:$0xff]  ;;  %v484_v60 = vld [vmem:[#allocation2 + $0x111] sm:$0xff] }
  0xc7   :  { %323 = vst.msk [vmem:[#allocation2 + $0x368] sm:$0xff] %vm129_vm0, %v113_v36  ;;  %v450_v2 = vld [vmem:[#allocation2 + $0x330] sm:$0xff] }
  0xc8   :  { %324 = vst.msk [vmem:[#allocation2 + $0x370] sm:$0xff] %vm129_vm0, %v114_v39  ;;  %v447_v3 = vld [vmem:[#allocation2 + $0x308] sm:$0xff]  ;;  %v7925_v5 = vpack.i.bf16 %v450_v2, %v449_v1 }
  0xc9   :  { %327 = vst.msk [vmem:[#allocation2 + $0x3a8] sm:$0xff] %vm129_vm0, %v117_v41  ;;  %v448_v4 = vld [vmem:[#allocation2 + $0x310] sm:$0xff] }
  0xca   :  { %7896 = vrot.lane.b32.xlu2 %v7895_v40, %s9479_s19  ;;  %328 = vst.msk [vmem:[#allocation2 + $0x3b0] sm:$0xff] %vm129_vm0, %v118_v44  ;;  %v451_v6 = vld [vmem:[#allocation2 + $0x348] sm:$0xff]  ;;  %v7920_v8 = vpack.i.bf16 %v448_v4, %v447_v3  ;;  %v472_v40 = vld [vmem:[#allocation2 + $0x51] sm:$0xff] }
  0xcb   :  { %331 = vst.msk [vmem:[#allocation2 + $0x3e8] sm:$0xff] %vm129_vm0, %v121_v46  ;;  %v452_v7 = vld [vmem:[#allocation2 + $0x350] sm:$0xff] }
  0xcc   :  { %7891 = vrot.lane.b32.xlu1 %v7890_v45, %s9479_s19  ;;  %332 = vst.msk [vmem:[#allocation2 + $0x3f0] sm:$0xff] %vm129_vm0, %v122_v47  ;;  %v7930_v9 = vpack.i.bf16 %v452_v7, %v451_v6  ;;  %v455_v10 = vld [vmem:[#allocation2 + $0x388] sm:$0xff]  ;;  %v480_v47 = vld [vmem:[#allocation2 + $0xd1] sm:$0xff] }
  0xcd   :  { %329 = vst.msk [vmem:[#allocation2 + $0x3c8] sm:$0xff] %vm129_vm0, %v119_v49  ;;  %v456_v11 = vld [vmem:[#allocation2 + $0x390] sm:$0xff] }
  0xce   :  { %7901 = vrot.lane.b32.xlu0 %v7900_v48, %s9479_s19  ;;  %330 = vst.msk [vmem:[#allocation2 + $0x3d0] sm:$0xff] %vm129_vm0, %v120_v52  ;;  %v453_v12 = vld [vmem:[#allocation2 + $0x368] sm:$0xff]  ;;  %v7940_v14 = vpack.i.bf16 %v456_v11, %v455_v10  ;;  %v492_v4 = vld [vmem:[#allocation2 + $0x191] sm:$0xff] }
  0xcf   :  { %333 = vst.msk [vmem:[#allocation2 + $0x408] sm:$0xff] %vm129_vm0, %v123_v53  ;;  %v454_v13 = vld [vmem:[#allocation2 + $0x370] sm:$0xff] }
  0xd0   :  { %334 = vst.msk [vmem:[#allocation2 + $0x410] sm:$0xff] %vm129_vm0, %v124_v56  ;;  %v457_v15 = vld [vmem:[#allocation2 + $0x3a8] sm:$0xff]  ;;  %v7935_v17 = vpack.i.bf16 %v454_v13, %v453_v12  ;;  %v482_v53 = vld [vmem:[#allocation2 + $0xf1] sm:$0xff] }
  0xd1   :  { %335 = vst.msk [vmem:[#allocation2 + $0x428] sm:$0xff] %vm129_vm0, %v125_v58  ;;  %v458_v16 = vld [vmem:[#allocation2 + $0x3b0] sm:$0xff] }
  0xd2   :  { %7911 = vrot.lane.b32.xlu2 %v7910_v57, %s9479_s19  ;;  %336 = vst.msk [vmem:[#allocation2 + $0x430] sm:$0xff] %vm129_vm0, %v126_v61  ;;  %v7945_v18 = vpack.i.bf16 %v458_v16, %v457_v15  ;;  %v461_v19 = vld [vmem:[#allocation2 + $0x3e8] sm:$0xff]  ;;  %v486_v57 = vld [vmem:[#allocation2 + $0x131] sm:$0xff] }
  0xd3   :  { %v462_v20 = vld [vmem:[#allocation2 + $0x3f0] sm:$0xff] }
  0xd4   :  { %7906 = vrot.lane.b32.xlu1 %v7905_v62, %s9479_s19  ;;  %v459_v21 = vld [vmem:[#allocation2 + $0x3c8] sm:$0xff]  ;;  %v7955_v23 = vpack.i.bf16 %v462_v20, %v461_v19  ;;  %v490_v7 = vld [vmem:[#allocation2 + $0x171] sm:$0xff] }
  0xd5   :  { %v460_v22 = vld [vmem:[#allocation2 + $0x3d0] sm:$0xff] }
  0xd6   :  { %7916 = vrot.lane.b32.xlu0 %v7915_v63, %s9479_s19  ;;  %v463_v24 = vld [vmem:[#allocation2 + $0x408] sm:$0xff]  ;;  %v7950_v26 = vpack.i.bf16 %v460_v22, %v459_v21  ;;  %v488_v63 = vld [vmem:[#allocation2 + $0x151] sm:$0xff] }
  0xd7   :  { %v464_v25 = vld [vmem:[#allocation2 + $0x410] sm:$0xff] }
  0xd8   :  { %v7960_v27 = vpack.i.bf16 %v464_v25, %v463_v24  ;;  %v467_v28 = vld [vmem:[#allocation2 + $0x9] sm:$0xff]  ;;  %v494_v11 = vld [vmem:[#allocation2 + $0x1b1] sm:$0xff] }
  0xd9   :  { %v465_v30 = vld [vmem:[#allocation2 + $0x428] sm:$0xff]  ;;  %v466_v31 = vld [vmem:[#allocation2 + $0x430] sm:$0xff]  ;;  %v7970_v32 = vpack.i.bf16 %v468_v29, %v467_v28 }
  0xda   :  { %7926 = vrot.lane.b32.xlu2 %v7925_v5, %s9479_s19  ;;  %v469_v33 = vld [vmem:[#allocation2 + $0x29] sm:$0xff]  ;;  %v7965_v35 = vpack.i.bf16 %v466_v31, %v465_v30  ;;  %v498_v15 = vld [vmem:[#allocation2 + $0x1f1] sm:$0xff] }
  0xdb   :  { %v10131_v36 = vpack.i.bf16 %v470_v34, %v469_v33  ;;  %v473_v37 = vld [vmem:[#allocation2 + $0x69] sm:$0xff]  ;;  %v500_v22 = vld [vmem:[#allocation2 + $0x251] sm:$0xff] }
  0xdc   :  { %7921 = vrot.lane.b32.xlu1 %v7920_v8, %s9479_s19  ;;  %v471_v39 = vld [vmem:[#allocation2 + $0x49] sm:$0xff]  ;;  %v7985_v41 = vpack.i.bf16 %v474_v38, %v473_v37  ;;  %v10151_v8 = vpop.permute.xlu0 %7811  ;;  %v502_v30 = vld [vmem:[#allocation2 + $0x271] sm:$0xff] }
  0xdd   :  { %v475_v42 = vld [vmem:[#allocation2 + $0x89] sm:$0xff]  ;;  %v7980_v44 = vpack.i.bf16 %v472_v40, %v471_v39  ;;  %v506_v34 = vld [vmem:[#allocation2 + $0x2b1] sm:$0xff] }
  0xde   :  { %7931 = vrot.lane.b32.xlu0 %v7930_v9, %s9479_s19  ;;  %v7990_v45 = vpack.i.bf16 %v476_v43, %v475_v42  ;;  %v479_v46 = vld [vmem:[#allocation2 + $0xc9] sm:$0xff]  ;;  %v510_v40 = vld [vmem:[#allocation2 + $0x2f1] sm:$0xff] }
  0xdf   :  { %v477_v49 = vld [vmem:[#allocation2 + $0xa9] sm:$0xff]  ;;  %v8000_v51 = vpack.i.bf16 %v480_v47, %v479_v46  ;;  %v508_v43 = vld [vmem:[#allocation2 + $0x2d1] sm:$0xff] }
  0xe0   :  { %v481_v52 = vld [vmem:[#allocation2 + $0xe9] sm:$0xff]  ;;  %v7995_v54 = vpack.i.bf16 %v478_v50, %v477_v49  ;;  %v512_v47 = vld [vmem:[#allocation2 + $0x311] sm:$0xff] }
  0xe1   :  { %v8005_v55 = vpack.i.bf16 %v482_v53, %v481_v52  ;;  %v485_v56 = vld [vmem:[#allocation2 + $0x129] sm:$0xff]  ;;  %v516_v53 = vld [vmem:[#allocation2 + $0x351] sm:$0xff] }
  0xe2   :  { %7941 = vrot.lane.b32.xlu2 %v7940_v14, %s9479_s19  ;;  %v483_v59 = vld [vmem:[#allocation2 + $0x109] sm:$0xff]  ;;  %v8015_v61 = vpack.i.bf16 %v486_v57, %v485_v56  ;;  %v514_v56 = vld [vmem:[#allocation2 + $0x331] sm:$0xff] }
  0xe3   :  { %v487_v62 = vld [vmem:[#allocation2 + $0x149] sm:$0xff]  ;;  %v8010_v1 = vpack.i.bf16 %v484_v60, %v483_v59 }
  0xe4   :  { %7936 = vrot.lane.b32.xlu1 %v7935_v17, %s9479_s19  ;;  %v8020_v2 = vpack.i.bf16 %v488_v63, %v487_v62  ;;  %v491_v3 = vld [vmem:[#allocation2 + $0x189] sm:$0xff] }
  0xe5   :  { %v489_v6 = vld [vmem:[#allocation2 + $0x169] sm:$0xff]  ;;  %v8030_v9 = vpack.i.bf16 %v492_v4, %v491_v3  ;;  %v522_v3 = vld [vmem:[#allocation2 + $0x3b1] sm:$0xff] }
  0xe6   :  { %7946 = vrot.lane.b32.xlu0 %v7945_v18, %s9479_s19  ;;  %v493_v10 = vld [vmem:[#allocation2 + $0x1a9] sm:$0xff]  ;;  %v8025_v12 = vpack.i.bf16 %v490_v7, %v489_v6  ;;  %v496_v18 = vld [vmem:[#allocation2 + $0x1d1] sm:$0xff] }
  0xe7   :  { %v8035_v13 = vpack.i.bf16 %v494_v11, %v493_v10  ;;  %v497_v14 = vld [vmem:[#allocation2 + $0x1e9] sm:$0xff]  ;;  %v520_v7 = vld [vmem:[#allocation2 + $0x391] sm:$0xff] }
  0xe8   :  { %v495_v17 = vld [vmem:[#allocation2 + $0x1c9] sm:$0xff]  ;;  %v8045_v20 = vpack.i.bf16 %v498_v15, %v497_v14 }
  0xe9   :  { %v499_v21 = vld [vmem:[#allocation2 + $0x249] sm:$0xff]  ;;  %v8040_v24 = vpack.i.bf16 %v496_v18, %v495_v17  ;;  %v528_v18 = vld [vmem:[#allocation2 + $0x411] sm:$0xff] }
  0xea   :  { %7956 = vrot.lane.b32.xlu2 %v7955_v23, %s9479_s19  ;;  %v8050_v25 = vpack.i.bf16 %v500_v22, %v499_v21  ;;  %v501_v29 = vld [vmem:[#allocation2 + $0x269] sm:$0xff]  ;;  %v526_v22 = vld [vmem:[#allocation2 + $0x3f1] sm:$0xff] }
  0xeb   :  { %v505_v33 = vld [vmem:[#allocation2 + $0x2a9] sm:$0xff]  ;;  %v8055_v37 = vpack.i.bf16 %v502_v30, %v501_v29 }
  0xec   :  { %7951 = vrot.lane.b32.xlu1 %v7950_v26, %s9479_s19  ;;  %v503_v26 = vld [vmem:[#allocation2 + $0x289] sm:$0xff]  ;;  %v8065_v38 = vpack.i.bf16 %v506_v34, %v505_v33 }
  0xed   :  { %v509_v39 = vld [vmem:[#allocation2 + $0x2e9] sm:$0xff] }
  0xee   :  { %7961 = vrot.lane.b32.xlu0 %v7960_v27, %s9479_s19  ;;  %v504_v27 = vld [vmem:[#allocation2 + $0x291] sm:$0xff]  ;;  %v507_v42 = vld [vmem:[#allocation2 + $0x2c9] sm:$0xff] }
  0xef   :  { %v511_v46 = vld [vmem:[#allocation2 + $0x309] sm:$0xff]  ;;  %v8070_v50 = vpack.i.bf16 %v508_v43, %v507_v42 }
  0xf0   :  { %v515_v52 = vld [vmem:[#allocation2 + $0x349] sm:$0xff] }
  0xf1   :  { %v8090_v59 = vpack.i.bf16 %v516_v53, %v515_v52  ;;  %v517_v60 = vld [vmem:[#allocation2 + $0x369] sm:$0xff] }
  0xf2   :  { %7971 = vrot.lane.b32.xlu2 %v7970_v32, %s9481_s7  ;;  %v8060_v32 = vpack.i.bf16 %v504_v27, %v503_v26  ;;  %v519_v6 = vld [vmem:[#allocation2 + $0x389] sm:$0xff]  ;;  %v530_v27 = vld [vmem:[#allocation2 + $0x431] sm:$0xff] }
  0xf3   :  { %v523_v11 = vld [vmem:[#allocation2 + $0x3c9] sm:$0xff]  ;;  %v8100_v14 = vpack.i.bf16 %v520_v7, %v519_v6 }
  0xf4   :  { %7966 = vrot.lane.b32.xlu1 %v7965_v35, %s9479_s19  ;;  %v527_v17 = vld [vmem:[#allocation2 + $0x409] sm:$0xff]  ;;  %s9482_s19 = smov 12  }
  0xf5   :  { %v525_v21 = vld [vmem:[#allocation2 + $0x3e9] sm:$0xff] }
  0xf6   :  { %7976 = vrot.lane.b32.xlu0 %v10131_v36, %s9481_s7  ;;  %v529_v26 = vld [vmem:[#allocation2 + $0x429] sm:$0xff]  ;;  %v8115_v30 = vpack.i.bf16 %v526_v22, %v525_v21 }
  0xf7   :  { %v10211_v34 = vld [vmem:[#allocation2 + $0x47] sm:$0xff]  ;;  %v10224_v42 = vld [vmem:[#allocation2 + $0x2f] sm:$0xff] }
  0xf8   :  { %v96_v52 = vld [vmem:[%s13353_s0 + $0xf8] sm:$0xff] }
  0xf9   :  { %306 = vst.msk [vmem:[#allocation2 + $0x210] sm:$0xff] %vm129_vm0, %v96_v52  ;;  %v352_v6 = vld [vmem:[#allocation2 + $0xcf] sm:$0xff] }
  0xfa   :  { %7986 = vrot.lane.b32.xlu2 %v7985_v41, %s9481_s7  ;;  %v360_v52 = vld [vmem:[#allocation2 + $0x14f] sm:$0xff] }
  0xfc   :  { %7981 = vrot.lane.b32.xlu1 %v7980_v44, %s9481_s7  ;;  %v10138_v48 = vpop.permute.xlu2 %7831 }
  0xfe   :  { %7991 = vrot.lane.b32.xlu0 %v7990_v45, %s9481_s7  ;;  %v8075_v45 = vpack.i.bf16 %v510_v40, %v509_v39  ;;  %v10222_v40 = vld [vmem:[#allocation2 + $0x27] sm:$0xff] }
 0x102   :  { %8001 = vrot.lane.b32.xlu2 %v8000_v51, %s9481_s7  ;;  %v8080_v51 = vpack.i.bf16 %v512_v47, %v511_v46  ;;  %v345_v46 = vld [vmem:[#allocation2 + $0x67] sm:$0xff]  ;;  %v346_v47 = vld [vmem:[#allocation2 + $0x6f] sm:$0xff] }
 0x104   :  { %7996 = vrot.lane.b32.xlu1 %v7995_v54, %s9481_s7  ;;  %v10143_v58 = vpop.permute.xlu2 %7836 }
 0x106   :  { %8006 = vrot.lane.b32.xlu0 %v8005_v55, %s9481_s7  ;;  %v513_v55 = vld [vmem:[#allocation2 + $0x329] sm:$0xff] }
 0x107   :  { %v8085_v63 = vpack.i.bf16 %v514_v56, %v513_v55  ;;  %v349_v55 = vld [vmem:[#allocation2 + $0xa7] sm:$0xff]  ;;  %v350_v56 = vld [vmem:[#allocation2 + $0xaf] sm:$0xff] }
 0x10a   :  { %8016 = vrot.lane.b32.xlu2 %v8015_v61, %s9481_s7  ;;  %v518_v61 = vld [vmem:[#allocation2 + $0x371] sm:$0xff] }
 0x10c   :  { %8011 = vrot.lane.b32.xlu1 %v8010_v1, %s9481_s7  ;;  %v10148_v5 = vpop.permute.xlu2 %7851  ;;  %v8095_v1 = vpack.i.bf16 %v518_v61, %v517_v60  ;;  %v8150_v60 = vpack.i.bf16 %v350_v56, %v349_v55  ;;  %v347_v61 = vld [vmem:[#allocation2 + $0x87] sm:$0xff] }
 0x10e   :  { %8021 = vrot.lane.b32.xlu0 %v8020_v2, %s9481_s7  ;;  %v521_v2 = vld [vmem:[#allocation2 + $0x3a9] sm:$0xff] }
 0x10f   :  { %v8105_v10 = vpack.i.bf16 %v522_v3, %v521_v2  ;;  %v351_v3 = vld [vmem:[#allocation2 + $0xc7] sm:$0xff] }
 0x110   :  { %v8155_v7 = vpack.i.bf16 %v352_v6, %v351_v3  ;;  %v367_v3 = vld [vmem:[#allocation2 + $0x1c7] sm:$0xff]  ;;  %v368_v6 = vld [vmem:[#allocation2 + $0x1cf] sm:$0xff] }
 0x112   :  { %8031 = vrot.lane.b32.xlu2 %v8030_v9, %s9481_s7 }
 0x114   :  { %8026 = vrot.lane.b32.xlu1 %v8025_v12, %s9481_s7  ;;  %v10155_v16 = vpop.permute.xlu2 %7866  ;;  %v524_v12 = vld [vmem:[#allocation2 + $0x3d1] sm:$0xff] }
 0x115   :  { %v8110_v15 = vpack.i.bf16 %v524_v12, %v523_v11  ;;  %v355_v11 = vld [vmem:[#allocation2 + $0x107] sm:$0xff]  ;;  %v356_v12 = vld [vmem:[#allocation2 + $0x10f] sm:$0xff] }
 0x116   :  { %8036 = vrot.lane.b32.xlu0 %v8035_v13, %s9481_s7  ;;  %v10158_v19 = vpop.permute.xlu1 %7821 }
 0x118   :  { %v10160_v23 = vpop.permute.xlu0 %7816 }
 0x11a   :  { %8046 = vrot.lane.b32.xlu2 %v8045_v20, %s9481_s7 }
 0x11c   :  { %8041 = vrot.lane.b32.xlu1 %v8040_v24, %s9481_s7  ;;  %v10164_v28 = vpop.permute.xlu2 %7881 }
 0x11d   :  { %13416 = vst [vmem:[#allocation14_spill] sm:$0xff] %v10164_v28 }
 0x11e   :  { %8051 = vrot.lane.b32.xlu0 %v8050_v25, %s9481_s7  ;;  %v10167_v31 = vpop.permute.xlu1 %7826  ;;  %v8120_v25 = vpack.i.bf16 %v528_v18, %v527_v17  ;;  %v353_v17 = vld [vmem:[#allocation2 + $0xe7] sm:$0xff]  ;;  %v354_v18 = vld [vmem:[#allocation2 + $0xef] sm:$0xff] }
 0x11f   :  { %v8160_v22 = vpack.i.bf16 %v354_v18, %v353_v17 }
 0x120   :  { %v10169_v35 = vpop.permute.xlu0 %7841 }
 0x122   :  { %8061 = vrot.lane.b32.xlu2 %v8060_v32, %s9481_s7  ;;  %v8125_v32 = vpack.i.bf16 %v530_v27, %v529_v26  ;;  %v358_v26 = vld [vmem:[#allocation2 + $0x12f] sm:$0xff] }
 0x124   :  { %8056 = vrot.lane.b32.xlu1 %v8055_v37, %s9481_s7  ;;  %v10173_v41 = vpop.permute.xlu2 %7896  ;;  %v10213_v37 = vld [vmem:[#allocation2 + $0x4f] sm:$0xff] }
 0x125   :  { %13417 = vst [vmem:[#allocation15_spill] sm:$0xff] %v10173_v41  ;;  %v10220_v39 = vpack.i.bf16 %v10213_v37, %v10211_v34 }
 0x126   :  { %8066 = vrot.lane.b32.xlu0 %v8065_v38, %s9481_s7  ;;  %v10176_v44 = vpop.permute.xlu1 %7846 }
 0x128   :  { %v10178_v49 = vpop.permute.xlu0 %7856 }
 0x12a   :  { %8076 = vrot.lane.b32.xlu2 %v8075_v45, %s9481_s7  ;;  %v8130_v45 = vpack.i.bf16 %v10224_v42, %v10222_v40 }
 0x12c   :  { %8071 = vrot.lane.b32.xlu1 %v8070_v50, %s9481_s7  ;;  %v10182_v54 = vpop.permute.xlu2 %7911  ;;  %v10232_v50 = vpack.i.bf16 %v346_v47, %v345_v46 }
 0x12d   :  { %13418 = vst [vmem:[#allocation16_spill] sm:$0xff] %v10182_v54  ;;  %v737_v54 = vld [vmem:[#allocation2 + $0x10f] sm:$0xff] }
 0x12e   :  { %8081 = vrot.lane.b32.xlu0 %v8080_v51, %s9481_s7  ;;  %v10185_v57 = vpop.permute.xlu1 %7861  ;;  %v95_v51 = vld [vmem:[%s13353_s0 + $0xf0] sm:$0xff] }
 0x12f   :  { %305 = vst.msk [vmem:[#allocation2 + $0x208] sm:$0xff] %vm129_vm0, %v95_v51  ;;  %v359_v51 = vld [vmem:[#allocation2 + $0x147] sm:$0xff] }
 0x130   :  { %v10187_v62 = vpop.permute.xlu0 %7871  ;;  %v8175_v56 = vpack.i.bf16 %v360_v52, %v359_v51 }
 0x132   :  { %8091 = vrot.lane.b32.xlu2 %v8090_v59, %s9481_s7 }
 0x134   :  { %8086 = vrot.lane.b32.xlu1 %v8085_v63, %s9481_s7  ;;  %v10191_v4 = vpop.permute.xlu2 %7926  ;;  %v348_v63 = vld [vmem:[#allocation2 + $0x8f] sm:$0xff] }
 0x135   :  { %13419 = vst [vmem:[#allocation17_spill] sm:$0xff] %v10191_v4  ;;  %v8145_v2 = vpack.i.bf16 %v348_v63, %v347_v61  ;;  %v364_v61 = vld [vmem:[#allocation2 + $0x18f] sm:$0xff] }
 0x136   :  { %8096 = vrot.lane.b32.xlu0 %v8095_v1, %s9481_s7  ;;  %v10194_v9 = vpop.permute.xlu1 %7876  ;;  %v562_v51 = vld [vmem:[#allocation2 + $0x20f] sm:$0xff] }
 0x137   :  { %13420 = vst [vmem:[#allocation18_spill] sm:$0xff] %v10194_v9 }
 0x138   :  { %v10196_v13 = vpop.permute.xlu0 %7886 }
 0x139   :  { %13421 = vst [vmem:[#allocation19_spill] sm:$0xff] %v10196_v13 }
 0x13a   :  { %8106 = vrot.lane.b32.xlu2 %v8105_v10, %s9481_s7 }
 0x13c   :  { %8101 = vrot.lane.b32.xlu1 %v8100_v14, %s9481_s7  ;;  %v10200_v20 = vpop.permute.xlu2 %7941 }
 0x13d   :  { %13422 = vst [vmem:[#allocation20_spill] sm:$0xff] %v10200_v20 }
 0x13e   :  { %8111 = vrot.lane.b32.xlu0 %v8110_v15, %s9481_s7  ;;  %v10203_v24 = vpop.permute.xlu1 %7891  ;;  %v8165_v15 = vpack.i.bf16 %v356_v12, %v355_v11  ;;  %v8195_v11 = vpack.i.bf16 %v368_v6, %v367_v3  ;;  %v365_v12 = vld [vmem:[#allocation2 + $0x1a7] sm:$0xff]  ;;  %v376_v3 = vld [vmem:[#allocation2 + $0x28f] sm:$0xff] }
 0x13f   :  { %13423 = vst [vmem:[#allocation21_spill] sm:$0xff] %v10203_v24 }
 0x140   :  { %v10205_v29 = vpop.permute.xlu0 %7901 }
 0x141   :  { %13424 = vst [vmem:[#allocation22_spill] sm:$0xff] %v10205_v29 }
 0x142   :  { %8121 = vrot.lane.b32.xlu2 %v8120_v25, %s9481_s7  ;;  %v357_v25 = vld [vmem:[#allocation2 + $0x127] sm:$0xff] }
 0x143   :  { %v8170_v27 = vpack.i.bf16 %v358_v26, %v357_v25  ;;  %v370_v25 = vld [vmem:[#allocation2 + $0x1ef] sm:$0xff] }
 0x144   :  { %8116 = vrot.lane.b32.xlu1 %v8115_v30, %s9481_s7  ;;  %v10209_v33 = vpop.permute.xlu2 %7956 }
 0x145   :  { %13425 = vst [vmem:[#allocation23_spill] sm:$0xff] %v10209_v33  ;;  %v793_v33 = vld [vmem:[#allocation2 + $0x90] sm:$0xff] }
 0x146   :  { %8126 = vrot.lane.b32.xlu0 %v8125_v32, %s9481_s7  ;;  %v10216_v38 = vpop.permute.xlu1 %7906  ;;  %v361_v32 = vld [vmem:[#allocation2 + $0x167] sm:$0xff] }
 0x147   :  { %13426 = vst [vmem:[#allocation24_spill] sm:$0xff] %v10216_v38 }
 0x148   :  { %v10226_v43 = vpop.permute.xlu0 %7916 }
 0x149   :  { %13427 = vst [vmem:[#allocation25_spill] sm:$0xff] %v10226_v43  ;;  %v731_v43 = vld [vmem:[#allocation2 + $0xaf] sm:$0xff] }
 0x14a   :  { %8136 = vrot.lane.b32.xlu2 %v10220_v39, %s9482_s19 }
 0x14c   :  { %8131 = vrot.lane.b32.xlu1 %v8130_v45, %s9482_s19  ;;  %v10242_v53 = vpop.permute.xlu2 %7971  ;;  %v362_v45 = vld [vmem:[#allocation2 + $0x16f] sm:$0xff] }
 0x14d   :  { %v8180_v47 = vpack.i.bf16 %v362_v45, %v361_v32  ;;  %v374_v45 = vld [vmem:[#allocation2 + $0x26f] sm:$0xff] }
 0x14e   :  { %8141 = vrot.lane.b32.xlu0 %v10232_v50, %s9482_s19  ;;  %v10247_v59 = vpop.permute.xlu1 %7921 }
 0x14f   :  { %13428 = vst [vmem:[#allocation26_spill] sm:$0xff] %v10247_v59  ;;  %v862_v59 = vld [vmem:[#allocation2 + $0xe9] sm:$0xff] }
 0x150   :  { %v10249_v1 = vpop.permute.xlu0 %7931 }
 0x151   :  { %13429 = vst [vmem:[#allocation27_spill] sm:$0xff] %v10249_v1  ;;  %v857_v1 = vld [vmem:[#allocation2 + $0x91] sm:$0xff] }
 0x152   :  { %8151 = vrot.lane.b32.xlu2 %v8150_v60, %s9482_s19  ;;  %v363_v60 = vld [vmem:[#allocation2 + $0x187] sm:$0xff] }
 0x153   :  { %v8185_v63 = vpack.i.bf16 %v364_v61, %v363_v60 }
 0x154   :  { %8146 = vrot.lane.b32.xlu1 %v8145_v2, %s9482_s19  ;;  %v10253_v10 = vpop.permute.xlu2 %7986 }
 0x156   :  { %8156 = vrot.lane.b32.xlu0 %v8155_v7, %s9482_s19  ;;  %v10256_v14 = vpop.permute.xlu1 %7936 }
 0x157   :  { %13430 = vst [vmem:[#allocation28_spill] sm:$0xff] %v10256_v14  ;;  %v792_v14 = vld [vmem:[#allocation2 + $0x88] sm:$0xff] }
 0x158   :  { %v10258_v21 = vpop.permute.xlu0 %7946 }
 0x159   :  { %13431 = vst [vmem:[#allocation29_spill] sm:$0xff] %v10258_v21 }
 0x15a   :  { %8166 = vrot.lane.b32.xlu2 %v8165_v15, %s9482_s19  ;;  %v366_v15 = vld [vmem:[#allocation2 + $0x1af] sm:$0xff] }
 0x15b   :  { %v8190_v18 = vpack.i.bf16 %v366_v15, %v365_v12  ;;  %v379_v12 = vld [vmem:[#allocation2 + $0x2c7] sm:$0xff]  ;;  %v380_v15 = vld [vmem:[#allocation2 + $0x2cf] sm:$0xff] }
 0x15c   :  { %8161 = vrot.lane.b32.xlu1 %v8160_v22, %s9482_s19  ;;  %v10262_v30 = vpop.permute.xlu2 %8001  ;;  %v369_v22 = vld [vmem:[#allocation2 + $0x1e7] sm:$0xff] }
 0x15d   :  { %v8200_v26 = vpack.i.bf16 %v370_v25, %v369_v22  ;;  %v8225_v22 = vpack.i.bf16 %v380_v15, %v379_v12  ;;  %v377_v25 = vld [vmem:[#allocation2 + $0x2a7] sm:$0xff] }
 0x15e   :  { %8171 = vrot.lane.b32.xlu0 %v8170_v27, %s9482_s19  ;;  %v10265_v46 = vpop.permute.xlu1 %7951  ;;  %v373_v27 = vld [vmem:[#allocation2 + $0x267] sm:$0xff] }
 0x15f   :  { %13432 = vst [vmem:[#allocation30_spill] sm:$0xff] %v10265_v46  ;;  %v856_v46 = vld [vmem:[#allocation2 + $0x89] sm:$0xff] }
 0x160   :  { %v10267_v55 = vpop.permute.xlu0 %7961 }
 0x161   :  { %13433 = vst [vmem:[#allocation31_spill] sm:$0xff] %v10267_v55 }
 0x162   :  { %8181 = vrot.lane.b32.xlu2 %v8180_v47, %s9482_s19  ;;  %v561_v47 = vld [vmem:[#allocation2 + $0x207] sm:$0xff] }
 0x163   :  { %v8205_v61 = vpack.i.bf16 %v562_v51, %v561_v47  ;;  %v385_v47 = vld [vmem:[#allocation2 + $0x327] sm:$0xff] }
 0x164   :  { %8176 = vrot.lane.b32.xlu1 %v8175_v56, %s9482_s19  ;;  %v10271_v2 = vpop.permute.xlu2 %8016  ;;  %v8210_v56 = vpack.i.bf16 %v374_v45, %v373_v27  ;;  %v381_v51 = vld [vmem:[#allocation2 + $0x2e7] sm:$0xff] }
 0x166   :  { %8186 = vrot.lane.b32.xlu0 %v8185_v63, %s9482_s19  ;;  %v10274_v7 = vpop.permute.xlu1 %7966  ;;  %v375_v63 = vld [vmem:[#allocation2 + $0x287] sm:$0xff] }
 0x167   :  { %13434 = vst [vmem:[#allocation32_spill] sm:$0xff] %v10274_v7  ;;  %v8215_v6 = vpack.i.bf16 %v376_v3, %v375_v63  ;;  %v595_v63 = vld [vmem:[#allocation2 + $0x28] sm:$0xff]  ;;  %v596_v3 = vld [vmem:[#allocation2 + $0x30] sm:$0xff] }
 0x168   :  { %v10276_v17 = vpop.permute.xlu0 %7976  ;;  %v8235_v15 = vpack.i.bf16 %v596_v3, %v595_v63 }
 0x16a   :  { %8196 = vrot.lane.b32.xlu2 %v8195_v11, %s9482_s19 }
 0x16c   :  { %8191 = vrot.lane.b32.xlu1 %v8190_v18, %s9482_s19  ;;  %v10280_v32 = vpop.permute.xlu2 %8031 }
 0x16e   :  { %8201 = vrot.lane.b32.xlu0 %v8200_v26, %s9482_s19  ;;  %v10283_v52 = vpop.permute.xlu1 %7981  ;;  %v378_v26 = vld [vmem:[#allocation2 + $0x2af] sm:$0xff] }
 0x16f   :  { %v8220_v45 = vpack.i.bf16 %v378_v26, %v377_v25  ;;  %v852_v25 = vld [vmem:[#allocation2 + $0x49] sm:$0xff] }
 0x170   :  { %v10285_v60 = vpop.permute.xlu0 %7991 }
 0x172   :  { %8211 = vrot.lane.b32.xlu2 %v8210_v56, %s9482_s19  ;;  %v8230_v56 = vpack.i.bf16 %v385_v47, %v381_v51  ;;  %v789_v47 = vld [vmem:[#allocation2 + $0x50] sm:$0xff] }
 0x174   :  { %8206 = vrot.lane.b32.xlu1 %v8205_v61, %s9482_s19  ;;  %v10289_v11 = vpop.permute.xlu2 %8046 }
 0x175   :  { %13435 = vst [vmem:[#allocation33_spill] sm:$0xff] %v10289_v11 }
 0x176   :  { %8216 = vrot.lane.b32.xlu0 %v8215_v6, %s9482_s19  ;;  %v10292_v18 = vpop.permute.xlu1 %7996 }
 0x178   :  { %v10294_v27 = vpop.permute.xlu0 %8006 }
 0x17a   :  { %8226 = vrot.lane.b32.xlu2 %v8225_v22, %s9482_s19  ;;  %v853_v22 = vld [vmem:[#allocation2 + $0x51] sm:$0xff] }
 0x17c   :  { %8221 = vrot.lane.b32.xlu1 %v8220_v45, %s9482_s19  ;;  %v10298_v61 = vpop.permute.xlu2 %8061  ;;  %v788_v45 = vld [vmem:[#allocation2 + $0x48] sm:$0xff] }
 0x17d   :  { %13436 = vst [vmem:[#allocation34_spill] sm:$0xff] %v10298_v61  ;;  %v8250_v3 = vpack.i.bf16 %v789_v47, %v788_v45  ;;  %v854_v45 = vld [vmem:[#allocation2 + $0x69] sm:$0xff]  ;;  %v855_v47 = vld [vmem:[#allocation2 + $0x71] sm:$0xff] }
 0x17e   :  { %8231 = vrot.lane.b32.xlu0 %v8230_v56, %s9482_s19  ;;  %v10301_v6 = vpop.permute.xlu1 %8011  ;;  %v8255_v56 = vpack.i.bf16 %v853_v22, %v852_v25  ;;  %v8280_v20 = vpack.i.bf16 %v855_v47, %v854_v45 }
 0x180   :  { %v10303_v12 = vpop.permute.xlu0 %8021 }
 0x182   :  { %8241 = vrot.lane.b32.xlu2 %v10131_v36, %s9483_s24 }
 0x184   :  { %8236 = vrot.lane.b32.xlu1 %v8235_v15, %s9484_s25  ;;  %v10308_v26 = vpop.permute.xlu2 %8076 }
 0x185   :  { %13437 = vst [vmem:[#allocation35_spill] sm:$0xff] %v10308_v26 }
 0x186   :  { %8246 = vrot.lane.b32.xlu0 %v10220_v39, %s9485_s26  ;;  %v10312_v51 = vpop.permute.xlu1 %8026  ;;  %v791_v39 = vld [vmem:[#allocation2 + $0x70] sm:$0xff] }
 0x187   :  { %v8275_v25 = vpack.i.bf16 %v791_v39, %v790_v0 }
 0x188   :  { %v10314_v63 = vpop.permute.xlu0 %8036 }
 0x189   :  { %13438 = vst [vmem:[#allocation36_spill] sm:$0xff] %v10314_v63  ;;  %v743_v63 = vld [vmem:[#allocation2 + $0x16f] sm:$0xff] }
 0x18a   :  { %8256 = vrot.lane.b32.xlu2 %v8255_v56, %s9486_s27 }
 0x18c   :  { %8251 = vrot.lane.b32.xlu1 %v8250_v3, %s9487_s28  ;;  %v10318_v36 = vpop.permute.xlu2 %8091 }
 0x18d   :  { %13439 = vst [vmem:[#allocation37_spill] sm:$0xff] %v10318_v36  ;;  %v8300_v36 = vpack.i.bf16 %v793_v33, %v792_v14  ;;  %v858_v14 = vld [vmem:[#allocation2 + $0xa9] sm:$0xff] }
 0x18e   :  { %8261 = vrot.lane.b32.xlu0 %v8250_v3, %s9484_s25  ;;  %v10321_v15 = vpop.permute.xlu1 %8041 }
 0x18f   :  { %13440 = vst [vmem:[#allocation38_spill] sm:$0xff] %v10321_v15 }
 0x190   :  { %v10323_v7 = vpop.permute.xlu0 %8051 }
 0x191   :  { %13441 = vst [vmem:[#allocation39_spill] sm:$0xff] %v10323_v7 }
 0x192   :  { %8271 = vrot.lane.b32.xlu2 %v10232_v50, %s9485_s26  ;;  %v728_v50 = vld [vmem:[#allocation2 + $0x87] sm:$0xff] }
 0x194   :  { %8266 = vrot.lane.b32.xlu1 %v8255_v56, %s9483_s24  ;;  %v10328_v22 = vpop.permute.xlu2 %8106  ;;  %v729_v56 = vld [vmem:[#allocation2 + $0x8f] sm:$0xff] }
 0x195   :  { %13442 = vst [vmem:[#allocation40_spill] sm:$0xff] %v10328_v22  ;;  %v8295_v45 = vpack.i.bf16 %v729_v56, %v728_v50  ;;  %v859_v50 = vld [vmem:[#allocation2 + $0xb1] sm:$0xff] }
 0x196   :  { %8276 = vrot.lane.b32.xlu0 %v8275_v25, %s9487_s28  ;;  %v10331_v55 = vpop.permute.xlu1 %8056  ;;  %v795_v56 = vld [vmem:[#allocation2 + $0xb0] sm:$0xff] }
 0x197   :  { %13443 = vst [vmem:[#allocation41_spill] sm:$0xff] %v10331_v55  ;;  %v869_v55 = vld [vmem:[#allocation2 + $0x151] sm:$0xff] }
 0x198   :  { %v10333_v3 = vpop.permute.xlu0 %8066 }
 0x199   :  { %13444 = vst [vmem:[#allocation42_spill] sm:$0xff] %v10333_v3 }
 0x19a   :  { %8286 = vrot.lane.b32.xlu2 %v8275_v25, %s9484_s25  ;;  %v8305_v25 = vpack.i.bf16 %v857_v1, %v856_v46  ;;  %v794_v46 = vld [vmem:[#allocation2 + $0xa8] sm:$0xff] }
 0x19b   :  { %v8325_v4 = vpack.i.bf16 %v795_v56, %v794_v46  ;;  %v860_v46 = vld [vmem:[#allocation2 + $0xc9] sm:$0xff]  ;;  %v861_v56 = vld [vmem:[#allocation2 + $0xd1] sm:$0xff] }
 0x19c   :  { %8281 = vrot.lane.b32.xlu1 %v8280_v20, %s9486_s27  ;;  %v10337_v0 = vpop.permute.xlu2 %8121 }
 0x19d   :  { %13445 = vst [vmem:[#allocation43_spill] sm:$0xff] %v10337_v0 }
 0x19e   :  { %8291 = vrot.lane.b32.xlu0 %v8280_v20, %s9483_s24  ;;  %v10340_v39 = vpop.permute.xlu1 %8071  ;;  %v730_v20 = vld [vmem:[#allocation2 + $0xa7] sm:$0xff] }
 0x19f   :  { %13446 = vst [vmem:[#allocation44_spill] sm:$0xff] %v10340_v39  ;;  %v8320_v33 = vpack.i.bf16 %v731_v43, %v730_v20  ;;  %v733_v43 = vld [vmem:[#allocation2 + $0xcf] sm:$0xff] }
 0x1a0   :  { %v10342_v26 = vpop.permute.xlu0 %8081  ;;  %v863_v39 = vld [vmem:[#allocation2 + $0xf1] sm:$0xff] }
 0x1a1   :  { %13447 = vst [vmem:[#allocation45_spill] sm:$0xff] %v10342_v26  ;;  %v797_v26 = vld [vmem:[#allocation2 + $0xd0] sm:$0xff] }
 0x1a2   :  { %8301 = vrot.lane.b32.xlu2 %v8300_v36, %s9487_s28 }
 0x1a4   :  { %8296 = vrot.lane.b32.xlu1 %v8295_v45, %s9485_s26  ;;  %v10346_v47 = vpop.permute.xlu2 %8136 }
 0x1a6   :  { %8306 = vrot.lane.b32.xlu0 %v8305_v25, %s9486_s27  ;;  %v10349_v0 = vpop.permute.xlu1 %8086 }
 0x1a7   :  { %13448 = vst [vmem:[#allocation46_spill] sm:$0xff] %v10349_v0  ;;  %v8330_v0 = vpack.i.bf16 %v859_v50, %v858_v14 }
 0x1a8   :  { %v10351_v22 = vpop.permute.xlu0 %8096 }
 0x1a9   :  { %13449 = vst [vmem:[#allocation47_spill] sm:$0xff] %v10351_v22 }
 0x1aa   :  { %8316 = vrot.lane.b32.xlu2 %v8305_v25, %s9483_s24  ;;  %v732_v25 = vld [vmem:[#allocation2 + $0xc7] sm:$0xff] }
 0x1ab   :  { %v8345_v22 = vpack.i.bf16 %v733_v43, %v732_v25  ;;  %v8355_v25 = vpack.i.bf16 %v861_v56, %v860_v46  ;;  %v798_v43 = vld [vmem:[#allocation2 + $0xe8] sm:$0xff] }
 0x1ac   :  { %8311 = vrot.lane.b32.xlu1 %v8300_v36, %s9484_s25  ;;  %v10355_v1 = vpop.permute.xlu2 %8151 }
 0x1ae   :  { %8321 = vrot.lane.b32.xlu0 %v8320_v33, %s9485_s26  ;;  %v10358_v45 = vpop.permute.xlu1 %8101  ;;  %v796_v33 = vld [vmem:[#allocation2 + $0xc8] sm:$0xff] }
 0x1af   :  { %13450 = vst [vmem:[#allocation48_spill] sm:$0xff] %v10358_v45  ;;  %v8350_v14 = vpack.i.bf16 %v797_v26, %v796_v33 }
 0x1b0   :  { %v10360_v21 = vpop.permute.xlu0 %8111 }
 0x1b1   :  { %13451 = vst [vmem:[#allocation49_spill] sm:$0xff] %v10360_v21 }
 0x1b2   :  { %8331 = vrot.lane.b32.xlu2 %v8330_v0, %s9486_s27 }
 0x1b4   :  { %8326 = vrot.lane.b32.xlu1 %v8325_v4, %s9487_s28  ;;  %v10364_v20 = vpop.permute.xlu2 %8166 }
 0x1b6   :  { %8336 = vrot.lane.b32.xlu0 %v8325_v4, %s9484_s25  ;;  %v10367_v36 = vpop.permute.xlu1 %8116 }
 0x1b7   :  { %13452 = vst [vmem:[#allocation50_spill] sm:$0xff] %v10367_v36 }
 0x1b8   :  { %v10369_v45 = vpop.permute.xlu0 %8126 }
 0x1b9   :  { %13453 = vst [vmem:[#allocation51_spill] sm:$0xff] %v10369_v45  ;;  %v799_v45 = vld [vmem:[#allocation2 + $0xf0] sm:$0xff] }
 0x1ba   :  { %8346 = vrot.lane.b32.xlu2 %v8345_v22, %s9485_s26  ;;  %v734_v22 = vld [vmem:[#allocation2 + $0xe7] sm:$0xff]  ;;  %v8375_v36 = vpack.i.bf16 %v799_v45, %v798_v43 }
 0x1bb   :  { %v864_v43 = vld [vmem:[#allocation2 + $0x109] sm:$0xff] }
 0x1bc   :  { %8341 = vrot.lane.b32.xlu1 %v8330_v0, %s9483_s24  ;;  %v10373_v50 = vpop.permute.xlu2 %8181  ;;  %v735_v0 = vld [vmem:[#allocation2 + $0xef] sm:$0xff] }
 0x1bd   :  { %v8370_v46 = vpack.i.bf16 %v735_v0, %v734_v22  ;;  %v865_v22 = vld [vmem:[#allocation2 + $0x111] sm:$0xff] }
 0x1be   :  { %8351 = vrot.lane.b32.xlu0 %v8350_v14, %s9487_s28  ;;  %v10376_v21 = vpop.permute.xlu1 %8131  ;;  %v801_v0 = vld [vmem:[#allocation2 + $0x110] sm:$0xff]  ;;  %v8405_v29 = vpack.i.bf16 %v865_v22, %v864_v43  ;;  %v802_v22 = vld [vmem:[#allocation2 + $0x128] sm:$0xff] }
 0x1c0   :  { %v10378_v4 = vpop.permute.xlu0 %8141 }
 0x1c2   :  { %8361 = vrot.lane.b32.xlu2 %v8350_v14, %s9484_s25  ;;  %v8380_v14 = vpack.i.bf16 %v863_v39, %v862_v59  ;;  %v800_v39 = vld [vmem:[#allocation2 + $0x108] sm:$0xff] }
 0x1c4   :  { %8356 = vrot.lane.b32.xlu1 %v8355_v25, %s9486_s27  ;;  %v10382_v26 = vpop.permute.xlu2 %8196 }
 0x1c5   :  { %13454 = vst [vmem:[#allocation52_spill] sm:$0xff] %v10382_v26  ;;  %v742_v26 = vld [vmem:[#allocation2 + $0x167] sm:$0xff] }
 0x1c6   :  { %8366 = vrot.lane.b32.xlu0 %v8355_v25, %s9483_s24  ;;  %v10385_v33 = vpop.permute.xlu1 %8146  ;;  %v736_v25 = vld [vmem:[#allocation2 + $0x107] sm:$0xff] }
 0x1c7   :  { %v8395_v45 = vpack.i.bf16 %v737_v54, %v736_v25  ;;  %v8400_v54 = vpack.i.bf16 %v801_v0, %v800_v39  ;;  %v803_v39 = vld [vmem:[#allocation2 + $0x130] sm:$0xff] }
 0x1c8   :  { %v10387_v7 = vpop.permute.xlu0 %8156 }
 0x1ca   :  { %8376 = vrot.lane.b32.xlu2 %v8375_v36, %s9487_s28 }
 0x1cc   :  { %8371 = vrot.lane.b32.xlu1 %v8370_v46, %s9485_s26  ;;  %v10391_v56 = vpop.permute.xlu2 %8211  ;;  %v3519_v46 = vld [vmem:[%s13354_s1 + $0x10] sm:$0x3] }
 0x1cd   :  { %13455 = vst [vmem:[#allocation53_spill] sm:$0xff] %v10391_v56  ;;  %v3529_v3 = vunpack.c.l.b16 %v3519_v46  ;;  %v7655_v46 = vld [vmem:[%s13354_s1] sm:$0xff] }
 0x1ce   :  { %8381 = vrot.lane.b32.xlu0 %v8380_v14, %s9486_s27  ;;  %v10394_v24 = vpop.permute.xlu1 %8161 }
 0x1cf   :  { %v3532_v25 = vpack.c.b16 %v3529_v3, %v3529_v3 }
 0x1d0   :  { %v10396_v61 = vpop.permute.xlu0 %8171 }
 0x1d1   :  { %v3634_v38 = vsel %vm3632_vm1, %v3532_v25, 0  ;;  %v8425_v25 = vpack.i.bf16 %v803_v39, %v802_v22  ;;  %v804_v22 = vld [vmem:[#allocation2 + $0x148] sm:$0xff]  ;;  %v805_v39 = vld [vmem:[#allocation2 + $0x150] sm:$0xff] }
 0x1d2   :  { %8391 = vrot.lane.b32.xlu2 %v8380_v14, %s9483_s24  ;;  %3641 = vmatpush.bf16.msra.mxu0 %v3634_v38 }
 0x1d3   :  { %7791 = vmatpush.bf16.msra.mxu1 %v3634_v38  ;;  %7792 = vmatpush.bf16.msra.mxu3 %v3634_v38  ;;  %v13458_v38 = vmov 0.0  }
 0x1d4   :  { %8386 = vrot.lane.b32.xlu1 %v8375_v36, %s9484_s25  ;;  %v10400_v59 = vpop.permute.xlu2 %8226  ;;  %v738_v36 = vld [vmem:[#allocation2 + $0x127] sm:$0xff]  ;;  %4244 = vst.msk [vmem:[#allocation4] sm:$0xff] %vm3418_vm2, %v13458_v38 }
 0x1d5   :  { %13456 = vst [vmem:[#allocation54_spill] sm:$0xff] %v10400_v59  ;;  %v739_v59 = vld [vmem:[#allocation2 + $0x12f] sm:$0xff] }
 0x1d6   :  { %8396 = vrot.lane.b32.xlu0 %v8395_v45, %s9485_s26  ;;  %v10406_v56 = vpop.permute.xlu1 %8176  ;;  %v7656_v45 = vld [vmem:[%s13354_s1 + $0x8] sm:$0xff]  ;;  %v8420_v43 = vpack.i.bf16 %v739_v59, %v738_v36  ;;  %4245 = vst.msk [vmem:[#allocation4 + $0x8] sm:$0xff] %vm3418_vm2, %v13458_v38  ;;  %v867_v36 = vld [vmem:[#allocation2 + $0x131] sm:$0xff] }
 0x1d7   :  { %3642 = vmatpush.bf16.msra.mxu0 %v7656_v45  ;;  %7793 = vmatpush.bf16.msra.mxu1 %v7656_v45  ;;  %4246 = vst.msk [vmem:[#allocation4 + $0x10] sm:$0xff] %vm3418_vm2, %v13458_v38 }
 0x1d8   :  { %v10408_v14 = vpop.permute.xlu0 %8186  ;;  %7794 = vmatpush.bf16.msra.mxu3 %v7656_v45  ;;  %4247 = vst.msk [vmem:[#allocation4 + $0x18] sm:$0xff] %vm3418_vm2, %v13458_v38 }
 0x1d9   :  { %4248 = vst.msk [vmem:[#allocation4 + $0x20] sm:$0xff] %vm3418_vm2, %v13458_v38 }
 0x1da   :  { %8406 = vrot.lane.b32.xlu2 %v8405_v29, %s9486_s27  ;;  %4249 = vst.msk [vmem:[#allocation4 + $0x28] sm:$0xff] %vm3418_vm2, %v13458_v38 }
 0x1db   :  { %3643 = vmatpush.bf16.msra.mxu0 %v7655_v46  ;;  %7795 = vmatpush.bf16.msra.mxu1 %v7655_v46  ;;  %4250 = vst.msk [vmem:[#allocation4 + $0x30] sm:$0xff] %vm3418_vm2, %v13458_v38 }
 0x1dc   :  { %8401 = vrot.lane.b32.xlu1 %v8400_v54, %s9487_s28  ;;  %v10412_v11 = vpop.permute.xlu2 %8241  ;;  %7796 = vmatpush.bf16.msra.mxu3 %v7655_v46  ;;  %4251 = vst.msk [vmem:[#allocation4 + $0x38] sm:$0xff] %vm3418_vm2, %v13458_v38 }
 0x1dd   :  { %4252 = vst.msk [vmem:[#allocation4 + $0x40] sm:$0xff] %vm3418_vm2, %v13458_v38 }
 0x1de   :  { %8411 = vrot.lane.b32.xlu0 %v8400_v54, %s9484_s25  ;;  %v10418_v3 = vpop.permute.xlu1 %8191  ;;  %v866_v54 = vld [vmem:[#allocation2 + $0x129] sm:$0xff]  ;;  %4253 = vst.msk [vmem:[#allocation4 + $0x48] sm:$0xff] %vm3418_vm2, %v13458_v38 }
 0x1df   :  { %4254 = vst.msk [vmem:[#allocation4 + $0x50] sm:$0xff] %vm3418_vm2, %v13458_v38 }
 0x1e0   :  { %v10420_v0 = vpop.permute.xlu0 %8201  ;;  %4255 = vst.msk [vmem:[#allocation4 + $0x58] sm:$0xff] %vm3418_vm2, %v13458_v38 }
 0x1e1   :  { %13457 = vst [vmem:[#allocation55_spill] sm:$0xff] %v10420_v0 }
 0x1e2   :  { %8421 = vrot.lane.b32.xlu2 %v8420_v43, %s9485_s26  ;;  %v8430_v43 = vpack.i.bf16 %v867_v36, %v866_v54  ;;  %v740_v54 = vld [vmem:[#allocation2 + $0x147] sm:$0xff]  ;;  %v741_v36 = vld [vmem:[#allocation2 + $0x14f] sm:$0xff]  ;;  %4256 = vst.msk [vmem:[#allocation4 + $0x60] sm:$0xff] %vm3418_vm2, %v13458_v38 }
 0x1e3   :  { %v8445_v15 = vpack.i.bf16 %v741_v36, %v740_v54  ;;  %4257 = vst.msk [vmem:[#allocation4 + $0x68] sm:$0xff] %vm3418_vm2, %v13458_v38  ;;  %v340_v54 = vld [vmem:[#allocation2 + $0xf] sm:$0xff]  ;;  %v7974_v36 = vunpack.i.h.bf16 %v10242_v53 }
 0x1e4   :  { %8416 = vrot.lane.b32.xlu1 %v8405_v29, %s9483_s24  ;;  %v10429_v59 = vpop.permute.xlu2 %8256  ;;  %4258 = vst.msk [vmem:[#allocation4 + $0x70] sm:$0xff] %vm3418_vm2, %v13458_v38 }
 0x1e5   :  { %4259 = vst.msk [vmem:[#allocation4 + $0x78] sm:$0xff] %vm3418_vm2, %v13458_v38 }
 0x1e6   :  { %8426 = vrot.lane.b32.xlu0 %v8425_v25, %s9487_s28  ;;  %v10436_v45 = vpop.permute.xlu1 %8206  ;;  %4260 = vst.msk [vmem:[#allocation4 + $0x80] sm:$0xff] %vm3418_vm2, %v13458_v38 }
 0x1e7   :  { %13459 = vst [vmem:[#allocation56_spill] sm:$0xff] %v10436_v45  ;;  %v8450_v45 = vpack.i.bf16 %v805_v39, %v804_v22  ;;  %v7814_v39 = vunpack.i.h.bf16 %v10151_v8 }
 0x1e8   :  { %v10442_v29 = vpop.permute.xlu0 %8216  ;;  %4261 = vst.msk [vmem:[#allocation4 + $0x88] sm:$0xff] %vm3418_vm2, %v13458_v38 }
 0x1e9   :  { %13460 = vst [vmem:[#allocation57_spill] sm:$0xff] %v10442_v29  ;;  %v868_v29 = vld [vmem:[#allocation2 + $0x149] sm:$0xff] }
 0x1ea   :  { %8436 = vrot.lane.b32.xlu2 %v8425_v25, %s9484_s25  ;;  %v8455_v22 = vpack.i.bf16 %v869_v55, %v868_v29  ;;  %v8134_v55 = vunpack.i.h.bf16 %v10376_v21  ;;  %4262 = vst.msk [vmem:[#allocation4 + $0x90] sm:$0xff] %vm3418_vm2, %v13458_v38 }
 0x1eb   :  { %4263 = vst.msk [vmem:[#allocation4 + $0x98] sm:$0xff] %vm3418_vm2, %v13458_v38 }
 0x1ec   :  { %8431 = vrot.lane.b32.xlu1 %v8430_v43, %s9486_s27  ;;  %v10454_v46 = vpop.permute.xlu2 %8271  ;;  %4264 = vst.msk [vmem:[#allocation4 + $0xa0] sm:$0xff] %vm3418_vm2, %v13458_v38 }
 0x1ed   :  { %4265 = vst.msk [vmem:[#allocation4 + $0xa8] sm:$0xff] %vm3418_vm2, %v13458_v38 }
 0x1ee   :  { %8441 = vrot.lane.b32.xlu0 %v8430_v43, %s9483_s24  ;;  %v10461_v25 = vpop.permute.xlu1 %8221  ;;  %v7813_v43 = vunpack.i.l.bf16 %v10151_v8  ;;  %v8133_v8 = vunpack.i.l.bf16 %v10376_v21  ;;  %4266 = vst.msk [vmem:[#allocation4 + $0xb0] sm:$0xff] %vm3418_vm2, %v13458_v38 }
 0x1ef   :  { %13461 = vst [vmem:[#allocation58_spill] sm:$0xff] %v10461_v25  ;;  %v339_v25 = vld [vmem:[#allocation2 + $0x7] sm:$0xff] }
 0x1f0   :  { %v10467_v0 = vpop.permute.xlu0 %8231  ;;  %v2964_v29 = vsel %vm129_vm0, %v339_v25, %v7813_v43  ;;  %4267 = vst.msk [vmem:[#allocation4 + $0xb8] sm:$0xff] %vm3418_vm2, %v13458_v38 }
 0x1f1   :  { %13462 = vst [vmem:[#allocation59_spill] sm:$0xff] %v10467_v0  ;;  %v7973_v0 = vunpack.i.l.bf16 %v10242_v53 }
 0x1f2   :  { %8451 = vrot.lane.b32.xlu2 %v8450_v45, %s9487_s28  ;;  %4268 = vst.msk [vmem:[#allocation4 + $0xc0] sm:$0xff] %vm3418_vm2, %v13458_v38 }
 0x1f3   :  { %v3029_v25 = vsel %vm3028_vm3, %v2964_v29, %v7973_v0  ;;  %v8470_v29 = vpack.i.bf16 %v743_v63, %v742_v26  ;;  %4269 = vst.msk [vmem:[#allocation4 + $0xc8] sm:$0xff] %vm3418_vm2, %v13458_v38  ;;  %v807_v63 = vld [vmem:[#allocation2 + $0x170] sm:$0xff]  ;;  %v8259_v26 = vunpack.i.h.bf16 %v10429_v59 }
 0x1f4   :  { %8446 = vrot.lane.b32.xlu1 %v8445_v15, %s9485_s26  ;;  %v10483_v13 = vpop.permute.xlu2 %8286  ;;  %v2965_v15 = vsel %vm129_vm0, %v340_v54, %v7814_v39  ;;  %v3094_v39 = vsel %vm3093_vm5, %v3029_v25, %v8133_v8  ;;  %v8244_v54 = vunpack.i.h.bf16 %v10412_v11  ;;  %v871_v8 = vld [vmem:[#allocation2 + $0x171] sm:$0xff]  ;;  %4270 = vst.msk [vmem:[#allocation4 + $0xd0] sm:$0xff] %vm3418_vm2, %v13458_v38 }
 0x1f5   :  { %v3030_v21 = vsel %vm3028_vm3, %v2965_v15, %v7974_v36  ;;  %4271 = vst.msk [vmem:[#allocation4 + $0xd8] sm:$0xff] %vm3418_vm2, %v13458_v38 }
 0x1f6   :  { %8456 = vrot.lane.b32.xlu0 %v8455_v22, %s9486_s27  ;;  %v8237_v53 = vpop.permute.xlu1 %8236  ;;  %v3095_v9 = vsel %vm3093_vm5, %v3030_v21, %v8134_v55  ;;  %v870_v55 = vld [vmem:[#allocation2 + $0x169] sm:$0xff]  ;;  %4272 = vst.msk [vmem:[#allocation4 + $0xe0] sm:$0xff] %vm3418_vm2, %v13458_v38 }
 0x1f7   :  { %v8239_v41 = vunpack.i.h.bf16 %v8237_v53  ;;  %v8238_v28 = vunpack.i.l.bf16 %v8237_v53  ;;  %v8243_v53 = vunpack.i.l.bf16 %v10412_v11  ;;  %v10527_v25 = vpack.i.bf16 %v871_v8, %v870_v55  ;;  %4273 = vst.msk [vmem:[#allocation4 + $0xe8] sm:$0xff] %vm3418_vm2, %v13458_v38 }
 0x1f8   :  { %v8247_v43 = vpop.permute.xlu0 %8246  ;;  %4274 = vst.msk [vmem:[#allocation4 + $0xf0] sm:$0xff] %vm3418_vm2, %v13458_v38  ;;  %v7818_v8 = vunpack.i.l.bf16 %v10160_v23 }
 0x1f9   :  { %v3159_v36 = vsel %vm3158_vm4, %v3094_v39, %v8238_v28  ;;  %v3160_v0 = vsel %vm3158_vm4, %v3095_v9, %v8239_v41  ;;  %v8249_v11 = vunpack.i.h.bf16 %v8247_v43  ;;  %v8248_v15 = vunpack.i.l.bf16 %v8247_v43  ;;  %v806_v9 = vld [vmem:[#allocation2 + $0x168] sm:$0xff]  ;;  %4275 = vst.msk [vmem:[#allocation4 + $0xf8] sm:$0xff] %vm3418_vm2, %v13458_v38 }
 0x1fa   :  { %8466 = vrot.lane.b32.xlu2 %v8455_v22, %s9483_s24  ;;  %v3224_v28 = vsel %vm3223_vm6, %v3159_v36, %v8243_v53  ;;  %v3225_v41 = vsel %vm3223_vm6, %v3160_v0, %v8244_v54  ;;  %v8258_v22 = vunpack.i.l.bf16 %v10429_v59  ;;  %v8475_v59 = vpack.i.bf16 %v807_v63, %v806_v9  ;;  %4276 = vst.msk [vmem:[#allocation4 + $0x100] sm:$0xff] %vm3418_vm2, %v13458_v38  ;;  %v745_v63 = vld [vmem:[#allocation2 + $0x18f] sm:$0xff] }
 0x1fb   :  { %v3290_v54 = vsel %vm3288_vm7, %v3225_v41, %v8249_v11  ;;  %v3289_v53 = vsel %vm3288_vm7, %v3224_v28, %v8248_v15  ;;  %v7819_v0 = vunpack.i.h.bf16 %v10160_v23  ;;  %v7979_v28 = vunpack.i.h.bf16 %v10276_v17  ;;  %v744_v23 = vld [vmem:[#allocation2 + $0x187] sm:$0xff]  ;;  %4277 = vst.msk [vmem:[#allocation4 + $0x108] sm:$0xff] %vm3418_vm2, %v13458_v38 }
 0x1fc   :  { %8461 = vrot.lane.b32.xlu1 %v8450_v45, %s9484_s25  ;;  %v10516_v21 = vpop.permute.xlu2 %8301  ;;  %v7978_v41 = vunpack.i.l.bf16 %v10276_v17  ;;  %4278 = vst.msk [vmem:[#allocation4 + $0x110] sm:$0xff] %vm3418_vm2, %v13458_v38  ;;  %v2966_v17 = vsel %vm129_vm0, %v10222_v40, %v7818_v8  ;;  %v808_v40 = vld [vmem:[#allocation2 + $0x188] sm:$0xff]  ;;  %v809_v8 = vld [vmem:[#allocation2 + $0x190] sm:$0xff] }
 0x1fd   :  { %4279 = vst.msk [vmem:[#allocation4 + $0x118] sm:$0xff] %vm3418_vm2, %v13458_v38 }
 0x1fe   :  { %8471 = vrot.lane.b32.xlu0 %v8470_v29, %s9485_s26  ;;  %v8252_v45 = vpop.permute.xlu1 %8251  ;;  %4280 = vst.msk [vmem:[#allocation4 + $0x120] sm:$0xff] %vm3418_vm2, %v13458_v38 }
 0x1ff   :  { %v8254_v43 = vunpack.i.h.bf16 %v8252_v45  ;;  %v8253_v39 = vunpack.i.l.bf16 %v8252_v45  ;;  %v8139_v45 = vunpack.i.h.bf16 %v10346_v47  ;;  %4281 = vst.msk [vmem:[#allocation4 + $0x128] sm:$0xff] %vm3418_vm2, %v13458_v38 }
 0x200   :  { %v8262_v36 = vpop.permute.xlu0 %8261  ;;  %4282 = vst.msk [vmem:[#allocation4 + $0x130] sm:$0xff] %vm3418_vm2, %v13458_v38 }
 0x201   :  { %v3354_v29 = vsel %vm3353_vm8, %v3289_v53, %v8253_v39  ;;  %v3355_v55 = vsel %vm3353_vm8, %v3290_v54, %v8254_v43  ;;  %v8264_v43 = vunpack.i.h.bf16 %v8262_v36  ;;  %v8263_v39 = vunpack.i.l.bf16 %v8262_v36  ;;  %4283 = vst.msk [vmem:[#allocation4 + $0x138] sm:$0xff] %vm3418_vm2, %v13458_v38 }
 0x202   :  { %8481 = vrot.lane.b32.xlu2 %v10527_v25, %s9486_s27  ;;  %v3419_v11 = vsel %vm3418_vm2, %v3354_v29, %v8258_v22  ;;  %v3420_v15 = vsel %vm3418_vm2, %v3355_v55, %v8259_v26  ;;  %v8138_v22 = vunpack.i.l.bf16 %v10346_v47  ;;  %v2967_v47 = vsel %vm129_vm0, %v10224_v42, %v7819_v0  ;;  %4284 = vst.msk [vmem:[#allocation4 + $0x140] sm:$0xff] %vm3418_vm2, %v13458_v38 }
 0x203   :  { %v3483_v9 = vpack.c.bf16 %v3420_v15, %v3419_v11  ;;  %v8495_v53 = vpack.i.bf16 %v745_v63, %v744_v23  ;;  %v3031_v36 = vsel %vm3028_vm3, %v2966_v17, %v7978_v41  ;;  %v3032_v29 = vsel %vm3028_vm3, %v2967_v47, %v7979_v28  ;;  %4285 = vst.msk [vmem:[#allocation4 + $0x148] sm:$0xff] %vm3418_vm2, %v13458_v38  ;;  %v873_v17 = vld [vmem:[#allocation2 + $0x191] sm:$0xff] }
 0x204   :  { %8476 = vrot.lane.b32.xlu1 %v8475_v59, %s9487_s28  ;;  %v10558_v26 = vpop.permute.xlu2 %8316  ;;  %v3096_v42 = vsel %vm3093_vm5, %v3031_v36, %v8138_v22  ;;  %v8274_v15 = vunpack.i.h.bf16 %v10454_v46  ;;  %v8273_v41 = vunpack.i.l.bf16 %v10454_v46  ;;  %4286 = vst.msk [vmem:[#allocation4 + $0x150] sm:$0xff] %vm3418_vm2, %v13458_v38  ;;  %v7824_v36 = vunpack.i.h.bf16 %v10158_v19 }
 0x205   :  { %7077 = vmatmul.msk.bf16.vlgmr.msra.gmra.mxu0 %vm3535_vm9, %v3483_v9  ;;  %v3161_v28 = vsel %vm3158_vm4, %v3096_v42, %v8263_v39  ;;  %v872_v39 = vld [vmem:[#allocation2 + $0x189] sm:$0xff]  ;;  %4287 = vst.msk [vmem:[#allocation4 + $0x158] sm:$0xff] %vm3418_vm2, %v13458_v38 }
 0x206   :  { %8486 = vrot.lane.b32.xlu0 %v8475_v59, %s9484_s25  ;;  %v8267_v54 = vpop.permute.xlu1 %8266  ;;  %v3097_v59 = vsel %vm3093_vm5, %v3032_v29, %v8139_v45  ;;  %v8500_v45 = vpack.i.bf16 %v809_v8, %v808_v40  ;;  %4288 = vst.msk [vmem:[#allocation4 + $0x160] sm:$0xff] %vm3418_vm2, %v13458_v38  ;;  %v8505_v8 = vpack.i.bf16 %v873_v17, %v872_v39 }
 0x207   :  { %v8269_v55 = vunpack.i.h.bf16 %v8267_v54  ;;  %v8268_v11 = vunpack.i.l.bf16 %v8267_v54  ;;  %v3162_v9 = vsel %vm3158_vm4, %v3097_v59, %v8264_v43  ;;  %4289 = vst.msk [vmem:[#allocation4 + $0x168] sm:$0xff] %vm3418_vm2, %v13458_v38 }
 0x208   :  { %v8277_v0 = vpop.permute.xlu0 %8276  ;;  %4290 = vst.msk [vmem:[#allocation4 + $0x170] sm:$0xff] %vm3418_vm2, %v13458_v38 }
 0x209   :  { %v3226_v23 = vsel %vm3223_vm6, %v3161_v28, %v8268_v11  ;;  %v3227_v63 = vsel %vm3223_vm6, %v3162_v9, %v8269_v55  ;;  %v8279_v46 = vunpack.i.h.bf16 %v8277_v0  ;;  %v8278_v22 = vunpack.i.l.bf16 %v8277_v0  ;;  %4291 = vst.msk [vmem:[#allocation4 + $0x178] sm:$0xff] %vm3418_vm2, %v13458_v38 }
 0x20a   :  { %8496 = vrot.lane.b32.xlu2 %v8495_v53, %s9485_s26  ;;  %v3291_v47 = vsel %vm3288_vm7, %v3226_v23, %v8273_v41  ;;  %v3292_v54 = vsel %vm3288_vm7, %v3227_v63, %v8274_v15  ;;  %v7984_v11 = vunpack.i.h.bf16 %v10283_v52  ;;  %v7983_v0 = vunpack.i.l.bf16 %v10283_v52  ;;  %4292 = vst.msk [vmem:[#allocation4 + $0x180] sm:$0xff] %vm3418_vm2, %v13458_v38 }
 0x20b   :  { %v3356_v42 = vsel %vm3353_vm8, %v3291_v47, %v8278_v22  ;;  %v3357_v59 = vsel %vm3353_vm8, %v3292_v54, %v8279_v46  ;;  %v8143_v28 = vunpack.i.l.bf16 %v10378_v4  ;;  %v2969_v52 = vsel %vm129_vm0, %v10213_v37, %v7824_v36  ;;  %v810_v46 = vld [vmem:[#allocation2 + $0x1a8] sm:$0xff]  ;;  %v811_v22 = vld [vmem:[#allocation2 + $0x1b0] sm:$0xff]  ;;  %4293 = vst.msk [vmem:[#allocation4 + $0x188] sm:$0xff] %vm3418_vm2, %v13458_v38 }
 0x20c   :  { %8491 = vrot.lane.b32.xlu1 %v10527_v25, %s9483_s24  ;;  %v10595_v43 = vpop.permute.xlu2 %8331  ;;  %v7823_v25 = vunpack.i.l.bf16 %v10158_v19  ;;  %v8144_v19 = vunpack.i.h.bf16 %v10378_v4  ;;  %v8289_v23 = vunpack.i.h.bf16 %v10483_v13  ;;  %v8288_v63 = vunpack.i.l.bf16 %v10483_v13  ;;  %4294 = vst.msk [vmem:[#allocation4 + $0x190] sm:$0xff] %vm3418_vm2, %v13458_v38  ;;  %v747_v54 = vld [vmem:[#allocation2 + $0x1af] sm:$0xff] }
 0x20d   :  { %v3034_v39 = vsel %vm3028_vm3, %v2969_v52, %v7984_v11  ;;  %v8304_v36 = vunpack.i.h.bf16 %v10516_v21  ;;  %4295 = vst.msk [vmem:[#allocation4 + $0x198] sm:$0xff] %vm3418_vm2, %v13458_v38 }
 0x20e   :  { %8501 = vrot.lane.b32.xlu0 %v8500_v45, %s9487_s28  ;;  %v8282_v53 = vpop.permute.xlu1 %8281  ;;  %v2968_v4 = vsel %vm129_vm0, %v10211_v34, %v7823_v25  ;;  %v3099_v47 = vsel %vm3093_vm5, %v3034_v39, %v8144_v19  ;;  %v746_v34 = vld [vmem:[#allocation2 + $0x1a7] sm:$0xff]  ;;  %v8303_v25 = vunpack.i.l.bf16 %v10516_v21  ;;  %4296 = vst.msk [vmem:[#allocation4 + $0x1a0] sm:$0xff] %vm3418_vm2, %v13458_v38  ;;  %v875_v19 = vld [vmem:[#allocation2 + $0x1b1] sm:$0xff]  ;;  %v7828_v39 = vunpack.i.l.bf16 %v10167_v31 }
 0x20f   :  { %v8284_v29 = vunpack.i.h.bf16 %v8282_v53  ;;  %v8283_v55 = vunpack.i.l.bf16 %v8282_v53  ;;  %v3033_v13 = vsel %vm3028_vm3, %v2968_v4, %v7983_v0  ;;  %v874_v0 = vld [vmem:[#allocation2 + $0x1a9] sm:$0xff]  ;;  %4297 = vst.msk [vmem:[#allocation4 + $0x1a8] sm:$0xff] %vm3418_vm2, %v13458_v38  ;;  %v7829_v4 = vunpack.i.h.bf16 %v10167_v31 }
 0x210   :  { %v8292_v40 = vpop.permute.xlu0 %8291  ;;  %v3098_v53 = vsel %vm3093_vm5, %v3033_v13, %v8143_v28  ;;  %4298 = vst.msk [vmem:[#allocation4 + $0x1b0] sm:$0xff] %vm3418_vm2, %v13458_v38  ;;  %v7989_v13 = vunpack.i.h.bf16 %v10253_v10  ;;  %v8149_v31 = vunpack.i.h.bf16 %v10385_v33 }
 0x211   :  { %v3421_v15 = vsel %vm3418_vm2, %v3356_v42, %v8283_v55  ;;  %v3422_v41 = vsel %vm3418_vm2, %v3357_v59, %v8284_v29  ;;  %v8293_v17 = vunpack.i.l.bf16 %v8292_v40  ;;  %v8525_v55 = vpack.i.bf16 %v811_v22, %v810_v46  ;;  %4299 = vst.msk [vmem:[#allocation4 + $0x1b8] sm:$0xff] %vm3418_vm2, %v13458_v38 }
 0x212   :  { %8511 = vrot.lane.b32.xlu2 %v8500_v45, %s9484_s25  ;;  %v3484_v9 = vpack.c.bf16 %v3422_v41, %v3421_v15  ;;  %v8294_v45 = vunpack.i.h.bf16 %v8292_v40  ;;  %v3163_v11 = vsel %vm3158_vm4, %v3098_v53, %v8288_v63  ;;  %v3164_v40 = vsel %vm3158_vm4, %v3099_v47, %v8289_v23  ;;  %4300 = vst.msk [vmem:[#allocation4 + $0x1c0] sm:$0xff] %vm3418_vm2, %v13458_v38 }
 0x213   :  { %v3228_v21 = vsel %vm3223_vm6, %v3163_v11, %v8293_v17  ;;  %v8520_v41 = vpack.i.bf16 %v747_v54, %v746_v34  ;;  %v8530_v63 = vpack.i.bf16 %v875_v19, %v874_v0  ;;  %v7988_v47 = vunpack.i.l.bf16 %v10253_v10  ;;  %4301 = vst.msk [vmem:[#allocation4 + $0x1c8] sm:$0xff] %vm3418_vm2, %v13458_v38  ;;  %v749_v0 = vld [vmem:[#allocation2 + $0x1cf] sm:$0xff] }
 0x214   :  { %8506 = vrot.lane.b32.xlu1 %v8505_v8, %s9486_s27  ;;  %v10635_v37 = vpop.permute.xlu2 %8346  ;;  %v8148_v53 = vunpack.i.l.bf16 %v10385_v33  ;;  %4302 = vst.msk [vmem:[#allocation4 + $0x1d0] sm:$0xff] %vm3418_vm2, %v13458_v38 }
 0x215   :  { %7078 = vmatmul.msk.bf16.gmra.mxu0 %vm3535_vm9, %v3484_v9  ;;  %4303 = vst.msk [vmem:[#allocation4 + $0x1d8] sm:$0xff] %vm3418_vm2, %v13458_v38 }
 0x216   :  { %8516 = vrot.lane.b32.xlu0 %v8505_v8, %s9483_s24  ;;  %v8297_v29 = vpop.permute.xlu1 %8296  ;;  %v3229_v8 = vsel %vm3223_vm6, %v3164_v40, %v8294_v45  ;;  %5446 = vst.msk [vmem:[#allocation6] sm:$0xff] %vm4866_vm10, %v13458_v38 }
 0x217   :  { %v8299_v42 = vunpack.i.h.bf16 %v8297_v29  ;;  %v8298_v59 = vunpack.i.l.bf16 %v8297_v29  ;;  %v9378_v29 = vld [vmem:[#allocation2 + $0x67] sm:$0xff]  ;;  %5447 = vst.msk [vmem:[#allocation6 + $0x8] sm:$0xff] %vm4866_vm10, %v13458_v38 }
 0x218   :  { %v8307_v15 = vpop.permute.xlu0 %8306  ;;  %v2970_v11 = vsel %vm129_vm0, %v9378_v29, %v7828_v39  ;;  %5450 = vst.msk [vmem:[#allocation6 + $0x18] sm:$0xff] %vm4866_vm10, %v13458_v38 }
 0x219   :  { %v3293_v28 = vsel %vm3288_vm7, %v3228_v21, %v8298_v59  ;;  %v3294_v9 = vsel %vm3288_vm7, %v3229_v8, %v8299_v42  ;;  %v8309_v52 = vunpack.i.h.bf16 %v8307_v15  ;;  %v8308_v23 = vunpack.i.l.bf16 %v8307_v15  ;;  %v748_v59 = vld [vmem:[#allocation2 + $0x1c7] sm:$0xff]  ;;  %5451 = vst.msk [vmem:[#allocation6 + $0x20] sm:$0xff] %vm4866_vm10, %v13458_v38 }
 0x21a   :  { %8526 = vrot.lane.b32.xlu2 %v8525_v55, %s9487_s28  ;;  %v3358_v46 = vsel %vm3353_vm8, %v3293_v28, %v8303_v25  ;;  %v3359_v22 = vsel %vm3353_vm8, %v3294_v9, %v8304_v36  ;;  %v9377_v36 = vld [vmem:[#allocation2 + $0x6f] sm:$0xff]  ;;  %v3035_v33 = vsel %vm3028_vm3, %v2970_v11, %v7988_v47  ;;  %v8318_v28 = vunpack.i.l.bf16 %v10558_v26  ;;  %5453 = vst.msk [vmem:[#allocation6 + $0x30] sm:$0xff] %vm4866_vm10, %v13458_v38 }
 0x21b   :  { %v3423_v45 = vsel %vm3418_vm2, %v3358_v46, %v8308_v23  ;;  %v3424_v17 = vsel %vm3418_vm2, %v3359_v22, %v8309_v52  ;;  %v2971_v25 = vsel %vm129_vm0, %v9377_v36, %v7829_v4  ;;  %v3100_v15 = vsel %vm3093_vm5, %v3035_v33, %v8148_v53  ;;  %v876_v46 = vld [vmem:[#allocation2 + $0x1c9] sm:$0xff]  ;;  %v877_v22 = vld [vmem:[#allocation2 + $0x1d1] sm:$0xff]  ;;  %5454 = vst.msk [vmem:[#allocation6 + $0x38] sm:$0xff] %vm4866_vm10, %v13458_v38 }
 0x21c   :  { %8521 = vrot.lane.b32.xlu1 %v8520_v41, %s9485_s26  ;;  %v10676_v34 = vpop.permute.xlu2 %8361  ;;  %v3485_v54 = vpack.c.bf16 %v3424_v17, %v3423_v45  ;;  %v3036_v19 = vsel %vm3028_vm3, %v2971_v25, %v7989_v13  ;;  %v8319_v41 = vunpack.i.h.bf16 %v10558_v26  ;;  %v8545_v23 = vpack.i.bf16 %v749_v0, %v748_v59  ;;  %v812_v26 = vld [vmem:[#allocation2 + $0x1c8] sm:$0xff]  ;;  %v813_v47 = vld [vmem:[#allocation2 + $0x1d0] sm:$0xff]  ;;  %5456 = vst.msk [vmem:[#allocation6 + $0x48] sm:$0xff] %vm4866_vm10, %v13458_v38 }
 0x21d   :  { %v3101_v8 = vsel %vm3093_vm5, %v3036_v19, %v8149_v31  ;;  %v8334_v31 = vunpack.i.h.bf16 %v10595_v43  ;;  %v7834_v59 = vunpack.i.h.bf16 %v10138_v48  ;;  %v7994_v19 = vunpack.i.h.bf16 %v10285_v60  ;;  %5457 = vst.msk [vmem:[#allocation6 + $0x50] sm:$0xff] %vm4866_vm10, %v13458_v38 }
 0x21e   :  { %8531 = vrot.lane.b32.xlu0 %v8530_v63, %s9486_s27  ;;  %v8312_v10 = vpop.permute.xlu1 %8311  ;;  %5459 = vst.msk [vmem:[#allocation6 + $0x60] sm:$0xff] %vm4866_vm10, %v13458_v38 }
 0x21f   :  { %v8314_v40 = vunpack.i.h.bf16 %v8312_v10  ;;  %v8313_v42 = vunpack.i.l.bf16 %v8312_v10  ;;  %v8555_v10 = vpack.i.bf16 %v877_v22, %v876_v46  ;;  %v9379_v46 = vld [vmem:[#allocation2 + $0x87] sm:$0xff]  ;;  %5460 = vst.msk [vmem:[#allocation6 + $0x68] sm:$0xff] %vm4866_vm10, %v13458_v38 }
 0x220   :  { %v8322_v21 = vpop.permute.xlu0 %8321  ;;  %5462 = vst.msk [vmem:[#allocation6 + $0x78] sm:$0xff] %vm4866_vm10, %v13458_v38 }
 0x221   :  { %v3165_v9 = vsel %vm3158_vm4, %v3100_v15, %v8313_v42  ;;  %v3166_v52 = vsel %vm3158_vm4, %v3101_v8, %v8314_v40  ;;  %v8324_v4 = vunpack.i.h.bf16 %v8322_v21  ;;  %v8323_v39 = vunpack.i.l.bf16 %v8322_v21  ;;  %v750_v8 = vld [vmem:[#allocation2 + $0x1e7] sm:$0xff]  ;;  %v751_v15 = vld [vmem:[#allocation2 + $0x1ef] sm:$0xff]  ;;  %5463 = vst.msk [vmem:[#allocation6 + $0x80] sm:$0xff] %vm4866_vm10, %v13458_v38 }
 0x222   :  { %8541 = vrot.lane.b32.xlu2 %v8530_v63, %s9483_s24  ;;  %v3230_v17 = vsel %vm3223_vm6, %v3165_v9, %v8318_v28  ;;  %v3231_v13 = vsel %vm3223_vm6, %v3166_v52, %v8319_v41  ;;  %v8333_v63 = vunpack.i.l.bf16 %v10595_v43  ;;  %v8550_v40 = vpack.i.bf16 %v813_v47, %v812_v26  ;;  %5465 = vst.msk [vmem:[#allocation6 + $0x90] sm:$0xff] %vm4866_vm10, %v13458_v38 }
 0x223   :  { %v3296_v25 = vsel %vm3288_vm7, %v3231_v13, %v8324_v4  ;;  %v3295_v29 = vsel %vm3288_vm7, %v3230_v17, %v8323_v39  ;;  %v7833_v43 = vunpack.i.l.bf16 %v10138_v48  ;;  %v7993_v21 = vunpack.i.l.bf16 %v10285_v60  ;;  %v9380_v4 = vld [vmem:[#allocation2 + $0x8f] sm:$0xff]  ;;  %5466 = vst.msk [vmem:[#allocation6 + $0x98] sm:$0xff] %vm4866_vm10, %v13458_v38 }
 0x224   :  { %8536 = vrot.lane.b32.xlu1 %v8525_v55, %s9484_s25  ;;  %v10697_v45 = vpop.permute.xlu2 %8376  ;;  %v8154_v28 = vunpack.i.h.bf16 %v10355_v1  ;;  %v8153_v9 = vunpack.i.l.bf16 %v10355_v1  ;;  %v2973_v39 = vsel %vm129_vm0, %v9380_v4, %v7834_v59  ;;  %v8570_v17 = vpack.i.bf16 %v751_v15, %v750_v8  ;;  %5468 = vst.msk [vmem:[#allocation6 + $0xa8] sm:$0xff] %vm4866_vm10, %v13458_v38 }
 0x225   :  { %7079 = vmatmul.msk.bf16.gmra.mxu0 %vm3535_vm9, %v3485_v54  ;;  %v2972_v22 = vsel %vm129_vm0, %v9379_v46, %v7833_v43  ;;  %v3038_v13 = vsel %vm3028_vm3, %v2973_v39, %v7994_v19  ;;  %v879_v19 = vld [vmem:[#allocation2 + $0x1f1] sm:$0xff]  ;;  %v7998_v39 = vunpack.i.l.bf16 %v10292_v18  ;;  %5469 = vst.msk [vmem:[#allocation6 + $0xb0] sm:$0xff] %vm4866_vm10, %v13458_v38 }
 0x226   :  { %8546 = vrot.lane.b32.xlu0 %v8545_v23, %s9485_s26  ;;  %v8327_v53 = vpop.permute.xlu1 %8326  ;;  %v3037_v1 = vsel %vm3028_vm3, %v2972_v22, %v7993_v21  ;;  %5471 = vst.msk [vmem:[#allocation6 + $0xc0] sm:$0xff] %vm4866_vm10, %v13458_v38 }
 0x227   :  { %v8329_v36 = vunpack.i.h.bf16 %v8327_v53  ;;  %v8328_v55 = vunpack.i.l.bf16 %v8327_v53  ;;  %v3102_v53 = vsel %vm3093_vm5, %v3037_v1, %v8153_v9  ;;  %v7838_v9 = vunpack.i.l.bf16 %v10143_v58  ;;  %5472 = vst.msk [vmem:[#allocation6 + $0xc8] sm:$0xff] %vm4866_vm10, %v13458_v38 }
 0x228   :  { %v8337_v11 = vpop.permute.xlu0 %8336  ;;  %5474 = vst.msk [vmem:[#allocation6 + $0xd8] sm:$0xff] %vm4866_vm10, %v13458_v38 }
 0x229   :  { %v3360_v54 = vsel %vm3353_vm8, %v3295_v29, %v8328_v55  ;;  %v3361_v42 = vsel %vm3353_vm8, %v3296_v25, %v8329_v36  ;;  %v8339_v52 = vunpack.i.h.bf16 %v8337_v11  ;;  %v8338_v23 = vunpack.i.l.bf16 %v8337_v11  ;;  %5475 = vst.msk [vmem:[#allocation6 + $0xe0] sm:$0xff] %vm4866_vm10, %v13458_v38 }
 0x22a   :  { %8556 = vrot.lane.b32.xlu2 %v8555_v10, %s9486_s27  ;;  %v3425_v0 = vsel %vm3418_vm2, %v3360_v54, %v8333_v63  ;;  %v3426_v33 = vsel %vm3418_vm2, %v3361_v42, %v8334_v31  ;;  %v814_v31 = vld [vmem:[#allocation2 + $0x1e8] sm:$0xff]  ;;  %v815_v63 = vld [vmem:[#allocation2 + $0x1f0] sm:$0xff]  ;;  %v3103_v36 = vsel %vm3093_vm5, %v3038_v13, %v8154_v28  ;;  %v8349_v25 = vunpack.i.h.bf16 %v10635_v37  ;;  %5477 = vst.msk [vmem:[#allocation6 + $0xf0] sm:$0xff] %vm4866_vm10, %v13458_v38 }
 0x22b   :  { %v3486_v41 = vpack.c.bf16 %v3426_v33, %v3425_v0  ;;  %v8348_v29 = vunpack.i.l.bf16 %v10635_v37  ;;  %v3167_v11 = vsel %vm3158_vm4, %v3102_v53, %v8338_v23  ;;  %v8575_v59 = vpack.i.bf16 %v815_v63, %v814_v31  ;;  %v878_v37 = vld [vmem:[#allocation2 + $0x1e9] sm:$0xff]  ;;  %5478 = vst.msk [vmem:[#allocation6 + $0xf8] sm:$0xff] %vm4866_vm10, %v13458_v38 }
 0x22c   :  { %8551 = vrot.lane.b32.xlu1 %v8550_v40, %s9487_s28  ;;  %v10719_v48 = vpop.permute.xlu2 %8391  ;;  %v7839_v28 = vunpack.i.h.bf16 %v10143_v58  ;;  %v8580_v22 = vpack.i.bf16 %v879_v19, %v878_v37  ;;  %v8158_v58 = vunpack.i.l.bf16 %v10387_v7  ;;  %v8364_v31 = vunpack.i.h.bf16 %v10676_v34  ;;  %v816_v53 = vld [vmem:[#allocation2 + $0x208] sm:$0xff]  ;;  %5480 = vst.msk [vmem:[#allocation6 + $0x108] sm:$0xff] %vm4866_vm10, %v13458_v38 }
 0x22d   :  { %v8363_v63 = vunpack.i.l.bf16 %v10676_v34  ;;  %5481 = vst.msk [vmem:[#allocation6 + $0x110] sm:$0xff] %vm4866_vm10, %v13458_v38 }
 0x22e   :  { %8561 = vrot.lane.b32.xlu0 %v8550_v40, %s9484_s25  ;;  %v8342_v60 = vpop.permute.xlu1 %8341  ;;  %v3168_v40 = vsel %vm3158_vm4, %v3103_v36, %v8339_v52  ;;  %v9382_v36 = vld [vmem:[#allocation2 + $0xa7] sm:$0xff] }
 0x22f   :  { %v8344_v26 = vunpack.i.h.bf16 %v8342_v60  ;;  %v8343_v47 = vunpack.i.l.bf16 %v8342_v60  ;;  %v8159_v60 = vunpack.i.h.bf16 %v10387_v7 }
 0x230   :  { %v8352_v55 = vpop.permute.xlu0 %8351 }
 0x231   :  { %v3232_v54 = vsel %vm3223_vm6, %v3167_v11, %v8343_v47  ;;  %v3233_v42 = vsel %vm3223_vm6, %v3168_v40, %v8344_v26  ;;  %v8354_v43 = vunpack.i.h.bf16 %v8352_v55  ;;  %v8353_v0 = vunpack.i.l.bf16 %v8352_v55  ;;  %v9381_v26 = vld [vmem:[#allocation2 + $0xaf] sm:$0xff] }
 0x232   :  { %8571 = vrot.lane.b32.xlu2 %v8570_v17, %s9485_s26  ;;  %v3297_v21 = vsel %vm3288_vm7, %v3232_v54, %v8348_v29  ;;  %v3298_v8 = vsel %vm3288_vm7, %v3233_v42, %v8349_v25  ;;  %v2975_v47 = vsel %vm129_vm0, %v9381_v26, %v7839_v28  ;;  %v2974_v55 = vsel %vm129_vm0, %v9382_v36, %v7838_v9  ;;  %v752_v42 = vld [vmem:[#allocation2 + $0x207] sm:$0xff] }
 0x233   :  { %v3363_v4 = vsel %vm3353_vm8, %v3298_v8, %v8354_v43  ;;  %v3039_v40 = vsel %vm3028_vm3, %v2974_v55, %v7998_v39  ;;  %v8379_v43 = vunpack.i.h.bf16 %v10697_v45  ;;  %v880_v9 = vld [vmem:[#allocation2 + $0x209] sm:$0xff]  ;;  %v7843_v26 = vunpack.i.l.bf16 %v10169_v35 }
 0x234   :  { %8566 = vrot.lane.b32.xlu1 %v8555_v10, %s9483_s24  ;;  %v10736_v33 = vpop.permute.xlu2 %8406  ;;  %v7999_v10 = vunpack.i.h.bf16 %v10292_v18  ;;  %v817_v18 = vld [vmem:[#allocation2 + $0x210] sm:$0xff]  ;;  %v3104_v34 = vsel %vm3093_vm5, %v3039_v40, %v8158_v58  ;;  %v7844_v58 = vunpack.i.h.bf16 %v10169_v35  ;;  %v8164_v55 = vunpack.i.h.bf16 %v10394_v24 }
 0x235   :  { %7080 = vmatmul.msk.bf16.gmra.mxu0 %vm3535_vm9, %v3486_v41  ;;  %v3362_v41 = vsel %vm3353_vm8, %v3297_v21, %v8353_v0  ;;  %v8378_v0 = vunpack.i.l.bf16 %v10697_v45  ;;  %v8600_v19 = vpack.i.bf16 %v817_v18, %v816_v53  ;;  %v3169_v21 = vsel %vm3158_vm4, %v3104_v34, %v8363_v63  ;;  %v755_v34 = vld [vmem:[#allocation2 + $0x22f] sm:$0xff] }
 0x236   :  { %8576 = vrot.lane.b32.xlu0 %v8575_v59, %s9487_s28  ;;  %v8357_v15 = vpop.permute.xlu1 %8356  ;;  %v3040_v25 = vsel %vm3028_vm3, %v2975_v47, %v7999_v10  ;;  %v8004_v63 = vunpack.i.h.bf16 %v10262_v30  ;;  %v8003_v53 = vunpack.i.l.bf16 %v10262_v30  ;;  %v8163_v35 = vunpack.i.l.bf16 %v10394_v24  ;;  %v9384_v30 = vld [vmem:[#allocation2 + $0xc7] sm:$0xff] }
 0x237   :  { %v8359_v52 = vunpack.i.h.bf16 %v8357_v15  ;;  %v8358_v23 = vunpack.i.l.bf16 %v8357_v15  ;;  %v3105_v54 = vsel %vm3093_vm5, %v3040_v25, %v8159_v60  ;;  %v2976_v40 = vsel %vm129_vm0, %v9384_v30, %v7843_v26 }
 0x238   :  { %v8367_v46 = vpop.permute.xlu0 %8366  ;;  %v3170_v8 = vsel %vm3158_vm4, %v3105_v54, %v8364_v31  ;;  %v7848_v30 = vunpack.i.l.bf16 %v10176_v44 }
 0x239   :  { %v3427_v17 = vsel %vm3418_vm2, %v3362_v41, %v8358_v23  ;;  %v3428_v13 = vsel %vm3418_vm2, %v3363_v4, %v8359_v52  ;;  %v8369_v29 = vunpack.i.h.bf16 %v8367_v46  ;;  %v8368_v11 = vunpack.i.l.bf16 %v8367_v46  ;;  %v881_v52 = vld [vmem:[#allocation2 + $0x211] sm:$0xff] }
 0x23a   :  { %8586 = vrot.lane.b32.xlu2 %v8575_v59, %s9484_s25  ;;  %v3487_v1 = vpack.c.bf16 %v3428_v13, %v3427_v17  ;;  %v753_v59 = vld [vmem:[#allocation2 + $0x20f] sm:$0xff]  ;;  %v8605_v60 = vpack.i.bf16 %v881_v52, %v880_v9 }
 0x23b   :  { %v3234_v23 = vsel %vm3223_vm6, %v3169_v21, %v8368_v11  ;;  %v3235_v10 = vsel %vm3223_vm6, %v3170_v8, %v8369_v29  ;;  %v8595_v41 = vpack.i.bf16 %v753_v59, %v752_v42  ;;  %v9383_v29 = vld [vmem:[#allocation2 + $0xcf] sm:$0xff]  ;;  %v754_v59 = vld [vmem:[#allocation2 + $0x227] sm:$0xff]  ;;  %v8394_v21 = vunpack.i.h.bf16 %v10719_v48 }
 0x23c   :  { %8581 = vrot.lane.b32.xlu1 %v8580_v22, %s9486_s27  ;;  %v10759_v7 = vpop.permute.xlu2 %8421  ;;  %v2977_v11 = vsel %vm129_vm0, %v9383_v29, %v7844_v58  ;;  %v8393_v8 = vunpack.i.l.bf16 %v10719_v48  ;;  %v8620_v9 = vpack.i.bf16 %v755_v34, %v754_v59  ;;  %v882_v52 = vld [vmem:[#allocation2 + $0x229] sm:$0xff]  ;;  %v7849_v29 = vunpack.i.h.bf16 %v10176_v44 }
 0x23d   :  { %v818_v48 = vld [vmem:[#allocation2 + $0x228] sm:$0xff]  ;;  %v8009_v59 = vunpack.i.h.bf16 %v10294_v27  ;;  %v8008_v34 = vunpack.i.l.bf16 %v10294_v27  ;;  %v8169_v44 = vunpack.i.h.bf16 %v10364_v20 }
 0x23e   :  { %8591 = vrot.lane.b32.xlu0 %v8580_v22, %s9483_s24  ;;  %v8372_v37 = vpop.permute.xlu1 %8371  ;;  %v691_v27 = vld [vmem:[#allocation2 + $0x269] sm:$0xff] }
 0x23f   :  { %v8374_v15 = vunpack.i.h.bf16 %v8372_v37  ;;  %v8373_v28 = vunpack.i.l.bf16 %v8372_v37 }
 0x240   :  { %v8382_v46 = vpop.permute.xlu0 %8381 }
 0x241   :  { %v3299_v45 = vsel %vm3288_vm7, %v3234_v23, %v8373_v28  ;;  %v3300_v22 = vsel %vm3288_vm7, %v3235_v10, %v8374_v15  ;;  %v8384_v4 = vunpack.i.h.bf16 %v8382_v46  ;;  %v8383_v39 = vunpack.i.l.bf16 %v8382_v46  ;;  %v883_v23 = vld [vmem:[#allocation2 + $0x231] sm:$0xff] }
 0x242   :  { %8601 = vrot.lane.b32.xlu2 %v8600_v19, %s9487_s28  ;;  %v3364_v17 = vsel %vm3353_vm8, %v3299_v45, %v8378_v0  ;;  %v3365_v13 = vsel %vm3353_vm8, %v3300_v22, %v8379_v43  ;;  %v3041_v43 = vsel %vm3028_vm3, %v2976_v40, %v8003_v53  ;;  %v3042_v0 = vsel %vm3028_vm3, %v2977_v11, %v8004_v63  ;;  %v627_v63 = vld [vmem:[#allocation2 + $0x268] sm:$0xff] }
 0x243   :  { %v10779_v47 = vsel %vm3418_vm2, %v3364_v17, %v8383_v39  ;;  %v10782_v31 = vsel %vm3418_vm2, %v3365_v13, %v8384_v4  ;;  %v3107_v37 = vsel %vm3093_vm5, %v3042_v0, %v8164_v55  ;;  %v819_v4 = vld [vmem:[#allocation2 + $0x230] sm:$0xff]  ;;  %v8409_v39 = vunpack.i.h.bf16 %v10736_v33 }
 0x244   :  { %8596 = vrot.lane.b32.xlu1 %v8595_v41, %s9485_s26  ;;  %v10787_v18 = vpop.permute.xlu2 %8436  ;;  %v3488_v36 = vpack.c.bf16 %v10782_v31, %v10779_v47  ;;  %v8408_v17 = vunpack.i.l.bf16 %v10736_v33  ;;  %v8630_v13 = vpack.i.bf16 %v883_v23, %v882_v52  ;;  %v757_v0 = vld [vmem:[#allocation2 + $0x28f] sm:$0xff]  ;;  %v9386_v52 = vld [vmem:[#allocation2 + $0xe7] sm:$0xff] }
 0x245   :  { %7081 = vmatmul.msk.bf16.gmra.mxu0 %vm3535_vm9, %v3487_v1  ;;  %v3106_v1 = vsel %vm3093_vm5, %v3041_v43, %v8163_v35  ;;  %v756_v43 = vld [vmem:[#allocation2 + $0x287] sm:$0xff]  ;;  %v2978_v23 = vsel %vm129_vm0, %v9386_v52, %v7848_v30 }
 0x246   :  { %8606 = vrot.lane.b32.xlu0 %v8605_v60, %s9486_s27  ;;  %v8387_v25 = vpop.permute.xlu1 %8386  ;;  %v820_v31 = vld [vmem:[#allocation2 + $0x288] sm:$0xff] }
 0x247   :  { %v8389_v54 = vunpack.i.h.bf16 %v8387_v25  ;;  %v8388_v42 = vunpack.i.l.bf16 %v8387_v25  ;;  %v8625_v25 = vpack.i.bf16 %v819_v4, %v818_v48 }
 0x248   :  { %v8397_v24 = vpop.permute.xlu0 %8396 }
 0x249   :  { %v3171_v15 = vsel %vm3158_vm4, %v3106_v1, %v8388_v42  ;;  %v3172_v28 = vsel %vm3158_vm4, %v3107_v37, %v8389_v54  ;;  %v8399_v10 = vunpack.i.h.bf16 %v8397_v24  ;;  %v8398_v46 = vunpack.i.l.bf16 %v8397_v24 }
 0x24a   :  { %8616 = vrot.lane.b32.xlu2 %v8605_v60, %s9483_s24  ;;  %v3236_v45 = vsel %vm3223_vm6, %v3171_v15, %v8393_v8  ;;  %v3237_v22 = vsel %vm3223_vm6, %v3172_v28, %v8394_v21  ;;  %v8168_v1 = vunpack.i.l.bf16 %v10364_v20  ;;  %v692_v15 = vld [vmem:[#allocation2 + $0x271] sm:$0xff] }
 0x24b   :  { %v3301_v53 = vsel %vm3288_vm7, %v3236_v45, %v8398_v46  ;;  %v3302_v55 = vsel %vm3288_vm7, %v3237_v22, %v8399_v10  ;;  %v9385_v28 = vld [vmem:[#allocation2 + $0xef] sm:$0xff]  ;;  %v8645_v10 = vpack.i.bf16 %v757_v0, %v756_v43  ;;  %v3043_v45 = vsel %vm3028_vm3, %v2978_v23, %v8008_v34 }
 0x24c   :  { %8611 = vrot.lane.b32.xlu1 %v8600_v19, %s9484_s25  ;;  %v10807_v41 = vpop.permute.xlu2 %8451  ;;  %v628_v19 = vld [vmem:[#allocation2 + $0x270] sm:$0xff]  ;;  %v3108_v48 = vsel %vm3093_vm5, %v3043_v45, %v8168_v1  ;;  %v8014_v0 = vunpack.i.h.bf16 %v10301_v6 }
 0x24d   :  { %v8635_v40 = vpack.i.bf16 %v628_v19, %v627_v63  ;;  %v9387_v23 = vld [vmem:[#allocation2 + $0x10f] sm:$0xff] }
 0x24e   :  { %8621 = vrot.lane.b32.xlu0 %v8620_v9, %s9485_s26  ;;  %v8402_v60 = vpop.permute.xlu1 %8401  ;;  %v2979_v9 = vsel %vm129_vm0, %v9385_v28, %v7849_v29  ;;  %v884_v29 = vld [vmem:[#allocation2 + $0x289] sm:$0xff] }
 0x24f   :  { %v8404_v58 = vunpack.i.h.bf16 %v8402_v60  ;;  %v8403_v26 = vunpack.i.l.bf16 %v8402_v60  ;;  %v3044_v46 = vsel %vm3028_vm3, %v2979_v9, %v8009_v59  ;;  %v8424_v60 = vunpack.i.h.bf16 %v10759_v7  ;;  %v823_v45 = vld [vmem:[#allocation2 + $0x2b0] sm:$0xff] }
 0x250   :  { %v8412_v35 = vpop.permute.xlu0 %8411  ;;  %v3109_v4 = vsel %vm3093_vm5, %v3044_v46, %v8169_v44  ;;  %v7853_v59 = vunpack.i.l.bf16 %v10148_v5  ;;  %v822_v46 = vld [vmem:[#allocation2 + $0x2a8] sm:$0xff] }
 0x251   :  { %v3366_v11 = vsel %vm3353_vm8, %v3301_v53, %v8403_v26  ;;  %v3367_v33 = vsel %vm3353_vm8, %v3302_v55, %v8404_v58  ;;  %v8414_v21 = vunpack.i.h.bf16 %v8412_v35  ;;  %v8413_v8 = vunpack.i.l.bf16 %v8412_v35 }
 0x252   :  { %8631 = vrot.lane.b32.xlu2 %v8630_v13, %s9486_s27  ;;  %v10822_v54 = vsel %vm3418_vm2, %v3366_v11, %v8408_v17  ;;  %v10825_v42 = vsel %vm3418_vm2, %v3367_v33, %v8409_v39  ;;  %v8640_v17 = vpack.i.bf16 %v692_v15, %v691_v27  ;;  %v8423_v13 = vunpack.i.l.bf16 %v10759_v7  ;;  %v885_v11 = vld [vmem:[#allocation2 + $0x291] sm:$0xff] }
 0x253   :  { %v3489_v24 = vpack.c.bf16 %v10825_v42, %v10822_v54  ;;  %v3173_v58 = vsel %vm3158_vm4, %v3108_v48, %v8413_v8  ;;  %v3174_v26 = vsel %vm3158_vm4, %v3109_v4, %v8414_v21  ;;  %v8655_v1 = vpack.i.bf16 %v885_v11, %v884_v29  ;;  %v886_v42 = vld [vmem:[#allocation2 + $0x2a9] sm:$0xff] }
 0x254   :  { %8626 = vrot.lane.b32.xlu1 %v8625_v25, %s9487_s28  ;;  %v10834_v37 = vpop.permute.xlu2 %8466  ;;  %v8013_v27 = vunpack.i.l.bf16 %v10301_v6  ;;  %v8174_v15 = vunpack.i.h.bf16 %v10396_v61  ;;  %v8439_v6 = vunpack.i.h.bf16 %v10787_v18 }
 0x255   :  { %7082 = vmatmul.msk.bf16.gmra.mxu0 %vm3535_vm9, %v3488_v36  ;;  %v821_v36 = vld [vmem:[#allocation2 + $0x290] sm:$0xff] }
 0x256   :  { %8636 = vrot.lane.b32.xlu0 %v8635_v40, %s9484_s25  ;;  %v8417_v20 = vpop.permute.xlu1 %8416  ;;  %v8650_v53 = vpack.i.bf16 %v821_v36, %v820_v31  ;;  %v7854_v40 = vunpack.i.h.bf16 %v10148_v5  ;;  %v8173_v5 = vunpack.i.l.bf16 %v10396_v61 }
 0x257   :  { %v8419_v22 = vunpack.i.h.bf16 %v8417_v20  ;;  %v8418_v47 = vunpack.i.l.bf16 %v8417_v20 }
 0x258   :  { %v8427_v39 = vpop.permute.xlu0 %8426  ;;  %v2981_v20 = vsel %vm129_vm0, %v9387_v23, %v7854_v40  ;;  %v8179_v23 = vunpack.i.h.bf16 %v10406_v56 }
 0x259   :  { %v3238_v63 = vsel %vm3223_vm6, %v3173_v58, %v8418_v47  ;;  %v3239_v19 = vsel %vm3223_vm6, %v3174_v26, %v8419_v22  ;;  %v8429_v55 = vunpack.i.h.bf16 %v8427_v39  ;;  %v8428_v35 = vunpack.i.l.bf16 %v8427_v39  ;;  %v9388_v22 = vld [vmem:[#allocation2 + $0x107] sm:$0xff] }
 0x25a   :  { %8646 = vrot.lane.b32.xlu2 %v8645_v10, %s9485_s26  ;;  %v3303_v7 = vsel %vm3288_vm7, %v3238_v63, %v8423_v13  ;;  %v3304_v33 = vsel %vm3288_vm7, %v3239_v19, %v8424_v60  ;;  %v8438_v10 = vunpack.i.l.bf16 %v10787_v18  ;;  %v2980_v47 = vsel %vm129_vm0, %v9388_v22, %v7853_v59  ;;  %v758_v18 = vld [vmem:[#allocation2 + $0x2a7] sm:$0xff] }
 0x25b   :  { %v3368_v21 = vsel %vm3353_vm8, %v3303_v7, %v8428_v35  ;;  %v3369_v8 = vsel %vm3353_vm8, %v3304_v33, %v8429_v55  ;;  %v3046_v31 = vsel %vm3028_vm3, %v2981_v20, %v8014_v0  ;;  %v3045_v4 = vsel %vm3028_vm3, %v2980_v47, %v8013_v27  ;;  %v760_v47 = vld [vmem:[#allocation2 + $0x2c7] sm:$0xff] }
 0x25c   :  { %8641 = vrot.lane.b32.xlu1 %v8640_v17, %s9483_s24  ;;  %v10855_v25 = vpop.permute.xlu2 %8481  ;;  %v3111_v39 = vsel %vm3093_vm5, %v3046_v31, %v8174_v15  ;;  %v759_v17 = vld [vmem:[#allocation2 + $0x2af] sm:$0xff]  ;;  %v3110_v60 = vsel %vm3093_vm5, %v3045_v4, %v8173_v5  ;;  %v8454_v13 = vunpack.i.h.bf16 %v10807_v41  ;;  %v8453_v58 = vunpack.i.l.bf16 %v10807_v41 }
 0x25d   :  { %v8675_v63 = vpack.i.bf16 %v823_v45, %v822_v46  ;;  %v3175_v19 = vsel %vm3158_vm4, %v3110_v60, %v8438_v10  ;;  %v8670_v7 = vpack.i.bf16 %v759_v17, %v758_v18  ;;  %v7859_v0 = vunpack.i.h.bf16 %v10178_v49  ;;  %v9390_v46 = vld [vmem:[#allocation2 + $0x127] sm:$0xff]  ;;  %v761_v31 = vld [vmem:[#allocation2 + $0x2cf] sm:$0xff] }
 0x25e   :  { %8651 = vrot.lane.b32.xlu0 %v8650_v53, %s9487_s28  ;;  %v8432_v30 = vpop.permute.xlu1 %8431  ;;  %v8018_v27 = vunpack.i.l.bf16 %v10271_v2  ;;  %v8469_v18 = vunpack.i.h.bf16 %v10834_v37  ;;  %v8468_v17 = vunpack.i.l.bf16 %v10834_v37  ;;  %v824_v37 = vld [vmem:[#allocation2 + $0x2c8] sm:$0xff] }
 0x25f   :  { %v8434_v34 = vunpack.i.h.bf16 %v8432_v30  ;;  %v8433_v43 = vunpack.i.l.bf16 %v8432_v30 }
 0x260   :  { %v8442_v44 = vpop.permute.xlu0 %8441 }
 0x261   :  { %v10868_v28 = vsel %vm3418_vm2, %v3368_v21, %v8433_v43  ;;  %v10871_v9 = vsel %vm3418_vm2, %v3369_v8, %v8434_v34  ;;  %v8444_v61 = vunpack.i.h.bf16 %v8442_v44  ;;  %v8443_v36 = vunpack.i.l.bf16 %v8442_v44 }
 0x262   :  { %8661 = vrot.lane.b32.xlu2 %v8650_v53, %s9484_s25  ;;  %v3490_v52 = vpack.c.bf16 %v10871_v9, %v10868_v28  ;;  %v3176_v53 = vsel %vm3158_vm4, %v3111_v39, %v8439_v6  ;;  %v7858_v44 = vunpack.i.l.bf16 %v10178_v49  ;;  %v8019_v8 = vunpack.i.h.bf16 %v10271_v2  ;;  %v9389_v6 = vld [vmem:[#allocation2 + $0x12f] sm:$0xff] }
 0x263   :  { %v3240_v35 = vsel %vm3223_vm6, %v3175_v19, %v8443_v36  ;;  %v3241_v29 = vsel %vm3223_vm6, %v3176_v53, %v8444_v61  ;;  %v8178_v49 = vunpack.i.l.bf16 %v10406_v56  ;;  %v2983_v10 = vsel %vm129_vm0, %v9389_v6, %v7859_v0  ;;  %v889_v19 = vld [vmem:[#allocation2 + $0x2d1] sm:$0xff] }
 0x264   :  { %8656 = vrot.lane.b32.xlu1 %v8655_v1, %s9486_s27  ;;  %v10883_v48 = vpop.permute.xlu2 %8496  ;;  %v2982_v2 = vsel %vm129_vm0, %v9390_v46, %v7858_v44  ;;  %v3048_v36 = vsel %vm3028_vm3, %v2983_v10, %v8019_v8  ;;  %v7863_v0 = vunpack.i.l.bf16 %v10185_v57  ;;  %v8183_v6 = vunpack.i.l.bf16 %v10373_v50 }
 0x265   :  { %7083 = vmatmul.msk.bf16.gmra.mxu0 %vm3535_vm9, %v3489_v24  ;;  %v887_v24 = vld [vmem:[#allocation2 + $0x2b1] sm:$0xff]  ;;  %v3047_v61 = vsel %vm3028_vm3, %v2982_v2, %v8018_v27  ;;  %v3113_v39 = vsel %vm3093_vm5, %v3048_v36, %v8179_v23  ;;  %v8024_v23 = vunpack.i.h.bf16 %v10303_v12 }
 0x266   :  { %8666 = vrot.lane.b32.xlu0 %v8655_v1, %s9483_s24  ;;  %v8447_v26 = vpop.permute.xlu1 %8446  ;;  %v8680_v59 = vpack.i.bf16 %v887_v24, %v886_v42  ;;  %v3112_v56 = vsel %vm3093_vm5, %v3047_v61, %v8178_v49  ;;  %v8023_v49 = vunpack.i.l.bf16 %v10303_v12  ;;  %v9392_v61 = vld [vmem:[#allocation2 + $0x147] sm:$0xff] }
 0x267   :  { %v8449_v55 = vunpack.i.h.bf16 %v8447_v26  ;;  %v8448_v54 = vunpack.i.l.bf16 %v8447_v26  ;;  %v888_v26 = vld [vmem:[#allocation2 + $0x2c9] sm:$0xff]  ;;  %v2984_v12 = vsel %vm129_vm0, %v9392_v61, %v7863_v0 }
 0x268   :  { %v8457_v11 = vpop.permute.xlu0 %8456 }
 0x269   :  { %v3305_v41 = vsel %vm3288_vm7, %v3240_v35, %v8448_v54  ;;  %v3306_v33 = vsel %vm3288_vm7, %v3241_v29, %v8449_v55  ;;  %v8459_v30 = vunpack.i.h.bf16 %v8457_v11  ;;  %v8458_v40 = vunpack.i.l.bf16 %v8457_v11  ;;  %v825_v35 = vld [vmem:[#allocation2 + $0x2d0] sm:$0xff] }
 0x26a   :  { %8676 = vrot.lane.b32.xlu2 %v8675_v63, %s9487_s28  ;;  %v3370_v34 = vsel %vm3353_vm8, %v3305_v41, %v8453_v58  ;;  %v3371_v43 = vsel %vm3353_vm8, %v3306_v33, %v8454_v13  ;;  %v8695_v58 = vpack.i.bf16 %v761_v31, %v760_v47  ;;  %v8484_v29 = vunpack.i.h.bf16 %v10855_v25  ;;  %v9391_v47 = vld [vmem:[#allocation2 + $0x14f] sm:$0xff] }
 0x26b   :  { %v10907_v1 = vsel %vm3418_vm2, %v3370_v34, %v8458_v40  ;;  %v10910_v21 = vsel %vm3418_vm2, %v3371_v43, %v8459_v30  ;;  %v8483_v11 = vunpack.i.l.bf16 %v10855_v25  ;;  %v10947_v30 = vld [vmem:[#allocation2 + $0x32f] sm:$0xff]  ;;  %v10949_v40 = vld [vmem:[#allocation2 + $0x347] sm:$0xff]  ;;  %v7864_v34 = vunpack.i.h.bf16 %v10185_v57 }
 0x26c   :  { %8671 = vrot.lane.b32.xlu1 %v8670_v7, %s9485_s26  ;;  %v10915_v15 = vpop.permute.xlu2 %8511  ;;  %v3491_v5 = vpack.c.bf16 %v10910_v21, %v10907_v1  ;;  %v10945_v7 = vpack.i.bf16 %v889_v19, %v888_v26  ;;  %v8710_v44 = vpack.i.bf16 %v10949_v40, %v10947_v30  ;;  %v8184_v57 = vunpack.i.h.bf16 %v10373_v50  ;;  %v762_v21 = vld [vmem:[#allocation2 + $0x2e7] sm:$0xff] }
 0x26d   :  { %v2985_v31 = vsel %vm129_vm0, %v9391_v47, %v7864_v34  ;;  %v3049_v50 = vsel %vm3028_vm3, %v2984_v12, %v8023_v49 }
 0x26e   :  { %8681 = vrot.lane.b32.xlu0 %v8680_v59, %s9486_s27  ;;  %v8462_v20 = vpop.permute.xlu1 %8461 }
 0x26f   :  { %v8464_v45 = vunpack.i.h.bf16 %v8462_v20  ;;  %v8463_v22 = vunpack.i.l.bf16 %v8462_v20 }
 0x270   :  { %v8472_v4 = vpop.permute.xlu0 %8471 }
 0x271   :  { %v3177_v60 = vsel %vm3158_vm4, %v3112_v56, %v8463_v22  ;;  %v3178_v13 = vsel %vm3158_vm4, %v3113_v39, %v8464_v45  ;;  %v8474_v53 = vunpack.i.h.bf16 %v8472_v4  ;;  %v8473_v55 = vunpack.i.l.bf16 %v8472_v4  ;;  %v639_v45 = vld [vmem:[#allocation2 + $0x328] sm:$0xff]  ;;  %v640_v22 = vld [vmem:[#allocation2 + $0x330] sm:$0xff] }
 0x272   :  { %8691 = vrot.lane.b32.xlu2 %v8680_v59, %s9483_s24  ;;  %v3242_v42 = vsel %vm3223_vm6, %v3177_v60, %v8468_v17  ;;  %v3243_v24 = vsel %vm3223_vm6, %v3178_v13, %v8469_v18  ;;  %v8700_v59 = vpack.i.bf16 %v825_v35, %v824_v37  ;;  %v3050_v4 = vsel %vm3028_vm3, %v2985_v31, %v8024_v23  ;;  %v10984_v18 = vld [vmem:[%s13355_s2] ss:$0 sm:$0xff]  ;;  %v703_v17 = vld [vmem:[#allocation2 + $0x329] sm:$0xff] }
 0x273   :  { %v3307_v28 = vsel %vm3288_vm7, %v3242_v42, %v8473_v55  ;;  %v3308_v9 = vsel %vm3288_vm7, %v3243_v24, %v8474_v53  ;;  %v704_v60 = vld [vmem:[#allocation2 + $0x331] sm:$0xff]  ;;  %v3114_v13 = vsel %vm3093_vm5, %v3049_v50, %v8183_v6  ;;  %v10988_v19 = vpack.i.bf16 %v640_v22, %v639_v45 }
 0x274   :  { %8686 = vrot.lane.b32.xlu1 %v8675_v63, %s9484_s25  ;;  %v10934_v54 = vpop.permute.xlu2 %8526  ;;  %v8499_v53 = vunpack.i.h.bf16 %v10883_v48  ;;  %v8498_v55 = vunpack.i.l.bf16 %v10883_v48  ;;  %v10997_v37 = vld [vmem:[%s13356_s3] ss:$0 sm:$0xff]  ;;  %v8028_v6 = vunpack.i.l.bf16 %v10312_v51  ;;  %v8189_v22 = vunpack.i.h.bf16 %v10408_v14 }
 0x275   :  { %7084 = vmatmul.msk.bf16.gmra.mxu0 %vm3535_vm9, %v3490_v52  ;;  %v8513_v31 = vunpack.i.l.bf16 %v10915_v15 }
 0x276   :  { %8696 = vrot.lane.b32.xlu0 %v8695_v58, %s9485_s26  ;;  %v8477_v63 = vpop.permute.xlu1 %8476  ;;  %v3115_v58 = vsel %vm3093_vm5, %v3050_v4, %v8184_v57  ;;  %v8029_v57 = vunpack.i.h.bf16 %v10312_v51  ;;  %v9394_v4 = vld [vmem:[#allocation2 + $0x167] sm:$0xff] }
 0x277   :  { %v8479_v41 = vunpack.i.h.bf16 %v8477_v63  ;;  %v8478_v33 = vunpack.i.l.bf16 %v8477_v63  ;;  %v11002_v63 = vpack.i.bf16 %v704_v60, %v703_v17  ;;  %v826_v17 = vld [vmem:[#allocation2 + $0x2e8] sm:$0xff]  ;;  %v827_v60 = vld [vmem:[#allocation2 + $0x2f0] sm:$0xff] }
 0x278   :  { %v8487_v52 = vpop.permute.xlu0 %8486 }
 0x279   :  { %v3372_v25 = vsel %vm3353_vm8, %v3307_v28, %v8478_v33  ;;  %v3373_v43 = vsel %vm3353_vm8, %v3308_v9, %v8479_v41  ;;  %v8489_v46 = vunpack.i.h.bf16 %v8487_v52  ;;  %v8488_v2 = vunpack.i.l.bf16 %v8487_v52  ;;  %v11005_v41 = vld [vmem:[#allocation2 + $0x34f] sm:$0xff] }
 0x27a   :  { %8706 = vrot.lane.b32.xlu2 %v10945_v7, %s9486_s27  ;;  %v10962_v8 = vsel %vm3418_vm2, %v3372_v25, %v8483_v11  ;;  %v10965_v27 = vsel %vm3418_vm2, %v3373_v43, %v8484_v29  ;;  %v7869_v25 = vunpack.i.h.bf16 %v10155_v16  ;;  %v8735_v0 = vpack.i.bf16 %v11005_v41, %v10949_v40 }
 0x27b   :  { %v3492_v20 = vpack.c.bf16 %v10965_v27, %v10962_v8  ;;  %v3179_v42 = vsel %vm3158_vm4, %v3114_v13, %v8488_v2  ;;  %v3180_v24 = vsel %vm3158_vm4, %v3115_v58, %v8489_v46  ;;  %v8188_v40 = vunpack.i.l.bf16 %v10408_v14 }
 0x27c   :  { %8701 = vrot.lane.b32.xlu1 %v8700_v59, %s9487_s28  ;;  %v10974_v10 = vpop.permute.xlu2 %8541 }
 0x27e   :  { %8711 = vrot.lane.b32.xlu0 %v8710_v44, %s9482_s19  ;;  %v8492_v36 = vpop.permute.xlu1 %8491  ;;  %v7868_v44 = vunpack.i.l.bf16 %v10155_v16 }
 0x27f   :  { %v8494_v56 = vunpack.i.h.bf16 %v8492_v36  ;;  %v8493_v39 = vunpack.i.l.bf16 %v8492_v36  ;;  %v9393_v36 = vld [vmem:[#allocation2 + $0x16f] sm:$0xff] }
 0x280   :  { %v8502_v26 = vpop.permute.xlu0 %8501  ;;  %v2987_v14 = vsel %vm129_vm0, %v9393_v36, %v7869_v25  ;;  %v2986_v50 = vsel %vm129_vm0, %v9394_v4, %v7868_v44  ;;  %v8033_v4 = vunpack.i.l.bf16 %v10280_v32 }
 0x281   :  { %v3244_v35 = vsel %vm3223_vm6, %v3179_v42, %v8493_v39  ;;  %v3245_v29 = vsel %vm3223_vm6, %v3180_v24, %v8494_v56  ;;  %v8504_v33 = vunpack.i.h.bf16 %v8502_v26  ;;  %v8503_v28 = vunpack.i.l.bf16 %v8502_v26 }
 0x282   :  { %v3645_v11 = vpop.f32.mrf.mxu0  ;;  %8721 = vrot.lane.b32.xlu2 %v8700_v59, %s9484_s25  ;;  %v3309_v59 = vsel %vm3288_vm7, %v3244_v35, %v8498_v55  ;;  %v3310_v34 = vsel %vm3288_vm7, %v3245_v29, %v8499_v53  ;;  %v8514_v56 = vunpack.i.h.bf16 %v10915_v15  ;;  %v3052_v13 = vsel %vm3028_vm3, %v2987_v14, %v8029_v57  ;;  %v832_v35 = vld [vmem:[#allocation2 + $0x348] sm:$0xff]  ;;  %v833_v29 = vld [vmem:[#allocation2 + $0x350] sm:$0xff] }
 0x283   :  { %v3809_v48 = vmul.f32 %v10984_v18, %v3645_v11  ;;  %v3374_v2 = vsel %vm3353_vm8, %v3309_v59, %v8503_v28  ;;  %v3375_v45 = vsel %vm3353_vm8, %v3310_v34, %v8504_v33  ;;  %v3051_v58 = vsel %vm3028_vm3, %v2986_v50, %v8028_v6 }
 0x284   :  { %8716 = vrot.lane.b32.xlu1 %v10988_v19, %s9484_s25  ;;  %v11009_v9 = vpop.permute.xlu2 %8556  ;;  %v3117_v42 = vsel %vm3093_vm5, %v3052_v13, %v8189_v22  ;;  %v3116_v24 = vsel %vm3093_vm5, %v3051_v58, %v8188_v40  ;;  %v8528_v33 = vunpack.i.l.bf16 %v10934_v54  ;;  %v8034_v14 = vunpack.i.h.bf16 %v10280_v32  ;;  %v891_v32 = vld [vmem:[#allocation2 + $0x2f1] sm:$0xff] }
 0x285   :  { %v3877_v52 = vadd.f32 %v10997_v37, %v3809_v48  ;;  %7085 = vmatmul.msk.bf16.gmra.mxu0 %vm3535_vm9, %v3491_v5  ;;  %v11024_v5 = vld [vmem:[#allocation2 + $0x2ef] sm:$0xff]  ;;  %v3181_v11 = vsel %vm3158_vm4, %v3116_v24, %v8513_v31  ;;  %v8529_v48 = vunpack.i.h.bf16 %v10934_v54  ;;  %v7873_v31 = vunpack.i.l.bf16 %v10187_v62 }
 0x286   :  { %8726 = vrot.lane.b32.xlu0 %v11002_v63, %s9483_s24  ;;  %v8507_v43 = vpop.permute.xlu1 %8506  ;;  %v8740_v61 = vpack.i.bf16 %v11024_v5, %v762_v21  ;;  %v8765_v58 = vpack.i.bf16 %v11024_v5, %v11005_v41  ;;  %v8544_v5 = vunpack.i.h.bf16 %v10974_v10 }
 0x287   :  { %v3941_v23 = vmax.f32 %v3877_v52, 0.0  ;;  %v8509_v49 = vunpack.i.h.bf16 %v8507_v43  ;;  %v8508_v1 = vunpack.i.l.bf16 %v8507_v43  ;;  %v3182_v52 = vsel %vm3158_vm4, %v3117_v42, %v8514_v56  ;;  %v896_v43 = vld [vmem:[#allocation2 + $0x349] sm:$0xff] }
 0x288   :  { %v8517_v46 = vpop.permute.xlu0 %8516 }
 0x289   :  { %4005 = vst.msk [vmem:[#allocation3] sm:$0xff] %vm3418_vm2, %v3941_v23  ;;  %v11034_v16 = vsel %vm3418_vm2, %v3374_v2, %v8508_v1  ;;  %v11037_v47 = vsel %vm3418_vm2, %v3375_v45, %v8509_v49  ;;  %v8519_v26 = vunpack.i.h.bf16 %v8517_v46  ;;  %v8518_v53 = vunpack.i.l.bf16 %v8517_v46 }
 0x28a   :  { %v3647_v51 = vpop.f32.mrf.mxu0  ;;  %8736 = vrot.lane.b32.xlu2 %v8735_v0, %s9485_s26  ;;  %v3493_v12 = vpack.c.bf16 %v11037_v47, %v11034_v16  ;;  %v897_v0 = vld [vmem:[#allocation2 + $0x351] sm:$0xff]  ;;  %v8745_v1 = vpack.i.bf16 %v833_v29, %v832_v35  ;;  %v7874_v46 = vunpack.i.h.bf16 %v10187_v62  ;;  %v8194_v62 = vunpack.i.h.bf16 %v10418_v3 }
 0x28b   :  { %v3810_v39 = vmul.f32 %v10984_v18, %v3647_v51  ;;  %v3246_v44 = vsel %vm3223_vm6, %v3181_v11, %v8518_v53  ;;  %v3247_v23 = vsel %vm3223_vm6, %v3182_v52, %v8519_v26  ;;  %v11072_v45 = vpack.i.bf16 %v897_v0, %v896_v43  ;;  %v9395_v26 = vld [vmem:[#allocation2 + $0x18f] sm:$0xff] }
 0x28c   :  { %8731 = vrot.lane.b32.xlu1 %v10945_v7, %s9483_s24  ;;  %v11052_v55 = vpop.permute.xlu2 %8571  ;;  %v11061_v7 = vpack.i.bf16 %v827_v60, %v826_v17  ;;  %v890_v60 = vld [vmem:[#allocation2 + $0x2e9] sm:$0xff]  ;;  %v2989_v53 = vsel %vm129_vm0, %v9395_v26, %v7874_v46  ;;  %v13465_v26 = vld [vmem:[#allocation52_spill] sm:$0xff] }
 0x28d   :  { %v3878_v15 = vadd.f32 %v10997_v37, %v3810_v39  ;;  %v8193_v39 = vunpack.i.l.bf16 %v10418_v3  ;;  %v9396_v3 = vld [vmem:[#allocation2 + $0x187] sm:$0xff]  ;;  %v3054_v27 = vsel %vm3028_vm3, %v2989_v53, %v8034_v14  ;;  %v11106_v29 = vpack.i.bf16 %v891_v32, %v890_v60 }
 0x28e   :  { %8741 = vrot.lane.b32.xlu0 %v8740_v61, %s9485_s26  ;;  %v8522_v28 = vpop.permute.xlu1 %8521  ;;  %v2988_v42 = vsel %vm129_vm0, %v9396_v3, %v7873_v31  ;;  %v3119_v41 = vsel %vm3093_vm5, %v3054_v27, %v8194_v62  ;;  %v8198_v53 = vunpack.i.l.bf16 %v13465_v26  ;;  %v8199_v27 = vunpack.i.h.bf16 %v13465_v26  ;;  %v765_v26 = vld [vmem:[#allocation2 + $0x30f] sm:$0xff] }
 0x28f   :  { %v3942_v59 = vmax.f32 %v3878_v15, 0.0  ;;  %v8524_v34 = vunpack.i.h.bf16 %v8522_v28  ;;  %v8523_v25 = vunpack.i.l.bf16 %v8522_v28  ;;  %v3053_v8 = vsel %vm3028_vm3, %v2988_v42, %v8033_v4  ;;  %v13466_v42 = vld [vmem:[#allocation14_spill] sm:$0xff] }
 0x290   :  { %v8532_v49 = vpop.permute.xlu0 %8531  ;;  %v3118_v11 = vsel %vm3093_vm5, %v3053_v8, %v8193_v39  ;;  %v13464_v39 = vld [vmem:[#allocation36_spill] sm:$0xff] }
 0x291   :  { %4006 = vst.msk [vmem:[#allocation3 + $0x8] sm:$0xff] %vm3418_vm2, %v3942_v59  ;;  %v3311_v54 = vsel %vm3288_vm7, %v3246_v44, %v8523_v25  ;;  %v3312_v21 = vsel %vm3288_vm7, %v3247_v23, %v8524_v34  ;;  %v8534_v57 = vunpack.i.h.bf16 %v8532_v49  ;;  %v8533_v6 = vunpack.i.l.bf16 %v8532_v49  ;;  %v585_v23 = vld [vmem:[#allocation2 + $0x3c7] sm:$0xff]  ;;  %v586_v49 = vld [vmem:[#allocation2 + $0x3cf] sm:$0xff] }
 0x292   :  { %v3650_v2 = vpop.f32.mrf.mxu0  ;;  %8751 = vrot.lane.b32.xlu2 %v11061_v7, %s9487_s28  ;;  %v3376_v22 = vsel %vm3353_vm8, %v3311_v54, %v8528_v33  ;;  %v3377_v40 = vsel %vm3353_vm8, %v3312_v21, %v8529_v48  ;;  %v8543_v48 = vunpack.i.l.bf16 %v10974_v10  ;;  %v8559_v54 = vunpack.i.h.bf16 %v11009_v9 }
 0x293   :  { %v3811_v51 = vmul.f32 %v10984_v18, %v3650_v2  ;;  %v11079_v61 = vsel %vm3418_vm2, %v3376_v22, %v8533_v6  ;;  %v11082_v36 = vsel %vm3418_vm2, %v3377_v40, %v8534_v57  ;;  %v8558_v21 = vunpack.i.l.bf16 %v11009_v9  ;;  %v13463_v22 = vld [vmem:[#allocation18_spill] sm:$0xff] }
 0x294   :  { %8746 = vrot.lane.b32.xlu1 %v8745_v1, %s9487_s28  ;;  %v11087_v50 = vpop.permute.xlu2 %8586  ;;  %v3494_v56 = vpack.c.bf16 %v11082_v36, %v11079_v61  ;;  %v7879_v40 = vunpack.i.h.bf16 %v13463_v22  ;;  %v8775_v4 = vpack.i.bf16 %v586_v49, %v585_v23  ;;  %v7878_v62 = vunpack.i.l.bf16 %v13463_v22 }
 0x295   :  { %v3879_v17 = vadd.f32 %v10997_v37, %v3811_v51  ;;  %7086 = vmatmul.msk.bf16.gmra.mxu0 %vm3535_vm9, %v3492_v20  ;;  %v8038_v60 = vunpack.i.l.bf16 %v13464_v39 }
 0x296   :  { %8756 = vrot.lane.b32.xlu0 %v11072_v45, %s9486_s27  ;;  %v8537_v13 = vpop.permute.xlu1 %8536 }
 0x297   :  { %v3943_v24 = vmax.f32 %v3879_v17, 0.0  ;;  %v8539_v15 = vunpack.i.h.bf16 %v8537_v13  ;;  %v8538_v20 = vunpack.i.l.bf16 %v8537_v13  ;;  %v8039_v17 = vunpack.i.h.bf16 %v13464_v39 }
 0x298   :  { %v8547_v35 = vpop.permute.xlu0 %8546 }
 0x299   :  { %4007 = vst.msk [vmem:[#allocation3 + $0x10] sm:$0xff] %vm3418_vm2, %v3943_v24  ;;  %v3183_v33 = vsel %vm3158_vm4, %v3118_v11, %v8538_v20  ;;  %v3184_v28 = vsel %vm3158_vm4, %v3119_v41, %v8539_v15  ;;  %v8549_v34 = vunpack.i.h.bf16 %v8547_v35  ;;  %v8548_v25 = vunpack.i.l.bf16 %v8547_v35  ;;  %v9397_v15 = vld [vmem:[#allocation2 + $0x1af] sm:$0xff]  ;;  %v9398_v35 = vld [vmem:[#allocation2 + $0x1a7] sm:$0xff] }
 0x29a   :  { %v3652_v52 = vpop.f32.mrf.mxu0  ;;  %8766 = vrot.lane.b32.xlu2 %v8765_v58, %s9482_s19  ;;  %v3248_v10 = vsel %vm3223_vm6, %v3183_v33, %v8543_v48  ;;  %v3249_v0 = vsel %vm3223_vm6, %v3184_v28, %v8544_v5  ;;  %v7884_v24 = vunpack.i.h.bf16 %v13466_v42  ;;  %v2991_v8 = vsel %vm129_vm0, %v9397_v15, %v7879_v40  ;;  %v649_v33 = vld [vmem:[#allocation2 + $0x3c8] sm:$0xff]  ;;  %v650_v28 = vld [vmem:[#allocation2 + $0x3d0] sm:$0xff] }
 0x29b   :  { %v3812_v59 = vmul.f32 %v10984_v18, %v3652_v52  ;;  %v3313_v31 = vsel %vm3288_vm7, %v3248_v10, %v8548_v25  ;;  %v3314_v51 = vsel %vm3288_vm7, %v3249_v0, %v8549_v34  ;;  %v2990_v11 = vsel %vm129_vm0, %v9398_v35, %v7878_v62  ;;  %v4069_v0 = vld [vmem:[#allocation3] ss:$2 sm:$0xff] }
 0x29c   :  { %8761 = vrot.lane.b32.xlu1 %v11106_v29, %s9486_s27  ;;  %v11119_v43 = vpop.permute.xlu2 %8601  ;;  %v7883_v52 = vunpack.i.l.bf16 %v13466_v42  ;;  %v3056_v25 = vsel %vm3028_vm3, %v2991_v8, %v8039_v17  ;;  %v3055_v10 = vsel %vm3028_vm3, %v2990_v11, %v8038_v60  ;;  %v9400_v42 = vld [vmem:[#allocation2 + $0x1c7] sm:$0xff] }
 0x29d   :  { %v3880_v44 = vadd.f32 %v10997_v37, %v3812_v59  ;;  %v13467_v59 = vld [vmem:[#allocation15_spill] sm:$0xff]  ;;  %v3120_v16 = vsel %vm3093_vm5, %v3055_v10, %v8198_v53 }
 0x29e   :  { %8771 = vrot.lane.b32.xlu0 %v8745_v1, %s9484_s25  ;;  %v8552_v57 = vpop.permute.xlu1 %8551  ;;  %v7899_v34 = vunpack.i.h.bf16 %v13467_v59  ;;  %v7898_v62 = vunpack.i.l.bf16 %v13467_v59  ;;  %v9399_v53 = vld [vmem:[#allocation2 + $0x1cf] sm:$0xff]  ;;  %v2992_v15 = vsel %vm129_vm0, %v9400_v42, %v7883_v52 }
 0x29f   :  { %v3944_v6 = vmax.f32 %v3880_v44, 0.0  ;;  %v8554_v46 = vunpack.i.h.bf16 %v8552_v57  ;;  %v8553_v2 = vunpack.i.l.bf16 %v8552_v57  ;;  %v4133_v44 = vld [vmem:[#allocation3 + $0x1] ss:$2 sm:$0xff]  ;;  %v3121_v57 = vsel %vm3093_vm5, %v3056_v25, %v8199_v27 }
 0x2a0   :  { %v8562_v14 = vpop.permute.xlu0 %8561  ;;  %v13468_v59 = vld [vmem:[#allocation19_spill] sm:$0xff] }
 0x2a1   :  { %4008 = vst.msk [vmem:[#allocation3 + $0x18] sm:$0xff] %vm3418_vm2, %v3944_v6  ;;  %v3378_v9 = vsel %vm3353_vm8, %v3313_v31, %v8553_v2  ;;  %v3379_v1 = vsel %vm3353_vm8, %v3314_v51, %v8554_v46  ;;  %v8564_v41 = vunpack.i.h.bf16 %v8562_v14  ;;  %v8563_v5 = vunpack.i.l.bf16 %v8562_v14  ;;  %v828_v42 = vld [vmem:[#allocation2 + $0x308] sm:$0xff] }
 0x2a2   :  { %v3655_v32 = vpop.f32.mrf.mxu0  ;;  %8781 = vrot.lane.b32.xlu2 %v11061_v7, %s9484_s25  ;;  %v11139_v13 = vsel %vm3418_vm2, %v3378_v9, %v8558_v21  ;;  %v11142_v58 = vsel %vm3418_vm2, %v3379_v1, %v8559_v54  ;;  %v770_v54 = vld [vmem:[#allocation2 + $0x367] sm:$0xff]  ;;  %v771_v21 = vld [vmem:[#allocation2 + $0x36f] sm:$0xff]  ;;  %v8574_v6 = vunpack.i.h.bf16 %v11052_v55  ;;  %v8573_v46 = vunpack.i.l.bf16 %v11052_v55 }
 0x2a3   :  { %v3813_v3 = vmul.f32 %v10984_v18, %v3655_v32  ;;  %v3495_v20 = vpack.c.bf16 %v11142_v58, %v11139_v13  ;;  %v8790_v31 = vpack.i.bf16 %v650_v28, %v649_v33  ;;  %v4196_v51 = vmax.f32 %v4069_v0, %v4133_v44  ;;  %v764_v32 = vld [vmem:[#allocation2 + $0x307] sm:$0xff]  ;;  %v714_v33 = vld [vmem:[#allocation2 + $0x3d1] sm:$0xff] }
 0x2a4   :  { %8776 = vrot.lane.b32.xlu1 %v8775_v4, %s9482_s19  ;;  %v11150_v7 = vpop.permute.xlu2 %8616  ;;  %v3185_v14 = vsel %vm3158_vm4, %v3120_v16, %v8563_v5  ;;  %v3186_v4 = vsel %vm3158_vm4, %v3121_v57, %v8564_v41  ;;  %v11178_v55 = vpack.i.bf16 %v771_v21, %v770_v54  ;;  %v9402_v28 = vld [vmem:[#allocation2 + $0x267] sm:$0xff]  ;;  %v7889_v25 = vunpack.i.h.bf16 %v13468_v59  ;;  %v835_v54 = vld [vmem:[#allocation2 + $0x370] sm:$0xff] }
 0x2a5   :  { %v3881_v48 = vadd.f32 %v10997_v37, %v3813_v3  ;;  %7087 = vmatmul.msk.bf16.gmra.mxu0 %vm3535_vm9, %v3493_v12  ;;  %v2993_v3 = vsel %vm129_vm0, %v9399_v53, %v7884_v24  ;;  %v11194_v52 = vsel %vm129_vm0, %v9402_v28, %v7898_v62  ;;  %v7888_v10 = vunpack.i.l.bf16 %v13468_v59  ;;  %v13469_v44 = vld [vmem:[#allocation38_spill] sm:$0xff]  ;;  %v779_v59 = vld [vmem:[#allocation2 + $0x3ef] sm:$0xff] }
 0x2a6   :  { %8786 = vrot.lane.b32.xlu0 %v11072_v45, %s9483_s24  ;;  %v8567_v23 = vpop.permute.xlu1 %8566  ;;  %v11200_v0 = vpack.i.bf16 %v765_v26, %v764_v32  ;;  %v8043_v21 = vunpack.i.l.bf16 %v13469_v44  ;;  %v8588_v62 = vunpack.i.l.bf16 %v11087_v50  ;;  %v8589_v26 = vunpack.i.h.bf16 %v11087_v50 }
 0x2a7   :  { %v3945_v47 = vmax.f32 %v3881_v48, 0.0  ;;  %v8569_v12 = vunpack.i.h.bf16 %v8567_v23  ;;  %v8568_v49 = vunpack.i.l.bf16 %v8567_v23  ;;  %v713_v48 = vld [vmem:[#allocation2 + $0x3c9] sm:$0xff]  ;;  %v8044_v23 = vunpack.i.h.bf16 %v13469_v44 }
 0x2a8   :  { %v4071_v2 = vld [vmem:[#allocation3 + $0x10] ss:$2 sm:$0xff]  ;;  %v4135_v22 = vld [vmem:[#allocation3 + $0x11] ss:$2 sm:$0xff]  ;;  %v8577_v40 = vpop.permute.xlu0 %8576 }
 0x2a9   :  { %v4197_v45 = vmax.f32 %v4071_v2, %v4135_v22  ;;  %4009 = vst.msk [vmem:[#allocation3 + $0x20] sm:$0xff] %vm3418_vm2, %v3945_v47  ;;  %v3250_v9 = vsel %vm3223_vm6, %v3185_v14, %v8568_v49  ;;  %v3251_v1 = vsel %vm3223_vm6, %v3186_v4, %v8569_v12  ;;  %v8579_v8 = vunpack.i.h.bf16 %v8577_v40  ;;  %v834_v49 = vld [vmem:[#allocation2 + $0x368] sm:$0xff] }
 0x2aa   :  { %v3657_v39 = vpop.f32.mrf.mxu0  ;;  %8796 = vrot.lane.b32.xlu2 %v11106_v29, %s9483_s24  ;;  %v8578_v27 = vunpack.i.l.bf16 %v8577_v40  ;;  %v9401_v29 = vld [vmem:[#allocation2 + $0x26f] sm:$0xff]  ;;  %v3315_v41 = vsel %vm3288_vm7, %v3250_v9, %v8573_v46  ;;  %v3316_v5 = vsel %vm3288_vm7, %v3251_v1, %v8574_v6  ;;  %v8805_v2 = vpack.i.bf16 %v714_v33, %v713_v48 }
 0x2ab   :  { %v4228_v17 = vmax.f32 %v4196_v51, %v4197_v45  ;;  %v3814_v60 = vmul.f32 %v10984_v18, %v3657_v39  ;;  %v11187_v11 = vsel %vm129_vm0, %v9401_v29, %v7899_v34  ;;  %v3381_v6 = vsel %vm3353_vm8, %v3316_v5, %v8579_v8  ;;  %v13470_v22 = vld [vmem:[#allocation55_spill] sm:$0xff]  ;;  %v13471_v29 = vld [vmem:[#allocation41_spill] sm:$0xff] }
 0x2ac   :  { %8791 = vrot.lane.b32.xlu1 %v8790_v31, %s9484_s25  ;;  %v11184_v35 = vpop.permute.xlu2 %8631  ;;  %v3380_v57 = vsel %vm3353_vm8, %v3315_v41, %v8578_v27  ;;  %v8204_v40 = vunpack.i.h.bf16 %v13470_v22  ;;  %v8203_v31 = vunpack.i.l.bf16 %v13470_v22  ;;  %v9403_v14 = vld [vmem:[#allocation2 + $0x1ef] sm:$0xff]  ;;  %v11221_v1 = vpack.i.bf16 %v835_v54, %v834_v49  ;;  %v13472_v49 = vld [vmem:[#allocation57_spill] sm:$0xff] }
 0x2ad   :  { %4305 = vst.msk [vmem:[#allocation4 + $0x20] sm:$0xff] %vm3418_vm2, %v4228_v17  ;;  %v3882_v24 = vadd.f32 %v10997_v37, %v3814_v60  ;;  %v11216_v4 = vsel %vm129_vm0, %v9403_v14, %v7889_v25  ;;  %v9404_v17 = vld [vmem:[#allocation2 + $0x1e7] sm:$0xff]  ;;  %v3058_v32 = vsel %vm3028_vm3, %v2993_v3, %v8044_v23  ;;  %v829_v8 = vld [vmem:[#allocation2 + $0x310] sm:$0xff]  ;;  %v3057_v27 = vsel %vm3028_vm3, %v2992_v15, %v8043_v21 }
 0x2ae   :  { %8801 = vrot.lane.b32.xlu0 %v11178_v55, %s9485_s26  ;;  %v8582_v34 = vpop.permute.xlu1 %8581  ;;  %v11226_v60 = vsel %vm129_vm0, %v9404_v17, %v7888_v10  ;;  %v8059_v41 = vunpack.i.h.bf16 %v13471_v29  ;;  %v8058_v33 = vunpack.i.l.bf16 %v13471_v29  ;;  %v3123_v3 = vsel %vm3093_vm5, %v3058_v32, %v8204_v40  ;;  %v778_v15 = vld [vmem:[#allocation2 + $0x3e7] sm:$0xff]  ;;  %v13473_v32 = vld [vmem:[#allocation33_spill] sm:$0xff]  ;;  %v893_v29 = vld [vmem:[#allocation2 + $0x311] sm:$0xff] }
 0x2af   :  { %v3946_v16 = vmax.f32 %v3882_v24, 0.0  ;;  %v8584_v47 = vunpack.i.h.bf16 %v8582_v34  ;;  %v8583_v12 = vunpack.i.l.bf16 %v8582_v34  ;;  %v3122_v50 = vsel %vm3093_vm5, %v3057_v27, %v8203_v31  ;;  %v892_v27 = vld [vmem:[#allocation2 + $0x309] sm:$0xff] }
 0x2b0   :  { %v8592_v46 = vpop.permute.xlu0 %8591  ;;  %v3187_v25 = vsel %vm3158_vm4, %v3122_v50, %v8588_v62  ;;  %v8604_v10 = vunpack.i.h.bf16 %v11119_v43  ;;  %v8603_v34 = vunpack.i.l.bf16 %v11119_v43  ;;  %v11249_v23 = vpack.i.bf16 %v829_v8, %v828_v42 }
 0x2b1   :  { %4010 = vst.msk [vmem:[#allocation3 + $0x28] sm:$0xff] %vm3418_vm2, %v3946_v16  ;;  %v11210_v51 = vsel %vm3418_vm2, %v3380_v57, %v8583_v12  ;;  %v11213_v45 = vsel %vm3418_vm2, %v3381_v6, %v8584_v47  ;;  %v8594_v5 = vunpack.i.h.bf16 %v8592_v46  ;;  %v8593_v24 = vunpack.i.l.bf16 %v8592_v46  ;;  %v899_v12 = vld [vmem:[#allocation2 + $0x371] sm:$0xff] }
 0x2b2   :  { %v3660_v9 = vpop.f32.mrf.mxu0  ;;  %8811 = vrot.lane.b32.xlu2 %v11200_v0, %s9485_s26  ;;  %v3496_v39 = vpack.c.bf16 %v11213_v45, %v11210_v51  ;;  %v3188_v16 = vsel %vm3158_vm4, %v3123_v3, %v8589_v26  ;;  %v8219_v54 = vunpack.i.h.bf16 %v13472_v49  ;;  %v11255_v6 = vpack.i.bf16 %v779_v59, %v778_v15  ;;  %v13474_v3 = vld [vmem:[#allocation56_spill] sm:$0xff] }
 0x2b3   :  { %v3815_v53 = vmul.f32 %v10984_v18, %v3660_v9  ;;  %v3252_v21 = vsel %vm3223_vm6, %v3187_v25, %v8593_v24  ;;  %v3253_v57 = vsel %vm3223_vm6, %v3188_v16, %v8594_v5  ;;  %v8218_v46 = vunpack.i.l.bf16 %v13472_v49  ;;  %v906_v49 = vld [vmem:[#allocation2 + $0x3e9] sm:$0xff] }
 0x2b4   :  { %8806 = vrot.lane.b32.xlu1 %v8805_v2, %s9483_s24  ;;  %v11234_v48 = vpop.permute.xlu2 %8646  ;;  %v8049_v26 = vunpack.i.h.bf16 %v13473_v32  ;;  %v3064_v5 = vsel %vm3028_vm3, %v11187_v11, %v8059_v41  ;;  %v3063_v24 = vsel %vm3028_vm3, %v11194_v52, %v8058_v33  ;;  %v8209_v50 = vunpack.i.h.bf16 %v13474_v3  ;;  %v843_v11 = vld [vmem:[#allocation2 + $0x3f0] sm:$0xff] }
 0x2b5   :  { %v3883_v28 = vadd.f32 %v10997_v37, %v3815_v53  ;;  %7088 = vmatmul.msk.bf16.gmra.mxu0 %vm3535_vm9, %v3494_v56  ;;  %v898_v56 = vld [vmem:[#allocation2 + $0x369] sm:$0xff]  ;;  %v8048_v53 = vunpack.i.l.bf16 %v13473_v32  ;;  %v8208_v59 = vunpack.i.l.bf16 %v13474_v3  ;;  %v3129_v41 = vsel %vm3093_vm5, %v3064_v5, %v8219_v54  ;;  %v907_v54 = vld [vmem:[#allocation2 + $0x3f1] sm:$0xff] }
 0x2b6   :  { %8816 = vrot.lane.b32.xlu0 %v11221_v1, %s9487_s28  ;;  %v8597_v44 = vpop.permute.xlu1 %8596  ;;  %v11265_v17 = vpack.i.bf16 %v899_v12, %v898_v56  ;;  %v3128_v52 = vsel %vm3093_vm5, %v3063_v24, %v8218_v46  ;;  %v11289_v16 = vpack.i.bf16 %v893_v29, %v892_v27  ;;  %v8634_v3 = vunpack.i.h.bf16 %v11184_v35 }
 0x2b7   :  { %v3947_v47 = vmax.f32 %v3883_v28, 0.0  ;;  %v8599_v61 = vunpack.i.h.bf16 %v8597_v44  ;;  %v8598_v36 = vunpack.i.l.bf16 %v8597_v44  ;;  %v842_v44 = vld [vmem:[#allocation2 + $0x3e8] sm:$0xff] }
 0x2b8   :  { %v8607_v43 = vpop.permute.xlu0 %8606  ;;  %v4073_v5 = vld [vmem:[#allocation3 + $0x20] ss:$2 sm:$0xff]  ;;  %v4137_v24 = vld [vmem:[#allocation3 + $0x21] ss:$2 sm:$0xff] }
 0x2b9   :  { %4011 = vst.msk [vmem:[#allocation3 + $0x30] sm:$0xff] %vm3418_vm2, %v3947_v47  ;;  %v3317_v2 = vsel %vm3288_vm7, %v3252_v21, %v8598_v36  ;;  %v3318_v22 = vsel %vm3288_vm7, %v3253_v57, %v8599_v61  ;;  %v8609_v40 = vunpack.i.h.bf16 %v8607_v43  ;;  %v8608_v31 = vunpack.i.l.bf16 %v8607_v43 }
 0x2ba   :  { %v3382_v14 = vsel %vm3353_vm8, %v3317_v2, %v8603_v34  ;;  %v3383_v62 = vsel %vm3353_vm8, %v3318_v22, %v8604_v10  ;;  %v3662_v9 = vpop.f32.mrf.mxu0  ;;  %8826 = vrot.lane.b32.xlu2 %v11249_v23, %s9487_s28  ;;  %v3059_v21 = vsel %vm3028_vm3, %v11226_v60, %v8048_v53  ;;  %v3060_v57 = vsel %vm3028_vm3, %v11216_v4, %v8049_v26 }
 0x2bb   :  { %v11270_v42 = vsel %vm3418_vm2, %v3383_v62, %v8609_v40  ;;  %v3816_v8 = vmul.f32 %v10984_v18, %v3662_v9  ;;  %v11279_v28 = vsel %vm3418_vm2, %v3382_v14, %v8608_v31  ;;  %v11303_v2 = vpack.i.bf16 %v843_v11, %v842_v44 }
 0x2bc   :  { %8821 = vrot.lane.b32.xlu1 %v11255_v6, %s9485_s26  ;;  %v8662_v15 = vpop.permute.xlu2 %8661  ;;  %v3497_v47 = vpack.c.bf16 %v11270_v42, %v11279_v28  ;;  %v3124_v22 = vsel %vm3093_vm5, %v3059_v21, %v8208_v59  ;;  %v3125_v40 = vsel %vm3093_vm5, %v3060_v57, %v8209_v50  ;;  %v8619_v31 = vunpack.i.h.bf16 %v11150_v7 }
 0x2bd   :  { %v3884_v25 = vadd.f32 %v10997_v37, %v3816_v8  ;;  %v8664_v10 = vunpack.i.h.bf16 %v8662_v15  ;;  %v8663_v34 = vunpack.i.l.bf16 %v8662_v15  ;;  %v8618_v14 = vunpack.i.l.bf16 %v11150_v7 }
 0x2be   :  { %8831 = vrot.lane.b32.xlu0 %v11265_v17, %s9486_s27  ;;  %v8612_v33 = vpop.permute.xlu1 %8611  ;;  %v11314_v4 = vpack.i.bf16 %v907_v54, %v906_v49  ;;  %v8633_v50 = vunpack.i.l.bf16 %v11184_v35 }
 0x2bf   :  { %v3948_v61 = vmax.f32 %v3884_v25, 0.0  ;;  %v11294_v36 = vsel %vm3158_vm4, %v3128_v52, %v8663_v34  ;;  %v11297_v56 = vsel %vm3158_vm4, %v3129_v41, %v8664_v10  ;;  %v8614_v12 = vunpack.i.h.bf16 %v8612_v33 }
 0x2c0   :  { %v8613_v43 = vunpack.i.l.bf16 %v8612_v33  ;;  %v8622_v46 = vpop.permute.xlu0 %8621 }
 0x2c1   :  { %4012 = vst.msk [vmem:[#allocation3 + $0x38] sm:$0xff] %vm3418_vm2, %v3948_v61  ;;  %v3190_v60 = vsel %vm3158_vm4, %v3125_v40, %v8614_v12  ;;  %v8624_v26 = vunpack.i.h.bf16 %v8622_v46  ;;  %v8623_v53 = vunpack.i.l.bf16 %v8622_v46 }
 0x2c2   :  { %v3189_v62 = vsel %vm3158_vm4, %v3124_v22, %v8613_v43  ;;  %v3665_v9 = vpop.f32.mrf.mxu0  ;;  %8841 = vrot.lane.b32.xlu2 %v11289_v16, %s9486_s27  ;;  %v3255_v27 = vsel %vm3223_vm6, %v3190_v60, %v8619_v31 }
 0x2c3   :  { %v3817_v32 = vmul.f32 %v10984_v18, %v3665_v9  ;;  %v3254_v8 = vsel %vm3223_vm6, %v3189_v62, %v8618_v14  ;;  %v3320_v13 = vsel %vm3288_vm7, %v3255_v27, %v8624_v26  ;;  %v13475_v14 = vld [vmem:[#allocation24_spill] sm:$0xff]  ;;  %v13476_v9 = vld [vmem:[#allocation42_spill] sm:$0xff] }
 0x2c4   :  { %8836 = vrot.lane.b32.xlu1 %v11303_v2, %s9487_s28  ;;  %v11319_v7 = vpop.permute.xlu2 %8676  ;;  %v3319_v11 = vsel %vm3288_vm7, %v3254_v8, %v8623_v53  ;;  %v7908_v62 = vunpack.i.l.bf16 %v13475_v14  ;;  %v7909_v60 = vunpack.i.h.bf16 %v13475_v14  ;;  %v772_v26 = vld [vmem:[#allocation2 + $0x387] sm:$0xff]  ;;  %v773_v53 = vld [vmem:[#allocation2 + $0x38f] sm:$0xff]  ;;  %v8069_v8 = vunpack.i.h.bf16 %v13476_v9 }
 0x2c5   :  { %v3885_v29 = vadd.f32 %v10997_v37, %v3817_v32  ;;  %7089 = vmatmul.msk.bf16.gmra.mxu0 %vm3535_vm9, %v3495_v20  ;;  %v4198_v20 = vmax.f32 %v4073_v5, %v4137_v24  ;;  %v13477_v27 = vld [vmem:[#allocation54_spill] sm:$0xff]  ;;  %v11389_v24 = vpack.i.bf16 %v773_v53, %v772_v26 }
 0x2c6   :  { %8846 = vrot.lane.b32.xlu0 %v11314_v4, %s9486_s27  ;;  %v8627_v15 = vpop.permute.xlu1 %8626  ;;  %v8228_v51 = vunpack.i.l.bf16 %v13477_v27  ;;  %v13478_v14 = vld [vmem:[#allocation22_spill] sm:$0xff] }
 0x2c7   :  { %v3949_v59 = vmax.f32 %v3885_v29, 0.0  ;;  %v8629_v25 = vunpack.i.h.bf16 %v8627_v15  ;;  %v8628_v10 = vunpack.i.l.bf16 %v8627_v15 }
 0x2c8   :  { %v4075_v34 = vld [vmem:[#allocation3 + $0x30] ss:$2 sm:$0xff]  ;;  %v4139_v44 = vld [vmem:[#allocation3 + $0x31] ss:$2 sm:$0xff]  ;;  %v11334_v58 = vpop.permute.xlu0 %8636 }
 0x2c9   :  { %v4199_v41 = vmax.f32 %v4075_v34, %v4139_v44  ;;  %4013 = vst.msk [vmem:[#allocation3 + $0x40] sm:$0xff] %vm3418_vm2, %v3949_v59  ;;  %v3384_v35 = vsel %vm3353_vm8, %v3319_v11, %v8628_v10  ;;  %v3385_v52 = vsel %vm3353_vm8, %v3320_v13, %v8629_v25  ;;  %v766_v25 = vld [vmem:[#allocation2 + $0x327] sm:$0xff] }
 0x2ca   :  { %v3667_v33 = vpop.f32.mrf.mxu0  ;;  %8856 = vrot.lane.b32.xlu2 %v11200_v0, %s9482_s19  ;;  %v11342_v61 = vsel %vm3418_vm2, %v3384_v35, %v8633_v50  ;;  %v11345_v12 = vsel %vm3418_vm2, %v3385_v52, %v8634_v3  ;;  %v9406_v3 = vld [vmem:[#allocation2 + $0x2af] sm:$0xff]  ;;  %v8679_v52 = vunpack.i.h.bf16 %v11319_v7 }
 0x2cb   :  { %v4229_v49 = vmax.f32 %v4198_v20, %v4199_v41  ;;  %v3818_v54 = vmul.f32 %v10984_v18, %v3667_v33  ;;  %v3498_v21 = vpack.c.bf16 %v11345_v12, %v11342_v61  ;;  %v3003_v50 = vsel %vm129_vm0, %v9406_v3, %v7909_v60  ;;  %v13480_v3 = vld [vmem:[#allocation58_spill] sm:$0xff] }
 0x2cc   :  { %8851 = vrot.lane.b32.xlu1 %v11178_v55, %s9482_s19  ;;  %v11352_v57 = vpop.permute.xlu2 %8691  ;;  %v3068_v10 = vsel %vm3028_vm3, %v3003_v50, %v8069_v8  ;;  %v8678_v33 = vunpack.i.l.bf16 %v11319_v7  ;;  %v7903_v7 = vunpack.i.l.bf16 %v13478_v14  ;;  %v13479_v8 = vld [vmem:[#allocation34_spill] sm:$0xff]  ;;  %v8224_v50 = vunpack.i.h.bf16 %v13480_v3 }
 0x2cd   :  { %4306 = vst.msk [vmem:[#allocation4 + $0x38] sm:$0xff] %vm3418_vm2, %v4229_v49  ;;  %v3886_v0 = vadd.f32 %v10997_v37, %v3818_v54  ;;  %v8900_v54 = vpack.i.bf16 %v10947_v30, %v766_v25  ;;  %v8649_v12 = vunpack.i.h.bf16 %v11234_v48 }
 0x2ce   :  { %8861 = vrot.lane.b32.xlu0 %v11221_v1, %s9484_s25  ;;  %v11358_v43 = vpop.permute.xlu1 %8641 }
 0x2cf   :  { %v3950_v46 = vmax.f32 %v3886_v0, 0.0 }
 0x2d0   :  { %v11360_v22 = vpop.permute.xlu0 %8651 }
 0x2d1   :  { %4014 = vst.msk [vmem:[#allocation3 + $0x48] sm:$0xff] %vm3418_vm2, %v3950_v46 }
 0x2d2   :  { %v3670_v40 = vpop.f32.mrf.mxu0  ;;  %8871 = vrot.lane.b32.xlu2 %v11249_v23, %s9484_s25 }
 0x2d3   :  { %v3819_v55 = vmul.f32 %v10984_v18, %v3670_v40 }
 0x2d4   :  { %8866 = vrot.lane.b32.xlu1 %v11255_v6, %s9482_s19  ;;  %v11368_v31 = vpop.permute.xlu2 %8706  ;;  %v8068_v6 = vunpack.i.l.bf16 %v13476_v9 }
 0x2d5   :  { %v3887_v1 = vadd.f32 %v10997_v37, %v3819_v55  ;;  %7090 = vmatmul.msk.bf16.gmra.mxu0 %vm3535_vm9, %v3496_v39  ;;  %v9405_v39 = vld [vmem:[#allocation2 + $0x2a7] sm:$0xff] }
 0x2d6   :  { %8876 = vrot.lane.b32.xlu0 %v11265_v17, %s9483_s24  ;;  %v11378_v23 = vpop.permute.xlu1 %8656  ;;  %v3002_v29 = vsel %vm129_vm0, %v9405_v39, %v7908_v62  ;;  %v8229_v17 = vunpack.i.h.bf16 %v13477_v27  ;;  %v836_v55 = vld [vmem:[#allocation2 + $0x388] sm:$0xff]  ;;  %v7904_v62 = vunpack.i.h.bf16 %v13478_v14  ;;  %v8063_v27 = vunpack.i.l.bf16 %v13479_v8 }
 0x2d7   :  { %v3951_v32 = vmax.f32 %v3887_v1, 0.0  ;;  %v3067_v15 = vsel %vm3028_vm3, %v3002_v29, %v8068_v6  ;;  %v837_v1 = vld [vmem:[#allocation2 + $0x390] sm:$0xff]  ;;  %v8064_v29 = vunpack.i.h.bf16 %v13479_v8 }
 0x2d8   :  { %v8667_v45 = vpop.permute.xlu0 %8666  ;;  %v3132_v34 = vsel %vm3093_vm5, %v3067_v15, %v8228_v51  ;;  %v3133_v35 = vsel %vm3093_vm5, %v3068_v10, %v8229_v17  ;;  %v8223_v15 = vunpack.i.l.bf16 %v13480_v3  ;;  %v9407_v10 = vld [vmem:[#allocation2 + $0x287] sm:$0xff] }
 0x2d9   :  { %4015 = vst.msk [vmem:[#allocation3 + $0x50] sm:$0xff] %vm3418_vm2, %v3951_v32  ;;  %v8669_v44 = vunpack.i.h.bf16 %v8667_v45 }
 0x2da   :  { %v3672_v5 = vpop.f32.mrf.mxu0  ;;  %8886 = vrot.lane.b32.xlu2 %v11289_v16, %s9483_s24  ;;  %v8668_v16 = vunpack.i.l.bf16 %v8667_v45 }
 0x2db   :  { %v3820_v59 = vmul.f32 %v10984_v18, %v3672_v5  ;;  %v3259_v60 = vsel %vm3223_vm6, %v11297_v56, %v8669_v44  ;;  %v11423_v56 = vpack.i.bf16 %v837_v1, %v836_v55  ;;  %v901_v55 = vld [vmem:[#allocation2 + $0x391] sm:$0xff] }
 0x2dc   :  { %8881 = vrot.lane.b32.xlu1 %v11303_v2, %s9484_s25  ;;  %v8722_v11 = vpop.permute.xlu2 %8721  ;;  %v3258_v30 = vsel %vm3223_vm6, %v11294_v36, %v8668_v16  ;;  %v780_v16 = vld [vmem:[#allocation2 + $0x407] sm:$0xff] }
 0x2dd   :  { %v3888_v13 = vadd.f32 %v10997_v37, %v3820_v59  ;;  %v8724_v20 = vunpack.i.h.bf16 %v8722_v11  ;;  %v8723_v41 = vunpack.i.l.bf16 %v8722_v11 }
 0x2de   :  { %8891 = vrot.lane.b32.xlu0 %v11389_v24, %s9485_s26  ;;  %v8672_v49 = vpop.permute.xlu1 %8671 }
 0x2df   :  { %v3952_v0 = vmax.f32 %v3888_v13, 0.0  ;;  %v11406_v2 = vsel %vm3158_vm4, %v3132_v34, %v8723_v41  ;;  %v11409_v46 = vsel %vm3158_vm4, %v3133_v35, %v8724_v20  ;;  %v8674_v40 = vunpack.i.h.bf16 %v8672_v49  ;;  %v781_v13 = vld [vmem:[#allocation2 + $0x40f] sm:$0xff]  ;;  %v4077_v35 = vld [vmem:[#allocation3 + $0x40] ss:$2 sm:$0xff] }
 0x2e0   :  { %v8673_v9 = vunpack.i.l.bf16 %v8672_v49  ;;  %v8682_v6 = vpop.permute.xlu0 %8681  ;;  %v3000_v34 = vsel %vm129_vm0, %v9407_v10, %v7903_v7  ;;  %v9408_v20 = vld [vmem:[#allocation2 + $0x28f] sm:$0xff]  ;;  %v8693_v49 = vunpack.i.l.bf16 %v11352_v57 }
 0x2e1   :  { %4016 = vst.msk [vmem:[#allocation3 + $0x58] sm:$0xff] %vm3418_vm2, %v3952_v0  ;;  %v3324_v32 = vsel %vm3288_vm7, %v3259_v60, %v8674_v40  ;;  %v8684_v26 = vunpack.i.h.bf16 %v8682_v6  ;;  %v8683_v53 = vunpack.i.l.bf16 %v8682_v6  ;;  %v3065_v41 = vsel %vm3028_vm3, %v3000_v34, %v8063_v27  ;;  %v900_v40 = vld [vmem:[#allocation2 + $0x389] sm:$0xff] }
 0x2e2   :  { %v3323_v51 = vsel %vm3288_vm7, %v3258_v30, %v8673_v9  ;;  %v3389_v45 = vsel %vm3353_vm8, %v3324_v32, %v8679_v52  ;;  %v3675_v39 = vpop.f32.mrf.mxu0  ;;  %8901 = vrot.lane.b32.xlu2 %v8900_v54, %s9485_s26  ;;  %v4141_v52 = vld [vmem:[#allocation3 + $0x41] ss:$2 sm:$0xff]  ;;  %v3130_v1 = vsel %vm3093_vm5, %v3065_v41, %v8223_v15  ;;  %v11457_v9 = vpack.i.bf16 %v781_v13, %v780_v16  ;;  %v845_v10 = vld [vmem:[#allocation2 + $0x410] sm:$0xff] }
 0x2e3   :  { %v3388_v36 = vsel %vm3353_vm8, %v3323_v51, %v8678_v33  ;;  %v11428_v17 = vsel %vm3418_vm2, %v3389_v45, %v8684_v26  ;;  %v3821_v5 = vmul.f32 %v10984_v18, %v3675_v39  ;;  %v8694_v33 = vunpack.i.h.bf16 %v11352_v57  ;;  %v13481_v26 = vld [vmem:[#allocation16_spill] sm:$0xff]  ;;  %v844_v15 = vld [vmem:[#allocation2 + $0x408] sm:$0xff]  ;;  %v13482_v13 = vld [vmem:[#allocation21_spill] sm:$0xff] }
 0x2e4   :  { %v11434_v59 = vsel %vm3418_vm2, %v3388_v36, %v8683_v53  ;;  %8896 = vrot.lane.b32.xlu1 %v11314_v4, %s9483_s24  ;;  %v11438_v25 = vpop.permute.xlu2 %8736  ;;  %v3001_v4 = vsel %vm129_vm0, %v9408_v20, %v7904_v62  ;;  %v4200_v57 = vmax.f32 %v4077_v35, %v4141_v52  ;;  %v7914_v53 = vunpack.i.h.bf16 %v13481_v26  ;;  %v9409_v34 = vld [vmem:[#allocation2 + $0x2cf] sm:$0xff] }
 0x2e5   :  { %v3500_v44 = vpack.c.bf16 %v11428_v17, %v11434_v59  ;;  %v3889_v11 = vadd.f32 %v10997_v37, %v3821_v5  ;;  %7091 = vmatmul.msk.bf16.gmra.mxu0 %vm3535_vm9, %v3497_v47  ;;  %v3066_v42 = vsel %vm3028_vm3, %v3001_v4, %v8064_v29  ;;  %v11467_v45 = vpack.i.bf16 %v901_v55, %v900_v40  ;;  %v908_v52 = vld [vmem:[#allocation2 + $0x409] sm:$0xff] }
 0x2e6   :  { %8906 = vrot.lane.b32.xlu0 %v11423_v56, %s9487_s28  ;;  %v8687_v54 = vpop.permute.xlu1 %8686  ;;  %v3131_v14 = vsel %vm3093_vm5, %v3066_v42, %v8224_v50  ;;  %v7894_v20 = vunpack.i.h.bf16 %v13482_v13 }
 0x2e7   :  { %v3953_v28 = vmax.f32 %v3889_v11, 0.0  ;;  %v8689_v47 = vunpack.i.h.bf16 %v8687_v54  ;;  %v8688_v0 = vunpack.i.l.bf16 %v8687_v54  ;;  %v8709_v11 = vunpack.i.h.bf16 %v11368_v31 }
 0x2e8   :  { %v4079_v62 = vld [vmem:[#allocation3 + $0x50] ss:$2 sm:$0xff]  ;;  %v4143_v7 = vld [vmem:[#allocation3 + $0x51] ss:$2 sm:$0xff]  ;;  %v8697_v60 = vpop.permute.xlu0 %8696 }
 0x2e9   :  { %v4201_v6 = vmax.f32 %v4079_v62, %v4143_v7  ;;  %4017 = vst.msk [vmem:[#allocation3 + $0x60] sm:$0xff] %vm3418_vm2, %v3953_v28  ;;  %v3195_v30 = vsel %vm3158_vm4, %v3130_v1, %v8688_v0  ;;  %v3196_v32 = vsel %vm3158_vm4, %v3131_v14, %v8689_v47  ;;  %v8699_v36 = vunpack.i.h.bf16 %v8697_v60  ;;  %v371_v28 = vld [vmem:[#allocation2 + $0x247] sm:$0xff]  ;;  %v372_v47 = vld [vmem:[#allocation2 + $0x24f] sm:$0xff] }
 0x2ea   :  { %v3260_v8 = vsel %vm3223_vm6, %v3195_v30, %v8693_v49  ;;  %v3261_v27 = vsel %vm3223_vm6, %v3196_v32, %v8694_v33  ;;  %v3677_v51 = vpop.f32.mrf.mxu0  ;;  %8916 = vrot.lane.b32.xlu2 %v10988_v19, %s9487_s28  ;;  %v8698_v5 = vunpack.i.l.bf16 %v8697_v60  ;;  %v3005_v19 = vsel %vm129_vm0, %v9409_v34, %v7914_v53  ;;  %v13483_v0 = vld [vmem:[#allocation39_spill] sm:$0xff]  ;;  %v13484_v62 = vld [vmem:[#allocation44_spill] sm:$0xff]  ;;  %v13485_v32 = vld [vmem:[#allocation53_spill] sm:$0xff] }
 0x2eb   :  { %v4230_v39 = vmax.f32 %v4200_v57, %v4201_v6  ;;  %v3822_v29 = vmul.f32 %v10984_v18, %v3677_v51  ;;  %v8708_v18 = vunpack.i.l.bf16 %v11368_v31  ;;  %v7893_v33 = vunpack.i.l.bf16 %v13482_v13  ;;  %v11528_v34 = vld [vmem:[%s13356_s3] ss:$0 sm:$0xff] }
 0x2ec   :  { %8911 = vrot.lane.b32.xlu1 %v11457_v9, %s9485_s26  ;;  %v11472_v3 = vpop.permute.xlu2 %8751  ;;  %v3325_v49 = vsel %vm3288_vm7, %v3260_v8, %v8698_v5  ;;  %v3326_v54 = vsel %vm3288_vm7, %v3261_v27, %v8699_v36  ;;  %v11487_v31 = vpack.i.bf16 %v845_v10, %v844_v15  ;;  %v8054_v40 = vunpack.i.h.bf16 %v13483_v0  ;;  %v11510_v27 = vld [vmem:[%s13355_s2] ss:$0 sm:$0xff] }
 0x2ed   :  { %4307 = vst.msk [vmem:[#allocation4 + $0x50] sm:$0xff] %vm3418_vm2, %v4230_v39  ;;  %v3890_v50 = vadd.f32 %v10997_v37, %v3822_v29  ;;  %v909_v37 = vld [vmem:[#allocation2 + $0x411] sm:$0xff]  ;;  %v8053_v55 = vunpack.i.l.bf16 %v13483_v0  ;;  %v8074_v7 = vunpack.i.h.bf16 %v13484_v62  ;;  %v8214_v53 = vunpack.i.h.bf16 %v13485_v32 }
 0x2ee   :  { %8921 = vrot.lane.b32.xlu0 %v11467_v45, %s9486_s27  ;;  %v8702_v16 = vpop.permute.xlu1 %8701  ;;  %v11497_v57 = vpack.i.bf16 %v909_v37, %v908_v52  ;;  %v8213_v8 = vunpack.i.l.bf16 %v13485_v32  ;;  %v2997_v39 = vsel %vm129_vm0, %v372_v47, %v7894_v20  ;;  %v2996_v29 = vsel %vm129_vm0, %v371_v28, %v7893_v33  ;;  %v13487_v47 = vld [vmem:[#allocation45_spill] sm:$0xff] }
 0x2ef   :  { %v3954_v4 = vmax.f32 %v3890_v50, 0.0  ;;  %v8704_v41 = vunpack.i.h.bf16 %v8702_v16  ;;  %v8703_v35 = vunpack.i.l.bf16 %v8702_v16  ;;  %v8639_v36 = vunpack.i.h.bf16 %v11334_v58 }
 0x2f0   :  { %v11485_v42 = vpop.permute.xlu0 %8711  ;;  %v8638_v5 = vunpack.i.l.bf16 %v11334_v58  ;;  %v8644_v15 = vunpack.i.h.bf16 %v11358_v43  ;;  %v8643_v10 = vunpack.i.l.bf16 %v11358_v43  ;;  %v3061_v16 = vsel %vm3028_vm3, %v2996_v29, %v8053_v55 }
 0x2f1   :  { %4018 = vst.msk [vmem:[#allocation3 + $0x68] sm:$0xff] %vm3418_vm2, %v3954_v4  ;;  %v3390_v1 = vsel %vm3353_vm8, %v3325_v49, %v8703_v35  ;;  %v3391_v14 = vsel %vm3353_vm8, %v3326_v54, %v8704_v41  ;;  %v3070_v43 = vsel %vm3028_vm3, %v3005_v19, %v8074_v7  ;;  %v3126_v20 = vsel %vm3093_vm5, %v3061_v16, %v8213_v8  ;;  %v13486_v49 = vld [vmem:[#allocation26_spill] sm:$0xff] }
 0x2f2   :  { %v3680_v60 = vpop.f32.mrf.mxu0  ;;  %8931 = vrot.lane.b32.xlu2 %v11002_v63, %s9486_s27  ;;  %v11500_v6 = vsel %vm3418_vm2, %v3390_v1, %v8708_v18  ;;  %v11503_v30 = vsel %vm3418_vm2, %v3391_v14, %v8709_v11  ;;  %v3062_v18 = vsel %vm3028_vm3, %v2997_v39, %v8054_v40  ;;  %v3191_v35 = vsel %vm3158_vm4, %v3126_v20, %v8638_v5  ;;  %v13488_v39 = vld [vmem:[#allocation59_spill] sm:$0xff] }
 0x2f3   :  { %v3823_v51 = vmul.f32 %v11510_v27, %v3680_v60  ;;  %v3501_v63 = vpack.c.bf16 %v11503_v30, %v11500_v6  ;;  %v3127_v4 = vsel %vm3093_vm5, %v3062_v18, %v8214_v53  ;;  %v3256_v37 = vsel %vm3223_vm6, %v3191_v35, %v8643_v10  ;;  %v383_v60 = vld [vmem:[#allocation2 + $0x307] sm:$0xff] }
 0x2f4   :  { %8926 = vrot.lane.b32.xlu1 %v11487_v31, %s9487_s28  ;;  %v11521_v50 = vpop.permute.xlu2 %8766  ;;  %v3192_v19 = vsel %vm3158_vm4, %v3127_v4, %v8639_v36  ;;  %v7924_v54 = vunpack.i.h.bf16 %v13486_v49  ;;  %v7923_v28 = vunpack.i.l.bf16 %v13486_v49  ;;  %v8084_v0 = vunpack.i.h.bf16 %v13487_v47  ;;  %v774_v16 = vld [vmem:[#allocation2 + $0x3a7] sm:$0xff] }
 0x2f5   :  { %v3891_v11 = vadd.f32 %v11528_v34, %v3823_v51  ;;  %7092 = vmatmul.msk.bf16.gmra.mxu0 %vm3535_vm9, %v3498_v21  ;;  %v8769_v58 = vunpack.i.h.bf16 %v11521_v50  ;;  %v8648_v21 = vunpack.i.l.bf16 %v11234_v48  ;;  %v3257_v33 = vsel %vm3223_vm6, %v3192_v19, %v8644_v15  ;;  %v384_v48 = vld [vmem:[#allocation2 + $0x30f] sm:$0xff] }
 0x2f6   :  { %8936 = vrot.lane.b32.xlu0 %v11497_v57, %s9486_s27  ;;  %v8717_v13 = vpop.permute.xlu1 %8716  ;;  %v8083_v55 = vunpack.i.l.bf16 %v13487_v47  ;;  %v8654_v1 = vunpack.i.h.bf16 %v11360_v22  ;;  %v8653_v14 = vunpack.i.l.bf16 %v11360_v22  ;;  %v3322_v53 = vsel %vm3288_vm7, %v3257_v33, %v8649_v12 }
 0x2f7   :  { %v3955_v41 = vmax.f32 %v3891_v11, 0.0  ;;  %v11544_v61 = vsel %vm3093_vm5, %v3070_v43, %v8769_v58  ;;  %v3321_v32 = vsel %vm3288_vm7, %v3256_v37, %v8648_v21  ;;  %v8659_v8 = vunpack.i.h.bf16 %v11378_v23  ;;  %v775_v43 = vld [vmem:[#allocation2 + $0x3af] sm:$0xff] }
 0x2f8   :  { %v11550_v52 = vpop.permute.xlu0 %8726  ;;  %v8658_v51 = vunpack.i.l.bf16 %v11378_v23  ;;  %v8234_v29 = vunpack.i.h.bf16 %v13488_v39  ;;  %v8713_v22 = vunpack.i.l.bf16 %v11485_v42  ;;  %v3009_v5 = vsel %vm129_vm0, %v384_v48, %v7924_v54  ;;  %v782_v48 = vld [vmem:[#allocation2 + $0x427] sm:$0xff] }
 0x2f9   :  { %4019 = vst.msk [vmem:[#allocation3 + $0x70] sm:$0xff] %vm3418_vm2, %v3955_v41  ;;  %v8719_v15 = vunpack.i.h.bf16 %v8717_v13  ;;  %v8718_v10 = vunpack.i.l.bf16 %v8717_v13  ;;  %v3008_v23 = vsel %vm129_vm0, %v383_v60, %v7923_v28  ;;  %v3387_v58 = vsel %vm3353_vm8, %v3322_v53, %v8654_v1  ;;  %v838_v28 = vld [vmem:[#allocation2 + $0x3a8] sm:$0xff] }
 0x2fa   :  { %v3682_v40 = vpop.f32.mrf.mxu0  ;;  %8946 = vrot.lane.b32.xlu2 %v11423_v56, %s9484_s25  ;;  %v3074_v20 = vsel %vm3028_vm3, %v3009_v5, %v8084_v0  ;;  %v3073_v4 = vsel %vm3028_vm3, %v3008_v23, %v8083_v55  ;;  %v3452_v41 = vsel %vm3418_vm2, %v3387_v58, %v8659_v8  ;;  %v8729_v35 = vunpack.i.h.bf16 %v11550_v52  ;;  %v783_v55 = vld [vmem:[#allocation2 + $0x42f] sm:$0xff] }
 0x2fb   :  { %v3824_v7 = vmul.f32 %v11510_v27, %v3682_v40  ;;  %v3138_v12 = vsel %vm3093_vm5, %v3073_v4, %v8234_v29  ;;  %v3139_v21 = vsel %vm3093_vm5, %v3074_v20, %v8713_v22  ;;  %v8728_v19 = vunpack.i.l.bf16 %v11550_v52  ;;  %v839_v40 = vld [vmem:[#allocation2 + $0x3b0] sm:$0xff] }
 0x2fc   :  { %8941 = vrot.lane.b32.xlu1 %v11389_v24, %s9482_s19  ;;  %v11570_v56 = vpop.permute.xlu2 %8781  ;;  %v3386_v24 = vsel %vm3353_vm8, %v3321_v32, %v8653_v14  ;;  %v3203_v37 = vsel %vm3158_vm4, %v3138_v12, %v8718_v10  ;;  %v3204_v33 = vsel %vm3158_vm4, %v3139_v21, %v8719_v15  ;;  %v11598_v54 = vpack.i.bf16 %v775_v43, %v774_v16  ;;  %v4081_v14 = vld [vmem:[#allocation3 + $0x60] ss:$2 sm:$0xff] }
 0x2fd   :  { %v3892_v36 = vadd.f32 %v11528_v34, %v3824_v7  ;;  %v3451_v13 = vsel %vm3418_vm2, %v3386_v24, %v8658_v51  ;;  %v8739_v52 = vunpack.i.h.bf16 %v11438_v25  ;;  %v8738_v1 = vunpack.i.l.bf16 %v11438_v25  ;;  %v4145_v7 = vld [vmem:[#allocation3 + $0x61] ss:$2 sm:$0xff]  ;;  %v128_v25 = vld [vmem:[%s13353_s0 + $0x1f8] sm:$0xff] }
 0x2fe   :  { %8951 = vrot.lane.b32.xlu0 %v11457_v9, %s9482_s19  ;;  %v11578_v11 = vpop.permute.xlu1 %8731  ;;  %v3499_v47 = vpack.c.bf16 %v3452_v41, %v3451_v13  ;;  %v3268_v32 = vsel %vm3223_vm6, %v3203_v37, %v8728_v19  ;;  %v3269_v53 = vsel %vm3223_vm6, %v3204_v33, %v8729_v35  ;;  %v11622_v22 = vpack.i.bf16 %v839_v40, %v838_v28 }
 0x2ff   :  { %v3956_v18 = vmax.f32 %v3892_v36, 0.0  ;;  %v8733_v51 = vunpack.i.l.bf16 %v11578_v11  ;;  %338 = vst.msk [vmem:[#allocation2 + $0x450] sm:$0xff] %vm129_vm0, %v128_v25  ;;  %v4202_v36 = vmax.f32 %v4081_v14, %v4145_v7  ;;  %v11625_v10 = vpack.i.bf16 %v783_v55, %v782_v48  ;;  %v903_v14 = vld [vmem:[#allocation2 + $0x3b1] sm:$0xff] }
 0x300   :  { %v11587_v9 = vpop.permute.xlu0 %8741  ;;  %v3334_v16 = vsel %vm3288_vm7, %v3269_v53, %v8739_v52  ;;  %v8754_v40 = vunpack.i.h.bf16 %v11472_v3  ;;  %v8753_v48 = vunpack.i.l.bf16 %v11472_v3  ;;  %v910_v53 = vld [vmem:[#allocation2 + $0x429] sm:$0xff] }
 0x301   :  { %4020 = vst.msk [vmem:[#allocation3 + $0x78] sm:$0xff] %vm3418_vm2, %v3956_v18  ;;  %v8744_v58 = vunpack.i.h.bf16 %v11587_v9  ;;  %v3262_v12 = vsel %vm3223_vm6, %v11406_v2, %v8733_v51  ;;  %v8743_v35 = vunpack.i.l.bf16 %v11587_v9  ;;  %v847_v2 = vld [vmem:[#allocation2 + $0x430] sm:$0xff] }
 0x302   :  { %v3685_v49 = vpop.f32.mrf.mxu0  ;;  %8961 = vrot.lane.b32.xlu2 %v11487_v31, %s9484_s25  ;;  %v127_v31 = vld [vmem:[%s13353_s0 + $0x1f0] sm:$0xff]  ;;  %s9488_s0 = smov 96  }
 0x303   :  { %v3825_v0 = vmul.f32 %v11510_v27, %v3685_v49  ;;  %337 = vst.msk [vmem:[#allocation2 + $0x448] sm:$0xff] %vm129_vm0, %v127_v31  ;;  %v3327_v7 = vsel %vm3288_vm7, %v3262_v12, %v8743_v35  ;;  %v8784_v12 = vunpack.i.h.bf16 %v11570_v56 }
 0x304   :  { %8956 = vrot.lane.b32.xlu1 %v11467_v45, %s9483_s24  ;;  %v11605_v60 = vpop.permute.xlu2 %8796  ;;  %v8734_v45 = vunpack.i.h.bf16 %v11578_v11  ;;  %v3333_v11 = vsel %vm3288_vm7, %v3268_v32, %v8738_v1  ;;  %v902_v1 = vld [vmem:[#allocation2 + $0x3a9] sm:$0xff] }
 0x305   :  { %v3893_v8 = vadd.f32 %v11528_v34, %v3825_v0  ;;  %7093 = vmatmul.msk.bf16.gmra.mxu0 %vm3535_vm9, %v3499_v47  ;;  %v846_v0 = vld [vmem:[#allocation2 + $0x428] sm:$0xff]  ;;  %v8799_v17 = vunpack.i.h.bf16 %v11605_v60 }
 0x306   :  { %8966 = vrot.lane.b32.xlu0 %v11598_v54, %s9485_s26  ;;  %v8747_v29 = vpop.permute.xlu1 %8746  ;;  %v3263_v21 = vsel %vm3223_vm6, %v11409_v46, %v8734_v45  ;;  %v11656_v31 = vpack.i.bf16 %v847_v2, %v846_v0 }
 0x307   :  { %v3957_v5 = vmax.f32 %v3893_v8, 0.0  ;;  %v8749_v15 = vunpack.i.h.bf16 %v8747_v29  ;;  %v8748_v18 = vunpack.i.l.bf16 %v8747_v29  ;;  %v3328_v55 = vsel %vm3288_vm7, %v3263_v21, %v8744_v58  ;;  %v911_v8 = vld [vmem:[#allocation2 + $0x431] sm:$0xff] }
 0x308   :  { %v4083_v23 = vld [vmem:[#allocation3 + $0x70] ss:$2 sm:$0xff]  ;;  %v4147_v24 = vld [vmem:[#allocation3 + $0x71] ss:$2 sm:$0xff]  ;;  %v8757_v43 = vpop.permute.xlu0 %8756  ;;  %v3393_v45 = vsel %vm3353_vm8, %v3328_v55, %v8754_v40  ;;  %v11661_v29 = vpack.i.bf16 %v903_v14, %v902_v1  ;;  %v7913_v58 = vunpack.i.l.bf16 %v13481_v26  ;;  %v8783_v26 = vunpack.i.l.bf16 %v11570_v56 }
 0x309   :  { %v4203_v20 = vmax.f32 %v4083_v23, %v4147_v24  ;;  %4021 = vst.msk [vmem:[#allocation3 + $0x80] sm:$0xff] %vm3418_vm2, %v3957_v5  ;;  %v3399_v4 = vsel %vm3353_vm8, %v3334_v16, %v8749_v15  ;;  %v8759_v13 = vunpack.i.h.bf16 %v8757_v43  ;;  %v8758_v41 = vunpack.i.l.bf16 %v8757_v43 }
 0x30a   :  { %v3398_v19 = vsel %vm3353_vm8, %v3333_v11, %v8748_v18  ;;  %v3687_v37 = vpop.f32.mrf.mxu0  ;;  %8976 = vrot.lane.b32.xlu2 %v11622_v22, %s9487_s28  ;;  %v11673_v24 = vpack.i.bf16 %v911_v8, %v910_v53  ;;  %v8073_v16 = vunpack.i.l.bf16 %v13484_v62  ;;  %v9412_v62 = vld [vmem:[#allocation2 + $0x2c7] sm:$0xff] }
 0x30b   :  { %v4231_v33 = vmax.f32 %v4202_v36, %v4203_v20  ;;  %v3826_v49 = vmul.f32 %v11510_v27, %v3687_v37  ;;  %v3463_v28 = vsel %vm3418_vm2, %v3398_v19, %v8758_v41  ;;  %v3464_v47 = vsel %vm3418_vm2, %v3399_v4, %v8759_v13 }
 0x30c   :  { %8971 = vrot.lane.b32.xlu1 %v11497_v57, %s9483_s24  ;;  %v3505_v46 = vpack.c.bf16 %v3464_v47, %v3463_v28  ;;  %v11646_v9 = vpop.permute.xlu2 %8811  ;;  %v3392_v36 = vsel %vm3353_vm8, %v3327_v7, %v8753_v48  ;;  %v8233_v20 = vunpack.i.l.bf16 %v13488_v39  ;;  %v3004_v41 = vsel %vm129_vm0, %v9412_v62, %v7913_v58  ;;  %v841_v58 = vld [vmem:[#allocation2 + $0x3d0] sm:$0xff] }
 0x30d   :  { %4308 = vst.msk [vmem:[#allocation4 + $0x68] sm:$0xff] %vm3418_vm2, %v4231_v33  ;;  %v3894_v52 = vadd.f32 %v11528_v34, %v3826_v49  ;;  %v8798_v39 = vunpack.i.l.bf16 %v11605_v60  ;;  %v3069_v35 = vsel %vm3028_vm3, %v3004_v41, %v8073_v16  ;;  %v8813_v59 = vunpack.i.l.bf16 %v11646_v9  ;;  %v393_v41 = vld [vmem:[#allocation2 + $0x3a7] sm:$0xff] }
 0x30e   :  { %8981 = vrot.lane.b32.xlu0 %v11625_v10, %s9485_s26  ;;  %7099 = vmatmul.msk.bf16.vlgmr.msra.gmra.mxu1 %vm3535_vm9, %v3505_v46  ;;  %v8762_v57 = vpop.permute.xlu1 %8761  ;;  %v3134_v19 = vsel %vm3093_vm5, %v3069_v35, %v8233_v20  ;;  %v8814_v37 = vunpack.i.h.bf16 %v11646_v9  ;;  %v3200_v60 = vsel %vm3158_vm4, %v11544_v61, %v8784_v12 }
 0x30f   :  { %v3958_v32 = vmax.f32 %v3894_v52, 0.0  ;;  %v8764_v3 = vunpack.i.h.bf16 %v8762_v57  ;;  %v8763_v25 = vunpack.i.l.bf16 %v8762_v57  ;;  %v3199_v33 = vsel %vm3158_vm4, %v3134_v19, %v8783_v26  ;;  %v776_v57 = vld [vmem:[#allocation2 + $0x3c7] sm:$0xff]  ;;  %v394_v26 = vld [vmem:[#allocation2 + $0x3af] sm:$0xff] }
 0x310   :  { %v11659_v51 = vpop.permute.xlu0 %8771  ;;  %v3264_v47 = vsel %vm3223_vm6, %v3199_v33, %v8798_v39  ;;  %v3265_v2 = vsel %vm3223_vm6, %v3200_v60, %v8799_v17  ;;  %v13491_v17 = vld [vmem:[#allocation46_spill] sm:$0xff]  ;;  %v785_v33 = vld [vmem:[#allocation2 + $0x44f] sm:$0xff] }
 0x311   :  { %4022 = vst.msk [vmem:[#allocation3 + $0x88] sm:$0xff] %vm3418_vm2, %v3958_v32  ;;  %v11666_v5 = vsel %vm3418_vm2, %v3393_v45, %v8764_v3  ;;  %v11669_v15 = vsel %vm3418_vm2, %v3392_v36, %v8763_v25  ;;  %v3329_v40 = vsel %vm3288_vm7, %v3264_v47, %v8813_v59  ;;  %v3330_v9 = vsel %vm3288_vm7, %v3265_v2, %v8814_v37  ;;  %v777_v32 = vld [vmem:[#allocation2 + $0x3cf] sm:$0xff]  ;;  %v13489_v25 = vld [vmem:[#allocation17_spill] sm:$0xff]  ;;  %v784_v37 = vld [vmem:[#allocation2 + $0x447] sm:$0xff] }
 0x312   :  { %v3690_v23 = vpop.f32.mrf.mxu0  ;;  %8991 = vrot.lane.b32.xlu2 %v11656_v31, %s9487_s28  ;;  %v3502_v18 = vpack.c.bf16 %v11666_v5, %v11669_v15  ;;  %v7929_v45 = vunpack.i.h.bf16 %v13489_v25  ;;  %v7928_v16 = vunpack.i.l.bf16 %v13489_v25  ;;  %v8088_v59 = vunpack.i.l.bf16 %v13491_v17 }
 0x313   :  { %v3827_v11 = vmul.f32 %v11510_v27, %v3690_v23  ;;  %v840_v23 = vld [vmem:[#allocation2 + $0x3c8] sm:$0xff]  ;;  %v8768_v2 = vunpack.i.l.bf16 %v11521_v50 }
 0x314   :  { %8986 = vrot.lane.b32.xlu1 %v11661_v29, %s9486_s27  ;;  %v8827_v43 = vpop.permute.xlu2 %8826 }
 0x315   :  { %v3895_v4 = vadd.f32 %v11528_v34, %v3827_v11  ;;  %7094 = vmatmul.msk.bf16.gmra.mxu0 %vm3535_vm9, %v3500_v44  ;;  %v8829_v56 = vunpack.i.h.bf16 %v8827_v43  ;;  %v8828_v49 = vunpack.i.l.bf16 %v8827_v43  ;;  %v386_v11 = vld [vmem:[#allocation2 + $0x32f] sm:$0xff]  ;;  %v13490_v43 = vld [vmem:[#allocation29_spill] sm:$0xff] }
 0x316   :  { %8996 = vrot.lane.b32.xlu0 %v11673_v24, %s9486_s27  ;;  %v11691_v13 = vpop.permute.xlu1 %8776  ;;  %v7949_v20 = vunpack.i.h.bf16 %v13490_v43  ;;  %v3011_v35 = vsel %vm129_vm0, %v386_v11, %v7929_v45  ;;  %v912_v11 = vld [vmem:[#allocation2 + $0x449] sm:$0xff] }
 0x317   :  { %v3959_v21 = vmax.f32 %v3895_v4, 0.0  ;;  %v3394_v61 = vsel %vm3353_vm8, %v3329_v40, %v8828_v49  ;;  %v3395_v52 = vsel %vm3353_vm8, %v3330_v9, %v8829_v56  ;;  %v9413_v56 = vld [vmem:[#allocation2 + $0x327] sm:$0xff]  ;;  %v8714_v49 = vunpack.i.h.bf16 %v11485_v42  ;;  %v13492_v9 = vld [vmem:[#allocation40_spill] sm:$0xff] }
 0x318   :  { %v11699_v44 = vpop.permute.xlu0 %8786  ;;  %v4085_v12 = vld [vmem:[#allocation3 + $0x80] ss:$2 sm:$0xff]  ;;  %v4149_v39 = vld [vmem:[#allocation3 + $0x81] ss:$2 sm:$0xff]  ;;  %v3010_v6 = vsel %vm129_vm0, %v9413_v56, %v7928_v16  ;;  %v11757_v30 = vsel %vm129_vm0, %v394_v26, %v7949_v20  ;;  %v11770_v42 = vpack.i.bf16 %v785_v33, %v784_v37  ;;  %v913_v16 = vld [vmem:[#allocation2 + $0x451] sm:$0xff] }
 0x319   :  { %4023 = vst.msk [vmem:[#allocation3 + $0x90] sm:$0xff] %vm3418_vm2, %v3959_v21  ;;  %v4204_v40 = vmax.f32 %v4085_v12, %v4149_v39 }
 0x31a   :  { %v3692_v28 = vpop.f32.mrf.mxu0  ;;  %9006 = vrot.lane.b32.xlu2 %v11622_v22, %s9484_s25 }
 0x31b   :  { %v3828_v0 = vmul.f32 %v11510_v27, %v3692_v28 }
 0x31c   :  { %9001 = vrot.lane.b32.xlu1 %v11598_v54, %s9482_s19  ;;  %v8842_v46 = vpop.permute.xlu2 %8841 }
 0x31d   :  { %v3896_v48 = vadd.f32 %v11528_v34, %v3828_v0  ;;  %v8844_v22 = vunpack.i.h.bf16 %v8842_v46  ;;  %v8843_v55 = vunpack.i.l.bf16 %v8842_v46 }
 0x31e   :  { %9011 = vrot.lane.b32.xlu0 %v11625_v10, %s9482_s19  ;;  %v11721_v1 = vpop.permute.xlu1 %8791  ;;  %v9025_v10 = vpack.i.bf16 %v777_v32, %v776_v57  ;;  %v848_v32 = vld [vmem:[#allocation2 + $0x448] sm:$0xff] }
 0x31f   :  { %v3960_v14 = vmax.f32 %v3896_v48, 0.0  ;;  %v11724_v7 = vsel %vm3418_vm2, %v3394_v61, %v8843_v55  ;;  %v11727_v54 = vsel %vm3418_vm2, %v3395_v52, %v8844_v22  ;;  %v8109_v48 = vunpack.i.h.bf16 %v13492_v9 }
 0x320   :  { %v3503_v3 = vpack.c.bf16 %v11727_v54, %v11724_v7  ;;  %v11731_v53 = vpop.permute.xlu0 %8801  ;;  %v8108_v22 = vunpack.i.l.bf16 %v13492_v9  ;;  %v8774_v55 = vunpack.i.h.bf16 %v11659_v51  ;;  %v3075_v52 = vsel %vm3028_vm3, %v3010_v6, %v8088_v59 }
 0x321   :  { %4024 = vst.msk [vmem:[#allocation3 + $0x98] sm:$0xff] %vm3418_vm2, %v3960_v14  ;;  %v8773_v14 = vunpack.i.l.bf16 %v11659_v51  ;;  %v3140_v45 = vsel %vm3093_vm5, %v3075_v52, %v8714_v49  ;;  %v905_v51 = vld [vmem:[#allocation2 + $0x3d1] sm:$0xff]  ;;  %v8804_v20 = vunpack.i.h.bf16 %v11731_v53  ;;  %v8803_v26 = vunpack.i.l.bf16 %v11731_v53 }
 0x322   :  { %v3695_v8 = vpop.f32.mrf.mxu0  ;;  %9021 = vrot.lane.b32.xlu2 %v11656_v31, %s9484_s25  ;;  %v7948_v31 = vunpack.i.l.bf16 %v13490_v43  ;;  %v8779_v59 = vunpack.i.h.bf16 %v11691_v13  ;;  %v8778_v53 = vunpack.i.l.bf16 %v11691_v13  ;;  %v3084_v52 = vsel %vm3028_vm3, %v11757_v30, %v8109_v48 }
 0x323   :  { %v3829_v36 = vmul.f32 %v11510_v27, %v3695_v8  ;;  %v849_v8 = vld [vmem:[#allocation2 + $0x450] sm:$0xff]  ;;  %v3205_v39 = vsel %vm3158_vm4, %v3140_v45, %v8773_v14 }
 0x324   :  { %9016 = vrot.lane.b32.xlu1 %v11661_v29, %s9483_s24  ;;  %v11742_v4 = vpop.permute.xlu2 %8856  ;;  %v9035_v29 = vpack.i.bf16 %v841_v58, %v840_v23  ;;  %v11762_v0 = vsel %vm129_vm0, %v393_v41, %v7948_v31  ;;  %v8788_v23 = vunpack.i.l.bf16 %v11699_v44  ;;  %v9050_v12 = vpack.i.bf16 %v849_v8, %v848_v32 }
 0x325   :  { %v3897_v62 = vadd.f32 %v11528_v34, %v3829_v36  ;;  %7095 = vmatmul.msk.bf16.gmra.mxu0 %vm3535_vm9, %v3501_v63  ;;  %v8089_v63 = vunpack.i.h.bf16 %v13491_v17  ;;  %v8789_v36 = vunpack.i.h.bf16 %v11699_v44  ;;  %v11792_v17 = vpack.i.bf16 %v913_v16, %v912_v11 }
 0x326   :  { %9026 = vrot.lane.b32.xlu0 %v9025_v10, %s9485_s26  ;;  %v11751_v21 = vpop.permute.xlu1 %8806  ;;  %v904_v10 = vld [vmem:[#allocation2 + $0x3c9] sm:$0xff]  ;;  %v3083_v32 = vsel %vm3028_vm3, %v11762_v0, %v8108_v22  ;;  %v3149_v8 = vsel %vm3093_vm5, %v3084_v52, %v8779_v59  ;;  %v8858_v52 = vunpack.i.l.bf16 %v11742_v4 }
 0x327   :  { %v3961_v19 = vmax.f32 %v3897_v62, 0.0  ;;  %v3076_v25 = vsel %vm3028_vm3, %v3011_v35, %v8089_v63  ;;  %v9045_v35 = vpack.i.bf16 %v905_v51, %v904_v10  ;;  %v787_v59 = vld [vmem:[#allocation2 + $0x46f] sm:$0xff] }
 0x328   :  { %v4087_v28 = vld [vmem:[#allocation3 + $0x90] ss:$2 sm:$0xff]  ;;  %v4151_v60 = vld [vmem:[#allocation3 + $0x91] ss:$2 sm:$0xff]  ;;  %v8817_v47 = vpop.permute.xlu0 %8816  ;;  %v3141_v43 = vsel %vm3093_vm5, %v3076_v25, %v8768_v2 }
 0x329   :  { %v4205_v46 = vmax.f32 %v4087_v28, %v4151_v60  ;;  %4025 = vst.msk [vmem:[#allocation3 + $0xa0] sm:$0xff] %vm3418_vm2, %v3961_v19  ;;  %v3206_v44 = vsel %vm3158_vm4, %v3141_v43, %v8774_v55  ;;  %v8819_v62 = vunpack.i.h.bf16 %v8817_v47  ;;  %v8818_v41 = vunpack.i.l.bf16 %v8817_v47 }
 0x32a   :  { %v3697_v61 = vpop.f32.mrf.mxu0  ;;  %9036 = vrot.lane.b32.xlu2 %v9035_v29, %s9487_s28  ;;  %v3270_v19 = vsel %vm3223_vm6, %v3205_v39, %v8788_v23  ;;  %v3271_v37 = vsel %vm3223_vm6, %v3206_v44, %v8789_v36  ;;  %v8794_v28 = vunpack.i.h.bf16 %v11721_v1  ;;  %v8793_v60 = vunpack.i.l.bf16 %v11721_v1 }
 0x32b   :  { %v4232_v50 = vmax.f32 %v4204_v40, %v4205_v46  ;;  %v3830_v57 = vmul.f32 %v11510_v27, %v3697_v61  ;;  %v3335_v56 = vsel %vm3288_vm7, %v3270_v19, %v8803_v26  ;;  %v3336_v6 = vsel %vm3288_vm7, %v3271_v37, %v8804_v20  ;;  %v914_v37 = vld [vmem:[#allocation2 + $0x469] sm:$0xff] }
 0x32c   :  { %9031 = vrot.lane.b32.xlu1 %v11673_v24, %s9483_s24  ;;  %v11781_v58 = vpop.permute.xlu2 %8871  ;;  %v3400_v47 = vsel %vm3353_vm8, %v3335_v56, %v8818_v41  ;;  %v3401_v13 = vsel %vm3353_vm8, %v3336_v6, %v8819_v62  ;;  %v8809_v40 = vunpack.i.h.bf16 %v11751_v21  ;;  %v8808_v1 = vunpack.i.l.bf16 %v11751_v21  ;;  %v850_v62 = vld [vmem:[#allocation2 + $0x468] sm:$0xff]  ;;  %v851_v41 = vld [vmem:[#allocation2 + $0x470] sm:$0xff]  ;;  %v13493_v6 = vld [vmem:[#allocation25_spill] sm:$0xff] }
 0x32d   :  { %4309 = vst.msk [vmem:[#allocation4 + $0x80] sm:$0xff] %vm3418_vm2, %v4232_v50  ;;  %v3898_v31 = vadd.f32 %v11528_v34, %v3830_v57  ;;  %v3148_v21 = vsel %vm3093_vm5, %v3083_v32, %v8778_v53  ;;  %v3214_v30 = vsel %vm3158_vm4, %v3149_v8, %v8794_v28  ;;  %v9080_v53 = vpack.i.bf16 %v851_v41, %v850_v62  ;;  %v13494_v28 = vld [vmem:[#allocation35_spill] sm:$0xff] }
 0x32e   :  { %9041 = vrot.lane.b32.xlu0 %v11770_v42, %s9485_s26  ;;  %v8822_v24 = vpop.permute.xlu1 %8821  ;;  %v3213_v9 = vsel %vm3158_vm4, %v3148_v21, %v8793_v60  ;;  %v3279_v48 = vsel %vm3223_vm6, %v3214_v30, %v8809_v40  ;;  %v8078_v60 = vunpack.i.l.bf16 %v13494_v28  ;;  %v8873_v30 = vunpack.i.l.bf16 %v11781_v58 }
 0x32f   :  { %v3962_v29 = vmax.f32 %v3898_v31, 0.0  ;;  %v8824_v14 = vunpack.i.h.bf16 %v8822_v24  ;;  %v8823_v10 = vunpack.i.l.bf16 %v8822_v24  ;;  %v3278_v5 = vsel %vm3223_vm6, %v3213_v9, %v8808_v1 }
 0x330   :  { %v8832_v33 = vpop.permute.xlu0 %8831  ;;  %v8874_v54 = vunpack.i.h.bf16 %v11781_v58 }
 0x331   :  { %4026 = vst.msk [vmem:[#allocation3 + $0xa8] sm:$0xff] %vm3418_vm2, %v3962_v29  ;;  %v8834_v63 = vunpack.i.h.bf16 %v8832_v33  ;;  %v8833_v49 = vunpack.i.l.bf16 %v8832_v33  ;;  %v3344_v15 = vsel %vm3288_vm7, %v3279_v48, %v8824_v14  ;;  %v3343_v23 = vsel %vm3288_vm7, %v3278_v5, %v8823_v10  ;;  %v915_v33 = vld [vmem:[#allocation2 + $0x471] sm:$0xff]  ;;  %v11870_v14 = vld [vmem:[#allocation4 + $0x39] sm:$0xff]  ;;  %v4401_v48 = vld [vmem:[#allocation4 + $0x21] sm:$0xff] }
 0x332   :  { %v3700_v2 = vpop.f32.mrf.mxu0  ;;  %9051 = vrot.lane.b32.xlu2 %v9050_v12, %s9487_s28  ;;  %v8859_v10 = vunpack.i.h.bf16 %v11742_v4 }
 0x333   :  { %v3831_v46 = vmul.f32 %v11510_v27, %v3700_v2  ;;  %v3465_v55 = vsel %vm3418_vm2, %v3400_v47, %v8833_v49  ;;  %v3466_v61 = vsel %vm3418_vm2, %v3401_v13, %v8834_v63  ;;  %v7918_v63 = vunpack.i.l.bf16 %v13493_v6  ;;  %v382_v13 = vld [vmem:[#allocation2 + $0x2ef] sm:$0xff] }
 0x334   :  { %9046 = vrot.lane.b32.xlu1 %v9045_v35, %s9486_s27  ;;  %v3506_v50 = vpack.c.bf16 %v3466_v61, %v3465_v55  ;;  %v11814_v57 = vpop.permute.xlu2 %8886  ;;  %v786_v35 = vld [vmem:[#allocation2 + $0x467] sm:$0xff]  ;;  %v7919_v49 = vunpack.i.h.bf16 %v13493_v6  ;;  %v9085_v47 = vpack.i.bf16 %v915_v33, %v914_v37  ;;  %v8079_v2 = vunpack.i.h.bf16 %v13494_v28 }
 0x335   :  { %v3899_v25 = vadd.f32 %v11528_v34, %v3831_v46  ;;  %7096 = vmatmul.msk.bf16.gmra.mxu0 %vm3535_vm9, %v3502_v18  ;;  %v9414_v55 = vld [vmem:[#allocation2 + $0x2e7] sm:$0xff]  ;;  %v8889_v4 = vunpack.i.h.bf16 %v11814_v57 }
 0x336   :  { %9056 = vrot.lane.b32.xlu0 %v11792_v17, %s9486_s27  ;;  %7100 = vmatmul.msk.bf16.gmra.mxu1 %vm3535_vm9, %v3506_v50  ;;  %v8837_v0 = vpop.permute.xlu1 %8836  ;;  %v3006_v61 = vsel %vm129_vm0, %v9414_v55, %v7918_v63  ;;  %v11872_v50 = vld [vmem:[#allocation4 + $0x4f] sm:$0xff]  ;;  %v3007_v32 = vsel %vm129_vm0, %v382_v13, %v7919_v49 }
 0x337   :  { %v3963_v22 = vmax.f32 %v3899_v25, 0.0  ;;  %v8839_v45 = vunpack.i.h.bf16 %v8837_v0  ;;  %v8838_v18 = vunpack.i.l.bf16 %v8837_v0  ;;  %v3071_v8 = vsel %vm3028_vm3, %v3006_v61, %v8078_v60  ;;  %v4353_v63 = vld [vmem:[#allocation4 + $0x9] sm:$0xff] }
 0x338   :  { %v8847_v36 = vpop.permute.xlu0 %8846  ;;  %v4089_v25 = vld [vmem:[#allocation3 + $0xa0] ss:$2 sm:$0xff]  ;;  %v4153_v21 = vld [vmem:[#allocation3 + $0xa1] ss:$2 sm:$0xff]  ;;  %v3072_v7 = vsel %vm3028_vm3, %v3007_v32, %v8079_v2  ;;  %v3136_v58 = vsel %vm3093_vm5, %v3071_v8, %v8858_v52  ;;  %v9110_v55 = vpack.i.bf16 %v4401_v48, %v4353_v63 }
 0x339   :  { %4027 = vst.msk [vmem:[#allocation3 + $0xb0] sm:$0xff] %vm3418_vm2, %v3963_v22  ;;  %v3409_v51 = vsel %vm3353_vm8, %v3344_v15, %v8839_v45  ;;  %v8849_v11 = vunpack.i.h.bf16 %v8847_v36  ;;  %v8848_v16 = vunpack.i.l.bf16 %v8847_v36  ;;  %v3408_v43 = vsel %vm3353_vm8, %v3343_v23, %v8838_v18  ;;  %v11884_v22 = vld [vmem:[#allocation4 + $0x37] sm:$0xff]  ;;  %v4337_v2 = vld [vmem:[#allocation4 + $0x8] sm:$0xff]  ;;  %v4369_v8 = vld [vmem:[#allocation4 + $0x1f] sm:$0xff] }
 0x33a   :  { %v3702_v20 = vpop.f32.mrf.mxu0  ;;  %9066 = vrot.lane.b32.xlu2 %v9050_v12, %s9484_s25  ;;  %v9090_v36 = vpack.i.bf16 %v11870_v14, %v4401_v48  ;;  %v9095_v23 = vpack.i.bf16 %v11872_v50, %v11884_v22  ;;  %v4436_v63 = vld [vmem:[#allocation4 + $0x68] sm:$0xff] }
 0x33b   :  { %v3832_v26 = vmul.f32 %v11510_v27, %v3702_v20  ;;  %v3473_v31 = vsel %vm3418_vm2, %v3408_v43, %v8848_v16  ;;  %v3474_v44 = vsel %vm3418_vm2, %v3409_v51, %v8849_v11  ;;  %v4206_v51 = vmax.f32 %v4089_v25, %v4153_v21 }
 0x33c   :  { %9061 = vrot.lane.b32.xlu1 %v11770_v42, %s9482_s19  ;;  %v3510_v24 = vpack.c.bf16 %v3474_v44, %v3473_v31  ;;  %v11845_v39 = vpop.permute.xlu2 %8901  ;;  %v9075_v42 = vpack.i.bf16 %v787_v59, %v786_v35  ;;  %v3137_v43 = vsel %vm3093_vm5, %v3072_v7, %v8859_v10  ;;  %v3201_v20 = vsel %vm3158_vm4, %v3136_v58, %v8873_v30  ;;  %v13495_v10 = vld [vmem:[#allocation27_spill] sm:$0xff] }
 0x33d   :  { %v3900_v29 = vadd.f32 %v11528_v34, %v3832_v26  ;;  %v8903_v15 = vunpack.i.l.bf16 %v11845_v39  ;;  %v8904_v16 = vunpack.i.h.bf16 %v11845_v39  ;;  %v3202_v62 = vsel %vm3158_vm4, %v3137_v43, %v8874_v54  ;;  %v4434_v39 = vld [vmem:[#allocation4 + $0x38] sm:$0xff]  ;;  %v388_v7 = vld [vmem:[#allocation2 + $0x34f] sm:$0xff] }
 0x33e   :  { %9071 = vrot.lane.b32.xlu0 %v11792_v17, %s9483_s24  ;;  %7104 = vmatmul.msk.bf16.vlgmr.msra.gmra.mxu3 %vm3535_vm9, %v3510_v24  ;;  %v11851_v12 = vpop.permute.xlu1 %8851  ;;  %v3267_v35 = vsel %vm3223_vm6, %v3202_v62, %v8889_v4  ;;  %v7934_v25 = vunpack.i.h.bf16 %v13495_v10  ;;  %v9115_v21 = vpack.i.bf16 %v11884_v22, %v4369_v8  ;;  %v7933_v54 = vunpack.i.l.bf16 %v13495_v10  ;;  %v11941_v43 = vld [vmem:[#allocation4 + $0x69] sm:$0xff] }
 0x33f   :  { %v3964_v19 = vmax.f32 %v3900_v29, 0.0  ;;  %v3332_v37 = vsel %vm3288_vm7, %v3267_v35, %v8904_v16 }
 0x340   :  { %v11853_v56 = vpop.permute.xlu0 %8861 }
 0x341   :  { %4028 = vst.msk [vmem:[#allocation3 + $0xb8] sm:$0xff] %vm3418_vm2, %v3964_v19 }
 0x342   :  { %v3705_v17 = vpop.f32.mrf.mxu0  ;;  %9081 = vrot.lane.b32.xlu2 %v9080_v53, %s9487_s28 }
 0x343   :  { %v3833_v40 = vmul.f32 %v11510_v27, %v3705_v17 }
 0x344   :  { %9076 = vrot.lane.b32.xlu1 %v9075_v42, %s9485_s26  ;;  %v8917_v46 = vpop.permute.xlu2 %8916 }
 0x345   :  { %v3901_v1 = vadd.f32 %v11528_v34, %v3833_v40  ;;  %7097 = vmatmul.msk.bf16.gmra.mxu0 %vm3535_vm9, %v3503_v3  ;;  %v8888_v3 = vunpack.i.l.bf16 %v11814_v57  ;;  %v4435_v57 = vld [vmem:[#allocation4 + $0x50] sm:$0xff]  ;;  %v8919_v26 = vunpack.i.h.bf16 %v8917_v46  ;;  %v8918_v31 = vunpack.i.l.bf16 %v8917_v46  ;;  %v4338_v40 = vld [vmem:[#allocation4 + $0x20] sm:$0xff] }
 0x346   :  { %9086 = vrot.lane.b32.xlu0 %v9085_v47, %s9486_s27  ;;  %v11879_v0 = vpop.permute.xlu1 %8866  ;;  %v11905_v53 = vpack.i.bf16 %v4435_v57, %v4434_v39 }
 0x347   :  { %v3965_v9 = vmax.f32 %v3901_v1, 0.0  ;;  %v3266_v41 = vsel %vm3223_vm6, %v3201_v20, %v8888_v3  ;;  %v3397_v28 = vsel %vm3353_vm8, %v3332_v37, %v8919_v26  ;;  %v9105_v1 = vpack.i.bf16 %v4338_v40, %v4337_v2  ;;  %v13496_v3 = vld [vmem:[#allocation30_spill] sm:$0xff] }
 0x348   :  { %v4091_v45 = vld [vmem:[#allocation3 + $0xb0] ss:$2 sm:$0xff]  ;;  %v4155_v5 = vld [vmem:[#allocation3 + $0xb1] ss:$2 sm:$0xff]  ;;  %v11888_v18 = vpop.permute.xlu0 %8876  ;;  %v3331_v59 = vsel %vm3288_vm7, %v3266_v41, %v8903_v15  ;;  %v7953_v48 = vunpack.i.l.bf16 %v13496_v3  ;;  %v395_v15 = vld [vmem:[#allocation2 + $0x3c7] sm:$0xff]  ;;  %v3013_v26 = vsel %vm129_vm0, %v388_v7, %v7934_v25 }
 0x349   :  { %v4207_v11 = vmax.f32 %v4091_v45, %v4155_v5  ;;  %4029 = vst.msk [vmem:[#allocation3 + $0xc0] sm:$0xff] %vm3418_vm2, %v3965_v9  ;;  %v3396_v49 = vsel %vm3353_vm8, %v3331_v59, %v8918_v31  ;;  %v7954_v9 = vunpack.i.h.bf16 %v13496_v3  ;;  %v11933_v45 = vld [vmem:[#allocation4 + $0x7f] sm:$0xff]  ;;  %v387_v5 = vld [vmem:[#allocation2 + $0x347] sm:$0xff]  ;;  %v8854_v31 = vunpack.i.h.bf16 %v11851_v12 }
 0x34a   :  { %v3707_v44 = vpop.f32.mrf.mxu0  ;;  %9096 = vrot.lane.b32.xlu2 %v9095_v23, %s9478_s18  ;;  %v13497_v23 = vld [vmem:[#allocation37_spill] sm:$0xff]  ;;  %v11943_v20 = vld [vmem:[#allocation4 + $0x67] sm:$0xff]  ;;  %v3020_v35 = vsel %vm129_vm0, %v395_v15, %v7953_v48  ;;  %v8879_v40 = vunpack.i.h.bf16 %v11888_v18 }
 0x34b   :  { %v4233_v24 = vmax.f32 %v4206_v51, %v4207_v11  ;;  %v3834_v29 = vmul.f32 %v11510_v27, %v3707_v44  ;;  %v8094_v22 = vunpack.i.h.bf16 %v13497_v23  ;;  %v8093_v58 = vunpack.i.l.bf16 %v13497_v23  ;;  %v13498_v51 = vld [vmem:[#allocation49_spill] sm:$0xff] }
 0x34c   :  { %9091 = vrot.lane.b32.xlu1 %v9090_v36, %s9486_s27  ;;  %v8932_v19 = vpop.permute.xlu2 %8931  ;;  %v396_v36 = vld [vmem:[#allocation2 + $0x3cf] sm:$0xff]  ;;  %v8114_v11 = vunpack.i.h.bf16 %v13498_v51  ;;  %v8853_v44 = vunpack.i.l.bf16 %v11851_v12  ;;  %v9125_v41 = vpack.i.bf16 %v11933_v45, %v11943_v20  ;;  %v8113_v59 = vunpack.i.l.bf16 %v13498_v51 }
 0x34d   :  { %4310 = vst.msk [vmem:[#allocation4 + $0x98] sm:$0xff] %vm3418_vm2, %v4233_v24  ;;  %v3902_v33 = vadd.f32 %v11528_v34, %v3834_v29  ;;  %v8934_v42 = vunpack.i.h.bf16 %v8932_v19  ;;  %v8933_v6 = vunpack.i.l.bf16 %v8932_v19  ;;  %v4437_v24 = vld [vmem:[#allocation4 + $0x80] sm:$0xff]  ;;  %v3012_v29 = vsel %vm129_vm0, %v387_v5, %v7933_v54  ;;  %v4403_v19 = vld [vmem:[#allocation4 + $0x51] sm:$0xff] }
 0x34e   :  { %9101 = vrot.lane.b32.xlu0 %v11905_v53, %s9488_s0  ;;  %v11914_v60 = vpop.permute.xlu1 %8881  ;;  %v3021_v39 = vsel %vm129_vm0, %v396_v36, %v7954_v9  ;;  %v3077_v37 = vsel %vm3028_vm3, %v3012_v29, %v8093_v58  ;;  %v3078_v12 = vsel %vm3028_vm3, %v3013_v26, %v8094_v22  ;;  %v9145_v25 = vpack.i.bf16 %v11943_v20, %v11872_v50 }
 0x34f   :  { %v3966_v17 = vmax.f32 %v3902_v33, 0.0  ;;  %v3461_v47 = vsel %vm3418_vm2, %v3396_v49, %v8933_v6  ;;  %v3462_v13 = vsel %vm3418_vm2, %v3397_v28, %v8934_v42  ;;  %v3086_v33 = vsel %vm3028_vm3, %v3021_v39, %v8114_v11  ;;  %v12000_v11 = vld [vmem:[%s13355_s2] ss:$0 sm:$0xff] }
 0x350   :  { %v11918_v46 = vpop.permute.xlu0 %8891  ;;  %v3504_v61 = vpack.c.bf16 %v3462_v13, %v3461_v47  ;;  %v9120_v6 = vpack.i.bf16 %v11941_v43, %v4403_v19  ;;  %v8864_v49 = vunpack.i.h.bf16 %v11853_v56  ;;  %v8863_v28 = vunpack.i.l.bf16 %v11853_v56  ;;  %v12013_v39 = vld [vmem:[%s13356_s3] ss:$0 sm:$0xff] }
 0x351   :  { %4030 = vst.msk [vmem:[#allocation3 + $0xc8] sm:$0xff] %vm3418_vm2, %v3966_v17  ;;  %v11963_v47 = vpack.i.bf16 %v4437_v24, %v4436_v63  ;;  %v3142_v13 = vsel %vm3093_vm5, %v3077_v37, %v8853_v44  ;;  %v3143_v2 = vsel %vm3093_vm5, %v3078_v12, %v8854_v31  ;;  %v8893_v56 = vunpack.i.l.bf16 %v11918_v46 }
 0x352   :  { %v3710_v52 = vpop.f32.mrf.mxu0  ;;  %9111 = vrot.lane.b32.xlu2 %v9110_v55, %s9478_s18  ;;  %v8878_v55 = vunpack.i.l.bf16 %v11888_v18  ;;  %v9140_v18 = vpack.i.bf16 %v4403_v19, %v11870_v14  ;;  %v3208_v7 = vsel %vm3158_vm4, %v3143_v2, %v8864_v49  ;;  %v8868_v54 = vunpack.i.l.bf16 %v11879_v0 }
 0x353   :  { %v3835_v32 = vmul.f32 %v11510_v27, %v3710_v52  ;;  %v8894_v52 = vunpack.i.h.bf16 %v11918_v46  ;;  %v8869_v46 = vunpack.i.h.bf16 %v11879_v0  ;;  %v3273_v9 = vsel %vm3223_vm6, %v3208_v7, %v8879_v40 }
 0x354   :  { %9106 = vrot.lane.b32.xlu1 %v9105_v1, %s9486_s27  ;;  %v11926_v30 = vpop.permute.xlu2 %8946  ;;  %v8883_v48 = vunpack.i.l.bf16 %v11914_v60  ;;  %v8884_v36 = vunpack.i.h.bf16 %v11914_v60  ;;  %v12023_v63 = vld [vmem:[#allocation4 + $0x99] sm:$0xff] }
 0x355   :  { %v3903_v4 = vadd.f32 %v11528_v34, %v3835_v32  ;;  %7098 = vmatmul.msk.bf16.gmra.mxu0 %vm3535_vm9, %v3504_v61  ;;  %v3085_v61 = vsel %vm3028_vm3, %v3020_v35, %v8113_v59  ;;  %v3338_v50 = vsel %vm3288_vm7, %v3273_v9, %v8894_v52 }
 0x356   :  { %9116 = vrot.lane.b32.xlu0 %v9115_v21, %s9488_s0  ;;  %v11939_v16 = vpop.permute.xlu1 %8896  ;;  %v3207_v21 = vsel %vm3158_vm4, %v3142_v13, %v8863_v28  ;;  %v3150_v26 = vsel %vm3093_vm5, %v3085_v61, %v8868_v54 }
 0x357   :  { %v3967_v57 = vmax.f32 %v3903_v4, 0.0  ;;  %v3272_v3 = vsel %vm3223_vm6, %v3207_v21, %v8878_v55  ;;  %v8898_v23 = vunpack.i.l.bf16 %v11939_v16  ;;  %v8899_v51 = vunpack.i.h.bf16 %v11939_v16 }
 0x358   :  { %v8907_v62 = vpop.permute.xlu0 %8906  ;;  %v3337_v14 = vsel %vm3288_vm7, %v3272_v3, %v8893_v56  ;;  %v3151_v16 = vsel %vm3093_vm5, %v3086_v33, %v8869_v46  ;;  %v4157_v24 = vld [vmem:[#allocation3 + $0xc1] ss:$2 sm:$0xff]  ;;  %v3215_v29 = vsel %vm3158_vm4, %v3150_v26, %v8883_v48 }
 0x359   :  { %4031 = vst.msk [vmem:[#allocation3 + $0xd0] sm:$0xff] %vm3418_vm2, %v3967_v57  ;;  %v8909_v32 = vunpack.i.h.bf16 %v8907_v62  ;;  %v8908_v8 = vunpack.i.l.bf16 %v8907_v62  ;;  %v3216_v59 = vsel %vm3158_vm4, %v3151_v16, %v8884_v36  ;;  %v3280_v19 = vsel %vm3223_vm6, %v3215_v29, %v8898_v23  ;;  %v398_v26 = vld [vmem:[#allocation2 + $0x3ef] sm:$0xff] }
 0x35a   :  { %v3712_v42 = vpop.f32.mrf.mxu0  ;;  %9126 = vrot.lane.b32.xlu2 %v9125_v41, %s9478_s18  ;;  %v4093_v41 = vld [vmem:[#allocation3 + $0xc0] ss:$2 sm:$0xff]  ;;  %v3281_v37 = vsel %vm3223_vm6, %v3216_v59, %v8899_v51 }
 0x35b   :  { %v3836_v17 = vmul.f32 %v11510_v27, %v3712_v42  ;;  %v3402_v0 = vsel %vm3353_vm8, %v3337_v14, %v8908_v8  ;;  %v3403_v22 = vsel %vm3353_vm8, %v3338_v50, %v8909_v32  ;;  %v4208_v49 = vmax.f32 %v4093_v41, %v4157_v24  ;;  %v13499_v50 = vld [vmem:[#allocation23_spill] sm:$0xff] }
 0x35c   :  { %9121 = vrot.lane.b32.xlu1 %v9120_v6, %s9486_s27  ;;  %v11974_v1 = vpop.permute.xlu2 %8961  ;;  %v389_v24 = vld [vmem:[#allocation2 + $0x367] sm:$0xff] }
 0x35d   :  { %v3904_v27 = vadd.f32 %v11528_v34, %v3836_v17 }
 0x35e   :  { %9131 = vrot.lane.b32.xlu0 %v11963_v47, %s9488_s0  ;;  %v8912_v10 = vpop.permute.xlu1 %8911 }
 0x35f   :  { %v3968_v34 = vmax.f32 %v3904_v27, 0.0  ;;  %v8914_v31 = vunpack.i.h.bf16 %v8912_v10  ;;  %v8913_v44 = vunpack.i.l.bf16 %v8912_v10  ;;  %v12030_v27 = vld [vmem:[#allocation4 + $0x81] sm:$0xff] }
 0x360   :  { %v8922_v4 = vpop.permute.xlu0 %8921  ;;  %v9150_v10 = vpack.i.bf16 %v12023_v63, %v12030_v27 }
 0x361   :  { %4032 = vst.msk [vmem:[#allocation3 + $0xd8] sm:$0xff] %vm3418_vm2, %v3968_v34  ;;  %v8924_v5 = vunpack.i.h.bf16 %v8922_v4  ;;  %v8923_v15 = vunpack.i.l.bf16 %v8922_v4  ;;  %v3345_v13 = vsel %vm3288_vm7, %v3280_v19, %v8913_v44  ;;  %v3346_v2 = vsel %vm3288_vm7, %v3281_v37, %v8914_v31  ;;  %v390_v31 = vld [vmem:[#allocation2 + $0x36f] sm:$0xff] }
 0x362   :  { %v3715_v58 = vpop.f32.mrf.mxu0  ;;  %9141 = vrot.lane.b32.xlu2 %v9140_v18, %s9478_s18 }
 0x363   :  { %v3837_v57 = vmul.f32 %v12000_v11, %v3715_v58  ;;  %v3467_v60 = vsel %vm3418_vm2, %v3402_v0, %v8923_v15  ;;  %v3468_v20 = vsel %vm3418_vm2, %v3403_v22, %v8924_v5  ;;  %v7959_v5 = vunpack.i.h.bf16 %v13499_v50  ;;  %v4438_v15 = vld [vmem:[#allocation4 + $0x98] sm:$0xff] }
 0x364   :  { %9136 = vrot.lane.b32.xlu1 %v11905_v53, %s9486_s27  ;;  %v3507_v62 = vpack.c.bf16 %v3468_v20, %v3467_v60  ;;  %v12021_v33 = vpop.permute.xlu2 %8976  ;;  %v7958_v0 = vunpack.i.l.bf16 %v13499_v50  ;;  %v13500_v22 = vld [vmem:[#allocation28_spill] sm:$0xff]  ;;  %v397_v20 = vld [vmem:[#allocation2 + $0x3e7] sm:$0xff] }
 0x365   :  { %v3905_v35 = vadd.f32 %v12013_v39, %v3837_v57  ;;  %v7939_v58 = vunpack.i.h.bf16 %v13500_v22  ;;  %v4422_v60 = vld [vmem:[#allocation4 + $0x97] sm:$0xff]  ;;  %v7938_v44 = vunpack.i.l.bf16 %v13500_v22 }
 0x366   :  { %7101 = vmatmul.msk.bf16.gmra.mxu1 %vm3535_vm9, %v3507_v62  ;;  %9146 = vrot.lane.b32.xlu0 %v9145_v25, %s9488_s0  ;;  %v8927_v53 = vpop.permute.xlu1 %8926  ;;  %v13501_v62 = vld [vmem:[#allocation47_spill] sm:$0xff] }
 0x367   :  { %v3969_v12 = vmax.f32 %v3905_v35, 0.0  ;;  %v8929_v42 = vunpack.i.h.bf16 %v8927_v53  ;;  %v8928_v6 = vunpack.i.l.bf16 %v8927_v53  ;;  %v8098_v29 = vunpack.i.l.bf16 %v13501_v62  ;;  %v13502_v35 = vld [vmem:[#allocation50_spill] sm:$0xff] }
 0x368   :  { %v4095_v28 = vld [vmem:[#allocation3 + $0xd0] ss:$2 sm:$0xff]  ;;  %v4159_v17 = vld [vmem:[#allocation3 + $0xd1] ss:$2 sm:$0xff]  ;;  %v8937_v40 = vpop.permute.xlu0 %8936  ;;  %v8119_v59 = vunpack.i.h.bf16 %v13502_v35  ;;  %v8118_v53 = vunpack.i.l.bf16 %v13502_v35 }
 0x369   :  { %v4209_v55 = vmax.f32 %v4095_v28, %v4159_v17  ;;  %4033 = vst.msk [vmem:[#allocation3 + $0xe0] sm:$0xff] %vm3418_vm2, %v3969_v12  ;;  %v3410_v61 = vsel %vm3353_vm8, %v3345_v13, %v8928_v6  ;;  %v3411_v52 = vsel %vm3353_vm8, %v3346_v2, %v8929_v42  ;;  %v8939_v56 = vunpack.i.h.bf16 %v8937_v40 }
 0x36a   :  { %v8938_v32 = vunpack.i.l.bf16 %v8937_v40  ;;  %v3717_v8 = vpop.f32.mrf.mxu0  ;;  %v3023_v12 = vsel %vm129_vm0, %v398_v26, %v7959_v5  ;;  %v3022_v42 = vsel %vm129_vm0, %v397_v20, %v7958_v0  ;;  %v3015_v6 = vsel %vm129_vm0, %v390_v31, %v7939_v58 }
 0x36b   :  { %v4234_v18 = vmax.f32 %v4208_v49, %v4209_v55  ;;  %v3838_v25 = vmul.f32 %v12000_v11, %v3717_v8  ;;  %v3476_v21 = vsel %vm3418_vm2, %v3411_v52, %v8939_v56  ;;  %v3014_v49 = vsel %vm129_vm0, %v389_v24, %v7938_v44 }
 0x36c   :  { %9151 = vrot.lane.b32.xlu1 %v9150_v10, %s9486_s27  ;;  %v3475_v7 = vsel %vm3418_vm2, %v3410_v61, %v8938_v32  ;;  %v12044_v48 = vpop.permute.xlu2 %8991  ;;  %v3079_v40 = vsel %vm3028_vm3, %v3014_v49, %v8098_v29  ;;  %v3088_v55 = vsel %vm3028_vm3, %v3023_v12, %v8119_v59  ;;  %v3087_v32 = vsel %vm3028_vm3, %v3022_v42, %v8118_v53 }
 0x36d   :  { %4311 = vst.msk [vmem:[#allocation4 + $0xb0] sm:$0xff] %vm3418_vm2, %v4234_v18  ;;  %v3906_v46 = vadd.f32 %v12013_v39, %v3838_v25  ;;  %v3511_v34 = vpack.c.bf16 %v3476_v21, %v3475_v7  ;;  %v8949_v8 = vunpack.i.h.bf16 %v11926_v30  ;;  %v9170_v18 = vpack.i.bf16 %v12030_v27, %v11941_v43 }
 0x36e   :  { %v8942_v54 = vpop.permute.xlu1 %8941  ;;  %v8948_v25 = vunpack.i.l.bf16 %v11926_v30  ;;  %v8963_v21 = vunpack.i.l.bf16 %v11974_v1  ;;  %v8993_v12 = vunpack.i.l.bf16 %v12044_v48 }
 0x36f   :  { %v3970_v3 = vmax.f32 %v3906_v46, 0.0  ;;  %7105 = vmatmul.msk.bf16.gmra.mxu3 %vm3535_vm9, %v3511_v34  ;;  %v8944_v17 = vunpack.i.h.bf16 %v8942_v54  ;;  %v8943_v13 = vunpack.i.l.bf16 %v8942_v54  ;;  %v9175_v46 = vpack.i.bf16 %v4422_v60, %v11933_v45 }
 0x370   :  { %v12041_v9 = vpop.permute.xlu0 %8951 }
 0x371   :  { %4034 = vst.msk [vmem:[#allocation3 + $0xe8] sm:$0xff] %vm3418_vm2, %v3970_v3  ;;  %v8953_v61 = vunpack.i.l.bf16 %v12041_v9  ;;  %v8954_v10 = vunpack.i.h.bf16 %v12041_v9  ;;  %v3144_v34 = vsel %vm3093_vm5, %v3079_v40, %v8943_v13  ;;  %v8964_v9 = vunpack.i.h.bf16 %v11974_v1  ;;  %v7672_v13 = vld [vmem:[%s13357_s4 + $0x78] sm:$0xff] }
 0x372   :  { %v3720_v4 = vpop.f32.mrf.mxu0  ;;  %v3209_v45 = vsel %vm3158_vm4, %v3144_v34, %v8948_v25  ;;  %5189 = vmatpush.bf16.msra.mxu2 %v7672_v13  ;;  %v391_v13 = vld [vmem:[#allocation2 + $0x387] sm:$0xff] }
 0x373   :  { %v3839_v14 = vmul.f32 %v12000_v11, %v3720_v4  ;;  %v3152_v50 = vsel %vm3093_vm5, %v3087_v32, %v8953_v61  ;;  %v3153_v30 = vsel %vm3093_vm5, %v3088_v55, %v8954_v10 }
 0x374   :  { %9166 = vrot.lane.b32.xlu1 %v11963_v47, %s9486_s27  ;;  %v4439_v36 = vld [vmem:[#allocation4 + $0xb0] sm:$0xff]  ;;  %v8099_v47 = vunpack.i.h.bf16 %v13501_v62  ;;  %v12075_v52 = vpop.permute.xlu2 %9006  ;;  %v3218_v26 = vsel %vm3158_vm4, %v3153_v30, %v8964_v9  ;;  %v7671_v9 = vld [vmem:[%s13357_s4 + $0x70] sm:$0xff] }
 0x375   :  { %v12050_v23 = vld [vmem:[#allocation4 + $0xaf] sm:$0xff]  ;;  %v3907_v51 = vadd.f32 %v12013_v39, %v3839_v14  ;;  %v12055_v57 = vpack.i.bf16 %v4439_v36, %v4438_v15 }
 0x376   :  { %v8957_v16 = vpop.permute.xlu1 %8956  ;;  %v9155_v41 = vpack.i.bf16 %v12050_v23, %v4422_v60  ;;  %v3080_v28 = vsel %vm3028_vm3, %v3015_v6, %v8099_v47  ;;  %v8979_v47 = vunpack.i.h.bf16 %v12021_v33  ;;  %5190 = vmatpush.bf16.msra.mxu2 %v7671_v9 }
 0x377   :  { %v3971_v19 = vmax.f32 %v3907_v51, 0.0  ;;  %9161 = vrot.lane.b32.xlu0 %v12055_v57, %s9488_s0  ;;  %v3145_v54 = vsel %vm3093_vm5, %v3080_v28, %v8944_v17  ;;  %v8959_v3 = vunpack.i.h.bf16 %v8957_v16  ;;  %v8958_v4 = vunpack.i.l.bf16 %v8957_v16 }
 0x378   :  { %v8967_v37 = vpop.permute.xlu0 %8966  ;;  %9156 = vrot.lane.b32.xlu2 %v9155_v41, %s9478_s18  ;;  %v3210_v36 = vsel %vm3158_vm4, %v3145_v54, %v8949_v8  ;;  %v3217_v51 = vsel %vm3158_vm4, %v3152_v50, %v8963_v21  ;;  %v8978_v16 = vunpack.i.l.bf16 %v12021_v33  ;;  %v4097_v24 = vld [vmem:[#allocation3 + $0xe0] ss:$2 sm:$0xff]  ;;  %v4161_v29 = vld [vmem:[#allocation3 + $0xe1] ss:$2 sm:$0xff] }
 0x379   :  { %4035 = vst.msk [vmem:[#allocation3 + $0xf0] sm:$0xff] %vm3418_vm2, %v3971_v19  ;;  %v8969_v0 = vunpack.i.h.bf16 %v8967_v37  ;;  %v8968_v22 = vunpack.i.l.bf16 %v8967_v37  ;;  %v3274_v1 = vsel %vm3223_vm6, %v3209_v45, %v8958_v4  ;;  %v3275_v58 = vsel %vm3223_vm6, %v3210_v36, %v8959_v3 }
 0x37a   :  { %v3722_v2 = vpop.f32.mrf.mxu0  ;;  %v8994_v37 = vunpack.i.h.bf16 %v12044_v48 }
 0x37b   :  { %v3840_v56 = vmul.f32 %v12000_v11, %v3722_v2  ;;  %v3339_v35 = vsel %vm3288_vm7, %v3274_v1, %v8968_v22  ;;  %v3340_v59 = vsel %vm3288_vm7, %v3275_v58, %v8969_v0  ;;  %v4210_v2 = vmax.f32 %v4097_v24, %v4161_v29  ;;  %v7664_v0 = vld [vmem:[%s13357_s4 + $0x38] sm:$0xff]  ;;  %v7670_v22 = vld [vmem:[%s13357_s4 + $0x68] sm:$0xff] }
 0x37c   :  { %v12108_v19 = vpop.permute.xlu2 %9021  ;;  %v3405_v48 = vsel %vm3353_vm8, %v3340_v59, %v8979_v47  ;;  %5140 = vmatpush.bf16.msrb.mxu1 %v7664_v0  ;;  %5191 = vmatpush.bf16.msra.mxu2 %v7670_v22  ;;  %v13503_v47 = vld [vmem:[#allocation20_spill] sm:$0xff]  ;;  %v13504_v24 = vld [vmem:[#allocation31_spill] sm:$0xff] }
 0x37d   :  { %v3908_v7 = vadd.f32 %v12013_v39, %v3840_v56  ;;  %v3404_v56 = vsel %vm3353_vm8, %v3339_v35, %v8978_v16  ;;  %v7944_v16 = vunpack.i.h.bf16 %v13503_v47  ;;  %v7964_v29 = vunpack.i.h.bf16 %v13504_v24 }
 0x37e   :  { %v8972_v14 = vpop.permute.xlu1 %8971 }
 0x37f   :  { %v3972_v43 = vmax.f32 %v3908_v7, 0.0  ;;  %v8973_v27 = vunpack.i.l.bf16 %v8972_v14  ;;  %9176 = vrot.lane.b32.xlu0 %v9175_v46, %s9488_s0  ;;  %v8974_v5 = vunpack.i.h.bf16 %v8972_v14 }
 0x380   :  { %v8982_v15 = vpop.permute.xlu0 %8981  ;;  %9171 = vrot.lane.b32.xlu2 %v9170_v18, %s9478_s18 }
 0x381   :  { %4036 = vst.msk [vmem:[#allocation3 + $0xf8] sm:$0xff] %vm3418_vm2, %v3972_v43  ;;  %v8983_v60 = vunpack.i.l.bf16 %v8982_v15  ;;  %v3282_v31 = vsel %vm3223_vm6, %v3217_v51, %v8973_v27  ;;  %v8984_v44 = vunpack.i.h.bf16 %v8982_v15  ;;  %v3283_v41 = vsel %vm3223_vm6, %v3218_v26, %v8974_v5 }
 0x382   :  { %v3725_v20 = vpop.f32.mrf.mxu0 }
 0x383   :  { %v3841_v62 = vmul.f32 %v12000_v11, %v3725_v20  ;;  %v3347_v42 = vsel %vm3288_vm7, %v3282_v31, %v8983_v60  ;;  %v3348_v33 = vsel %vm3288_vm7, %v3283_v41, %v8984_v44  ;;  %v4441_v60 = vld [vmem:[#allocation4 + $0xe0] sm:$0xff]  ;;  %v7663_v44 = vld [vmem:[%s13357_s4 + $0x30] sm:$0xff]  ;;  %v7943_v41 = vunpack.i.l.bf16 %v13503_v47 }
 0x384   :  { %v3412_v7 = vsel %vm3353_vm8, %v3347_v42, %v8993_v12  ;;  %v3413_v46 = vsel %vm3353_vm8, %v3348_v33, %v8994_v37  ;;  %v12138_v45 = vpop.permute.xlu2 %9036  ;;  %v4425_v31 = vld [vmem:[#allocation4 + $0xdf] sm:$0xff]  ;;  %v392_v12 = vld [vmem:[#allocation2 + $0x38f] sm:$0xff]  ;;  %v7963_v42 = vunpack.i.l.bf16 %v13504_v24  ;;  %5141 = vmatpush.bf16.msrb.mxu1 %v7663_v44 }
 0x385   :  { %v3909_v53 = vadd.f32 %v12013_v39, %v3841_v62  ;;  %v7669_v62 = vld [vmem:[%s13357_s4 + $0x60] sm:$0xff] }
 0x386   :  { %v8987_v6 = vpop.permute.xlu1 %8986  ;;  %5192 = vmatpush.bf16.msra.mxu2 %v7669_v62 }
 0x387   :  { %v3973_v49 = vmax.f32 %v3909_v53, 0.0  ;;  %v8989_v28 = vunpack.i.h.bf16 %v8987_v6  ;;  %v8988_v17 = vunpack.i.l.bf16 %v8987_v6  ;;  %v13505_v6 = vld [vmem:[#allocation43_spill] sm:$0xff] }
 0x388   :  { %v4099_v40 = vld [vmem:[#allocation3 + $0xf0] ss:$2 sm:$0xff]  ;;  %v4163_v55 = vld [vmem:[#allocation3 + $0xf1] ss:$2 sm:$0xff]  ;;  %v8997_v61 = vpop.permute.xlu0 %8996  ;;  %v8124_v33 = vunpack.i.h.bf16 %v13505_v6 }
 0x389   :  { %v4211_v32 = vmax.f32 %v4099_v40, %v4163_v55  ;;  %4037 = vst.msk [vmem:[#allocation3 + $0x100] sm:$0xff] %vm3418_vm2, %v3973_v49  ;;  %v8999_v8 = vunpack.i.h.bf16 %v8997_v61  ;;  %v8998_v10 = vunpack.i.l.bf16 %v8997_v61  ;;  %v3469_v18 = vsel %vm3418_vm2, %v3404_v56, %v8988_v17  ;;  %v12172_v17 = vld [vmem:[#allocation4 + $0xb1] sm:$0xff] }
 0x38a   :  { %v3727_v25 = vpop.f32.mrf.mxu0  ;;  %v3470_v21 = vsel %vm3418_vm2, %v3405_v48, %v8989_v28  ;;  %v400_v40 = vld [vmem:[#allocation2 + $0x40f] sm:$0xff]  ;;  %v8123_v55 = vunpack.i.l.bf16 %v13505_v6  ;;  %v9200_v44 = vpack.i.bf16 %v12172_v17, %v12023_v63 }
 0x38b   :  { %v4235_v34 = vmax.f32 %v4210_v2, %v4211_v32  ;;  %v3842_v54 = vmul.f32 %v12000_v11, %v3727_v25  ;;  %v3755_v3 = vpop.f32.mrf.mxu1  ;;  %v3508_v4 = vpack.c.bf16 %v3470_v21, %v3469_v18  ;;  %v3477_v14 = vsel %vm3418_vm2, %v3412_v7, %v8998_v10  ;;  %v399_v2 = vld [vmem:[#allocation2 + $0x407] sm:$0xff]  ;;  %v7668_v7 = vld [vmem:[%s13357_s4 + $0x58] sm:$0xff] }
 0x38c   :  { %v3853_v50 = vmul.f32 %v12000_v11, %v3755_v3  ;;  %v3478_v43 = vsel %vm3418_vm2, %v3413_v46, %v8999_v8  ;;  %v13506_v8 = vld [vmem:[#allocation48_spill] sm:$0xff]  ;;  %v7662_v21 = vld [vmem:[%s13357_s4 + $0x28] sm:$0xff]  ;;  %v3017_v46 = vsel %vm129_vm0, %v392_v12, %v7944_v16  ;;  %v3016_v3 = vsel %vm129_vm0, %v391_v13, %v7943_v41  ;;  %v12198_v9 = vpop.permute.xlu2 %9051  ;;  %5193 = vmatpush.bf16.msra.mxu2 %v7668_v7 }
 0x38d   :  { %4312 = vst.msk [vmem:[#allocation4 + $0xc8] sm:$0xff] %vm3418_vm2, %v4235_v34  ;;  %v3910_v27 = vadd.f32 %v12013_v39, %v3842_v54  ;;  %7102 = vmatmul.msk.bf16.gmra.mxu1 %vm3535_vm9, %v3508_v4  ;;  %v3512_v30 = vpack.c.bf16 %v3478_v43, %v3477_v14  ;;  %v8104_v10 = vunpack.i.h.bf16 %v13506_v8  ;;  %v8103_v18 = vunpack.i.l.bf16 %v13506_v8 }
 0x38e   :  { %v3921_v5 = vadd.f32 %v12013_v39, %v3853_v50  ;;  %v12136_v15 = vpop.permute.xlu1 %9001  ;;  %v3025_v4 = vsel %vm129_vm0, %v400_v40, %v7964_v29  ;;  %v3024_v14 = vsel %vm129_vm0, %v399_v2, %v7963_v42  ;;  %5142 = vmatpush.bf16.msrb.mxu1 %v7662_v21  ;;  %v9039_v21 = vunpack.i.h.bf16 %v12138_v45 }
 0x38f   :  { %v3974_v36 = vmax.f32 %v3910_v27, 0.0  ;;  %7106 = vmatmul.msk.bf16.gmra.mxu3 %vm3535_vm9, %v3512_v30  ;;  %v9003_v50 = vunpack.i.l.bf16 %v12136_v15  ;;  %v3089_v43 = vsel %vm3028_vm3, %v3024_v14, %v8123_v55  ;;  %v3090_v27 = vsel %vm3028_vm3, %v3025_v4, %v8124_v33 }
 0x390   :  { %v3985_v1 = vmax.f32 %v3921_v5, 0.0  ;;  %v12147_v58 = vpop.permute.xlu0 %9011  ;;  %v9004_v30 = vunpack.i.h.bf16 %v12136_v15  ;;  %v3082_v0 = vsel %vm3028_vm3, %v3017_v46, %v8104_v10  ;;  %v3081_v22 = vsel %vm3028_vm3, %v3016_v3, %v8103_v18  ;;  %v7667_v15 = vld [vmem:[%s13357_s4 + $0x50] sm:$0xff] }
 0x391   :  { %4038 = vst.msk [vmem:[#allocation3 + $0x108] sm:$0xff] %vm3418_vm2, %v3974_v36  ;;  %v9013_v5 = vunpack.i.l.bf16 %v12147_v58  ;;  %v3146_v62 = vsel %vm3093_vm5, %v3081_v22, %v9003_v50  ;;  %5194 = vmatpush.bf16.msra.mxu2 %v7667_v15  ;;  %v7659_v18 = vld [vmem:[%s13357_s4 + $0x10] sm:$0xff]  ;;  %v9038_v7 = vunpack.i.l.bf16 %v12138_v45  ;;  %v9054_v50 = vunpack.i.h.bf16 %v12198_v9  ;;  %v7658_v22 = vld [vmem:[%s13357_s4 + $0x8] sm:$0xff] }
 0x392   :  { %4049 = vst.msk [vmem:[#allocation3 + $0x160] sm:$0xff] %vm3418_vm2, %v3985_v1  ;;  %v3730_v51 = vpop.f32.mrf.mxu0  ;;  %v9014_v1 = vunpack.i.h.bf16 %v12147_v58  ;;  %v9023_v58 = vunpack.i.l.bf16 %v12108_v19  ;;  %v3147_v41 = vsel %vm3093_vm5, %v3082_v0, %v9004_v30  ;;  %v9053_v45 = vunpack.i.l.bf16 %v12198_v9  ;;  %v7674_v9 = vld [vmem:[%s13357_s4 + $0x88] sm:$0xff] }
 0x393   :  { %v3843_v20 = vmul.f32 %v12000_v11, %v3730_v51  ;;  %v3757_v26 = vpop.f32.mrf.mxu1  ;;  %v3154_v24 = vsel %vm3093_vm5, %v3089_v43, %v9013_v5  ;;  %5244 = vmatpush.bf16.msrb.mxu3 %v7674_v9 }
 0x394   :  { %v3854_v35 = vmul.f32 %v12000_v11, %v3757_v26  ;;  %v12162_v59 = vld [vmem:[#allocation4 + $0xc8] sm:$0xff]  ;;  %v9008_v26 = vunpack.i.l.bf16 %v12075_v52  ;;  %v3155_v63 = vsel %vm3093_vm5, %v3090_v27, %v9014_v1  ;;  %v3219_v2 = vsel %vm3158_vm4, %v3154_v24, %v9023_v58 }
 0x395   :  { %v12164_v53 = vld [vmem:[#allocation4 + $0xc7] sm:$0xff]  ;;  %v3911_v49 = vadd.f32 %v12013_v39, %v3843_v20  ;;  %v9190_v28 = vpack.i.bf16 %v4441_v60, %v12162_v59  ;;  %v7661_v60 = vld [vmem:[%s13357_s4 + $0x20] sm:$0xff]  ;;  %v9009_v20 = vunpack.i.h.bf16 %v12075_v52 }
 0x396   :  { %v12166_v37 = vld [vmem:[#allocation4 + $0xc9] sm:$0xff]  ;;  %v3922_v61 = vadd.f32 %v12013_v39, %v3854_v35  ;;  %v12176_v56 = vpop.permute.xlu1 %9016  ;;  %v9185_v48 = vpack.i.bf16 %v4425_v31, %v12164_v53  ;;  %v9024_v31 = vunpack.i.h.bf16 %v12108_v19  ;;  %v9205_v16 = vpack.i.bf16 %v12164_v53, %v12050_v23  ;;  %5143 = vmatpush.bf16.msrb.mxu1 %v7661_v60  ;;  %v7666_v53 = vld [vmem:[%s13357_s4 + $0x48] sm:$0xff] }
 0x397   :  { %v9180_v32 = vpack.i.bf16 %v12166_v37, %v12172_v17  ;;  %v3975_v25 = vmax.f32 %v3911_v49, 0.0  ;;  %9191 = vrot.lane.b32.xlu0 %v9190_v28, %s9488_s0  ;;  %v9019_v52 = vunpack.i.h.bf16 %v12176_v56  ;;  %v9018_v29 = vunpack.i.l.bf16 %v12176_v56  ;;  %v7660_v23 = vld [vmem:[%s13357_s4 + $0x18] sm:$0xff]  ;;  %5195 = vmatpush.bf16.msra.mxu2 %v7666_v53 }
 0x398   :  { %v3986_v34 = vmax.f32 %v3922_v61, 0.0  ;;  %v12191_v54 = vpop.permute.xlu0 %9026  ;;  %9186 = vrot.lane.b32.xlu2 %v9185_v48, %s9478_s18  ;;  %v3211_v42 = vsel %vm3158_vm4, %v3146_v62, %v9008_v26  ;;  %v3212_v49 = vsel %vm3158_vm4, %v3147_v41, %v9009_v20  ;;  %v3220_v61 = vsel %vm3158_vm4, %v3155_v63, %v9024_v31 }
 0x399   :  { %9181 = vrot.lane.b32.xlu1 %v9180_v32, %s9486_s27  ;;  %4039 = vst.msk [vmem:[#allocation3 + $0x110] sm:$0xff] %vm3418_vm2, %v3975_v25  ;;  %v9029_v28 = vunpack.i.h.bf16 %v12191_v54  ;;  %v9028_v13 = vunpack.i.l.bf16 %v12191_v54  ;;  %v3276_v40 = vsel %vm3223_vm6, %v3211_v42, %v9018_v29  ;;  %v3277_v55 = vsel %vm3223_vm6, %v3212_v49, %v9019_v52  ;;  %v7665_v25 = vld [vmem:[%s13357_s4 + $0x40] sm:$0xff]  ;;  %v4165_v54 = vld [vmem:[#allocation3 + $0x101] ss:$2 sm:$0xff] }
 0x39a   :  { %4050 = vst.msk [vmem:[#allocation3 + $0x168] sm:$0xff] %vm3418_vm2, %v3986_v34  ;;  %v3732_v36 = vpop.f32.mrf.mxu0  ;;  %5144 = vmatpush.bf16.msrb.mxu1 %v7660_v23  ;;  %v4101_v34 = vld [vmem:[#allocation3 + $0x100] ss:$2 sm:$0xff]  ;;  %v13507_v23 = vld [vmem:[#allocation32_spill] sm:$0xff] }
 0x39b   :  { %v3844_v51 = vmul.f32 %v12000_v11, %v3732_v36  ;;  %v3342_v3 = vsel %vm3288_vm7, %v3277_v55, %v9029_v28  ;;  %v3341_v4 = vsel %vm3288_vm7, %v3276_v40, %v9028_v13  ;;  %5196 = vmatpush.bf16.msra.mxu2 %v7665_v25  ;;  %v4212_v1 = vmax.f32 %v4101_v34, %v4165_v54  ;;  %v402_v49 = vld [vmem:[#allocation2 + $0x42f] sm:$0xff] }
 0x39c   :  { %v3406_v20 = vsel %vm3353_vm8, %v3341_v4, %v9038_v7  ;;  %v3407_v26 = vsel %vm3353_vm8, %v3342_v3, %v9039_v21  ;;  %v7969_v53 = vunpack.i.h.bf16 %v13507_v23  ;;  %v7968_v42 = vunpack.i.l.bf16 %v13507_v23  ;;  %v13508_v28 = vld [vmem:[#allocation51_spill] sm:$0xff] }
 0x39d   :  { %v3912_v47 = vadd.f32 %v12013_v39, %v3844_v51  ;;  %v8129_v13 = vunpack.i.h.bf16 %v13508_v28 }
 0x39e   :  { %v9032_v35 = vpop.permute.xlu1 %9031  ;;  %5145 = vmatpush.bf16.msrb.mxu1 %v7659_v18 }
 0x39f   :  { %v3976_v19 = vmax.f32 %v3912_v47, 0.0  ;;  %v9033_v12 = vunpack.i.l.bf16 %v9032_v35  ;;  %9206 = vrot.lane.b32.xlu0 %v9205_v16, %s9488_s0  ;;  %v9034_v6 = vunpack.i.h.bf16 %v9032_v35 }
 0x3a0   :  { %v9042_v33 = vpop.permute.xlu0 %9041  ;;  %9201 = vrot.lane.b32.xlu2 %v9200_v44, %s9478_s18 }
 0x3a1   :  { %9196 = vrot.lane.b32.xlu1 %v12055_v57, %s9486_s27  ;;  %4040 = vst.msk [vmem:[#allocation3 + $0x118] sm:$0xff] %vm3418_vm2, %v3976_v19  ;;  %v9043_v56 = vunpack.i.l.bf16 %v9042_v33  ;;  %v12251_v57 = vpop.permute.xlu2 %9066  ;;  %v3284_v32 = vsel %vm3223_vm6, %v3219_v2, %v9033_v12  ;;  %v9044_v8 = vunpack.i.h.bf16 %v9042_v33  ;;  %v3285_v46 = vsel %vm3223_vm6, %v3220_v61, %v9034_v6  ;;  %v7657_v19 = vld [vmem:[%s13357_s4] sm:$0xff]  ;;  %v401_v33 = vld [vmem:[#allocation2 + $0x427] sm:$0xff] }
 0x3a2   :  { %v3735_v48 = vpop.f32.mrf.mxu0  ;;  %5146 = vmatpush.bf16.msrb.mxu1 %v7658_v22  ;;  %v7673_v12 = vld [vmem:[%s13357_s4 + $0x80] sm:$0xff]  ;;  %v8128_v2 = vunpack.i.l.bf16 %v13508_v28  ;;  %v3026_v18 = vsel %vm129_vm0, %v401_v33, %v7968_v42  ;;  %v9068_v34 = vunpack.i.l.bf16 %v12251_v57 }
 0x3a3   :  { %v3845_v10 = vmul.f32 %v12000_v11, %v3735_v48  ;;  %v3349_v43 = vsel %vm3288_vm7, %v3284_v32, %v9043_v56  ;;  %v3350_v30 = vsel %vm3288_vm7, %v3285_v46, %v9044_v8  ;;  %5245 = vmatpush.bf16.msrb.mxu3 %v7673_v12  ;;  %v9069_v46 = vunpack.i.h.bf16 %v12251_v57 }
 0x3a4   :  { %v3414_v41 = vsel %vm3353_vm8, %v3349_v43, %v9053_v45  ;;  %v3415_v24 = vsel %vm3353_vm8, %v3350_v30, %v9054_v50  ;;  %v3091_v7 = vsel %vm3028_vm3, %v3026_v18, %v8128_v2 }
 0x3a5   :  { %v3913_v14 = vadd.f32 %v12013_v39, %v3845_v10  ;;  %v3027_v10 = vsel %vm129_vm0, %v402_v49, %v7969_v53 }
 0x3a6   :  { %v9047_v27 = vpop.permute.xlu1 %9046  ;;  %5147 = vmatpush.bf16.msrb.mxu1 %v7657_v19  ;;  %v3092_v21 = vsel %vm3028_vm3, %v3027_v10, %v8129_v13 }
 0x3a7   :  { %v3977_v5 = vmax.f32 %v3913_v14, 0.0  ;;  %v9049_v36 = vunpack.i.h.bf16 %v9047_v27  ;;  %v9048_v0 = vunpack.i.l.bf16 %v9047_v27 }
 0x3a8   :  { %v4103_v51 = vld [vmem:[#allocation3 + $0x110] ss:$2 sm:$0xff]  ;;  %v4167_v60 = vld [vmem:[#allocation3 + $0x111] ss:$2 sm:$0xff]  ;;  %v9057_v15 = vpop.permute.xlu0 %9056 }
 0x3a9   :  { %v4213_v31 = vmax.f32 %v4103_v51, %v4167_v60  ;;  %4041 = vst.msk [vmem:[#allocation3 + $0x120] sm:$0xff] %vm3418_vm2, %v3977_v5  ;;  %v9059_v44 = vunpack.i.h.bf16 %v9057_v15  ;;  %v9058_v58 = vunpack.i.l.bf16 %v9057_v15  ;;  %v3471_v62 = vsel %vm3418_vm2, %v3406_v20, %v9048_v0  ;;  %v9082_v40 = vpop.permute.xlu2 %9081 }
 0x3aa   :  { %v3737_v47 = vpop.f32.mrf.mxu0  ;;  %v3472_v16 = vsel %vm3418_vm2, %v3407_v26, %v9049_v36  ;;  %v9084_v36 = vunpack.i.h.bf16 %v9082_v40  ;;  %v9083_v0 = vunpack.i.l.bf16 %v9082_v40 }
 0x3ab   :  { %v4236_v52 = vmax.f32 %v4212_v1, %v4213_v31  ;;  %v3846_v29 = vmul.f32 %v12000_v11, %v3737_v47  ;;  %v3509_v35 = vpack.c.bf16 %v3472_v16, %v3471_v62  ;;  %v3479_v63 = vsel %vm3418_vm2, %v3414_v41, %v9058_v58 }
 0x3ac   :  { %v3480_v6 = vsel %vm3418_vm2, %v3415_v24, %v9059_v44 }
 0x3ad   :  { %4313 = vst.msk [vmem:[#allocation4 + $0x110] sm:$0xff] %vm3418_vm2, %v4236_v52  ;;  %v3914_v55 = vadd.f32 %v12013_v39, %v3846_v29  ;;  %7103 = vmatmul.msk.bf16.gmra.mxu1 %vm3535_vm9, %v3509_v35  ;;  %v3513_v61 = vpack.c.bf16 %v3480_v6, %v3479_v63 }
 0x3ae   :  { %v9062_v56 = vpop.permute.xlu1 %9061 }
 0x3af   :  { %v3978_v48 = vmax.f32 %v3914_v55, 0.0  ;;  %7107 = vmatmul.msk.bf16.gmra.mxu3 %vm3535_vm9, %v3513_v61  ;;  %v9064_v32 = vunpack.i.h.bf16 %v9062_v56  ;;  %v9063_v8 = vunpack.i.l.bf16 %v9062_v56  ;;  %v9417_v56 = vld [vmem:[#allocation4 + $0x20] sm:$0xff] }
 0x3b0   :  { %v9072_v25 = vpop.permute.xlu0 %9071 }
 0x3b1   :  { %4042 = vst.msk [vmem:[#allocation3 + $0x128] sm:$0xff] %vm3418_vm2, %v3978_v48  ;;  %v3156_v54 = vsel %vm3093_vm5, %v3091_v7, %v9063_v8  ;;  %v3157_v3 = vsel %vm3093_vm5, %v3092_v21, %v9064_v32  ;;  %v9074_v45 = vunpack.i.h.bf16 %v9072_v25  ;;  %v9073_v43 = vunpack.i.l.bf16 %v9072_v25  ;;  %v9097_v1 = vpop.permute.xlu2 %9096  ;;  %v9418_v32 = vld [vmem:[#allocation4 + $0x38] sm:$0xff] }
 0x3b2   :  { %v3740_v4 = vpop.f32.mrf.mxu0  ;;  %v3221_v27 = vsel %vm3158_vm4, %v3156_v54, %v9068_v34  ;;  %v3222_v30 = vsel %vm3158_vm4, %v3157_v3, %v9069_v46  ;;  %v9099_v13 = vunpack.i.h.bf16 %v9097_v1  ;;  %v9098_v2 = vunpack.i.l.bf16 %v9097_v1 }
 0x3b3   :  { %v3847_v14 = vmul.f32 %v12000_v11, %v3740_v4  ;;  %v3760_v50 = vpop.f32.mrf.mxu1  ;;  %v3286_v20 = vsel %vm3223_vm6, %v3221_v27, %v9073_v43  ;;  %v3287_v26 = vsel %vm3223_vm6, %v3222_v30, %v9074_v45  ;;  %v4113_v4 = vld [vmem:[#allocation3 + $0x160] ss:$2 sm:$0xff]  ;;  %v4177_v45 = vld [vmem:[#allocation3 + $0x161] ss:$2 sm:$0xff] }
 0x3b4   :  { %v3855_v57 = vmul.f32 %v12000_v11, %v3760_v50  ;;  %v4218_v1 = vmax.f32 %v4113_v4, %v4177_v45 }
 0x3b5   :  { %v3915_v5 = vadd.f32 %v12013_v39, %v3847_v14 }
 0x3b6   :  { %v3923_v22 = vadd.f32 %v12013_v39, %v3855_v57  ;;  %v9077_v9 = vpop.permute.xlu1 %9076 }
 0x3b7   :  { %v3979_v51 = vmax.f32 %v3915_v5, 0.0  ;;  %v9079_v60 = vunpack.i.h.bf16 %v9077_v9  ;;  %v9078_v15 = vunpack.i.l.bf16 %v9077_v9  ;;  %v4321_v5 = vld [vmem:[#allocation4 + $0x7] sm:$0xff] }
 0x3b8   :  { %v3987_v31 = vmax.f32 %v3923_v22, 0.0  ;;  %v9087_v44 = vpop.permute.xlu0 %9086  ;;  %v4105_v43 = vld [vmem:[#allocation3 + $0x120] ss:$2 sm:$0xff]  ;;  %v4169_v57 = vld [vmem:[#allocation3 + $0x121] ss:$2 sm:$0xff] }
 0x3b9   :  { %4043 = vst.msk [vmem:[#allocation3 + $0x130] sm:$0xff] %vm3418_vm2, %v3979_v51  ;;  %v3351_v58 = vsel %vm3288_vm7, %v3286_v20, %v9078_v15  ;;  %v3352_v62 = vsel %vm3288_vm7, %v3287_v26, %v9079_v60  ;;  %v9089_v47 = vunpack.i.h.bf16 %v9087_v44  ;;  %v9088_v16 = vunpack.i.l.bf16 %v9087_v44  ;;  %v9112_v61 = vpop.permute.xlu2 %9111 }
 0x3ba   :  { %4051 = vst.msk [vmem:[#allocation3 + $0x170] sm:$0xff] %vm3418_vm2, %v3987_v31  ;;  %v3742_v41 = vpop.f32.mrf.mxu0  ;;  %v3416_v24 = vsel %vm3353_vm8, %v3351_v58, %v9083_v0  ;;  %v3417_v52 = vsel %vm3353_vm8, %v3352_v62, %v9084_v36  ;;  %v4214_v51 = vmax.f32 %v4105_v43, %v4169_v57  ;;  %v9114_v60 = vunpack.i.h.bf16 %v9112_v61 }
 0x3bb   :  { %v3848_v29 = vmul.f32 %v12000_v11, %v3742_v41  ;;  %v3762_v35 = vpop.f32.mrf.mxu1  ;;  %v3482_v63 = vsel %vm3418_vm2, %v3417_v52, %v9089_v47  ;;  %v3481_v12 = vsel %vm3418_vm2, %v3416_v24, %v9088_v16  ;;  %v9113_v15 = vunpack.i.l.bf16 %v9112_v61  ;;  %v9419_v47 = vld [vmem:[#allocation4 + $0x1f] sm:$0xff] }
 0x3bc   :  { %v3856_v19 = vmul.f32 %v12000_v11, %v3762_v35  ;;  %v3514_v53 = vpack.c.bf16 %v3482_v63, %v3481_v12 }
 0x3bd   :  { %v3916_v23 = vadd.f32 %v12013_v39, %v3848_v29 }
 0x3be   :  { %v3924_v42 = vadd.f32 %v12013_v39, %v3856_v19  ;;  %v9092_v6 = vpop.permute.xlu1 %9091 }
 0x3bf   :  { %v3980_v33 = vmax.f32 %v3916_v23, 0.0  ;;  %7108 = vmatmul.msk.bf16.gmra.mxu3 %vm3535_vm9, %v3514_v53  ;;  %v9094_v49 = vunpack.i.h.bf16 %v9092_v6  ;;  %v9093_v28 = vunpack.i.l.bf16 %v9092_v6  ;;  %v4451_v23 = vld [vmem:[#allocation4 + $0x51] sm:$0xff] }
 0x3c0   :  { %v3988_v40 = vmax.f32 %v3924_v42, 0.0  ;;  %v9102_v55 = vpop.permute.xlu0 %9101 }
 0x3c1   :  { %4044 = vst.msk [vmem:[#allocation3 + $0x138] sm:$0xff] %vm3418_vm2, %v3980_v33  ;;  %v4900_v48 = vsel %vm3418_vm2, %v9417_v56, %v9093_v28  ;;  %v4901_v8 = vsel %vm3418_vm2, %v9418_v32, %v9094_v49  ;;  %v9104_v10 = vunpack.i.h.bf16 %v9102_v55  ;;  %v9103_v18 = vunpack.i.l.bf16 %v9102_v55  ;;  %v3780_v25 = vpop.f32.mrf.mxu3  ;;  %v9127_v53 = vpop.permute.xlu2 %9126 }
 0x3c2   :  { %4052 = vst.msk [vmem:[#allocation3 + $0x178] sm:$0xff] %vm3418_vm2, %v3988_v40  ;;  %v3863_v21 = vmul.f32 %v12000_v11, %v3780_v25  ;;  %v3745_v7 = vpop.f32.mrf.mxu0  ;;  %v4916_v46 = vsel %vm4866_vm10, %v4900_v48, %v9098_v2  ;;  %v4917_v38 = vsel %vm4866_vm10, %v4901_v8, %v9099_v13  ;;  %v4450_v40 = vld [vmem:[#allocation4 + $0x39] sm:$0xff]  ;;  %v9128_v25 = vunpack.i.l.bf16 %v9127_v53 }
 0x3c3   :  { %v3849_v34 = vmul.f32 %v12000_v11, %v3745_v7  ;;  %v4932_v54 = vsel %vm4883_vm11, %v4916_v46, %v9103_v18  ;;  %v4933_v3 = vsel %vm4883_vm11, %v4917_v38, %v9104_v10  ;;  %v4950_v56 = vpack.c.bf16 %v4451_v23, %v4450_v40  ;;  %v4388_v7 = vld [vmem:[#allocation4 + $0x68] sm:$0xff]  ;;  %v12440_v23 = vld [vmem:[#allocation4 + $0x110] sm:$0xff] }
 0x3c4   :  { %v3931_v14 = vadd.f32 %v12013_v39, %v3863_v21  ;;  %v4949_v50 = vpack.c.bf16 %v4933_v3, %v4932_v54  ;;  %v9129_v18 = vunpack.i.h.bf16 %v9127_v53  ;;  %v4387_v21 = vld [vmem:[#allocation4 + $0x50] sm:$0xff] }
 0x3c5   :  { %v3917_v27 = vadd.f32 %v12013_v39, %v3849_v34 }
 0x3c6   :  { %v3995_v30 = vmax.f32 %v3931_v14, 0.0  ;;  %v9107_v36 = vpop.permute.xlu1 %9106  ;;  %5197 = vmatmul.bf16.vlgmr.msra.gmra.mxu2 %v4949_v50  ;;  %v12415_v50 = vld [vmem:[%s13355_s2] ss:$0 sm:$0xff] }
 0x3c7   :  { %v3981_v0 = vmax.f32 %v3917_v27, 0.0  ;;  %v9109_v22 = vunpack.i.h.bf16 %v9107_v36  ;;  %v9108_v9 = vunpack.i.l.bf16 %v9107_v36  ;;  %v12420_v27 = vld [vmem:[#allocation4 + $0x111] sm:$0xff] }
 0x3c8   :  { %v4107_v20 = vld [vmem:[#allocation3 + $0x130] ss:$2 sm:$0xff]  ;;  %v4171_v26 = vld [vmem:[#allocation3 + $0x131] ss:$2 sm:$0xff]  ;;  %4059 = vst.msk [vmem:[#allocation3 + $0x1b0] sm:$0xff] %vm3418_vm2, %v3995_v30  ;;  %v9117_v31 = vpop.permute.xlu0 %9116 }
 0x3c9   :  { %v4215_v44 = vmax.f32 %v4107_v20, %v4171_v26  ;;  %v4115_v58 = vld [vmem:[#allocation3 + $0x170] ss:$2 sm:$0xff]  ;;  %v4179_v62 = vld [vmem:[#allocation3 + $0x171] ss:$2 sm:$0xff]  ;;  %4045 = vst.msk [vmem:[#allocation3 + $0x140] sm:$0xff] %vm3418_vm2, %v3981_v0  ;;  %v4851_v16 = vsel %vm3418_vm2, %v9419_v47, %v9109_v22  ;;  %v4850_v41 = vsel %vm3418_vm2, %v4321_v5, %v9108_v9  ;;  %v9119_v24 = vunpack.i.h.bf16 %v9117_v31  ;;  %v3782_v52 = vpop.f32.mrf.mxu3  ;;  %v9142_v5 = vpop.permute.xlu2 %9141 }
 0x3ca   :  { %v4219_v29 = vmax.f32 %v4115_v58, %v4179_v62  ;;  %v9118_v35 = vunpack.i.l.bf16 %v9117_v31  ;;  %v3864_v63 = vmul.f32 %v12000_v11, %v3782_v52  ;;  %v3747_v19 = vpop.f32.mrf.mxu0  ;;  %v4867_v12 = vsel %vm4866_vm10, %v4850_v41, %v9113_v15  ;;  %v12427_v36 = vld [vmem:[%s13356_s3] ss:$0 sm:$0xff] }
 0x3cb   :  { %v4237_v42 = vmax.f32 %v4214_v51, %v4215_v44  ;;  %v3850_v6 = vmul.f32 %v12000_v11, %v3747_v19  ;;  %v4868_v33 = vsel %vm4866_vm10, %v4851_v16, %v9114_v60  ;;  %v9144_v20 = vunpack.i.h.bf16 %v9142_v5  ;;  %v4323_v31 = vld [vmem:[#allocation4 + $0x37] sm:$0xff]  ;;  %v4324_v44 = vld [vmem:[#allocation4 + $0x4f] sm:$0xff] }
 0x3cc   :  { %v4239_v49 = vmax.f32 %v4218_v1, %v4219_v29  ;;  %v3932_v28 = vadd.f32 %v12013_v39, %v3864_v63  ;;  %v4884_v13 = vsel %vm4883_vm11, %v4867_v12, %v9118_v35  ;;  %v4885_v2 = vsel %vm4883_vm11, %v4868_v33, %v9119_v24  ;;  %v4453_v35 = vld [vmem:[#allocation4 + $0x81] sm:$0xff]  ;;  %v4345_v12 = vld [vmem:[#allocation4 + $0xf8] sm:$0xff] }
 0x3cd   :  { %4314 = vst.msk [vmem:[#allocation4 + $0x128] sm:$0xff] %vm3418_vm2, %v4237_v42  ;;  %v3918_v55 = vadd.f32 %v12013_v39, %v3850_v6  ;;  %v4948_v61 = vpack.c.bf16 %v4885_v2, %v4884_v13  ;;  %v9143_v26 = vunpack.i.l.bf16 %v9142_v5  ;;  %v4452_v42 = vld [vmem:[#allocation4 + $0x69] sm:$0xff]  ;;  %v9225_v13 = vpack.i.bf16 %v12440_v23, %v4345_v12 }
 0x3ce   :  { %4316 = vst.msk [vmem:[#allocation4 + $0x158] sm:$0xff] %vm3418_vm2, %v4239_v49  ;;  %v3996_v48 = vmax.f32 %v3932_v28, 0.0  ;;  %v9122_v11 = vpop.permute.xlu1 %9121  ;;  %v4953_v49 = vpack.c.bf16 %v4453_v35, %v4452_v42 }
 0x3cf   :  { %v3982_v32 = vmax.f32 %v3918_v55, 0.0  ;;  %5148 = vmatmul.bf16.vlgmr.msrb.gmra.mxu1 %v4948_v61  ;;  %7181 = vmatmul.msk.bf16.vlgmr.msrb.gmra.mxu3 %vm3418_vm2, %v4950_v56  ;;  %v9124_v8 = vunpack.i.h.bf16 %v9122_v11  ;;  %v9123_v10 = vunpack.i.l.bf16 %v9122_v11 }
 0x3d0   :  { %4060 = vst.msk [vmem:[#allocation3 + $0x1b8] sm:$0xff] %vm3418_vm2, %v3996_v48  ;;  %v9132_v46 = vpop.permute.xlu0 %9131 }
 0x3d1   :  { %4046 = vst.msk [vmem:[#allocation3 + $0x148] sm:$0xff] %vm3418_vm2, %v3982_v32  ;;  %v4902_v39 = vsel %vm3418_vm2, %v4387_v21, %v9123_v10  ;;  %v4903_v38 = vsel %vm3418_vm2, %v4388_v7, %v9124_v8  ;;  %v9134_v34 = vunpack.i.h.bf16 %v9132_v46  ;;  %v9133_v54 = vunpack.i.l.bf16 %v9132_v46  ;;  %v4389_v10 = vld [vmem:[#allocation4 + $0x80] sm:$0xff]  ;;  %v9422_v7 = vld [vmem:[#allocation4 + $0x98] sm:$0xff] }
 0x3d2   :  { %v3750_v3 = vpop.f32.mrf.mxu0  ;;  %v4918_v4 = vsel %vm4866_vm10, %v4902_v39, %v9128_v25  ;;  %v4919_v14 = vsel %vm4866_vm10, %v4903_v38, %v9129_v18  ;;  %v9157_v55 = vpop.permute.xlu2 %9156 }
 0x3d3   :  { %v3851_v45 = vmul.f32 %v12415_v50, %v3750_v3  ;;  %v4934_v43 = vsel %vm4883_vm11, %v4918_v4, %v9133_v54  ;;  %v4935_v57 = vsel %vm4883_vm11, %v4919_v14, %v9134_v34  ;;  %v9159_v54 = vunpack.i.h.bf16 %v9157_v55 }
 0x3d4   :  { %v12422_v30 = vld [vmem:[#allocation4 + $0x129] sm:$0xff]  ;;  %v4952_v22 = vpack.c.bf16 %v4935_v57, %v4934_v43  ;;  %v9158_v3 = vunpack.i.l.bf16 %v9157_v55 }
 0x3d5   :  { %v3919_v0 = vadd.f32 %v12427_v36, %v3851_v45  ;;  %v9210_v9 = vpack.i.bf16 %v12422_v30, %v12420_v27 }
 0x3d6   :  { %v9137_v1 = vpop.permute.xlu1 %9136  ;;  %5202 = vmatmul.bf16.gmra.mxu2 %v4952_v22 }
 0x3d7   :  { %v3983_v51 = vmax.f32 %v3919_v0, 0.0  ;;  %v9139_v60 = vunpack.i.h.bf16 %v9137_v1  ;;  %v9138_v15 = vunpack.i.l.bf16 %v9137_v1  ;;  %9211 = vrot.lane.b32.xlu1 %v9210_v9, %s9486_s27 }
 0x3d8   :  { %v9147_v58 = vpop.permute.xlu0 %9146  ;;  %v4109_v11 = vld [vmem:[#allocation3 + $0x140] ss:$2 sm:$0xff]  ;;  %v4173_v32 = vld [vmem:[#allocation3 + $0x141] ss:$2 sm:$0xff] }
 0x3d9   :  { %4047 = vst.msk [vmem:[#allocation3 + $0x150] sm:$0xff] %vm3418_vm2, %v3983_v51  ;;  %v4853_v62 = vsel %vm3418_vm2, %v4324_v44, %v9139_v60  ;;  %v4852_v47 = vsel %vm3418_vm2, %v4323_v31, %v9138_v15  ;;  %v9149_v16 = vunpack.i.h.bf16 %v9147_v58  ;;  %v9148_v41 = vunpack.i.l.bf16 %v9147_v58  ;;  %v4454_v60 = vld [vmem:[#allocation4 + $0x99] sm:$0xff] }
 0x3da   :  { %v3752_v24 = vpop.f32.mrf.mxu0  ;;  %v4869_v52 = vsel %vm4866_vm10, %v4852_v47, %v9143_v26  ;;  %v4870_v29 = vsel %vm4866_vm10, %v4853_v62, %v9144_v20  ;;  %v4216_v34 = vmax.f32 %v4109_v11, %v4173_v32  ;;  %v4956_v26 = vpack.c.bf16 %v12172_v17, %v4454_v60  ;;  %v9172_v44 = vpop.permute.xlu2 %9171  ;;  %v4325_v62 = vld [vmem:[#allocation4 + $0x67] sm:$0xff]  ;;  %v4326_v47 = vld [vmem:[#allocation4 + $0x7f] sm:$0xff] }
 0x3db   :  { %v3852_v63 = vmul.f32 %v12415_v50, %v3752_v24  ;;  %v4887_v19 = vsel %vm4883_vm11, %v4870_v29, %v9149_v16  ;;  %v4886_v53 = vsel %vm4883_vm11, %v4869_v52, %v9148_v41  ;;  %v9174_v52 = vunpack.i.h.bf16 %v9172_v44  ;;  %v12485_v11 = vld [vmem:[#allocation4 + $0x159] sm:$0xff] }
 0x3dc   :  { %v4951_v33 = vpack.c.bf16 %v4887_v19, %v4886_v53  ;;  %v9173_v29 = vunpack.i.l.bf16 %v9172_v44 }
 0x3dd   :  { %v3920_v6 = vadd.f32 %v12427_v36, %v3852_v63 }
 0x3de   :  { %v9152_v28 = vpop.permute.xlu1 %9151 }
 0x3df   :  { %v3984_v2 = vmax.f32 %v3920_v6, 0.0  ;;  %5153 = vmatmul.bf16.gmra.mxu1 %v4951_v33  ;;  %7182 = vmatmul.msk.bf16.gmra.mxu3 %vm3418_vm2, %v4953_v49  ;;  %v9154_v61 = vunpack.i.h.bf16 %v9152_v28  ;;  %v9153_v56 = vunpack.i.l.bf16 %v9152_v28  ;;  %v12468_v6 = vld [vmem:[#allocation4 + $0x128] sm:$0xff] }
 0x3e0   :  { %9226 = vrot.lane.b32.xlu1 %v9225_v13, %s9486_s27  ;;  %v12470_v33 = vld [vmem:[#allocation4 + $0x127] sm:$0xff] }
 0x3e1   :  { %4048 = vst.msk [vmem:[#allocation3 + $0x158] sm:$0xff] %vm3418_vm2, %v3984_v2  ;;  %v4904_v21 = vsel %vm3418_vm2, %v4389_v10, %v9153_v56  ;;  %v4905_v46 = vsel %vm3418_vm2, %v9422_v7, %v9154_v61  ;;  %v4361_v7 = vld [vmem:[#allocation4 + $0xf9] sm:$0xff] }
 0x3e2   :  { %v4920_v22 = vsel %vm4866_vm10, %v4904_v21, %v9158_v3  ;;  %v4921_v9 = vsel %vm4866_vm10, %v4905_v46, %v9159_v54  ;;  %v12496_v46 = vld [vmem:[#allocation4 + $0x10f] sm:$0xff]  ;;  %v9230_v54 = vpack.i.bf16 %v12420_v27, %v4361_v7 }
 0x3e3   :  { %v3765_v40 = vpop.f32.mrf.mxu1 }
 0x3e4   :  { %v3857_v48 = vmul.f32 %v12415_v50, %v3765_v40 }
 0x3e6   :  { %v3925_v8 = vadd.f32 %v12427_v36, %v3857_v48  ;;  %v9167_v38 = vpop.permute.xlu1 %9166 }
 0x3e7   :  { %v9169_v5 = vunpack.i.h.bf16 %v9167_v38  ;;  %v9168_v1 = vunpack.i.l.bf16 %v9167_v38 }
 0x3e8   :  { %v4111_v18 = vld [vmem:[#allocation3 + $0x150] ss:$2 sm:$0xff]  ;;  %v4175_v25 = vld [vmem:[#allocation3 + $0x151] ss:$2 sm:$0xff]  ;;  %v3989_v39 = vmax.f32 %v3925_v8, 0.0 }
 0x3e9   :  { %v4217_v4 = vmax.f32 %v4111_v18, %v4175_v25  ;;  %v9162_v14 = vpop.permute.xlu0 %9161  ;;  %v4855_v16 = vsel %vm3418_vm2, %v4326_v47, %v9169_v5  ;;  %v4854_v41 = vsel %vm3418_vm2, %v4325_v62, %v9168_v1  ;;  %v4457_v25 = vld [vmem:[#allocation4 + $0xe1] sm:$0xff] }
 0x3ea   :  { %4053 = vst.msk [vmem:[#allocation3 + $0x180] sm:$0xff] %vm3418_vm2, %v3989_v39  ;;  %v9164_v45 = vunpack.i.h.bf16 %v9162_v14  ;;  %v9163_v43 = vunpack.i.l.bf16 %v9162_v14  ;;  %v4871_v53 = vsel %vm4866_vm10, %v4854_v41, %v9173_v29  ;;  %v4872_v42 = vsel %vm4866_vm10, %v4855_v16, %v9174_v52 }
 0x3eb   :  { %v4238_v57 = vmax.f32 %v4216_v34, %v4217_v4  ;;  %v3767_v0 = vpop.f32.mrf.mxu1  ;;  %v4959_v38 = vpack.c.bf16 %v4457_v25, %v12166_v37  ;;  %v9235_v34 = vpack.i.bf16 %v12470_v33, %v12496_v46 }
 0x3ec   :  { %v3858_v51 = vmul.f32 %v12415_v50, %v3767_v0  ;;  %v4936_v15 = vsel %vm4883_vm11, %v4920_v22, %v9163_v43  ;;  %v4937_v20 = vsel %vm4883_vm11, %v4921_v9, %v9164_v45  ;;  %v4391_v9 = vld [vmem:[#allocation4 + $0xb0] sm:$0xff] }
 0x3ed   :  { %4315 = vst.msk [vmem:[#allocation4 + $0x140] sm:$0xff] %vm3418_vm2, %v4238_v57  ;;  %v4955_v31 = vpack.c.bf16 %v4937_v20, %v4936_v15 }
 0x3ee   :  { %v3926_v58 = vadd.f32 %v12427_v36, %v3858_v51 }
 0x3ef   :  { %7183 = vmatmul.msk.bf16.gmra.mxu3 %vm3418_vm2, %v4956_v26  ;;  %5207 = vmatmul.bf16.gmra.mxu2 %v4955_v31 }
 0x3f0   :  { %v3990_v24 = vmax.f32 %v3926_v58, 0.0 }
 0x3f1   :  { %v9177_v35 = vpop.permute.xlu0 %9176 }
 0x3f2   :  { %4054 = vst.msk [vmem:[#allocation3 + $0x188] sm:$0xff] %vm3418_vm2, %v3990_v24  ;;  %v3785_v17 = vpop.f32.mrf.mxu3  ;;  %v9179_v63 = vunpack.i.h.bf16 %v9177_v35  ;;  %v9178_v19 = vunpack.i.l.bf16 %v9177_v35  ;;  %v9187_v4 = vpop.permute.xlu2 %9186 }
 0x3f3   :  { %v3865_v12 = vmul.f32 %v12415_v50, %v3785_v17  ;;  %v9189_v27 = vunpack.i.h.bf16 %v9187_v4  ;;  %v9188_v0 = vunpack.i.l.bf16 %v9187_v4 }
 0x3f4   :  { %v4888_v49 = vsel %vm4883_vm11, %v4871_v53, %v9178_v19  ;;  %v4889_v28 = vsel %vm4883_vm11, %v4872_v42, %v9179_v63  ;;  %v12474_v13 = vld [vmem:[#allocation4 + $0x140] sm:$0xff] }
 0x3f5   :  { %v12476_v2 = vld [vmem:[#allocation4 + $0x13f] sm:$0xff]  ;;  %v3933_v55 = vadd.f32 %v12427_v36, %v3865_v12  ;;  %v4954_v61 = vpack.c.bf16 %v4889_v28, %v4888_v49  ;;  %v9220_v56 = vpack.i.bf16 %v12474_v13, %v12468_v6  ;;  %v4327_v49 = vld [vmem:[#allocation4 + $0x97] sm:$0xff]  ;;  %v4328_v28 = vld [vmem:[#allocation4 + $0xaf] sm:$0xff] }
 0x3f6   :  { %v12478_v40 = vld [vmem:[#allocation4 + $0x141] sm:$0xff]  ;;  %v9215_v48 = vpack.i.bf16 %v12476_v2, %v12470_v33 }
 0x3f7   :  { %v9240_v32 = vpack.i.bf16 %v12485_v11, %v12478_v40  ;;  %v9260_v8 = vpack.i.bf16 %v12478_v40, %v12422_v30  ;;  %v3997_v10 = vmax.f32 %v3933_v55, 0.0  ;;  %5158 = vmatmul.bf16.gmra.mxu1 %v4954_v61  ;;  %9221 = vrot.lane.b32.xlu0 %v9220_v56, %s9488_s0  ;;  %v4962_v1 = vpack.c.bf16 %v12478_v40, %v12422_v30 }
 0x3f8   :  { %9216 = vrot.lane.b32.xlu2 %v9215_v48, %s9478_s18 }
 0x3f9   :  { %9241 = vrot.lane.b32.xlu1 %v9240_v32, %s9486_s27  ;;  %4061 = vst.msk [vmem:[#allocation3 + $0x1c0] sm:$0xff] %vm3418_vm2, %v3997_v10  ;;  %v4181_v4 = vld [vmem:[#allocation3 + $0x181] ss:$2 sm:$0xff] }
 0x3fa   :  { %v3787_v18 = vpop.f32.mrf.mxu3  ;;  %v9202_v16 = vpop.permute.xlu2 %9201 }
 0x3fb   :  { %v3866_v21 = vmul.f32 %v12415_v50, %v3787_v18  ;;  %v9204_v19 = vunpack.i.h.bf16 %v9202_v16  ;;  %v9203_v12 = vunpack.i.l.bf16 %v9202_v16 }
 0x3fd   :  { %v3934_v39 = vadd.f32 %v12427_v36, %v3866_v21 }
 0x3ff   :  { %v3998_v3 = vmax.f32 %v3934_v39, 0.0  ;;  %7184 = vmatmul.msk.bf16.gmra.mxu3 %vm3418_vm2, %v4959_v38  ;;  %9236 = vrot.lane.b32.xlu0 %v9235_v34, %s9488_s0 }
 0x400   :  { %9231 = vrot.lane.b32.xlu2 %v9230_v54, %s9478_s18 }
 0x401   :  { %9256 = vrot.lane.b32.xlu1 %v9220_v56, %s9486_s27  ;;  %4062 = vst.msk [vmem:[#allocation3 + $0x1c8] sm:$0xff] %vm3418_vm2, %v3998_v3  ;;  %v4117_v3 = vld [vmem:[#allocation3 + $0x180] ss:$2 sm:$0xff] }
 0x409   :  { %v9192_v14 = vpop.permute.xlu0 %9191 }
 0x40a   :  { %v3770_v45 = vpop.f32.mrf.mxu1  ;;  %v9194_v22 = vunpack.i.h.bf16 %v9192_v14  ;;  %v9193_v60 = vunpack.i.l.bf16 %v9192_v14 }
 0x40b   :  { %v9182_v37 = vpop.permute.xlu1 %9181  ;;  %v3859_v43 = vmul.f32 %v12415_v50, %v3770_v45 }
 0x40c   :  { %v9184_v57 = vunpack.i.h.bf16 %v9182_v37  ;;  %v9183_v5 = vunpack.i.l.bf16 %v9182_v37 }
 0x40d   :  { %v3927_v51 = vadd.f32 %v12427_v36, %v3859_v43  ;;  %v4220_v43 = vmax.f32 %v4117_v3, %v4181_v4 }
 0x40e   :  { %v4906_v15 = vsel %vm3418_vm2, %v4391_v9, %v9183_v5  ;;  %v4907_v20 = vsel %vm3418_vm2, %v12162_v59, %v9184_v57 }
 0x40f   :  { %v4922_v26 = vsel %vm4866_vm10, %v4906_v15, %v9188_v0  ;;  %v4923_v31 = vsel %vm4866_vm10, %v4907_v20, %v9189_v27  ;;  %v3991_v44 = vmax.f32 %v3927_v51, 0.0  ;;  %7185 = vmatmul.msk.bf16.gmra.mxu3 %vm3418_vm2, %v4962_v1  ;;  %v4125_v27 = vld [vmem:[#allocation3 + $0x1c0] ss:$2 sm:$0xff]  ;;  %v4189_v0 = vld [vmem:[#allocation3 + $0x1c1] ss:$2 sm:$0xff] }
 0x410   :  { %v4938_v58 = vsel %vm4883_vm11, %v4922_v26, %v9193_v60  ;;  %v4939_v62 = vsel %vm4883_vm11, %v4923_v31, %v9194_v22  ;;  %v4224_v1 = vmax.f32 %v4125_v27, %v4189_v0  ;;  %v12538_v26 = vld [vmem:[#allocation4 + $0x158] sm:$0xff] }
 0x411   :  { %v4958_v47 = vpack.c.bf16 %v4939_v62, %v4938_v58  ;;  %4055 = vst.msk [vmem:[#allocation3 + $0x190] sm:$0xff] %vm3418_vm2, %v3991_v44  ;;  %v9207_v35 = vpop.permute.xlu0 %9206  ;;  %v12540_v31 = vld [vmem:[#allocation4 + $0x157] sm:$0xff] }
 0x412   :  { %v3790_v41 = vpop.f32.mrf.mxu3  ;;  %v3772_v24 = vpop.f32.mrf.mxu1  ;;  %v9209_v56 = vunpack.i.h.bf16 %v9207_v35  ;;  %v9208_v48 = vunpack.i.l.bf16 %v9207_v35 }
 0x413   :  { %5212 = vmatmul.bf16.gmra.mxu2 %v4958_v47  ;;  %v3867_v59 = vmul.f32 %v12415_v50, %v3790_v41  ;;  %v3860_v52 = vmul.f32 %v12415_v50, %v3772_v24  ;;  %v9197_v29 = vpop.permute.xlu1 %9196 }
 0x414   :  { %v9199_v17 = vunpack.i.h.bf16 %v9197_v29  ;;  %v9198_v63 = vunpack.i.l.bf16 %v9197_v29 }
 0x415   :  { %v3935_v53 = vadd.f32 %v12427_v36, %v3867_v59  ;;  %v3928_v42 = vadd.f32 %v12427_v36, %v3860_v52 }
 0x416   :  { %v4857_v55 = vsel %vm3418_vm2, %v4328_v28, %v9199_v17  ;;  %v4856_v61 = vsel %vm3418_vm2, %v4327_v49, %v9198_v63 }
 0x417   :  { %v3999_v32 = vmax.f32 %v3935_v53, 0.0  ;;  %v3992_v10 = vmax.f32 %v3928_v42, 0.0  ;;  %v4873_v18 = vsel %vm4866_vm10, %v4856_v61, %v9203_v12  ;;  %v4874_v25 = vsel %vm4866_vm10, %v4857_v55, %v9204_v19  ;;  %v4123_v61 = vld [vmem:[#allocation3 + $0x1b0] ss:$2 sm:$0xff] }
 0x418   :  { %v4890_v21 = vsel %vm4883_vm11, %v4873_v18, %v9208_v48  ;;  %v4891_v7 = vsel %vm4883_vm11, %v4874_v25, %v9209_v56  ;;  %v9265_v12 = vpack.i.bf16 %v12540_v31, %v12476_v2  ;;  %v4187_v56 = vld [vmem:[#allocation3 + $0x1b1] ss:$2 sm:$0xff] }
 0x419   :  { %4063 = vst.msk [vmem:[#allocation3 + $0x1d0] sm:$0xff] %vm3418_vm2, %v3999_v32  ;;  %v4957_v39 = vpack.c.bf16 %v4891_v7, %v4890_v21  ;;  %v4223_v18 = vmax.f32 %v4123_v61, %v4187_v56 }
 0x41a   :  { %4056 = vst.msk [vmem:[#allocation3 + $0x198] sm:$0xff] %vm3418_vm2, %v3992_v10  ;;  %v3792_v38 = vpop.f32.mrf.mxu3 }
 0x41b   :  { %v3868_v34 = vmul.f32 %v12415_v50, %v3792_v38  ;;  %5163 = vmatmul.bf16.gmra.mxu1 %v4957_v39 }
 0x41d   :  { %v3936_v54 = vadd.f32 %v12427_v36, %v3868_v34 }
 0x41f   :  { %v4000_v14 = vmax.f32 %v3936_v54, 0.0 }
 0x421   :  { %v4119_v45 = vld [vmem:[#allocation3 + $0x190] ss:$2 sm:$0xff]  ;;  %v4183_v37 = vld [vmem:[#allocation3 + $0x191] ss:$2 sm:$0xff]  ;;  %4064 = vst.msk [vmem:[#allocation3 + $0x1d8] sm:$0xff] %vm3418_vm2, %v4000_v14 }
 0x422   :  { %v4221_v57 = vmax.f32 %v4119_v45, %v4183_v37 }
 0x424   :  { %v4240_v5 = vmax.f32 %v4220_v43, %v4221_v57 }
 0x426   :  { %4317 = vst.msk [vmem:[#allocation4 + $0x170] sm:$0xff] %vm3418_vm2, %v4240_v5 }
 0x428   :  { %v4127_v22 = vld [vmem:[#allocation3 + $0x1d0] ss:$2 sm:$0xff]  ;;  %v4191_v9 = vld [vmem:[#allocation3 + $0x1d1] ss:$2 sm:$0xff] }
 0x429   :  { %v4225_v51 = vmax.f32 %v4127_v22, %v4191_v9  ;;  %v12616_v9 = vld [vmem:[%s13358_s5] ss:$0 sm:$0xff] }
 0x42a   :  { %v3775_v60 = vpop.f32.mrf.mxu1 }
 0x42b   :  { %v4242_v15 = vmax.f32 %v4224_v1, %v4225_v51  ;;  %v3861_v20 = vmul.f32 %v12415_v50, %v3775_v60  ;;  %v12621_v60 = vld [vmem:[%s13359_s6] ss:$0 sm:$0xff] }
 0x42d   :  { %4319 = vst.msk [vmem:[#allocation4 + $0x1a0] sm:$0xff] %vm3418_vm2, %v4242_v15  ;;  %v3929_v44 = vadd.f32 %v12427_v36, %v3861_v20  ;;  %v12544_v58 = vld [vmem:[#allocation4 + $0x171] sm:$0xff] }
 0x42e   :  { %v12546_v62 = vld [vmem:[#allocation4 + $0x170] sm:$0xff]  ;;  %v4965_v16 = vpack.c.bf16 %v12544_v58, %v12485_v11 }
 0x42f   :  { %v12548_v47 = vld [vmem:[#allocation4 + $0x16f] sm:$0xff]  ;;  %v12554_v41 = vpack.i.bf16 %v12546_v62, %v12538_v26  ;;  %v3993_v59 = vmax.f32 %v3929_v44, 0.0 }
 0x430   :  { %v9245_v24 = vpack.i.bf16 %v12548_v47, %v12540_v31  ;;  %7186 = vmatmul.msk.bf16.gmra.mxu3 %vm3418_vm2, %v4965_v16 }
 0x431   :  { %9251 = vrot.lane.b32.xlu0 %v12554_v41, %s9488_s0  ;;  %4057 = vst.msk [vmem:[#allocation3 + $0x1a0] sm:$0xff] %vm3418_vm2, %v3993_v59 }
 0x432   :  { %9246 = vrot.lane.b32.xlu2 %v9245_v24, %s9478_s18  ;;  %v3795_v52 = vpop.f32.mrf.mxu3  ;;  %v3777_v29 = vpop.f32.mrf.mxu1 }
 0x433   :  { %v3869_v35 = vmul.f32 %v12415_v50, %v3795_v52  ;;  %v3862_v17 = vmul.f32 %v12415_v50, %v3777_v29  ;;  %v9290_v29 = vpack.i.bf16 %v12544_v58, %v12485_v11 }
 0x434   :  { %v12584_v3 = vld [vmem:[#allocation4 + $0x1a1] sm:$0xff] }
 0x435   :  { %v3937_v63 = vadd.f32 %v12427_v36, %v3869_v35  ;;  %v3930_v19 = vadd.f32 %v12427_v36, %v3862_v17  ;;  %v12586_v4 = vld [vmem:[#allocation4 + $0x1a0] sm:$0xff] }
 0x436   :  { %v12588_v14 = vld [vmem:[#allocation4 + $0x19f] sm:$0xff] }
 0x437   :  { %v4001_v53 = vmax.f32 %v3937_v63, 0.0  ;;  %v3994_v42 = vmax.f32 %v3930_v19, 0.0 }
 0x439   :  { %9266 = vrot.lane.b32.xlu0 %v9265_v12, %s9488_s0  ;;  %4065 = vst.msk [vmem:[#allocation3 + $0x1e0] sm:$0xff] %vm3418_vm2, %v4001_v53 }
 0x43a   :  { %9261 = vrot.lane.b32.xlu2 %v9260_v8, %s9478_s18  ;;  %4058 = vst.msk [vmem:[#allocation3 + $0x1a8] sm:$0xff] %vm3418_vm2, %v3994_v42  ;;  %v3797_v49 = vpop.f32.mrf.mxu3  ;;  %v5492_v42 = vld [vmem:[#allocation6 + $0x7] sm:$0xf] }
 0x43b   :  { %v3870_v28 = vmul.f32 %v12415_v50, %v3797_v49  ;;  %5573 = vst [vmem:[#allocation1] ss:$2 sm:$0xff] %v5492_v42 }
 0x43d   :  { %v3938_v55 = vadd.f32 %v12427_v36, %v3870_v28 }
 0x43f   :  { %v4002_v48 = vmax.f32 %v3938_v55, 0.0 }
 0x441   :  { %v4121_v32 = vld [vmem:[#allocation3 + $0x1a0] ss:$2 sm:$0xff]  ;;  %v4185_v10 = vld [vmem:[#allocation3 + $0x1a1] ss:$2 sm:$0xff]  ;;  %4066 = vst.msk [vmem:[#allocation3 + $0x1e8] sm:$0xff] %vm3418_vm2, %v4002_v48 }
 0x442   :  { %v4222_v25 = vmax.f32 %v4121_v32, %v4185_v10  ;;  %v3800_v21 = vpop.f32.mrf.mxu3 }
 0x443   :  { %v3871_v30 = vmul.f32 %v12415_v50, %v3800_v21  ;;  %v4449_v21 = vld [vmem:[#allocation4 + $0x1d0] sm:$0xff] }
 0x444   :  { %v4241_v40 = vmax.f32 %v4222_v25, %v4223_v18  ;;  %v4465_v25 = vld [vmem:[#allocation4 + $0x1d1] sm:$0xff] }
 0x445   :  { %v3939_v8 = vadd.f32 %v12427_v36, %v3871_v30 }
 0x446   :  { %4318 = vst.msk [vmem:[#allocation4 + $0x188] sm:$0xff] %vm3418_vm2, %v4241_v40  ;;  %v4433_v40 = vld [vmem:[#allocation4 + $0x1cf] sm:$0xff] }
 0x447   :  { %v4003_v7 = vmax.f32 %v3939_v8, 0.0 }
 0x448   :  { %v4129_v44 = vld [vmem:[#allocation3 + $0x1e0] ss:$2 sm:$0xff]  ;;  %v4193_v16 = vld [vmem:[#allocation3 + $0x1e1] ss:$2 sm:$0xff] }
 0x449   :  { %4067 = vst.msk [vmem:[#allocation3 + $0x1f0] sm:$0xff] %vm3418_vm2, %v4003_v7  ;;  %v5198_v38 = vpop.f32.mrf.mxu2  ;;  %v4226_v35 = vmax.f32 %v4129_v44, %v4193_v16  ;;  %v9212_v48 = vpop.permute.xlu1 %9211 }
 0x44a   :  { %v3802_v39 = vpop.f32.mrf.mxu3 }
 0x44b   :  { %v3872_v34 = vmul.f32 %v12415_v50, %v3802_v39 }
 0x44c   :  { %v5149_v54 = vpop.f32.mrf.mxu1 }
 0x44d   :  { %v3940_v45 = vadd.f32 %v12427_v36, %v3872_v34  ;;  %v12591_v37 = vld [vmem:[#allocation4 + $0x189] sm:$0xff]  ;;  %v5199_v22 = vadd.f32 %v5198_v38, %v5149_v54  ;;  %v9213_v38 = vunpack.i.l.bf16 %v9212_v48 }
 0x44e   :  { %v12593_v43 = vld [vmem:[#allocation4 + $0x188] sm:$0xff]  ;;  %v4968_v5 = vpack.c.bf16 %v12584_v3, %v12591_v37  ;;  %v9270_v36 = vpack.i.bf16 %v12591_v37, %v12544_v58 }
 0x44f   :  { %v12595_v57 = vld [vmem:[#allocation4 + $0x187] sm:$0xff]  ;;  %v12601_v50 = vpack.i.bf16 %v12586_v4, %v12593_v43  ;;  %v4004_v0 = vmax.f32 %v3940_v45, 0.0  ;;  %v4908_v16 = vsel %vm3418_vm2, %v12440_v23, %v9213_v38 }
 0x450   :  { %v9275_v27 = vpack.i.bf16 %v12588_v14, %v12595_v57  ;;  %7187 = vmatmul.msk.bf16.gmra.mxu3 %vm3418_vm2, %v4968_v5  ;;  %9271 = vrot.lane.b32.xlu1 %v9270_v36, %s9486_s27  ;;  %v9295_v59 = vpack.i.bf16 %v12595_v57, %v12548_v47  ;;  %v9214_v5 = vunpack.i.h.bf16 %v9212_v48 }
 0x451   :  { %9281 = vrot.lane.b32.xlu0 %v12601_v50, %s9488_s0  ;;  %4068 = vst.msk [vmem:[#allocation3 + $0x1f8] sm:$0xff] %vm3418_vm2, %v4004_v0  ;;  %v5200_v15 = vpop.f32.mrf.mxu2 }
 0x452   :  { %9276 = vrot.lane.b32.xlu2 %v9275_v27, %s9478_s18  ;;  %v5247_v1 = vpop.f32.mrf.mxu3  ;;  %v9217_v18 = vpop.permute.xlu2 %9216 }
 0x453   :  { %v5248_v51 = vadd.f32 %v5247_v1, %v5199_v22  ;;  %v9218_v27 = vunpack.i.l.bf16 %v9217_v18  ;;  %v9219_v1 = vunpack.i.h.bf16 %v9217_v18  ;;  %v9320_v18 = vpack.i.bf16 %v12584_v3, %v12591_v37 }
 0x454   :  { %v5151_v20 = vpop.f32.mrf.mxu1 }
 0x455   :  { %v5291_v24 = vmul.f32 %v12616_v9, %v5248_v51  ;;  %v5201_v53 = vadd.f32 %v5200_v15, %v5151_v20 }
 0x457   :  { %v5311_v52 = vadd.f32 %v12621_v60, %v5291_v24 }
 0x458   :  { %v4131_v17 = vld [vmem:[#allocation3 + $0x1f0] ss:$2 sm:$0xff]  ;;  %v4195_v63 = vld [vmem:[#allocation3 + $0x1f1] ss:$2 sm:$0xff]  ;;  %9286 = vrot.lane.b32.xlu1 %v12554_v41, %s9486_s27 }
 0x459   :  { %9296 = vrot.lane.b32.xlu0 %v9295_v59, %s9488_s0  ;;  %v4227_v19 = vmax.f32 %v4131_v17, %v4195_v63  ;;  %v5327_v12 = vmax.f32 %v5311_v52, 0.0  ;;  %v5203_v61 = vpop.f32.mrf.mxu2 }
 0x45a   :  { %9291 = vrot.lane.b32.xlu2 %v9290_v29, %s9478_s18  ;;  %v5249_v49 = vpop.f32.mrf.mxu3  ;;  %v4909_v29 = vsel %vm3418_vm2, %v12468_v6, %v9214_v5 }
 0x45b   :  { %v4243_v28 = vmax.f32 %v4226_v35, %v4227_v19  ;;  %5343 = vst.msk [vmem:[#allocation5] sm:$0xff] %vm4866_vm10, %v5327_v12  ;;  %v5250_v55 = vadd.f32 %v5249_v49, %v5201_v53  ;;  %v4924_v53 = vsel %vm4866_vm10, %v4908_v16, %v9218_v27  ;;  %v9227_v49 = vpop.permute.xlu1 %9226  ;;  %v4925_v23 = vsel %vm4866_vm10, %v4909_v29, %v9219_v1 }
 0x45c   :  { %v5154_v11 = vpop.f32.mrf.mxu1 }
 0x45d   :  { %4320 = vst.msk [vmem:[#allocation4 + $0x1b8] sm:$0xff] %vm3418_vm2, %v4243_v28  ;;  %v5292_v58 = vmul.f32 %v12616_v9, %v5250_v55  ;;  %v5204_v10 = vadd.f32 %v5203_v61, %v5154_v11  ;;  %v9232_v11 = vpop.permute.xlu2 %9231 }
 0x45f   :  { %v5312_v56 = vadd.f32 %v12621_v60, %v5292_v58 }
 0x461   :  { %v5328_v32 = vmax.f32 %v5312_v56, 0.0  ;;  %v5205_v44 = vpop.f32.mrf.mxu2 }
 0x462   :  { %v5252_v41 = vpop.f32.mrf.mxu3  ;;  %v5359_v15 = vld [vmem:[#allocation5] ss:$2 sm:$0xf]  ;;  %v5391_v20 = vld [vmem:[#allocation5 + $0x1] ss:$2 sm:$0xf] }
 0x463   :  { %5344 = vst.msk [vmem:[#allocation5 + $0x8] sm:$0xff] %vm4866_vm10, %v5328_v32  ;;  %v5253_v30 = vadd.f32 %v5252_v41, %v5204_v10  ;;  %v5422_v42 = vmax.f32 %v5359_v15, %v5391_v20  ;;  %v9229_v32 = vunpack.i.h.bf16 %v9227_v49  ;;  %v9228_v10 = vunpack.i.l.bf16 %v9227_v49 }
 0x464   :  { %v4464_v8 = vld [vmem:[#allocation4 + $0x1b9] sm:$0xff]  ;;  %v5156_v36 = vpop.f32.mrf.mxu1 }
 0x465   :  { %v12638_v7 = vld [vmem:[#allocation4 + $0x1b8] sm:$0xff]  ;;  %v5293_v34 = vmul.f32 %v12616_v9, %v5253_v30  ;;  %v4971_v54 = vpack.c.bf16 %v4465_v25, %v4464_v8  ;;  %v9300_v22 = vpack.i.bf16 %v4464_v8, %v12584_v3  ;;  %v5206_v59 = vadd.f32 %v5205_v44, %v5156_v36 }
 0x466   :  { %v4432_v39 = vld [vmem:[#allocation4 + $0x1b7] sm:$0xff]  ;;  %v9310_v45 = vpack.i.bf16 %v4449_v21, %v12638_v7  ;;  %v9234_v21 = vunpack.i.h.bf16 %v9232_v11  ;;  %v9233_v30 = vunpack.i.l.bf16 %v9232_v11  ;;  %v4859_v3 = vsel %vm3418_vm2, %v12496_v46, %v9229_v32 }
 0x467   :  { %v9305_v0 = vpack.i.bf16 %v4433_v40, %v4432_v39  ;;  %v5313_v51 = vadd.f32 %v12621_v60, %v5293_v34  ;;  %7188 = vmatmul.msk.bf16.gmra.mxu3 %vm3418_vm2, %v4971_v54  ;;  %9301 = vrot.lane.b32.xlu1 %v9300_v22, %s9486_s27  ;;  %v9325_v48 = vpack.i.bf16 %v4432_v39, %v12588_v14  ;;  %v4329_v25 = vld [vmem:[#allocation4 + $0xf7] sm:$0xff] }
 0x468   :  { %9311 = vrot.lane.b32.xlu0 %v9310_v45, %s9488_s0  ;;  %v4858_v37 = vsel %vm3418_vm2, %v4329_v25, %v9228_v10  ;;  %v4876_v5 = vsel %vm4866_vm10, %v4859_v3, %v9234_v21 }
 0x469   :  { %9306 = vrot.lane.b32.xlu2 %v9305_v0, %s9478_s18  ;;  %v5329_v24 = vmax.f32 %v5313_v51, 0.0  ;;  %v9222_v52 = vpop.permute.xlu0 %9221  ;;  %v4875_v45 = vsel %vm4866_vm10, %v4858_v37, %v9233_v30 }
 0x46a   :  { %v5361_v35 = vld [vmem:[#allocation5 + $0x8] ss:$2 sm:$0xf]  ;;  %v5393_v17 = vld [vmem:[#allocation5 + $0x9] ss:$2 sm:$0xf]  ;;  %v5254_v63 = vpop.f32.mrf.mxu3  ;;  %v9224_v19 = vunpack.i.h.bf16 %v9222_v52  ;;  %v9223_v12 = vunpack.i.l.bf16 %v9222_v52 }
 0x46b   :  { %v5423_v28 = vmax.f32 %v5361_v35, %v5393_v17  ;;  %5345 = vst.msk [vmem:[#allocation5 + $0x10] sm:$0xff] %vm4866_vm10, %v5329_v24  ;;  %v5255_v55 = vadd.f32 %v5254_v63, %v5206_v59 }
 0x46c   :  { %v4940_v58 = vsel %vm4883_vm11, %v4924_v53, %v9223_v12  ;;  %v4941_v6 = vsel %vm4883_vm11, %v4925_v23, %v9224_v19 }
 0x46d   :  { %v5438_v61 = vmax.f32 %v5422_v42, %v5423_v28  ;;  %v5294_v56 = vmul.f32 %v12616_v9, %v5255_v55  ;;  %v4961_v41 = vpack.c.bf16 %v4941_v6, %v4940_v58  ;;  %v5500_v55 = vld [vmem:[#allocation6 + $0x8] sm:$0xf] }
 0x46f   :  { %5484 = vst.msk [vmem:[#allocation6 + $0x20] sm:$0xf] %vm5448_vm12, %v5438_v61  ;;  %v5314_v40 = vadd.f32 %v12621_v60, %v5294_v56  ;;  %9316 = vrot.lane.b32.xlu1 %v12601_v50, %s9486_s27  ;;  %5217 = vmatmul.bf16.gmra.mxu2 %v4961_v41  ;;  %v5508_v61 = vld [vmem:[#allocation6 + $0x9] sm:$0xf] }
 0x470   :  { %9326 = vrot.lane.b32.xlu0 %v9325_v48, %s9488_s0 }
 0x471   :  { %9321 = vrot.lane.b32.xlu2 %v9320_v18, %s9478_s18  ;;  %v5330_v8 = vmax.f32 %v5314_v40, 0.0  ;;  %v9237_v39 = vpop.permute.xlu0 %9236 }
 0x472   :  { %v9239_v38 = vunpack.i.h.bf16 %v9237_v39  ;;  %v9238_v34 = vunpack.i.l.bf16 %v9237_v39  ;;  %v5208_v54 = vpop.f32.mrf.mxu2  ;;  %v5257_v27 = vpop.f32.mrf.mxu3  ;;  %v5363_v15 = vld [vmem:[#allocation5 + $0x10] ss:$2 sm:$0xf]  ;;  %v5395_v20 = vld [vmem:[#allocation5 + $0x11] ss:$2 sm:$0xf] }
 0x473   :  { %5346 = vst.msk [vmem:[#allocation5 + $0x18] sm:$0xff] %vm4866_vm10, %v5330_v8  ;;  %v5424_v59 = vmax.f32 %v5363_v15, %v5395_v20 }
 0x474   :  { %v5159_v36 = vpop.f32.mrf.mxu1  ;;  %v4892_v50 = vsel %vm4883_vm11, %v4875_v45, %v9238_v34  ;;  %v4893_v0 = vsel %vm4883_vm11, %v4876_v5, %v9239_v38 }
 0x475   :  { %v5209_v22 = vadd.f32 %v5208_v54, %v5159_v36  ;;  %v4960_v1 = vpack.c.bf16 %v4893_v0, %v4892_v50  ;;  %v9242_v54 = vpop.permute.xlu1 %9241 }
 0x476   :  { %v5493_v46 = vld [vmem:[#allocation6 + $0x1f] sm:$0xf] }
 0x477   :  { %5575 = vst [vmem:[#allocation1 + $0x1] ss:$2 sm:$0xff] %v5493_v46  ;;  %v5258_v51 = vadd.f32 %v5257_v27, %v5209_v22  ;;  %5168 = vmatmul.bf16.gmra.mxu1 %v4960_v1  ;;  %v5501_v53 = vld [vmem:[#allocation6 + $0x20] sm:$0xf]  ;;  %v9244_v1 = vunpack.i.h.bf16 %v9242_v54  ;;  %v9243_v46 = vunpack.i.l.bf16 %v9242_v54 }
 0x478   :  { %v5509_v48 = vld [vmem:[#allocation6 + $0x21] sm:$0xf] }
 0x479   :  { %v5295_v44 = vmul.f32 %v12616_v9, %v5258_v51  ;;  %v5516_v8 = vld [vmem:[#allocation6 + $0x1f] sm:$0xf] }
 0x47a   :  { %v5365_v16 = vld [vmem:[#allocation5 + $0x18] ss:$2 sm:$0xf]  ;;  %v5397_v24 = vld [vmem:[#allocation5 + $0x19] ss:$2 sm:$0xf]  ;;  %v5210_v35 = vpop.f32.mrf.mxu2  ;;  %v5259_v49 = vpop.f32.mrf.mxu3 }
 0x47b   :  { %v5425_v52 = vmax.f32 %v5365_v16, %v5397_v24  ;;  %v5315_v29 = vadd.f32 %v12621_v60, %v5295_v44  ;;  %v5524_v50 = vld [vmem:[#allocation6 + $0x20] sm:$0xf] }
 0x47c   :  { %v5161_v17 = vpop.f32.mrf.mxu1 }
 0x47d   :  { %v5439_v63 = vmax.f32 %v5424_v59, %v5425_v52  ;;  %v5331_v19 = vmax.f32 %v5315_v29, 0.0  ;;  %v5211_v12 = vadd.f32 %v5210_v35, %v5161_v17  ;;  %v4911_v52 = vsel %vm3418_vm2, %v12538_v26, %v9244_v1 }
 0x47e   :  { %v12677_v42 = vld.sshfl [vmem:[#allocation1] sm:$0xff pattern:$0x75316420] }
 0x47f   :  { %5606 = vst [vmem:[#allocation1 + $0x1] ss:$2 sm:$0xff] %v5501_v53  ;;  %v5260_v28 = vadd.f32 %v5259_v49, %v5211_v12  ;;  %v4910_v12 = vsel %vm3418_vm2, %v12474_v13, %v9243_v46  ;;  %v5532_v13 = vld [vmem:[#allocation6 + $0x21] sm:$0xf] }
 0x480   :  { %5485 = vst.msk [vmem:[#allocation6 + $0x38] sm:$0xf] %vm5448_vm12, %v5439_v63 }
 0x481   :  { %5347 = vst.msk [vmem:[#allocation5 + $0x20] sm:$0xff] %vm4866_vm10, %v5331_v19  ;;  %v5296_v23 = vmul.f32 %v12616_v9, %v5260_v28 }
 0x482   :  { %5604 = vst [vmem:[#allocation1] ss:$2 sm:$0xff] %v5500_v55  ;;  %v5262_v37 = vpop.f32.mrf.mxu3  ;;  %v9257_v55 = vpop.permute.xlu1 %9256 }
 0x483   :  { %v5316_v11 = vadd.f32 %v12621_v60, %v5296_v23 }
 0x485   :  { %v5332_v58 = vmax.f32 %v5316_v11, 0.0 }
 0x487   :  { %v5494_v6 = vld [vmem:[#allocation6 + $0x37] sm:$0xf]  ;;  %5348 = vst.msk [vmem:[#allocation5 + $0x28] sm:$0xff] %vm4866_vm10, %v5332_v58 }
 0x488   :  { %5577 = vst [vmem:[#allocation1 + $0x10] ss:$2 sm:$0xff] %v5494_v6  ;;  %v5367_v32 = vld [vmem:[#allocation5 + $0x20] ss:$2 sm:$0xf] }
 0x489   :  { %v12684_v56 = vld.sshfl [vmem:[#allocation1] sm:$0xff pattern:$0x75316420]  ;;  %v5399_v10 = vld [vmem:[#allocation5 + $0x21] ss:$2 sm:$0xf] }
 0x48a   :  { %5643 = vst [vmem:[#allocation1] ss:$2 sm:$0xff] %v5508_v61  ;;  %v5426_v25 = vmax.f32 %v5367_v32, %v5399_v10  ;;  %v5517_v39 = vld [vmem:[#allocation6 + $0x37] sm:$0xf]  ;;  %v5264_v17 = vpop.f32.mrf.mxu3 }
 0x48b   :  { %5645 = vst [vmem:[#allocation1 + $0x1] ss:$2 sm:$0xff] %v5509_v48  ;;  %v5525_v22 = vld [vmem:[#allocation6 + $0x38] sm:$0xf] }
 0x48c   :  { %v9247_v5 = vpop.permute.xlu2 %9246  ;;  %v5502_v19 = vld [vmem:[#allocation6 + $0x38] sm:$0xf] }
 0x48d   :  { %v9249_v15 = vunpack.i.h.bf16 %v9247_v5  ;;  %v9248_v20 = vunpack.i.l.bf16 %v9247_v5  ;;  %v5533_v10 = vld [vmem:[#allocation6 + $0x39] sm:$0xf] }
 0x48e   :  { %v5369_v18 = vld [vmem:[#allocation5 + $0x28] ss:$2 sm:$0xf]  ;;  %v5401_v41 = vld [vmem:[#allocation5 + $0x29] ss:$2 sm:$0xf] }
 0x48f   :  { %v5427_v21 = vmax.f32 %v5369_v18, %v5401_v41  ;;  %v4926_v23 = vsel %vm4866_vm10, %v4910_v12, %v9248_v20  ;;  %v4927_v11 = vsel %vm4866_vm10, %v4911_v52, %v9249_v15  ;;  %v9259_v18 = vunpack.i.h.bf16 %v9257_v55 }
 0x490   :  { %v9258_v41 = vunpack.i.l.bf16 %v9257_v55 }
 0x491   :  { %v5440_v30 = vmax.f32 %v5426_v25, %v5427_v21 }
 0x492   :  { %v12686_v40 = vld.sshfl [vmem:[#allocation1] sm:$0xff pattern:$0x75316420] }
 0x493   :  { %5486 = vst.msk [vmem:[#allocation6 + $0x50] sm:$0xf] %vm5448_vm12, %v5440_v30 }
 0x494   :  { %5674 = vst [vmem:[#allocation1] ss:$2 sm:$0xff] %v5516_v8  ;;  %v9262_v26 = vpop.permute.xlu2 %9261 }
 0x495   :  { %5676 = vst [vmem:[#allocation1 + $0x1] ss:$2 sm:$0xff] %v5517_v39  ;;  %v9264_v21 = vunpack.i.h.bf16 %v9262_v26  ;;  %v9263_v30 = vunpack.i.l.bf16 %v9262_v26 }
 0x496   :  { %v5213_v3 = vpop.f32.mrf.mxu2 }
 0x498   :  { %v5164_v38 = vpop.f32.mrf.mxu1 }
 0x499   :  { %v5214_v34 = vadd.f32 %v5213_v3, %v5164_v38  ;;  %v4860_v3 = vsel %vm3418_vm2, %v12470_v33, %v9258_v41 }
 0x49a   :  { %v5495_v45 = vld [vmem:[#allocation6 + $0x4f] sm:$0xf]  ;;  %v4877_v5 = vsel %vm4866_vm10, %v4860_v3, %v9263_v30 }
 0x49b   :  { %5579 = vst [vmem:[#allocation1 + $0x11] ss:$2 sm:$0xff] %v5495_v45  ;;  %v5263_v27 = vadd.f32 %v5262_v37, %v5214_v34  ;;  %v5503_v29 = vld [vmem:[#allocation6 + $0x50] sm:$0xf]  ;;  %v4861_v37 = vsel %vm3418_vm2, %v12476_v2, %v9259_v18 }
 0x49c   :  { %v12689_v36 = vld.sshfl [vmem:[#allocation1] sm:$0xff pattern:$0x75316420]  ;;  %v5511_v1 = vld [vmem:[#allocation6 + $0x51] sm:$0xf] }
 0x49d   :  { %v5297_v0 = vmul.f32 %v12616_v9, %v5263_v27  ;;  %5713 = vst [vmem:[#allocation1] ss:$2 sm:$0xff] %v5524_v50  ;;  %v4878_v27 = vsel %vm4866_vm10, %v4861_v37, %v9264_v21  ;;  %v5510_v50 = vld [vmem:[#allocation6 + $0x39] sm:$0xf]  ;;  %v5542_v2 = vld [vmem:[#allocation6 + $0x4f] sm:$0xf] }
 0x49e   :  { %5715 = vst [vmem:[#allocation1 + $0x1] ss:$2 sm:$0xff] %v5525_v22  ;;  %v5215_v44 = vpop.f32.mrf.mxu2  ;;  %v5518_v52 = vld [vmem:[#allocation6 + $0x4f] sm:$0xf] }
 0x49f   :  { %v5317_v51 = vadd.f32 %v12621_v60, %v5297_v0  ;;  %v5541_v0 = vld [vmem:[#allocation6 + $0x37] sm:$0xf]  ;;  %v5558_v55 = vld [vmem:[#allocation6 + $0x51] sm:$0xf] }
 0x4a0   :  { %v5166_v16 = vpop.f32.mrf.mxu1 }
 0x4a1   :  { %v5333_v24 = vmax.f32 %v5317_v51, 0.0  ;;  %v5216_v59 = vadd.f32 %v5215_v44, %v5166_v16 }
 0x4a2   :  { %v12695_v35 = vld.sshfl [vmem:[#allocation1 + $0x10] sm:$0xff pattern:$0x75316420] }
 0x4a3   :  { %v9252_v63 = vpop.permute.xlu0 %9251  ;;  %5610 = vst [vmem:[#allocation1 + $0x11] ss:$2 sm:$0xff] %v5503_v29  ;;  %v5265_v53 = vadd.f32 %v5264_v17, %v5216_v59  ;;  %v5549_v17 = vld [vmem:[#allocation6 + $0x38] sm:$0xf] }
 0x4a4   :  { %v9254_v49 = vunpack.i.h.bf16 %v9252_v63  ;;  %v9253_v28 = vunpack.i.l.bf16 %v9252_v63  ;;  %5608 = vst [vmem:[#allocation1 + $0x10] ss:$2 sm:$0xff] %v5502_v19  ;;  %v5550_v19 = vld [vmem:[#allocation6 + $0x50] sm:$0xf] }
 0x4a5   :  { %5349 = vst.msk [vmem:[#allocation5 + $0x30] sm:$0xff] %vm4866_vm10, %v5333_v24  ;;  %v5298_v58 = vmul.f32 %v12616_v9, %v5265_v53  ;;  %v12705_v48 = vld.sshfl [vmem:[#allocation1] sm:$0xff pattern:$0x75316420] }
 0x4a6   :  { %v4942_v6 = vsel %vm4883_vm11, %v4926_v23, %v9253_v28  ;;  %v4943_v61 = vsel %vm4883_vm11, %v4927_v11, %v9254_v49  ;;  %5744 = vst [vmem:[#allocation1] ss:$2 sm:$0xff] %v5532_v13  ;;  %v5557_v49 = vld [vmem:[#allocation6 + $0x39] sm:$0xf] }
 0x4a7   :  { %v4964_v32 = vpack.c.bf16 %v4943_v61, %v4942_v6  ;;  %v5318_v25 = vadd.f32 %v12621_v60, %v5298_v58  ;;  %5746 = vst [vmem:[#allocation1 + $0x1] ss:$2 sm:$0xff] %v5533_v10 }
 0x4a9   :  { %5222 = vmatmul.bf16.gmra.mxu2 %v4964_v32  ;;  %v5334_v8 = vmax.f32 %v5318_v25, 0.0  ;;  %v5526_v25 = vld [vmem:[#allocation6 + $0x50] sm:$0xf] }
 0x4ab   :  { %v9267_v39 = vpop.permute.xlu0 %9266  ;;  %5350 = vst.msk [vmem:[#allocation5 + $0x38] sm:$0xff] %vm4866_vm10, %v5334_v8  ;;  %v5620_v54 = vld.sshfl [vmem:[#allocation1 + $0x10] sm:$0xff pattern:$0x75316420] }
 0x4ac   :  { %v9269_v38 = vunpack.i.h.bf16 %v9267_v39  ;;  %v9268_v34 = vunpack.i.l.bf16 %v9267_v39  ;;  %v9330_v45 = vpack.i.bf16 %v5620_v54, %v12684_v56  ;;  %5647 = vst [vmem:[#allocation1 + $0x10] ss:$2 sm:$0xff] %v5510_v50  ;;  %v5371_v56 = vld [vmem:[#allocation5 + $0x30] ss:$2 sm:$0xf]  ;;  %v9277_v53 = vpop.permute.xlu2 %9276 }
 0x4ad   :  { %5649 = vst [vmem:[#allocation1 + $0x11] ss:$2 sm:$0xff] %v5511_v1  ;;  %v5403_v15 = vld [vmem:[#allocation5 + $0x31] ss:$2 sm:$0xf]  ;;  %v9279_v6 = vunpack.i.h.bf16 %v9277_v53  ;;  %v9278_v61 = vunpack.i.l.bf16 %v9277_v53 }
 0x4ae   :  { %v4894_v22 = vsel %vm4883_vm11, %v4877_v5, %v9268_v34  ;;  %v4895_v33 = vsel %vm4883_vm11, %v4878_v27, %v9269_v38  ;;  %9331 = vrot.lane.b32.xlu1 %v9330_v45, %s9478_s18  ;;  %v12719_v51 = vld.sshfl [vmem:[#allocation1] sm:$0xff pattern:$0x75316420]  ;;  %v5428_v16 = vmax.f32 %v5371_v56, %v5403_v15 }
 0x4af   :  { %v4963_v46 = vpack.c.bf16 %v4895_v33, %v4894_v22  ;;  %5783 = vst [vmem:[#allocation1] ss:$2 sm:$0xff] %v5541_v0 }
 0x4b0   :  { %5785 = vst [vmem:[#allocation1 + $0x1] ss:$2 sm:$0xff] %v5542_v2  ;;  %v5534_v2 = vld [vmem:[#allocation6 + $0x51] sm:$0xf] }
 0x4b1   :  { %5173 = vmatmul.bf16.gmra.mxu1 %v4963_v46 }
 0x4b2   :  { %v5373_v20 = vld [vmem:[#allocation5 + $0x38] ss:$2 sm:$0xf]  ;;  %v5405_v44 = vld [vmem:[#allocation5 + $0x39] ss:$2 sm:$0xf] }
 0x4b3   :  { %v5429_v24 = vmax.f32 %v5373_v20, %v5405_v44 }
 0x4b4   :  { %v12721_v29 = vld.sshfl [vmem:[#allocation1 + $0x10] sm:$0xff pattern:$0x75316420]  ;;  %v9292_v38 = vpop.permute.xlu2 %9291 }
 0x4b5   :  { %v5441_v59 = vmax.f32 %v5428_v16, %v5429_v24  ;;  %5678 = vst [vmem:[#allocation1 + $0x10] ss:$2 sm:$0xff] %v5518_v52  ;;  %v9294_v45 = vunpack.i.h.bf16 %v9292_v38  ;;  %v9293_v5 = vunpack.i.l.bf16 %v9292_v38  ;;  %v5544_v16 = vld [vmem:[#allocation6 + $0x7f] sm:$0xf] }
 0x4b7   :  { %5487 = vst.msk [vmem:[#allocation6 + $0x68] sm:$0xf] %vm5448_vm12, %v5441_v59  ;;  %v12724_v63 = vld.sshfl [vmem:[#allocation1] sm:$0xff pattern:$0x75316420] }
 0x4b8   :  { %5814 = vst [vmem:[#allocation1] ss:$2 sm:$0xff] %v5549_v17 }
 0x4b9   :  { %5816 = vst [vmem:[#allocation1 + $0x1] ss:$2 sm:$0xff] %v5550_v19 }
 0x4be   :  { %v5519_v12 = vld [vmem:[#allocation6 + $0x67] sm:$0xf] }
 0x4bf   :  { %5680 = vst [vmem:[#allocation1 + $0x11] ss:$2 sm:$0xff] %v5519_v12  ;;  %v5527_v39 = vld [vmem:[#allocation6 + $0x68] sm:$0xf] }
 0x4c0   :  { %v12726_v28 = vld.sshfl [vmem:[#allocation1] sm:$0xff pattern:$0x75316420]  ;;  %v5535_v20 = vld [vmem:[#allocation6 + $0x69] sm:$0xf] }
 0x4c1   :  { %5853 = vst [vmem:[#allocation1] ss:$2 sm:$0xff] %v5557_v49  ;;  %v5543_v24 = vld [vmem:[#allocation6 + $0x67] sm:$0xf] }
 0x4c2   :  { %5855 = vst [vmem:[#allocation1 + $0x1] ss:$2 sm:$0xff] %v5558_v55  ;;  %v9272_v11 = vpop.permute.xlu1 %9271 }
 0x4c3   :  { %v9282_v23 = vpop.permute.xlu0 %9281  ;;  %v9274_v26 = vunpack.i.h.bf16 %v9272_v11  ;;  %v9273_v58 = vunpack.i.l.bf16 %v9272_v11 }
 0x4c4   :  { %v9284_v13 = vunpack.i.h.bf16 %v9282_v23  ;;  %v9283_v32 = vunpack.i.l.bf16 %v9282_v23 }
 0x4c5   :  { %v4913_v10 = vsel %vm3418_vm2, %v12593_v43, %v9274_v26  ;;  %v4912_v18 = vsel %vm3418_vm2, %v12546_v62, %v9273_v58 }
 0x4c6   :  { %v5690_v41 = vld.sshfl [vmem:[#allocation1 + $0x10] sm:$0xff pattern:$0x75316420]  ;;  %v4928_v30 = vsel %vm4866_vm10, %v4912_v18, %v9278_v61  ;;  %v4929_v8 = vsel %vm4866_vm10, %v4913_v10, %v9279_v6 }
 0x4c7   :  { %v9335_v21 = vpack.i.bf16 %v5690_v41, %v12689_v36  ;;  %5717 = vst [vmem:[#allocation1 + $0x10] ss:$2 sm:$0xff] %v5526_v25  ;;  %v4944_v3 = vsel %vm4883_vm11, %v4928_v30, %v9283_v32  ;;  %v4945_v37 = vsel %vm4883_vm11, %v4929_v8, %v9284_v13  ;;  %v5552_v32 = vld [vmem:[#allocation6 + $0x80] sm:$0xf]  ;;  %v5551_v18 = vld [vmem:[#allocation6 + $0x68] sm:$0xf] }
 0x4c8   :  { %5719 = vst [vmem:[#allocation1 + $0x11] ss:$2 sm:$0xff] %v5527_v39  ;;  %v4967_v43 = vpack.c.bf16 %v4945_v37, %v4944_v3 }
 0x4c9   :  { %9336 = vrot.lane.b32.xlu2 %v9335_v21, %s9478_s18 }
 0x4ca   :  { %v9287_v34 = vpop.permute.xlu1 %9286  ;;  %5227 = vmatmul.bf16.gmra.mxu2 %v4967_v43 }
 0x4cb   :  { %v9297_v62 = vpop.permute.xlu0 %9296  ;;  %v9289_v54 = vunpack.i.h.bf16 %v9287_v34  ;;  %v9288_v36 = vunpack.i.l.bf16 %v9287_v34 }
 0x4cc   :  { %v9299_v27 = vunpack.i.h.bf16 %v9297_v62  ;;  %v9298_v50 = vunpack.i.l.bf16 %v9297_v62 }
 0x4cd   :  { %v4863_v0 = vsel %vm3418_vm2, %v12548_v47, %v9289_v54  ;;  %v4862_v22 = vsel %vm3418_vm2, %v12540_v31, %v9288_v36  ;;  %v9307_v47 = vpop.permute.xlu2 %9306 }
 0x4ce   :  { %v4879_v33 = vsel %vm4866_vm10, %v4862_v22, %v9293_v5  ;;  %v4880_v1 = vsel %vm4866_vm10, %v4863_v0, %v9294_v45  ;;  %v9309_v53 = vunpack.i.h.bf16 %v9307_v47  ;;  %v9308_v49 = vunpack.i.l.bf16 %v9307_v47  ;;  %v5560_v45 = vld [vmem:[#allocation6 + $0x81] sm:$0xf]  ;;  %v5559_v5 = vld [vmem:[#allocation6 + $0x69] sm:$0xf]  ;;  %v7681_v0 = vld [vmem:[#allocation8 + $0x30] sm:$0xff]  ;;  %v5267_v22 = vpop.f32.mrf.mxu3 }
 0x4cf   :  { %v12744_v46 = vld.sshfl [vmem:[#allocation1 + $0x10] sm:$0xff pattern:$0x75316420]  ;;  %v4896_v56 = vsel %vm4883_vm11, %v4879_v33, %v9298_v50  ;;  %v4897_v15 = vsel %vm4883_vm11, %v4880_v1, %v9299_v27  ;;  %v7690_v50 = vld [vmem:[#allocation8 + $0x78] sm:$0xff] }
 0x4d0   :  { %5748 = vst [vmem:[#allocation1 + $0x10] ss:$2 sm:$0xff] %v5534_v2  ;;  %v4966_v44 = vpack.c.bf16 %v4897_v15, %v4896_v56  ;;  %6215 = vmatpush.bf16.msra.mxu1 %v7690_v50  ;;  %v5496_v33 = vld [vmem:[#allocation6 + $0x97] sm:$0xf]  ;;  %v7688_v47 = vld [vmem:[#allocation8 + $0x68] sm:$0xff] }
 0x4d1   :  { %5750 = vst [vmem:[#allocation1 + $0x11] ss:$2 sm:$0xff] %v5535_v20  ;;  %v7689_v56 = vld [vmem:[#allocation8 + $0x70] sm:$0xff]  ;;  %v7680_v20 = vld [vmem:[#allocation8 + $0x28] sm:$0xff]  ;;  %v5504_v50 = vld [vmem:[#allocation6 + $0x98] sm:$0xf] }
 0x4d2   :  { %5178 = vmatmul.bf16.gmra.mxu1 %v4966_v44  ;;  %5581 = vst [vmem:[#allocation1 + $0x20] ss:$2 sm:$0xff] %v5496_v33 }
 0x4d4   :  { %6216 = vmatpush.bf16.msra.mxu1 %v7689_v56 }
 0x4d5   :  { %v9322_v10 = vpop.permute.xlu2 %9321 }
 0x4d6   :  { %v9324_v30 = vunpack.i.h.bf16 %v9322_v10  ;;  %v9323_v8 = vunpack.i.l.bf16 %v9322_v10  ;;  %v7684_v10 = vld [vmem:[#allocation8 + $0x48] sm:$0xff] }
 0x4d8   :  { %v5760_v31 = vld.sshfl [vmem:[#allocation1 + $0x10] sm:$0xff pattern:$0x75316420]  ;;  %6217 = vmatpush.bf16.msra.mxu1 %v7688_v47 }
 0x4d9   :  { %v9350_v59 = vpack.i.bf16 %v5760_v31, %v12719_v51  ;;  %5787 = vst [vmem:[#allocation1 + $0x10] ss:$2 sm:$0xff] %v5543_v24  ;;  %v9302_v17 = vpop.permute.xlu1 %9301  ;;  %v7679_v24 = vld [vmem:[#allocation8 + $0x20] sm:$0xff] }
 0x4da   :  { %v9312_v52 = vpop.permute.xlu0 %9311  ;;  %5789 = vst [vmem:[#allocation1 + $0x11] ss:$2 sm:$0xff] %v5544_v16  ;;  %v9304_v19 = vunpack.i.h.bf16 %v9302_v17  ;;  %v9303_v12 = vunpack.i.l.bf16 %v9302_v17  ;;  %v7687_v17 = vld [vmem:[#allocation8 + $0x60] sm:$0xff] }
 0x4db   :  { %9351 = vrot.lane.b32.xlu2 %v9350_v59, %s9478_s18  ;;  %v9314_v55 = vunpack.i.h.bf16 %v9312_v52  ;;  %v9313_v23 = vunpack.i.l.bf16 %v9312_v52 }
 0x4dc   :  { %v4915_v11 = vsel %vm3418_vm2, %v12638_v7, %v9304_v19  ;;  %v4914_v26 = vsel %vm3418_vm2, %v12586_v4, %v9303_v12  ;;  %6218 = vmatpush.bf16.msra.mxu1 %v7687_v17 }
 0x4dd   :  { %v4930_v51 = vsel %vm4866_vm10, %v4914_v26, %v9308_v49  ;;  %v4931_v58 = vsel %vm4866_vm10, %v4915_v11, %v9309_v53  ;;  %v5269_v53 = vpop.f32.mrf.mxu3  ;;  %v7678_v49 = vld [vmem:[#allocation8 + $0x18] sm:$0xff] }
 0x4de   :  { %v4946_v6 = vsel %vm4883_vm11, %v4930_v51, %v9313_v23  ;;  %v4947_v61 = vsel %vm4883_vm11, %v4931_v58, %v9314_v55  ;;  %v7686_v23 = vld [vmem:[#allocation8 + $0x58] sm:$0xff]  ;;  %v7677_v51 = vld [vmem:[#allocation8 + $0x10] sm:$0xff] }
 0x4df   :  { %v4970_v13 = vpack.c.bf16 %v4947_v61, %v4946_v6  ;;  %v7698_v11 = vld [vmem:[#allocation8 + $0xb8] sm:$0xff]  ;;  %v7685_v6 = vld [vmem:[#allocation8 + $0x50] sm:$0xff] }
 0x4e0   :  { %6219 = vmatpush.bf16.msra.mxu1 %v7686_v23  ;;  %6234 = vmatpush.bf16.msrb.mxu2 %v7698_v11  ;;  %v7697_v61 = vld [vmem:[#allocation8 + $0xb0] sm:$0xff] }
 0x4e1   :  { %v12758_v41 = vld.sshfl [vmem:[#allocation1 + $0x10] sm:$0xff pattern:$0x75316420]  ;;  %v9317_v21 = vpop.permute.xlu1 %9316  ;;  %5232 = vmatmul.bf16.gmra.mxu2 %v4970_v13 }
 0x4e2   :  { %v9327_v25 = vpop.permute.xlu0 %9326  ;;  %5818 = vst [vmem:[#allocation1 + $0x10] ss:$2 sm:$0xff] %v5551_v18  ;;  %v9319_v7 = vunpack.i.h.bf16 %v9317_v21  ;;  %v9318_v4 = vunpack.i.l.bf16 %v9317_v21  ;;  %v7676_v13 = vld [vmem:[#allocation8 + $0x8] sm:$0xff]  ;;  %v7683_v21 = vld [vmem:[#allocation8 + $0x40] sm:$0xff] }
 0x4e3   :  { %5820 = vst [vmem:[#allocation1 + $0x11] ss:$2 sm:$0xff] %v5552_v32  ;;  %v9329_v39 = vunpack.i.h.bf16 %v9327_v25  ;;  %v9328_v3 = vunpack.i.l.bf16 %v9327_v25  ;;  %v7696_v18 = vld [vmem:[#allocation8 + $0xa8] sm:$0xff]  ;;  %v7675_v25 = vld [vmem:[#allocation8] sm:$0xff] }
 0x4e4   :  { %v4865_v37 = vsel %vm3418_vm2, %v12588_v14, %v9319_v7  ;;  %v4864_v43 = vsel %vm3418_vm2, %v12595_v57, %v9318_v4  ;;  %v7682_v57 = vld [vmem:[#allocation8 + $0x38] sm:$0xff]  ;;  %6220 = vmatpush.bf16.msra.mxu1 %v7685_v6  ;;  %6235 = vmatpush.bf16.msrb.mxu2 %v7697_v61  ;;  %v7695_v7 = vld [vmem:[#allocation8 + $0xa0] sm:$0xff] }
 0x4e5   :  { %v4881_v38 = vsel %vm4866_vm10, %v4864_v43, %v9323_v8  ;;  %v4882_v62 = vsel %vm4866_vm10, %v4865_v37, %v9324_v30  ;;  %6196 = vmatpush.bf16.msra.mxu3 %v7682_v57  ;;  %v7694_v8 = vld [vmem:[#allocation8 + $0x98] sm:$0xff] }
 0x4e6   :  { %v4898_v34 = vsel %vm4883_vm11, %v4881_v38, %v9328_v3  ;;  %v4899_v54 = vsel %vm4883_vm11, %v4882_v62, %v9329_v39  ;;  %v7693_v62 = vld [vmem:[#allocation8 + $0x90] sm:$0xff] }
 0x4e7   :  { %v4969_v36 = vpack.c.bf16 %v4899_v54, %v4898_v34  ;;  %v7692_v34 = vld [vmem:[#allocation8 + $0x88] sm:$0xff] }
 0x4e8   :  { %6221 = vmatpush.bf16.msra.mxu1 %v7684_v10  ;;  %6236 = vmatpush.bf16.msrb.mxu2 %v7696_v18 }
 0x4e9   :  { %5183 = vmatmul.bf16.gmra.mxu1 %v4969_v36  ;;  %6197 = vmatpush.bf16.msra.mxu3 %v7681_v0  ;;  %v7691_v36 = vld [vmem:[#allocation8 + $0x80] sm:$0xff] }
 0x4ea   :  { %v12768_v27 = vld.sshfl [vmem:[#allocation1 + $0x10] sm:$0xff pattern:$0x75316420] }
 0x4eb   :  { %v9355_v14 = vpack.i.bf16 %v12768_v27, %v12726_v28  ;;  %5857 = vst [vmem:[#allocation1 + $0x10] ss:$2 sm:$0xff] %v5559_v5  ;;  %v7705_v28 = vld [vmem:[#allocation8 + $0xf0] sm:$0xff] }
 0x4ec   :  { %5859 = vst [vmem:[#allocation1 + $0x11] ss:$2 sm:$0xff] %v5560_v45  ;;  %6222 = vmatpush.bf16.msra.mxu1 %v7683_v21  ;;  %6237 = vmatpush.bf16.msrb.mxu2 %v7695_v7  ;;  %v5548_v27 = vld [vmem:[#allocation6 + $0x10f] sm:$0xf] }
 0x4ed   :  { %6198 = vmatpush.bf16.msra.mxu3 %v7680_v20 }
 0x4f0   :  { %6238 = vmatpush.bf16.msrb.mxu2 %v7694_v8 }
 0x4f1   :  { %6199 = vmatpush.bf16.msra.mxu3 %v7679_v24  ;;  %v5512_v24 = vld [vmem:[#allocation6 + $0x99] sm:$0xf] }
 0x4f2   :  { %v5218_v1 = vpop.f32.mrf.mxu2 }
 0x4f4   :  { %v5169_v2 = vpop.f32.mrf.mxu1  ;;  %6239 = vmatpush.bf16.msrb.mxu2 %v7693_v62 }
 0x4f5   :  { %v5219_v15 = vadd.f32 %v5218_v1, %v5169_v2  ;;  %6200 = vmatpush.bf16.msra.mxu3 %v7678_v49 }
 0x4f7   :  { %v5268_v44 = vadd.f32 %v5267_v22, %v5219_v15 }
 0x4f8   :  { %6240 = vmatpush.bf16.msrb.mxu2 %v7692_v34  ;;  %v9423_v34 = vld [vmem:[%s13358_s5] ss:$0 sm:$0xff] }
 0x4f9   :  { %v5299_v16 = vmul.f32 %v12616_v9, %v5268_v44  ;;  %6201 = vmatpush.bf16.msra.mxu3 %v7677_v51 }
 0x4fa   :  { %v5220_v59 = vpop.f32.mrf.mxu2 }
 0x4fb   :  { %v5319_v31 = vadd.f32 %v12621_v60, %v5299_v16 }
 0x4fc   :  { %v5171_v52 = vpop.f32.mrf.mxu1  ;;  %6241 = vmatpush.bf16.msrb.mxu2 %v7691_v36  ;;  %v9424_v36 = vld [vmem:[%s13359_s6] ss:$0 sm:$0xff] }
 0x4fd   :  { %v5335_v19 = vmax.f32 %v5319_v31, 0.0  ;;  %v5221_v12 = vadd.f32 %v5220_v59, %v5171_v52  ;;  %6202 = vmatpush.bf16.msra.mxu3 %v7676_v13 }
 0x4ff   :  { %5351 = vst.msk [vmem:[#allocation5 + $0x40] sm:$0xff] %vm4866_vm10, %v5335_v19  ;;  %v5270_v55 = vadd.f32 %v5269_v53, %v5221_v12 }
 0x501   :  { %v5300_v26 = vmul.f32 %v12616_v9, %v5270_v55  ;;  %6203 = vmatpush.bf16.msra.mxu3 %v7675_v25 }
 0x503   :  { %v5320_v58 = vadd.f32 %v12621_v60, %v5300_v26 }
 0x505   :  { %v5336_v32 = vmax.f32 %v5320_v58, 0.0 }
 0x506   :  { %v5375_v4 = vld [vmem:[#allocation5 + $0x40] ss:$2 sm:$0xf]  ;;  %v5407_v30 = vld [vmem:[#allocation5 + $0x41] ss:$2 sm:$0xf] }
 0x507   :  { %5352 = vst.msk [vmem:[#allocation5 + $0x48] sm:$0xff] %vm4866_vm10, %v5336_v32  ;;  %v5430_v37 = vmax.f32 %v5375_v4, %v5407_v30 }
 0x50e   :  { %v5377_v39 = vld [vmem:[#allocation5 + $0x48] ss:$2 sm:$0xf]  ;;  %v5409_v3 = vld [vmem:[#allocation5 + $0x49] ss:$2 sm:$0xf] }
 0x50f   :  { %v5431_v43 = vmax.f32 %v5377_v39, %v5409_v3 }
 0x511   :  { %v5442_v38 = vmax.f32 %v5430_v37, %v5431_v43 }
 0x513   :  { %5488 = vst.msk [vmem:[#allocation6 + $0xb0] sm:$0xf] %vm5448_vm12, %v5442_v38 }
 0x51a   :  { %v5497_v54 = vld [vmem:[#allocation6 + $0xaf] sm:$0xf] }
 0x51b   :  { %5583 = vst [vmem:[#allocation1 + $0x21] ss:$2 sm:$0xff] %v5497_v54  ;;  %v5505_v0 = vld [vmem:[#allocation6 + $0xb0] sm:$0xf] }
 0x51c   :  { %v5513_v59 = vld [vmem:[#allocation6 + $0xb1] sm:$0xf] }
 0x520   :  { %v9332_v45 = vpop.permute.xlu1 %9331 }
 0x521   :  { %v9334_v5 = vunpack.i.h.bf16 %v9332_v45  ;;  %v9333_v57 = vunpack.i.l.bf16 %v9332_v45 }
 0x522   :  { %v12779_v22 = vld.sshfl [vmem:[#allocation1 + $0x20] sm:$0xff pattern:$0x75316420] }
 0x523   :  { %5614 = vst [vmem:[#allocation1 + $0x21] ss:$2 sm:$0xff] %v5505_v0  ;;  %v5877_v33 = vsel %vm4866_vm10, %v12695_v35, %v9334_v5  ;;  %v5876_v1 = vsel %vm4866_vm10, %v12677_v42, %v9333_v57  ;;  %v9337_v2 = vpop.permute.xlu2 %9336  ;;  %v5272_v42 = vpop.f32.mrf.mxu3 }
 0x524   :  { %v5892_v56 = vpack.c.bf16 %v5877_v33, %v5876_v1  ;;  %v9339_v15 = vunpack.i.h.bf16 %v9337_v2  ;;  %v9338_v20 = vunpack.i.l.bf16 %v9337_v2  ;;  %5612 = vst [vmem:[#allocation1 + $0x20] ss:$2 sm:$0xff] %v5504_v50 }
 0x526   :  { %v5881_v44 = vsel %vm4866_vm10, %v12721_v29, %v9339_v15  ;;  %v5880_v47 = vsel %vm4866_vm10, %v12686_v40, %v9338_v20  ;;  %6204 = vmatmul.bf16.vlgmr.msra.gmra.mxu3 %v5892_v56  ;;  %v5520_v40 = vld [vmem:[#allocation6 + $0xaf] sm:$0xf] }
 0x527   :  { %v5893_v16 = vpack.c.bf16 %v5881_v44, %v5880_v47  ;;  %v5528_v56 = vld [vmem:[#allocation6 + $0xb0] sm:$0xf] }
 0x529   :  { %6223 = vmatmul.bf16.vlgmr.msra.gmra.mxu1 %v5893_v16 }
 0x52b   :  { %v12789_v35 = vld.sshfl [vmem:[#allocation1 + $0x20] sm:$0xff pattern:$0x75316420]  ;;  %v5274_v6 = vpop.f32.mrf.mxu3 }
 0x52c   :  { %v5223_v31 = vpop.f32.mrf.mxu2  ;;  %5651 = vst [vmem:[#allocation1 + $0x20] ss:$2 sm:$0xff] %v5512_v24  ;;  %v5536_v24 = vld [vmem:[#allocation6 + $0xb1] sm:$0xf] }
 0x52d   :  { %5653 = vst [vmem:[#allocation1 + $0x21] ss:$2 sm:$0xff] %v5513_v59 }
 0x52e   :  { %v5174_v52 = vpop.f32.mrf.mxu1 }
 0x52f   :  { %v5224_v17 = vadd.f32 %v5223_v31, %v5174_v52 }
 0x531   :  { %v5273_v19 = vadd.f32 %v5272_v42, %v5224_v17 }
 0x533   :  { %v5301_v12 = vmul.f32 %v12616_v9, %v5273_v19 }
 0x534   :  { %v5225_v53 = vpop.f32.mrf.mxu2  ;;  %v12793_v49 = vld.sshfl [vmem:[#allocation1 + $0x20] sm:$0xff pattern:$0x75316420] }
 0x535   :  { %v5321_v29 = vadd.f32 %v12621_v60, %v5301_v12  ;;  %v9352_v55 = vpop.permute.xlu2 %9351  ;;  %5682 = vst [vmem:[#allocation1 + $0x20] ss:$2 sm:$0xff] %v5520_v40 }
 0x536   :  { %v5176_v23 = vpop.f32.mrf.mxu1  ;;  %v9354_v26 = vunpack.i.h.bf16 %v9352_v55  ;;  %v9353_v51 = vunpack.i.l.bf16 %v9352_v55 }
 0x537   :  { %v5337_v11 = vmax.f32 %v5321_v29, 0.0  ;;  %v5226_v58 = vadd.f32 %v5225_v53, %v5176_v23 }
 0x538   :  { %v5884_v13 = vsel %vm4866_vm10, %v12705_v48, %v9353_v51  ;;  %v5885_v32 = vsel %vm4866_vm10, %v12744_v46, %v9354_v26  ;;  %v5277_v46 = vpop.f32.mrf.mxu3 }
 0x539   :  { %5353 = vst.msk [vmem:[#allocation5 + $0x50] sm:$0xff] %vm4866_vm10, %v5337_v11  ;;  %v5275_v61 = vadd.f32 %v5274_v6, %v5226_v58  ;;  %v5894_v10 = vpack.c.bf16 %v5885_v32, %v5884_v13 }
 0x53b   :  { %v5302_v18 = vmul.f32 %v12616_v9, %v5275_v61  ;;  %6242 = vmatmul.bf16.vlgmr.msrb.gmra.mxu2 %v5894_v10 }
 0x53d   :  { %v5322_v25 = vadd.f32 %v12621_v60, %v5302_v18 }
 0x53f   :  { %v5338_v21 = vmax.f32 %v5322_v25, 0.0 }
 0x540   :  { %v5379_v7 = vld [vmem:[#allocation5 + $0x50] ss:$2 sm:$0xf]  ;;  %v5411_v4 = vld [vmem:[#allocation5 + $0x51] ss:$2 sm:$0xf]  ;;  %v5279_v33 = vpop.f32.mrf.mxu3 }
 0x541   :  { %5354 = vst.msk [vmem:[#allocation5 + $0x58] sm:$0xff] %vm4866_vm10, %v5338_v21  ;;  %v5432_v39 = vmax.f32 %v5379_v7, %v5411_v4 }
 0x548   :  { %v5381_v30 = vld [vmem:[#allocation5 + $0x58] ss:$2 sm:$0xf]  ;;  %v5413_v8 = vld [vmem:[#allocation5 + $0x59] ss:$2 sm:$0xf]  ;;  %v5282_v42 = vpop.f32.mrf.mxu3 }
 0x549   :  { %v5433_v3 = vmax.f32 %v5381_v30, %v5413_v8 }
 0x54b   :  { %v5443_v37 = vmax.f32 %v5432_v39, %v5433_v3 }
 0x54d   :  { %5489 = vst.msk [vmem:[#allocation6 + $0xc8] sm:$0xf] %vm5448_vm12, %v5443_v37  ;;  %v5228_v48 = vpop.f32.mrf.mxu2 }
 0x54f   :  { %v5179_v43 = vpop.f32.mrf.mxu1 }
 0x550   :  { %v5229_v38 = vadd.f32 %v5228_v48, %v5179_v43  ;;  %v5284_v18 = vpop.f32.mrf.mxu3 }
 0x552   :  { %v5278_v62 = vadd.f32 %v5277_v46, %v5229_v38 }
 0x554   :  { %v5498_v9 = vld [vmem:[#allocation6 + $0xc7] sm:$0xf]  ;;  %v5303_v54 = vmul.f32 %v9423_v34, %v5278_v62 }
 0x555   :  { %5585 = vst [vmem:[#allocation1 + $0x30] ss:$2 sm:$0xff] %v5498_v9  ;;  %v5521_v60 = vld [vmem:[#allocation6 + $0xc7] sm:$0xf]  ;;  %v5230_v5 = vpop.f32.mrf.mxu2 }
 0x556   :  { %5684 = vst [vmem:[#allocation1 + $0x21] ss:$2 sm:$0xff] %v5521_v60  ;;  %v5323_v45 = vadd.f32 %v9424_v36, %v5303_v54  ;;  %v5529_v20 = vld [vmem:[#allocation6 + $0xc8] sm:$0xf] }
 0x557   :  { %v5181_v57 = vpop.f32.mrf.mxu1  ;;  %v5537_v59 = vld [vmem:[#allocation6 + $0xc9] sm:$0xf] }
 0x558   :  { %v5339_v50 = vmax.f32 %v5323_v45, 0.0  ;;  %v5231_v0 = vadd.f32 %v5230_v5, %v5181_v57  ;;  %v5545_v13 = vld [vmem:[#allocation6 + $0xc7] sm:$0xf] }
 0x559   :  { %v5506_v39 = vld [vmem:[#allocation6 + $0xc8] sm:$0xf] }
 0x55a   :  { %5355 = vst.msk [vmem:[#allocation5 + $0x60] sm:$0xff] %vm4866_vm10, %v5339_v50  ;;  %v5280_v1 = vadd.f32 %v5279_v33, %v5231_v0  ;;  %v5553_v60 = vld [vmem:[#allocation6 + $0xc8] sm:$0xf] }
 0x55b   :  { %v5514_v5 = vld [vmem:[#allocation6 + $0xc9] sm:$0xf] }
 0x55c   :  { %v5304_v15 = vmul.f32 %v9423_v34, %v5280_v1  ;;  %v5561_v0 = vld [vmem:[#allocation6 + $0xc9] sm:$0xf] }
 0x55d   :  { %v12811_v2 = vld.sshfl [vmem:[#allocation1 + $0x20] sm:$0xff pattern:$0x75316420] }
 0x55e   :  { %5721 = vst [vmem:[#allocation1 + $0x20] ss:$2 sm:$0xff] %v5528_v56  ;;  %v5324_v44 = vadd.f32 %v9424_v36, %v5304_v15 }
 0x55f   :  { %5723 = vst [vmem:[#allocation1 + $0x21] ss:$2 sm:$0xff] %v5529_v20 }
 0x560   :  { %v5340_v47 = vmax.f32 %v5324_v44, 0.0 }
 0x561   :  { %v5383_v17 = vld [vmem:[#allocation5 + $0x60] ss:$2 sm:$0xf]  ;;  %v5415_v19 = vld [vmem:[#allocation5 + $0x61] ss:$2 sm:$0xf] }
 0x562   :  { %5356 = vst.msk [vmem:[#allocation5 + $0x68] sm:$0xff] %vm4866_vm10, %v5340_v47  ;;  %v5434_v55 = vmax.f32 %v5383_v17, %v5415_v19 }
 0x564   :  { %v5233_v16 = vpop.f32.mrf.mxu2 }
 0x566   :  { %v12814_v31 = vld.sshfl [vmem:[#allocation1 + $0x20] sm:$0xff pattern:$0x75316420]  ;;  %v5184_v52 = vpop.f32.mrf.mxu1 }
 0x567   :  { %5752 = vst [vmem:[#allocation1 + $0x20] ss:$2 sm:$0xff] %v5536_v24  ;;  %v5234_v12 = vadd.f32 %v5233_v16, %v5184_v52  ;;  %v7706_v52 = vld [vmem:[#allocation8 + $0xf8] sm:$0xff] }
 0x568   :  { %5754 = vst [vmem:[#allocation1 + $0x21] ss:$2 sm:$0xff] %v5537_v59  ;;  %6253 = vmatpush.bf16.msrb.mxu3 %v7706_v52  ;;  %v7726_v52 = vld [vmem:[%s13363_s10 + $0x74] sm:$0xf0] }
 0x569   :  { %v5385_v29 = vld [vmem:[#allocation5 + $0x68] ss:$2 sm:$0xf]  ;;  %v5417_v53 = vld [vmem:[#allocation5 + $0x69] ss:$2 sm:$0xf]  ;;  %v5283_v40 = vadd.f32 %v5282_v42, %v5234_v12 }
 0x56a   :  { %v5435_v23 = vmax.f32 %v5385_v29, %v5417_v53  ;;  %v5556_v12 = vld [vmem:[#allocation6 + $0x110] sm:$0xf] }
 0x56b   :  { %v5305_v11 = vmul.f32 %v9423_v34, %v5283_v40  ;;  %v5564_v40 = vld [vmem:[#allocation6 + $0x111] sm:$0xf] }
 0x56c   :  { %v5444_v26 = vmax.f32 %v5434_v55, %v5435_v23  ;;  %v5235_v6 = vpop.f32.mrf.mxu2  ;;  %6254 = vmatpush.bf16.msrb.mxu3 %v7705_v28  ;;  %v7449_v28 = vld [vmem:[%s13363_s10 + $0xe0] sm:$0xf] }
 0x56d   :  { %v5325_v51 = vadd.f32 %v9424_v36, %v5305_v11 }
 0x56e   :  { %5490 = vst.msk [vmem:[#allocation6 + $0xe0] sm:$0xf] %vm5448_vm12, %v5444_v26  ;;  %v5186_v61 = vpop.f32.mrf.mxu1  ;;  %v7703_v26 = vld [vmem:[#allocation8 + $0xe0] sm:$0xff] }
 0x56f   :  { %v12816_v58 = vld.sshfl [vmem:[#allocation1 + $0x20] sm:$0xff pattern:$0x75316420]  ;;  %v5341_v32 = vmax.f32 %v5325_v51, 0.0  ;;  %v5236_v10 = vadd.f32 %v5235_v6, %v5186_v61  ;;  %v7701_v6 = vld [vmem:[#allocation8 + $0xd0] sm:$0xff] }
 0x570   :  { %5791 = vst [vmem:[#allocation1 + $0x20] ss:$2 sm:$0xff] %v5545_v13  ;;  %v7710_v51 = vld [vmem:[#allocation8 + $0x118] sm:$0xff]  ;;  %v7709_v61 = vld [vmem:[#allocation8 + $0x110] sm:$0xff]  ;;  %v7700_v13 = vld [vmem:[#allocation8 + $0xc8] sm:$0xff] }
 0x571   :  { %5357 = vst.msk [vmem:[#allocation5 + $0x70] sm:$0xff] %vm4866_vm10, %v5341_v32  ;;  %v5285_v25 = vadd.f32 %v5284_v18, %v5236_v10  ;;  %6276 = vmatpush.bf16.msrb.mxu1 %v7710_v51  ;;  %v7699_v32 = vld [vmem:[#allocation8 + $0xc0] sm:$0xff]  ;;  %v7708_v10 = vld [vmem:[#allocation8 + $0x108] sm:$0xff] }
 0x572   :  { %v7707_v18 = vld [vmem:[#allocation8 + $0x100] sm:$0xff] }
 0x573   :  { %v5306_v21 = vmul.f32 %v9423_v34, %v5285_v25 }
 0x575   :  { %v5499_v7 = vld [vmem:[#allocation6 + $0xdf] sm:$0xf]  ;;  %v5326_v4 = vadd.f32 %v9424_v36, %v5306_v21  ;;  %6277 = vmatpush.bf16.msrb.mxu1 %v7709_v61  ;;  %v7369_v61 = vld [vmem:[%s13363_s10 + $0x40] sm:$0xf] }
 0x576   :  { %5587 = vst [vmem:[#allocation1 + $0x31] ss:$2 sm:$0xff] %v5499_v7  ;;  %v5546_v8 = vld [vmem:[#allocation6 + $0xdf] sm:$0xf] }
 0x577   :  { %v5342_v30 = vmax.f32 %v5326_v4, 0.0  ;;  %5793 = vst [vmem:[#allocation1 + $0x21] ss:$2 sm:$0xff] %v5546_v8  ;;  %v5507_v3 = vld [vmem:[#allocation6 + $0xe0] sm:$0xf] }
 0x578   :  { %v5387_v48 = vld [vmem:[#allocation5 + $0x70] ss:$2 sm:$0xf]  ;;  %v5419_v46 = vld [vmem:[#allocation5 + $0x71] ss:$2 sm:$0xf] }
 0x579   :  { %5358 = vst.msk [vmem:[#allocation5 + $0x78] sm:$0xff] %vm4866_vm10, %v5342_v30  ;;  %v5436_v9 = vmax.f32 %v5387_v48, %v5419_v46  ;;  %v5554_v54 = vld [vmem:[#allocation6 + $0xe0] sm:$0xf]  ;;  %6278 = vmatpush.bf16.msrb.mxu1 %v7708_v10 }
 0x57a   :  { %v5515_v50 = vld [vmem:[#allocation6 + $0xe1] sm:$0xf] }
 0x57b   :  { %v5562_v1 = vld [vmem:[#allocation6 + $0xe1] sm:$0xf] }
 0x57c   :  { %v5522_v15 = vld [vmem:[#allocation6 + $0xdf] sm:$0xf] }
 0x57d   :  { %v12821_v37 = vld.sshfl [vmem:[#allocation1 + $0x30] sm:$0xff pattern:$0x75316420]  ;;  %v5530_v44 = vld [vmem:[#allocation6 + $0xe0] sm:$0xf]  ;;  %6279 = vmatpush.bf16.msrb.mxu1 %v7707_v18 }
 0x57e   :  { %5618 = vst [vmem:[#allocation1 + $0x31] ss:$2 sm:$0xff] %v5507_v3  ;;  %v12823_v34 = vld.sshfl [vmem:[#allocation1 + $0x20] sm:$0xff pattern:$0x75316420] }
 0x57f   :  { %5616 = vst [vmem:[#allocation1 + $0x30] ss:$2 sm:$0xff] %v5506_v39  ;;  %v5538_v24 = vld [vmem:[#allocation6 + $0xe1] sm:$0xf] }
 0x580   :  { %v5389_v43 = vld [vmem:[#allocation5 + $0x78] ss:$2 sm:$0xf]  ;;  %v5421_v38 = vld [vmem:[#allocation5 + $0x79] ss:$2 sm:$0xf] }
 0x581   :  { %v5437_v62 = vmax.f32 %v5389_v43, %v5421_v38  ;;  %5822 = vst [vmem:[#allocation1 + $0x20] ss:$2 sm:$0xff] %v5553_v60 }
 0x582   :  { %5824 = vst [vmem:[#allocation1 + $0x21] ss:$2 sm:$0xff] %v5554_v54 }
 0x583   :  { %v5445_v36 = vmax.f32 %v5436_v9, %v5437_v62 }
 0x585   :  { %5491 = vst.msk [vmem:[#allocation6 + $0xf8] sm:$0xf] %vm5448_vm12, %v5445_v36 }
 0x586   :  { %v5622_v45 = vld.sshfl [vmem:[#allocation1 + $0x30] sm:$0xff pattern:$0x75316420] }
 0x587   :  { %v9340_v57 = vpack.i.bf16 %v5622_v45, %v12789_v35  ;;  %5655 = vst [vmem:[#allocation1 + $0x30] ss:$2 sm:$0xff] %v5514_v5 }
 0x588   :  { %5657 = vst [vmem:[#allocation1 + $0x31] ss:$2 sm:$0xff] %v5515_v50 }
 0x589   :  { %9341 = vrot.lane.b32.xlu0 %v9340_v57, %s9478_s18  ;;  %v5831_v33 = vld.sshfl [vmem:[#allocation1 + $0x20] sm:$0xff pattern:$0x75316420]  ;;  %v5869_v57 = vld.sshfl [vmem:[#allocation1 + $0x10] sm:$0xff pattern:$0x75316420] }
 0x58a   :  { %5861 = vst [vmem:[#allocation1 + $0x20] ss:$2 sm:$0xff] %v5561_v0 }
 0x58b   :  { %5863 = vst [vmem:[#allocation1 + $0x21] ss:$2 sm:$0xff] %v5562_v1 }
 0x58c   :  { %v5523_v56 = vld [vmem:[#allocation6 + $0xf7] sm:$0xf] }
 0x58d   :  { %v5531_v16 = vld [vmem:[#allocation6 + $0xf8] sm:$0xf] }
 0x58e   :  { %v5539_v42 = vld [vmem:[#allocation6 + $0xf9] sm:$0xf] }
 0x58f   :  { %v12828_v20 = vld.sshfl [vmem:[#allocation1 + $0x30] sm:$0xff pattern:$0x75316420]  ;;  %v5555_v29 = vld [vmem:[#allocation6 + $0xf8] sm:$0xf] }
 0x590   :  { %5686 = vst [vmem:[#allocation1 + $0x30] ss:$2 sm:$0xff] %v5522_v15  ;;  %v5563_v55 = vld [vmem:[#allocation6 + $0xf9] sm:$0xf] }
 0x591   :  { %9356 = vrot.lane.b32.xlu0 %v9355_v14, %s9478_s18  ;;  %5688 = vst [vmem:[#allocation1 + $0x31] ss:$2 sm:$0xff] %v5523_v56  ;;  %v5547_v14 = vld [vmem:[#allocation6 + $0xf7] sm:$0xf] }
 0x598   :  { %v5692_v35 = vld.sshfl [vmem:[#allocation1 + $0x30] sm:$0xff pattern:$0x75316420] }
 0x599   :  { %v9345_v47 = vpack.i.bf16 %v5692_v35, %v12811_v2  ;;  %5725 = vst [vmem:[#allocation1 + $0x30] ss:$2 sm:$0xff] %v5530_v44  ;;  %v7704_v2 = vld [vmem:[#allocation8 + $0xe8] sm:$0xff]  ;;  %v5870_v44 = vld.sshfl [vmem:[#allocation1 + $0x20] sm:$0xff pattern:$0x75316420] }
 0x59a   :  { %5727 = vst [vmem:[#allocation1 + $0x31] ss:$2 sm:$0xff] %v5531_v16  ;;  %6255 = vmatpush.bf16.msrb.mxu3 %v7704_v2  ;;  %v7457_v16 = vld [vmem:[%s13363_s10 + $0xf0] sm:$0xf]  ;;  %v7724_v2 = vld [vmem:[%s13363_s10 + $0x64] sm:$0xf0] }
 0x59b   :  { %9346 = vrot.lane.b32.xlu1 %v9345_v47, %s9478_s18 }
 0x59e   :  { %6256 = vmatpush.bf16.msrb.mxu3 %v7703_v26  ;;  %v7736_v26 = vld [vmem:[%s13363_s10 + $0xc4] sm:$0xf0] }
 0x5a1   :  { %v12836_v59 = vld.sshfl [vmem:[#allocation1 + $0x30] sm:$0xff pattern:$0x75316420] }
 0x5a2   :  { %5756 = vst [vmem:[#allocation1 + $0x30] ss:$2 sm:$0xff] %v5538_v24  ;;  %v7393_v24 = vld [vmem:[%s13363_s10 + $0x70] sm:$0xf] }
 0x5a3   :  { %5758 = vst [vmem:[#allocation1 + $0x31] ss:$2 sm:$0xff] %v5539_v42 }
 0x5aa   :  { %v5762_v17 = vld.sshfl [vmem:[#allocation1 + $0x30] sm:$0xff pattern:$0x75316420] }
 0x5ab   :  { %v9360_v19 = vpack.i.bf16 %v5762_v17, %v12816_v58  ;;  %5795 = vst [vmem:[#allocation1 + $0x30] ss:$2 sm:$0xff] %v5547_v14  ;;  %v7702_v58 = vld [vmem:[#allocation8 + $0xd8] sm:$0xff]  ;;  %v7394_v14 = vor.u32 %v7726_v52, %v7393_v24  ;;  %v7585_v24 = vld [vmem:[%s13363_s10 + $0x1f0] sm:$0xf] }
 0x5ac   :  { %5797 = vst [vmem:[#allocation1 + $0x31] ss:$2 sm:$0xff] %v5548_v27  ;;  %6257 = vmatpush.bf16.msrb.mxu3 %v7702_v58  ;;  %v7740_v27 = vld [vmem:[%s13363_s10 + $0xe4] sm:$0xf0]  ;;  %v7774_v52 = vld [vmem:[%s13363_s10 + $0x1f4] sm:$0xf0] }
 0x5ad   :  { %9361 = vrot.lane.b32.xlu1 %v9360_v19, %s9478_s18  ;;  %v7450_v17 = vor.u32 %v7740_v27, %v7449_v28  ;;  %6785 = vmatpush.bf16.msra.mxu2 %v7394_v14  ;;  %v7385_v19 = vld [vmem:[%s13363_s10 + $0x60] sm:$0xf]  ;;  %v7586_v28 = vor.u32 %v7774_v52, %v7585_v24  ;;  %v7723_v27 = vld [vmem:[%s13363_s10 + $0x64] sm:$0xf]  ;;  %v7387_v14 = vld [vmem:[%s13363_s10 + $0x68] sm:$0xf0] }
 0x5ae   :  { %v7545_v24 = vld [vmem:[%s13363_s10 + $0x1a0] sm:$0xf]  ;;  %v7764_v52 = vld [vmem:[%s13363_s10 + $0x1a4] sm:$0xf0] }
 0x5b0   :  { %6258 = vmatpush.bf16.msrb.mxu3 %v7701_v6 }
 0x5b3   :  { %v5801_v53 = vld.sshfl [vmem:[#allocation1 + $0x30] sm:$0xff pattern:$0x75316420] }
 0x5b4   :  { %5826 = vst [vmem:[#allocation1 + $0x30] ss:$2 sm:$0xff] %v5555_v29  ;;  %6259 = vmatpush.bf16.msrb.mxu3 %v7700_v13  ;;  %v7441_v29 = vld [vmem:[%s13363_s10 + $0xd0] sm:$0xf]  ;;  %v7720_v13 = vld [vmem:[%s13363_s10 + $0x44] sm:$0xf0] }
 0x5b5   :  { %5828 = vst [vmem:[#allocation1 + $0x31] ss:$2 sm:$0xff] %v5556_v12  ;;  %v7386_v12 = vor.u32 %v7724_v2, %v7385_v19  ;;  %v7370_v10 = vor.u32 %v7720_v13, %v7369_v61  ;;  %v7390_v19 = vor.u32 %v7723_v27, %v7387_v14  ;;  %v7497_v2 = vld [vmem:[%s13363_s10 + $0x140] sm:$0xf]  ;;  %v7489_v13 = vld [vmem:[%s13363_s10 + $0x130] sm:$0xf] }
 0x5b6   :  { %v7459_v27 = vld [vmem:[%s13363_s10 + $0xf8] sm:$0xf0] }
 0x5b7   :  { %6786 = vmatpush.bf16.msra.mxu2 %v7386_v12  ;;  %v7752_v12 = vld [vmem:[%s13363_s10 + $0x144] sm:$0xf0] }
 0x5b8   :  { %6260 = vmatpush.bf16.msrb.mxu3 %v7699_v32  ;;  %v12914_v32 = vpop.f32.mrf.mxu1 }
 0x5bc   :  { %v5832_v23 = vld.sshfl [vmem:[#allocation1 + $0x30] sm:$0xff pattern:$0x75316420] }
 0x5bd   :  { %v9365_v11 = vpack.i.bf16 %v5832_v23, %v5831_v33  ;;  %5865 = vst [vmem:[#allocation1 + $0x30] ss:$2 sm:$0xff] %v5563_v55  ;;  %v7722_v23 = vld [vmem:[%s13363_s10 + $0x54] sm:$0xf0] }
 0x5be   :  { %5867 = vst [vmem:[#allocation1 + $0x31] ss:$2 sm:$0xff] %v5564_v40  ;;  %v7377_v40 = vld [vmem:[%s13363_s10 + $0x50] sm:$0xf] }
 0x5bf   :  { %9366 = vrot.lane.b32.xlu2 %v9365_v11, %s9478_s18  ;;  %v7433_v11 = vld [vmem:[%s13363_s10 + $0xc0] sm:$0xf]  ;;  %v7378_v51 = vor.u32 %v7722_v23, %v7377_v40  ;;  %v7772_v23 = vld [vmem:[%s13363_s10 + $0x1e4] sm:$0xf0] }
 0x5c0   :  { %v7434_v6 = vor.u32 %v7736_v26, %v7433_v11  ;;  %v7721_v26 = vld [vmem:[%s13363_s10 + $0x54] sm:$0xf] }
 0x5c1   :  { %6787 = vmatpush.bf16.msra.mxu2 %v7378_v51  ;;  %v7379_v51 = vld [vmem:[%s13363_s10 + $0x58] sm:$0xf0] }
 0x5c5   :  { %6788 = vmatpush.bf16.msra.mxu2 %v7370_v10  ;;  %v7750_v10 = vld [vmem:[%s13363_s10 + $0x134] sm:$0xf0] }
 0x5fb   :  { %v9342_v25 = vpop.permute.xlu0 %9341 }
 0x5fc   :  { %v9344_v21 = vunpack.i.h.bf16 %v9342_v25  ;;  %v9343_v7 = vunpack.i.l.bf16 %v9342_v25  ;;  %v7425_v25 = vld [vmem:[%s13363_s10 + $0xb0] sm:$0xf] }
 0x5fe   :  { %v5878_v4 = vsel %vm4866_vm10, %v12779_v22, %v9343_v7  ;;  %v5879_v30 = vsel %vm4866_vm10, %v12821_v37, %v9344_v21  ;;  %v7734_v21 = vld [vmem:[%s13363_s10 + $0xb4] sm:$0xf0] }
 0x5ff   :  { %v5897_v8 = vpack.c.bf16 %v5879_v30, %v5878_v4  ;;  %v7426_v7 = vor.u32 %v7734_v21, %v7425_v25  ;;  %v7361_v4 = vld [vmem:[%s13363_s10 + $0x30] sm:$0xf]  ;;  %v7718_v30 = vld [vmem:[%s13363_s10 + $0x34] sm:$0xf0]  ;;  %v7490_v21 = vor.u32 %v7750_v10, %v7489_v13  ;;  %v7711_v10 = vld [vmem:[%s13363_s10 + $0x4] sm:$0xf] }
 0x600   :  { %v7569_v25 = vld [vmem:[%s13363_s10 + $0x1d0] sm:$0xf] }
 0x601   :  { %6209 = vmatmul.bf16.gmra.mxu3 %v5897_v8  ;;  %v7362_v8 = vor.u32 %v7718_v30, %v7361_v4  ;;  %v7719_v4 = vld [vmem:[%s13363_s10 + $0x44] sm:$0xf]  ;;  %v7371_v30 = vld [vmem:[%s13363_s10 + $0x48] sm:$0xf0] }
 0x603   :  { %v9357_v39 = vpop.permute.xlu0 %9356  ;;  %6789 = vmatpush.bf16.msra.mxu2 %v7362_v8  ;;  %v13051_v8 = vld [vmem:[%s13361_s8] ss:$0 sm:$0xff] }
 0x604   :  { %v9359_v3 = vunpack.i.h.bf16 %v9357_v39  ;;  %v9358_v48 = vunpack.i.l.bf16 %v9357_v39  ;;  %v12930_v39 = vpop.f32.mrf.mxu1 }
 0x606   :  { %v5889_v46 = vsel %vm4866_vm10, %v12758_v41, %v9359_v3  ;;  %v5888_v43 = vsel %vm4866_vm10, %v12724_v63, %v9358_v48  ;;  %v7417_v3 = vld [vmem:[%s13363_s10 + $0xa0] sm:$0xf]  ;;  %v7732_v48 = vld [vmem:[%s13363_s10 + $0xa4] sm:$0xf0] }
 0x607   :  { %v5895_v60 = vpack.c.bf16 %v5889_v46, %v5888_v43  ;;  %v7418_v46 = vor.u32 %v7732_v48, %v7417_v3  ;;  %v7353_v43 = vld [vmem:[%s13363_s10 + $0x20] sm:$0xf]  ;;  %v7374_v3 = vor.u32 %v7719_v4, %v7371_v30 }
 0x608   :  { %v7529_v30 = vld [vmem:[%s13363_s10 + $0x180] sm:$0xf] }
 0x60d   :  { %v9347_v38 = vpop.permute.xlu1 %9346 }
 0x60e   :  { %v9349_v9 = vunpack.i.h.bf16 %v9347_v38  ;;  %v9348_v62 = vunpack.i.l.bf16 %v9347_v38  ;;  %v7716_v38 = vld [vmem:[%s13363_s10 + $0x24] sm:$0xf0] }
 0x610   :  { %v5882_v22 = vsel %vm4866_vm10, %v12793_v49, %v9348_v62  ;;  %v5883_v37 = vsel %vm4866_vm10, %v12828_v20, %v9349_v9  ;;  %v5868_v49 = vld.sshfl [vmem:[#allocation1] sm:$0xff pattern:$0x75316420]  ;;  %v7354_v9 = vor.u32 %v7716_v38, %v7353_v43  ;;  %v7521_v62 = vld [vmem:[%s13363_s10 + $0x170] sm:$0xf] }
 0x611   :  { %v5898_v54 = vpack.c.bf16 %v5883_v37, %v5882_v22  ;;  %6261 = vmatmul.bf16.vlgmr.msrb.gmra.mxu3 %v5895_v60  ;;  %v5896_v56 = vpack.c.bf16 %v5869_v57, %v5868_v49  ;;  %v7758_v60 = vld [vmem:[%s13363_s10 + $0x174] sm:$0xf0]  ;;  %v7409_v37 = vld [vmem:[%s13363_s10 + $0x90] sm:$0xf]  ;;  %v7513_v57 = vld [vmem:[%s13363_s10 + $0x160] sm:$0xf] }
 0x612   :  { %v7522_v22 = vor.u32 %v7758_v60, %v7521_v62  ;;  %6790 = vmatpush.bf16.msra.mxu2 %v7354_v9  ;;  %v7728_v49 = vld [vmem:[%s13363_s10 + $0x84] sm:$0xf0]  ;;  %v7561_v38 = vld [vmem:[%s13363_s10 + $0x1c0] sm:$0xf] }
 0x613   :  { %6228 = vmatmul.bf16.gmra.mxu1 %v5898_v54  ;;  %v7730_v54 = vld [vmem:[%s13363_s10 + $0x94] sm:$0xf0]  ;;  %v7748_v43 = vld [vmem:[%s13363_s10 + $0x124] sm:$0xf0] }
 0x614   :  { %6811 = vmatpush.bf16.msra.mxu1 %v7522_v22  ;;  %v7768_v22 = vld [vmem:[%s13363_s10 + $0x1c4] sm:$0xf0] }
 0x619   :  { %v9367_v36 = vpop.permute.xlu2 %9366 }
 0x61a   :  { %v9369_v45 = vunpack.i.h.bf16 %v9367_v36  ;;  %v9368_v5 = vunpack.i.l.bf16 %v9367_v36  ;;  %v7410_v36 = vor.u32 %v7730_v54, %v7409_v37  ;;  %v13068_v54 = vld [vmem:[%s13362_s9] ss:$0 sm:$0xff] }
 0x61c   :  { %v5890_v41 = vsel %vm4866_vm10, %v12823_v34, %v9368_v5  ;;  %v5891_v63 = vsel %vm4866_vm10, %v5801_v53, %v9369_v45  ;;  %v5871_v34 = vld.sshfl [vmem:[#allocation1 + $0x30] sm:$0xff pattern:$0x75316420]  ;;  %v7738_v53 = vld [vmem:[%s13363_s10 + $0xd4] sm:$0xf0] }
 0x61d   :  { %v5900_v0 = vpack.c.bf16 %v5891_v63, %v5890_v41  ;;  %v5901_v47 = vpack.c.bf16 %v5871_v34, %v5870_v44  ;;  %v7442_v55 = vor.u32 %v7738_v53, %v7441_v29  ;;  %v7345_v5 = vld [vmem:[%s13363_s10 + $0x10] sm:$0xf]  ;;  %v7714_v41 = vld [vmem:[%s13363_s10 + $0x14] sm:$0xf0]  ;;  %v7337_v34 = vld [vmem:[%s13363_s10] sm:$0xf] }
 0x61e   :  { %v7346_v63 = vor.u32 %v7714_v41, %v7345_v5  ;;  %v7712_v44 = vld [vmem:[%s13363_s10 + $0x4] sm:$0xf0]  ;;  %v7577_v29 = vld [vmem:[%s13363_s10 + $0x1e0] sm:$0xf]  ;;  %v7717_v5 = vld [vmem:[%s13363_s10 + $0x34] sm:$0xf] }
 0x61f   :  { %v9362_v50 = vpop.permute.xlu1 %9361  ;;  %v7578_v11 = vor.u32 %v7772_v23, %v7577_v29  ;;  %v7363_v41 = vld [vmem:[%s13363_s10 + $0x38] sm:$0xf0] }
 0x620   :  { %v9364_v33 = vunpack.i.h.bf16 %v9362_v50  ;;  %v9363_v1 = vunpack.i.l.bf16 %v9362_v50  ;;  %v7756_v50 = vld [vmem:[%s13363_s10 + $0x164] sm:$0xf0]  ;;  %6791 = vmatpush.bf16.msra.mxu2 %v7346_v63  ;;  %v7347_v29 = vld [vmem:[%s13363_s10 + $0x18] sm:$0xf0] }
 0x621   :  { %6266 = vmatmul.bf16.gmra.mxu3 %v5900_v0 }
 0x622   :  { %v5886_v15 = vsel %vm4866_vm10, %v12814_v31, %v9363_v1  ;;  %v5887_v20 = vsel %vm4866_vm10, %v12836_v59, %v9364_v33  ;;  %v7742_v31 = vld [vmem:[%s13363_s10 + $0xf4] sm:$0xf0]  ;;  %v12871_v59 = vpop.f32.mrf.mxu3  ;;  %v7514_v33 = vor.u32 %v7756_v50, %v7513_v57  ;;  %v7401_v1 = vld [vmem:[%s13363_s10 + $0x80] sm:$0xf]  ;;  %v7366_v57 = vor.u32 %v7717_v5, %v7363_v41  ;;  %v7435_v5 = vld [vmem:[%s13363_s10 + $0xc8] sm:$0xf0] }
 0x623   :  { %v5899_v35 = vpack.c.bf16 %v5887_v20, %v5886_v15  ;;  %7333 = vmatmul.msk.bf16.vlgmr.msrb.gmra.mxu1 %vm4866_vm10, %v5896_v56  ;;  %v7458_v42 = vor.u32 %v7742_v31, %v7457_v16  ;;  %v7402_v56 = vor.u32 %v7728_v49, %v7401_v1  ;;  %v7725_v15 = vld [vmem:[%s13363_s10 + $0x74] sm:$0xf]  ;;  %v7395_v20 = vld [vmem:[%s13363_s10 + $0x78] sm:$0xf0]  ;;  %v7505_v16 = vld [vmem:[%s13363_s10 + $0x150] sm:$0xf]  ;;  %v6225_v61 = vadd.f32 %v12914_v32, %v12871_v59 }
 0x624   :  { %6812 = vmatpush.bf16.msra.mxu1 %v7514_v33  ;;  %v7754_v31 = vld [vmem:[%s13363_s10 + $0x154] sm:$0xf0]  ;;  %v7473_v1 = vld [vmem:[%s13363_s10 + $0x110] sm:$0xf] }
 0x625   :  { %6247 = vmatmul.bf16.gmra.mxu2 %v5899_v35  ;;  %6798 = vmatpush.bf16.msra.mxu3 %v7458_v42  ;;  %v7398_v35 = vor.u32 %v7725_v15, %v7395_v20  ;;  %v7506_v42 = vor.u32 %v7754_v31, %v7505_v16  ;;  %v7746_v49 = vld [vmem:[%s13363_s10 + $0x114] sm:$0xf0]  ;;  %v7355_v20 = vld [vmem:[%s13363_s10 + $0x28] sm:$0xf0]  ;;  %v7465_v16 = vld [vmem:[%s13363_s10 + $0x100] sm:$0xf] }
 0x626   :  { %v7474_v15 = vor.u32 %v7746_v49, %v7473_v1  ;;  %v7744_v31 = vld [vmem:[%s13363_s10 + $0x104] sm:$0xf0]  ;;  %v7733_v49 = vld [vmem:[%s13363_s10 + $0xb4] sm:$0xf] }
 0x628   :  { %6813 = vmatpush.bf16.msra.mxu1 %v7506_v42  ;;  %v7466_v42 = vor.u32 %v7744_v31, %v7465_v16 }
 0x629   :  { %6799 = vmatpush.bf16.msra.mxu3 %v7450_v17  ;;  %v6243_v17 = vpop.f32.mrf.mxu2 }
 0x62a   :  { %v12906_v58 = vpop.f32.mrf.mxu3  ;;  %v6244_v59 = vadd.f32 %v6243_v17, %v6225_v61 }
 0x62b   :  { %v6227_v50 = vadd.f32 %v12930_v39, %v12906_v58  ;;  %v7766_v58 = vld [vmem:[%s13363_s10 + $0x1b4] sm:$0xf0]  ;;  %v7715_v39 = vld [vmem:[%s13363_s10 + $0x24] sm:$0xf] }
 0x62d   :  { %6800 = vmatpush.bf16.msra.mxu3 %v7442_v55  ;;  %v7498_v55 = vor.u32 %v7752_v12, %v7497_v2  ;;  %v7713_v12 = vld [vmem:[%s13363_s10 + $0x14] sm:$0xf] }
 0x62f   :  { %6814 = vmatpush.bf16.msra.mxu1 %v7498_v55 }
 0x631   :  { %6801 = vmatpush.bf16.msra.mxu3 %v7434_v6  ;;  %v7382_v6 = vor.u32 %v7721_v26, %v7379_v51  ;;  %v6245_v9 = vpop.f32.mrf.mxu2  ;;  %v7537_v26 = vld [vmem:[%s13363_s10 + $0x190] sm:$0xf]  ;;  %v7762_v51 = vld [vmem:[%s13363_s10 + $0x194] sm:$0xf0] }
 0x633   :  { %7334 = vmatmul.msk.bf16.gmra.mxu1 %vm4866_vm10, %v5901_v47  ;;  %v7338_v47 = vor.u32 %v7712_v44, %v7337_v34 }
 0x634   :  { %6815 = vmatpush.bf16.msra.mxu1 %v7490_v21 }
 0x635   :  { %6802 = vmatpush.bf16.msra.mxu3 %v7426_v7  ;;  %6792 = vmatpush.bf16.msra.mxu2 %v7338_v47  ;;  %v7770_v7 = vld [vmem:[%s13363_s10 + $0x1d4] sm:$0xf0]  ;;  %v7358_v47 = vor.u32 %v7715_v39, %v7355_v20 }
 0x636   :  { %v7570_v32 = vor.u32 %v7770_v7, %v7569_v25  ;;  %v7339_v25 = vld [vmem:[%s13363_s10 + $0x8] sm:$0xf0]  ;;  %v7538_v7 = vor.u32 %v7762_v51, %v7537_v26 }
 0x637   :  { %v7342_v4 = vor.u32 %v7711_v10, %v7339_v25 }
 0x639   :  { %6803 = vmatpush.bf16.msra.mxu3 %v7418_v46  ;;  %6824 = vmatpush.bf16.msrb.mxu2 %v7586_v28  ;;  %v7481_v46 = vld [vmem:[%s13363_s10 + $0x120] sm:$0xf]  ;;  %v7741_v28 = vld [vmem:[%s13363_s10 + $0xf4] sm:$0xf] }
 0x63a   :  { %v7482_v60 = vor.u32 %v7748_v43, %v7481_v46  ;;  %v7462_v2 = vor.u32 %v7741_v28, %v7459_v27  ;;  %v7443_v43 = vld [vmem:[%s13363_s10 + $0xd8] sm:$0xf0]  ;;  %v7729_v27 = vld [vmem:[%s13363_s10 + $0x94] sm:$0xf] }
 0x63c   :  { %6816 = vmatpush.bf16.msra.mxu1 %v7482_v60 }
 0x63d   :  { %6804 = vmatpush.bf16.msra.mxu3 %v7410_v36  ;;  %6825 = vmatpush.bf16.msrb.mxu2 %v7578_v11  ;;  %v7562_v36 = vor.u32 %v7768_v22, %v7561_v38  ;;  %v7350_v11 = vor.u32 %v7713_v12, %v7347_v29 }
 0x640   :  { %6817 = vmatpush.bf16.msra.mxu1 %v7474_v15 }
 0x641   :  { %6805 = vmatpush.bf16.msra.mxu3 %v7402_v56  ;;  %6826 = vmatpush.bf16.msrb.mxu2 %v7570_v32  ;;  %v7553_v56 = vld [vmem:[%s13363_s10 + $0x1b0] sm:$0xf] }
 0x642   :  { %v7554_v44 = vor.u32 %v7766_v58, %v7553_v56  ;;  %v7427_v56 = vld [vmem:[%s13363_s10 + $0xb8] sm:$0xf0] }
 0x643   :  { %v7430_v39 = vor.u32 %v7733_v49, %v7427_v56  ;;  %v7769_v56 = vld [vmem:[%s13363_s10 + $0x1d4] sm:$0xf] }
 0x644   :  { %6818 = vmatpush.bf16.msra.mxu1 %v7466_v42 }
 0x645   :  { %6837 = vmatpush.bf16.msrb.mxu3 %v7398_v35  ;;  %6827 = vmatpush.bf16.msrb.mxu2 %v7562_v36  ;;  %v6246_v35 = vadd.f32 %v6245_v9, %v6227_v50  ;;  %v7735_v36 = vld [vmem:[%s13363_s10 + $0xc4] sm:$0xf] }
 0x646   :  { %v7438_v1 = vor.u32 %v7735_v36, %v7435_v5 }
 0x648   :  { %6850 = vmatpush.bf16.msrb.mxu1 %v7462_v2 }
 0x649   :  { %6838 = vmatpush.bf16.msrb.mxu3 %v7390_v19  ;;  %6828 = vmatpush.bf16.msrb.mxu2 %v7554_v44  ;;  %v7546_v19 = vor.u32 %v7764_v52, %v7545_v24 }
 0x64d   :  { %6839 = vmatpush.bf16.msrb.mxu3 %v7382_v6  ;;  %v7739_v6 = vld [vmem:[%s13363_s10 + $0xe4] sm:$0xf]  ;;  %6829 = vmatpush.bf16.msrb.mxu2 %v7546_v19 }
 0x651   :  { %6840 = vmatpush.bf16.msrb.mxu3 %v7374_v3  ;;  %v7760_v3 = vld [vmem:[%s13363_s10 + $0x184] sm:$0xf0]  ;;  %6830 = vmatpush.bf16.msrb.mxu2 %v7538_v7  ;;  %v7523_v7 = vld [vmem:[%s13363_s10 + $0x178] sm:$0xf0] }
 0x655   :  { %6841 = vmatpush.bf16.msrb.mxu3 %v7366_v57 }
 0x659   :  { %6842 = vmatpush.bf16.msrb.mxu3 %v7358_v47 }
 0x65d   :  { %6843 = vmatpush.bf16.msrb.mxu3 %v7350_v11 }
 0x661   :  { %6844 = vmatpush.bf16.msrb.mxu3 %v7342_v4 }
 0x684   :  { %v12916_v18 = vpop.f32.mrf.mxu3 }
 0x68c   :  { %v12956_v45 = vpop.f32.mrf.mxu3 }
 0x690   :  { %v12970_v0 = vpop.f32.mrf.mxu1 }
 0x694   :  { %v6262_v53 = vpop.f32.mrf.mxu3 }
 0x695   :  { %v6263_v48 = vadd.f32 %v6262_v53, %v6244_v59  ;;  %v6230_v53 = vadd.f32 %v12970_v0, %v12916_v18  ;;  %v7451_v18 = vld [vmem:[%s13363_s10 + $0xe8] sm:$0xf0] }
 0x696   :  { %v7454_v59 = vor.u32 %v7739_v6, %v7451_v18  ;;  %v7773_v18 = vld [vmem:[%s13363_s10 + $0x1f4] sm:$0xf] }
 0x698   :  { %v13017_v40 = vpop.f32.mrf.mxu1  ;;  %6851 = vmatpush.bf16.msrb.mxu1 %v7454_v59  ;;  %v7771_v59 = vld [vmem:[%s13363_s10 + $0x1e4] sm:$0xf] }
 0x699   :  { %v6232_v41 = vadd.f32 %v13017_v40, %v12956_v45 }
 0x69c   :  { %v6264_v63 = vpop.f32.mrf.mxu3 }
 0x69d   :  { %v6265_v14 = vadd.f32 %v6264_v63, %v6246_v35  ;;  %v7731_v35 = vld [vmem:[%s13363_s10 + $0xa4] sm:$0xf] }
 0x6a0   :  { %v6281_v62 = vpop.f32.mrf.mxu1 }
 0x6a1   :  { %v6282_v37 = vadd.f32 %v6281_v62, %v6263_v48  ;;  %v7737_v48 = vld [vmem:[%s13363_s10 + $0xd4] sm:$0xf]  ;;  %v7530_v62 = vor.u32 %v7760_v3, %v7529_v30 }
 0x6a2   :  { %v7446_v60 = vor.u32 %v7737_v48, %v7443_v43  ;;  %v7579_v48 = vld [vmem:[%s13363_s10 + $0x1e8] sm:$0xf0] }
 0x6a3   :  { %v6295_v33 = vmul.f32 %v13051_v8, %v6282_v37  ;;  %6831 = vmatpush.bf16.msrb.mxu2 %v7530_v62 }
 0x6a4   :  { %v6267_v32 = vpop.f32.mrf.mxu3  ;;  %6852 = vmatpush.bf16.msrb.mxu1 %v7446_v60 }
 0x6a5   :  { %v6303_v34 = vadd.f32 %v13068_v54, %v6295_v33 }
 0x6a7   :  { %v6307_v17 = vmax.f32 %v6303_v34, 0.0  ;;  %v7419_v34 = vld [vmem:[%s13363_s10 + $0xa8] sm:$0xf0] }
 0x6a8   :  { %v6248_v55 = vpop.f32.mrf.mxu2  ;;  %v6283_v23 = vpop.f32.mrf.mxu1  ;;  %6853 = vmatpush.bf16.msrb.mxu1 %v7438_v1  ;;  %v7422_v28 = vor.u32 %v7731_v35, %v7419_v34 }
 0x6a9   :  { %v6315_v61 = vrot.slane %v6307_v17, 4  ;;  %6323 = vst [vmem:[#allocation7] sm:$0xf] %v6307_v17  ;;  %v6284_v13 = vadd.f32 %v6283_v23, %v6265_v14  ;;  %v6249_v0 = vadd.f32 %v6248_v55, %v6230_v53  ;;  %v7411_v14 = vld [vmem:[%s13363_s10 + $0x98] sm:$0xf0] }
 0x6aa   :  { %v7414_v29 = vor.u32 %v7729_v27, %v7411_v14  ;;  %v7403_v53 = vld [vmem:[%s13363_s10 + $0x88] sm:$0xf0] }
 0x6ab   :  { %6324 = vst [vmem:[#allocation7 + $0x4] sm:$0xf] %v6315_v61  ;;  %v6296_v21 = vmul.f32 %v13051_v8, %v6284_v13  ;;  %v6268_v38 = vadd.f32 %v6267_v32, %v6249_v0  ;;  %v7587_v0 = vld [vmem:[%s13363_s10 + $0x1f8] sm:$0xf0]  ;;  %v7499_v27 = vld [vmem:[%s13363_s10 + $0x148] sm:$0xf0] }
 0x6ac   :  { %v6269_v40 = vpop.f32.mrf.mxu3  ;;  %6854 = vmatpush.bf16.msrb.mxu1 %v7430_v39  ;;  %v7590_v30 = vor.u32 %v7773_v18, %v7587_v0  ;;  %v7753_v39 = vld [vmem:[%s13363_s10 + $0x154] sm:$0xf]  ;;  %v7539_v0 = vld [vmem:[%s13363_s10 + $0x198] sm:$0xf0] }
 0x6ad   :  { %v6304_v46 = vadd.f32 %v13068_v54, %v6296_v21  ;;  %v7757_v21 = vld [vmem:[%s13363_s10 + $0x174] sm:$0xf] }
 0x6ae   :  { %v7761_v18 = vld [vmem:[%s13363_s10 + $0x194] sm:$0xf] }
 0x6af   :  { %v6308_v9 = vmax.f32 %v6304_v46, 0.0 }
 0x6b0   :  { %v6250_v22 = vpop.f32.mrf.mxu2  ;;  %v6286_v37 = vpop.f32.mrf.mxu1  ;;  %v6331_v16 = vld [vmem:[#allocation7] ss:$2 sm:$0x3]  ;;  %v6347_v52 = vld [vmem:[#allocation7 + $0x1] ss:$2 sm:$0x3]  ;;  %6855 = vmatpush.bf16.msrb.mxu1 %v7422_v28 }
 0x6b1   :  { %v6316_v63 = vrot.slane %v6308_v9, 4  ;;  %6325 = vst [vmem:[#allocation7 + $0x8] sm:$0xf] %v6308_v9  ;;  %v6287_v57 = vadd.f32 %v6286_v37, %v6268_v38  ;;  %v6251_v50 = vadd.f32 %v6250_v22, %v6232_v41  ;;  %v6362_v12 = vmax.f32 %v6331_v16, %v6347_v52  ;;  %v7755_v38 = vld [vmem:[%s13363_s10 + $0x164] sm:$0xf] }
 0x6b2   :  { %v6333_v31 = vld [vmem:[#allocation7 + $0x4] ss:$2 sm:$0x3]  ;;  %v6349_v24 = vld [vmem:[#allocation7 + $0x5] ss:$2 sm:$0x3]  ;;  %v7526_v37 = vor.u32 %v7757_v21, %v7523_v7  ;;  %v7542_v7 = vor.u32 %v7761_v18, %v7539_v0 }
 0x6b3   :  { %6326 = vst [vmem:[#allocation7 + $0xc] sm:$0xf] %v6316_v63  ;;  %v6297_v33 = vmul.f32 %v13051_v8, %v6287_v57  ;;  %v6270_v15 = vadd.f32 %v6269_v40, %v6251_v50  ;;  %v6363_v19 = vmax.f32 %v6333_v31, %v6349_v24  ;;  %v7515_v9 = vld [vmem:[%s13363_s10 + $0x168] sm:$0xf0]  ;;  %v7582_v50 = vor.u32 %v7771_v59, %v7579_v48  ;;  %v7751_v28 = vld [vmem:[%s13363_s10 + $0x144] sm:$0xf] }
 0x6b4   :  { %6856 = vmatpush.bf16.msrb.mxu1 %v7414_v29  ;;  %v7518_v40 = vor.u32 %v7755_v38, %v7515_v9  ;;  %v7563_v16 = vld [vmem:[%s13363_s10 + $0x1c8] sm:$0xf0]  ;;  %v7781_v29 = vld [vmem:[%s13365_s12 + $0x30] sm:$0xff]  ;;  %v7475_v21 = vld [vmem:[%s13363_s10 + $0x118] sm:$0xf0] }
 0x6b5   :  { %v6305_v45 = vadd.f32 %v13068_v54, %v6297_v33  ;;  %v6370_v26 = vmax.f32 %v6362_v12, %v6363_v19  ;;  %v7555_v19 = vld [vmem:[%s13363_s10 + $0x1b8] sm:$0xf0]  ;;  %v7759_v59 = vld [vmem:[%s13363_s10 + $0x184] sm:$0xf]  ;;  %v7780_v38 = vld [vmem:[%s13365_s12 + $0x28] sm:$0xff] }
 0x6b6   :  { %v7779_v9 = vld [vmem:[%s13365_s12 + $0x20] sm:$0xff] }
 0x6b7   :  { %v6309_v58 = vmax.f32 %v6305_v45, 0.0  ;;  %v6380_v25 = vrot.slane %v6370_v26, 1  ;;  %v7571_v45 = vld [vmem:[%s13363_s10 + $0x1d8] sm:$0xf0] }
 0x6b8   :  { %v6288_v20 = vpop.f32.mrf.mxu1  ;;  %v6335_v36 = vld [vmem:[#allocation7 + $0x8] ss:$2 sm:$0x3]  ;;  %v6351_v5 = vld [vmem:[#allocation7 + $0x9] ss:$2 sm:$0x3]  ;;  %v7574_v35 = vor.u32 %v7769_v56, %v7571_v45 }
 0x6b9   :  { %v6317_v44 = vrot.slane %v6309_v58, 4  ;;  %6327 = vst [vmem:[#allocation7 + $0x10] sm:$0xf] %v6309_v58  ;;  %v6289_v47 = vadd.f32 %v6288_v20, %v6270_v15  ;;  %v6364_v15 = vmax.f32 %v6335_v36, %v6351_v5  ;;  %v7507_v20 = vld [vmem:[%s13363_s10 + $0x158] sm:$0xf0]  ;;  %v7788_v36 = vld [vmem:[%s13365_s12 + $0x68] sm:$0xff] }
 0x6ba   :  { %v6337_v32 = vld [vmem:[#allocation7 + $0xc] ss:$2 sm:$0x3]  ;;  %v6353_v46 = vld [vmem:[#allocation7 + $0xd] ss:$2 sm:$0x3]  ;;  %v7510_v24 = vor.u32 %v7753_v39, %v7507_v20 }
 0x6bb   :  { %6328 = vst [vmem:[#allocation7 + $0x14] sm:$0xf] %v6317_v44  ;;  %v6298_v42 = vmul.f32 %v13051_v8, %v6289_v47  ;;  %v7727_v8 = vld [vmem:[%s13363_s10 + $0x84] sm:$0xf]  ;;  %v6365_v33 = vmax.f32 %v6337_v32, %v6353_v46  ;;  %v7531_v32 = vld [vmem:[%s13363_s10 + $0x188] sm:$0xf0] }
 0x6bc   :  { %v7406_v13 = vor.u32 %v7727_v8, %v7403_v53  ;;  %v7767_v47 = vld [vmem:[%s13363_s10 + $0x1c4] sm:$0xf]  ;;  %v7749_v8 = vld [vmem:[%s13363_s10 + $0x134] sm:$0xf]  ;;  %v7491_v53 = vld [vmem:[%s13363_s10 + $0x138] sm:$0xf0]  ;;  %v7534_v48 = vor.u32 %v7759_v59, %v7531_v32 }
 0x6bd   :  { %v6306_v17 = vadd.f32 %v13068_v54, %v6298_v42  ;;  %v6371_v34 = vmax.f32 %v6364_v15, %v6365_v33  ;;  %v7782_v42 = vld [vmem:[%s13365_s12 + $0x38] sm:$0xff]  ;;  %v7566_v14 = vor.u32 %v7767_v47, %v7563_v16  ;;  %v7775_v5 = vld [vmem:[%s13365_s12] sm:$0xff] }
 0x6be   :  { %6857 = vmatpush.bf16.msrb.mxu1 %v7406_v13  ;;  %v6459_v33 = vld [vmem:[%s13364_s11] sm:$0x3] }
 0x6bf   :  { %v6310_v2 = vmax.f32 %v6306_v17, 0.0  ;;  %v7765_v17 = vld [vmem:[%s13363_s10 + $0x1b4] sm:$0xf]  ;;  %v6388_v12 = vrot.slane %v6371_v34, 1  ;;  %v6461_v56 = vperm.slane %v6459_v33, 0  ;;  %v7783_v39 = vld [vmem:[%s13365_s12 + $0x40] sm:$0xff] }
 0x6c0   :  { %v6339_v55 = vld [vmem:[#allocation7 + $0x10] ss:$2 sm:$0x3]  ;;  %v6355_v23 = vld [vmem:[#allocation7 + $0x11] ss:$2 sm:$0x3] }
 0x6c1   :  { %v6318_v11 = vrot.slane %v6310_v2, 4  ;;  %6329 = vst [vmem:[#allocation7 + $0x18] sm:$0xf] %v6310_v2  ;;  %v6366_v6 = vmax.f32 %v6339_v55, %v6355_v23  ;;  %v7502_v2 = vor.u32 %v7751_v28, %v7499_v27  ;;  %v7558_v55 = vor.u32 %v7765_v17, %v7555_v19 }
 0x6c2   :  { %v6341_v51 = vld [vmem:[#allocation7 + $0x14] ss:$2 sm:$0x3]  ;;  %v6357_v54 = vld [vmem:[#allocation7 + $0x15] ss:$2 sm:$0x3] }
 0x6c3   :  { %6330 = vst [vmem:[#allocation7 + $0x1c] sm:$0xf] %v6318_v11  ;;  %v6367_v61 = vmax.f32 %v6341_v51, %v6357_v54  ;;  %v7763_v11 = vld [vmem:[%s13363_s10 + $0x1a4] sm:$0xf]  ;;  %v7494_v51 = vor.u32 %v7749_v8, %v7491_v53  ;;  %v6462_v27 = vperm.slane %v6459_v33, 1 }
 0x6c5   :  { %v6372_v10 = vmax.f32 %v6366_v6, %v6367_v61  ;;  %v7747_v6 = vld [vmem:[%s13363_s10 + $0x124] sm:$0xf]  ;;  %v7483_v61 = vld [vmem:[%s13363_s10 + $0x128] sm:$0xf0] }
 0x6c7   :  { %v6381_v4 = vsel %vm6377_vm13, %v6372_v10, %v6380_v25  ;;  %v6376_v3 = vrot.slane %v6372_v10, 7  ;;  %v7486_v10 = vor.u32 %v7747_v6, %v7483_v61  ;;  %v7745_v25 = vld [vmem:[%s13363_s10 + $0x114] sm:$0xf] }
 0x6c8   :  { %v13211_v43 = vpack.c.bf16 %v6381_v4, %v6381_v4  ;;  %v6343_v62 = vld [vmem:[#allocation7 + $0x18] ss:$2 sm:$0x3]  ;;  %v6359_v60 = vld [vmem:[#allocation7 + $0x19] ss:$2 sm:$0x3]  ;;  %v7478_v4 = vor.u32 %v7745_v25, %v7475_v21 }
 0x6c9   :  { %v6378_v22 = vsel %vm6377_vm13, %v6376_v3, %v6370_v26  ;;  %v6368_v1 = vmax.f32 %v6343_v62, %v6359_v60  ;;  %v7547_v26 = vld [vmem:[%s13363_s10 + $0x1a8] sm:$0xf0]  ;;  %v7790_v62 = vld [vmem:[%s13365_s12 + $0x78] sm:$0xff]  ;;  %v7777_v60 = vld [vmem:[%s13365_s12 + $0x10] sm:$0xff] }
 0x6ca   :  { %6806 = vmatmul.bf16.vlgmr.msra.gmra.mxu3 %v13211_v43  ;;  %v6391_v41 = vpack.c.bf16 %v6378_v22, %v6378_v22  ;;  %v6345_v63 = vld [vmem:[#allocation7 + $0x1c] ss:$2 sm:$0x3]  ;;  %v6361_v57 = vld [vmem:[#allocation7 + $0x1d] ss:$2 sm:$0x3]  ;;  %v7550_v13 = vor.u32 %v7763_v11, %v7547_v26 }
 0x6cb   :  { %6876 = vmatpush.bf16.msra.mxu3 %v7590_v30  ;;  %v6369_v49 = vmax.f32 %v6345_v63, %v6361_v57  ;;  %v7743_v30 = vld [vmem:[%s13363_s10 + $0x104] sm:$0xf]  ;;  %v7467_v3 = vld [vmem:[%s13363_s10 + $0x108] sm:$0xf0]  ;;  %v7789_v22 = vld [vmem:[%s13365_s12 + $0x70] sm:$0xff]  ;;  %s7057_s10 = sshll.u32 %s9489_s30, 4  ;;  %s7058_s10 = int_to_ptr.vmem [resolvable:$true] %s7057_s10 }
 0x6cc   :  { %6793 = vmatmul.bf16.vlgmr.msra.gmra.mxu2 %v6391_v41  ;;  %v7470_v46 = vor.u32 %v7743_v30, %v7467_v3  ;;  %v7786_v63 = vld [vmem:[%s13365_s12 + $0x58] sm:$0xff] }
 0x6cd   :  { %6863 = vmatpush.bf16.msra.mxu2 %v7526_v37  ;;  %v6373_v58 = vmax.f32 %v6368_v1, %v6369_v49  ;;  %v7776_v37 = vld [vmem:[%s13365_s12 + $0x8] sm:$0xff] }
 0x6cf   :  { %6877 = vmatpush.bf16.msra.mxu3 %v7582_v50  ;;  %v6385_v44 = vrot.slane %v6373_v58, 7  ;;  %v6389_v23 = vsel %vm6377_vm13, %v6373_v58, %v6388_v12  ;;  %v7785_v50 = vld [vmem:[%s13365_s12 + $0x50] sm:$0xff] }
 0x6d0   :  { %v6394_v54 = vpack.c.bf16 %v6389_v23, %v6389_v23 }
 0x6d1   :  { %6864 = vmatpush.bf16.msra.mxu2 %v7518_v40  ;;  %v6386_v31 = vsel %vm6377_vm13, %v6385_v44, %v6371_v34  ;;  %v7784_v40 = vld [vmem:[%s13365_s12 + $0x48] sm:$0xff] }
 0x6d2   :  { %v6393_v52 = vpack.c.bf16 %v6386_v31, %v6386_v31 }
 0x6d3   :  { %6878 = vmatpush.bf16.msra.mxu3 %v7574_v35 }
 0x6d4   :  { %6819 = vmatmul.bf16.vlgmr.msra.gmra.mxu1 %v6393_v52 }
 0x6d5   :  { %6865 = vmatpush.bf16.msra.mxu2 %v7510_v24  ;;  %7025 = vmatpush.bf16.msra.mxu1 %v7782_v42 }
 0x6d7   :  { %6879 = vmatpush.bf16.msra.mxu3 %v7566_v14 }
 0x6d9   :  { %6866 = vmatpush.bf16.msra.mxu2 %v7502_v2  ;;  %7026 = vmatpush.bf16.msra.mxu1 %v7781_v29 }
 0x6da   :  { %6845 = vmatmul.bf16.vlgmr.msrb.gmra.mxu3 %v6391_v41  ;;  %v7787_v41 = vld [vmem:[%s13365_s12 + $0x60] sm:$0xff] }
 0x6db   :  { %6880 = vmatpush.bf16.msra.mxu3 %v7558_v55 }
 0x6dc   :  { %6832 = vmatmul.bf16.vlgmr.msrb.gmra.mxu2 %v6394_v54 }
 0x6dd   :  { %6867 = vmatpush.bf16.msra.mxu2 %v7494_v51  ;;  %7027 = vmatpush.bf16.msra.mxu1 %v7780_v38 }
 0x6df   :  { %6881 = vmatpush.bf16.msra.mxu3 %v7550_v13 }
 0x6e1   :  { %6868 = vmatpush.bf16.msra.mxu2 %v7486_v10  ;;  %7028 = vmatpush.bf16.msra.mxu1 %v7779_v9 }
 0x6e3   :  { %6882 = vmatpush.bf16.msra.mxu3 %v7542_v7 }
 0x6e4   :  { %6858 = vmatmul.bf16.vlgmr.msrb.gmra.mxu1 %v13211_v43  ;;  %v7778_v43 = vld [vmem:[%s13365_s12 + $0x18] sm:$0xff] }
 0x6e5   :  { %6869 = vmatpush.bf16.msra.mxu2 %v7478_v4  ;;  %7029 = vmatpush.bf16.msra.mxu1 %v7778_v43 }
 0x6e7   :  { %6883 = vmatpush.bf16.msra.mxu3 %v7534_v48 }
 0x6e9   :  { %6870 = vmatpush.bf16.msra.mxu2 %v7470_v46  ;;  %7030 = vmatpush.bf16.msra.mxu1 %v7777_v60 }
 0x6ea   :  { %6884 = vmatmul.bf16.vlgmr.msra.gmra.mxu3 %v6394_v54  ;;  %v9376_v54 = vld [vmem:[%s13366_s13] ss:$0 sm:$0xff] }
 0x6ec   :  { %6871 = vmatmul.bf16.vlgmr.msra.gmra.mxu2 %v6393_v52 }
 0x6ed   :  { %7038 = vmatpush.bf16.msrb.mxu2 %v7790_v62  ;;  %7031 = vmatpush.bf16.msra.mxu1 %v7776_v37 }
 0x6f1   :  { %7039 = vmatpush.bf16.msrb.mxu2 %v7789_v22  ;;  %7032 = vmatpush.bf16.msra.mxu1 %v7775_v5 }
 0x6f5   :  { %7040 = vmatpush.bf16.msrb.mxu2 %v7788_v36 }
 0x6f9   :  { %7041 = vmatpush.bf16.msrb.mxu2 %v7787_v41 }
 0x6fd   :  { %7042 = vmatpush.bf16.msrb.mxu2 %v7786_v63 }
 0x701   :  { %7043 = vmatpush.bf16.msrb.mxu2 %v7785_v50 }
 0x705   :  { %7044 = vmatpush.bf16.msrb.mxu2 %v7784_v40 }
 0x709   :  { %7045 = vmatpush.bf16.msrb.mxu2 %v7783_v39 }
 0x74d   :  { %v6807_v57 = vpop.f32.mrf.mxu3 }
 0x74f   :  { %v6794_v1 = vpop.f32.mrf.mxu2 }
 0x750   :  { %v6795_v15 = vadd.f32 %v6794_v1, %v6461_v56 }
 0x751   :  { %v6820_v49 = vpop.f32.mrf.mxu1 }
 0x752   :  { %v6808_v35 = vadd.f32 %v6807_v57, %v6795_v15 }
 0x754   :  { %v6821_v44 = vadd.f32 %v6820_v49, %v6808_v35 }
 0x755   :  { %v6809_v45 = vpop.f32.mrf.mxu3 }
 0x757   :  { %v6796_v58 = vpop.f32.mrf.mxu2 }
 0x759   :  { %v6822_v20 = vpop.f32.mrf.mxu1 }
 0x75d   :  { %v6846_v34 = vpop.f32.mrf.mxu3 }
 0x75e   :  { %v6847_v17 = vadd.f32 %v6846_v34, %v6462_v27 }
 0x75f   :  { %v6833_v47 = vpop.f32.mrf.mxu2 }
 0x760   :  { %v6834_v16 = vadd.f32 %v6833_v47, %v6821_v44 }
 0x761   :  { %v6859_v31 = vpop.f32.mrf.mxu1 }
 0x762   :  { %v6889_v24 = vmax.f32 %v6834_v16, 0.0  ;;  %v6860_v2 = vadd.f32 %v6859_v31, %v6847_v17 }
 0x764   :  { %v6891_v42 = vpack.c.bf16 %v6889_v24, %v6889_v24 }
 0x765   :  { %v6848_v52 = vpop.f32.mrf.mxu3 }
 0x766   :  { %7033 = vmatmul.bf16.vlgmr.msra.gmra.mxu1 %v6891_v42 }
 0x767   :  { %v6835_v28 = vpop.f32.mrf.mxu2 }
 0x769   :  { %v6861_v14 = vpop.f32.mrf.mxu1 }
 0x76d   :  { %v6885_v19 = vpop.f32.mrf.mxu3 }
 0x76f   :  { %v6872_v12 = vpop.f32.mrf.mxu2 }
 0x770   :  { %v6873_v29 = vadd.f32 %v6872_v12, %v6860_v2 }
 0x772   :  { %v6886_v8 = vadd.f32 %v6885_v19, %v6873_v29 }
 0x774   :  { %v6890_v53 = vmax.f32 %v6886_v8, 0.0 }
 0x775   :  { %v6887_v55 = vpop.f32.mrf.mxu3 }
 0x776   :  { %v6892_v23 = vpack.c.bf16 %v6890_v53, %v6890_v53 }
 0x777   :  { %v6874_v11 = vpop.f32.mrf.mxu2 }
 0x778   :  { %7046 = vmatmul.bf16.vlgmr.msrb.gmra.mxu2 %v6892_v23 }
 0x7e3   :  { %v7034_v26 = vpop.f32.mrf.mxu1 }
 0x7e4   :  { %v7035_v6 = vadd.f32 %v9376_v54, %v7034_v26 }
 0x7eb   :  { %v7036_v51 = vpop.f32.mrf.mxu1 }
 0x7fb   :  { %v7047_v61 = vpop.f32.mrf.mxu2 }
 0x7fc   :  { %v7048_v13 = vadd.f32 %v7047_v61, %v7035_v6 }
 0x7fe   :  { %7051 = vst [vmem:[#allocation11] sm:$0x3] %v7048_v13 }
 0x7ff   :  { %7062 = dma.vmem_to_hbm [thread:$0]  %s7058_s10, 32, %s7060_s15, [#allocation10]  }
 0x803   :  { %v7049_v18 = vpop.f32.mrf.mxu2 }
 0x804   :  { %9475 = dma.done.wait [#allocation10], 32  }
 0x805   :  { %9476 = vsyncadd [#allocation10], 4294967264 }
 0x806   :  { %7067 = vsyncpa [#allocation9], 1 }
 0x807   :  { %7068 = vsyncpa [#allocation10], 1 }

</bundles_post_ra>
